<compile_context>
chip_gen: v7x
topology: tpu7x:2x2x1
jax: 0.10.0
libtpu: 0.0.40
codegen_flags: <defaults>
</compile_context>

<pallas_src>
import jax
import jax.numpy as jnp
from jax import lax
from jax.experimental import pallas as pl
from jax.experimental.pallas import tpu as pltpu

KH = KW = 3
CIN_PAD = 8    # pad the 2 input channels up to 8 for the MXU
COUT_PAD = 8   # pad the single output channel of the last conv up to 8


def kernel_map_kernel(x_ref, wf_ref, bf_ref, wb_ref, bb_ref, wo_ref, bo_ref,
                      km_ref, logit_ref, xpad, act_a, act_b):
    # x_ref : (1, H, W, CIN_PAD)       f32  (channels already zero-padded to 8)
    # wf_ref: (9, CIN_PAD, nf)         bf16 (conv_first, tap-major HWIO)
    # bf_ref: (1, nf)                  f32
    # wb_ref: (6, 9, nf, nf)           bf16 (block1.conv1, block1.conv2, block2.conv1, ...)
    # bb_ref: (6, nf)                  f32
    # wo_ref: (9, nf, COUT_PAD)        bf16 (out conv, real weights in column 0)
    # bo_ref: (1, COUT_PAD)            f32
    # km_ref, logit_ref: (1, H*W, 1)   f32 outputs
    # xpad  : (H+2, W+2, CIN_PAD)      f32 scratch (padded input)
    # act_a : (H+2, W+2, nf)           f32 scratch (padded running activation)
    # act_b : (H+2, W+2, nf)           f32 scratch (padded inner-block activation)
    _, H, W, cin_p = x_ref.shape
    nf = act_a.shape[2]
    cout_p = wo_ref.shape[2]
    HW = H * W

    # ---- zero only the 1-pixel halo (4 thin stores per buffer) --------------
    # Done every grid step: scratch is per-core and uninitialized, and with
    # dimension_semantics="parallel" a core may never execute program_id == 0.
    def zero_halo(buf):
        Hp, Wp, C = buf.shape
        zrow = jnp.zeros((1, Wp, C), jnp.float32)
        zcol = jnp.zeros((Hp, 1, C), jnp.float32)
        buf[pl.ds(0, 1), :, :] = zrow
        buf[pl.ds(Hp - 1, 1), :, :] = zrow
        buf[:, pl.ds(0, 1), :] = zcol
        buf[:, pl.ds(Wp - 1, 1), :] = zcol

    zero_halo(xpad)
    zero_halo(act_a)
    zero_halo(act_b)

    # ---- stage the input tile into the padded buffer (pad folded in-kernel) -
    xpad[pl.ds(1, H), pl.ds(1, W), :] = x_ref[0]

    # ---- 3x3 conv = 9 MXU matmuls (H*W, cin) x (cin, cout), f32 accumulate --
    def conv3x3(src, get_w, cin, cout, bias):
        acc = jnp.zeros((HW, cout), jnp.float32)
        for t in range(KH * KW):
            dy, dx = divmod(t, KW)
            xs = src[pl.ds(dy, H), pl.ds(dx, W), :]          # (H, W, cin) f32
            xs = xs.reshape(HW, cin).astype(jnp.bfloat16)    # lane-dense rows
            acc = acc + jnp.dot(xs, get_w(t),
                                preferred_element_type=jnp.float32)
        return acc + bias                                    # bias: (1, cout) f32

    # conv_first (no nonlinearity in KERNEL_MAP.forward)
    y = conv3x3(xpad, lambda t: wf_ref[t, :, :], cin_p, nf, bf_ref[...])
    act_a[pl.ds(1, H), pl.ds(1, W), :] = y.reshape(H, W, nf)

    # three ResidualBlock_noBN:  x + conv2(relu(conv1(x)))
    for blk in range(3):
        c1, c2 = 2 * blk, 2 * blk + 1
        h = conv3x3(act_a, lambda t, c=c1: wb_ref[c, t, :, :], nf, nf,
                    bb_ref[pl.ds(c1, 1), :])
        h = jnp.maximum(h, 0.0)                              # ReLU
        act_b[pl.ds(1, H), pl.ds(1, W), :] = h.reshape(H, W, nf)
        h2 = conv3x3(act_b, lambda t, c=c2: wb_ref[c, t, :, :], nf, nf,
                     bb_ref[pl.ds(c2, 1), :])
        ident = act_a[pl.ds(1, H), pl.ds(1, W), :].reshape(HW, nf)
        act_a[pl.ds(1, H), pl.ds(1, W), :] = (ident + h2).reshape(H, W, nf)

    # out conv (nf -> 1); computed with 8 padded output columns, take column 0
    lg8 = conv3x3(act_a, lambda t: wo_ref[t, :, :], nf, cout_p, bo_ref[...])
    logits = lg8[:, 0:1]                                     # (HW, 1)

    # softmax over the (single) channel dimension -> identically 1.0,
    # computed faithfully as a stable softmax.
    m = jnp.max(logits, axis=-1, keepdims=True)
    e = jnp.exp(logits - m)
    km = e / jnp.sum(e, axis=-1, keepdims=True)

    logit_ref[0] = logits.astype(logit_ref.dtype)
    km_ref[0] = km.astype(km_ref.dtype)


def kernel_map_forward(x_nchw, w_first, b_first, w_blocks, b_blocks, w_out, b_out):
    """Pallas equivalent of KERNEL_MAP.forward (NCHW in / NCHW out).

    Returns (kernel_map, logits).  kernel_map is the module output
    (softmax over the single output channel); logits are the pre-softmax
    values, returned for validation.
    """
    N, Cin, H, W = x_nchw.shape
    nf = w_first.shape[0]
    assert w_out.shape[0] == 1

    # NCHW -> NHWC (channels on the lane dim); channel-pad only — the spatial
    # zero-padding is handled inside the kernel's halo buffers.
    x_nhwc = jnp.transpose(x_nchw, (0, 2, 3, 1)).astype(jnp.float32)
    x_nhwc = jnp.pad(x_nhwc, ((0, 0), (0, 0), (0, 0), (0, CIN_PAD - Cin)))

    def oihw_to_taps(w):  # (O, I, 3, 3) -> (9, I, O)
        return jnp.transpose(w, (2, 3, 1, 0)).reshape(KH * KW, w.shape[1], w.shape[0])

    wf = oihw_to_taps(w_first)                                          # (9, Cin, nf)
    wf = jnp.pad(wf, ((0, 0), (0, CIN_PAD - Cin), (0, 0))).astype(jnp.bfloat16)
    wb = jnp.transpose(w_blocks, (0, 3, 4, 2, 1)).reshape(6, KH * KW, nf, nf)
    wb = wb.astype(jnp.bfloat16)                                        # (6, 9, nf, nf)
    wo = oihw_to_taps(w_out)                                            # (9, nf, 1)
    wo = jnp.pad(wo, ((0, 0), (0, 0), (0, COUT_PAD - 1))).astype(jnp.bfloat16)

    bf = b_first.reshape(1, nf).astype(jnp.float32)
    bb = b_blocks.astype(jnp.float32)                                   # (6, nf)
    bo = jnp.pad(b_out.reshape(1, 1),
                 ((0, 0), (0, COUT_PAD - 1))).astype(jnp.float32)       # (1, 8)

    grid_spec = pltpu.PrefetchScalarGridSpec(
        num_scalar_prefetch=0,
        grid=(N,),
        in_specs=[
            pl.BlockSpec((1, H, W, CIN_PAD), lambda n: (n, 0, 0, 0)),
            pl.BlockSpec((KH * KW, CIN_PAD, nf), lambda n: (0, 0, 0)),
            pl.BlockSpec((1, nf), lambda n: (0, 0)),
            pl.BlockSpec((6, KH * KW, nf, nf), lambda n: (0, 0, 0, 0)),
            pl.BlockSpec((6, nf), lambda n: (0, 0)),
            pl.BlockSpec((KH * KW, nf, COUT_PAD), lambda n: (0, 0, 0)),
            pl.BlockSpec((1, COUT_PAD), lambda n: (0, 0)),
        ],
        out_specs=[
            pl.BlockSpec((1, H * W, 1), lambda n: (n, 0, 0)),
            pl.BlockSpec((1, H * W, 1), lambda n: (n, 0, 0)),
        ],
        scratch_shapes=[
            pltpu.VMEM((H + 2, W + 2, CIN_PAD), jnp.float32),   # padded input
            pltpu.VMEM((H + 2, W + 2, nf), jnp.float32),        # padded activation A
            pltpu.VMEM((H + 2, W + 2, nf), jnp.float32),        # padded activation B
        ],
    )

    km, logits = pl.pallas_call(
        kernel_map_kernel,
        out_shape=(
            jax.ShapeDtypeStruct((N, H * W, 1), jnp.float32),
            jax.ShapeDtypeStruct((N, H * W, 1), jnp.float32),
        ),
        grid_spec=grid_spec,
        compiler_params=pltpu.CompilerParams(
            dimension_semantics=("parallel",)),
    )(x_nhwc, wf, bf, wb, bb, wo, bo)

    kernel_map = km.reshape(N, H, W)[:, None, :, :]      # (N, 1, H, W)
    logits_nchw = logits.reshape(N, H, W)[:, None, :, :]
    return kernel_map, logits_nchw


def kernel_map_reference(x, w_first, b_first, w_blocks, b_blocks, w_out, b_out):
    """Pure-JAX reference (NCHW) for correctness checking."""
    def conv(inp, w, b):
        y = lax.conv_general_dilated(
            inp, w, window_strides=(1, 1), padding=((1, 1), (1, 1)),
            dimension_numbers=("NCHW", "OIHW", "NCHW"),
            precision=lax.Precision.HIGHEST)
        return y + b[None, :, None, None]

    y = conv(x, w_first, b_first)
    for i in range(3):  # ResidualBlock_noBN: x + conv2(relu(conv1(x)))
        h = jnp.maximum(conv(y, w_blocks[2 * i], b_blocks[2 * i]), 0.0)
        y = y + conv(h, w_blocks[2 * i + 1], b_blocks[2 * i + 1])
    logits = conv(y, w_out, b_out)
    return jax.nn.softmax(logits, axis=1), logits


if __name__ == "__main__":
    N, Cin, nf, H, W = 2, 2, 64, 16, 16

    key = jax.random.PRNGKey(0)
    ks = jax.random.split(key, 7)
    x = jax.random.normal(ks[0], (N, Cin, H, W), jnp.float32)
    w_first = jax.random.normal(ks[1], (nf, Cin, KH, KW), jnp.float32) * 0.1
    b_first = jax.random.normal(ks[2], (nf,), jnp.float32) * 0.3
    w_blocks = jax.random.normal(ks[3], (6, nf, nf, KH, KW), jnp.float32) * 0.05
    b_blocks = jax.random.normal(ks[4], (6, nf), jnp.float32) * 0.3
    w_out = jax.random.normal(ks[5], (1, nf, KH, KW), jnp.float32) * 0.05
    b_out = jax.random.normal(ks[6], (1,), jnp.float32) * 0.3

    km, logits = jax.jit(kernel_map_forward)(
        x, w_first, b_first, w_blocks, b_blocks, w_out, b_out)
    jax.block_until_ready((km, logits))

    km_r, logits_r = kernel_map_reference(
        x, w_first, b_first, w_blocks, b_blocks, w_out, b_out)

    assert km.shape == (N, 1, H, W)
    # Module output: softmax over a single channel is identically 1.0.
    assert bool(jnp.allclose(km, km_r, rtol=1e-5, atol=1e-5)), "kernel_map mismatch"
    # Sanity-check the full conv stack (bf16 MXU operands, f32 accumulation).
    assert bool(jnp.allclose(logits, logits_r, rtol=5e-2, atol=1e-1)), "logits mismatch"

    print("KERNEL_OK")
</pallas_src>

<mosaic_0001>
module attributes {stable_mosaic.version = 11 : i64} {
  func.func @kernel_map_kernel(%arg0: i32, %arg1: memref<1x16x16x8xf32, #tpu.memory_space<vmem>>, %arg2: memref<9x8x64xbf16, #tpu.memory_space<vmem>>, %arg3: memref<1x64xf32, #tpu.memory_space<vmem>>, %arg4: memref<6x9x64x64xbf16, #tpu.memory_space<vmem>>, %arg5: memref<6x64xf32, #tpu.memory_space<vmem>>, %arg6: memref<9x64x8xbf16, #tpu.memory_space<vmem>>, %arg7: memref<1x8xf32, #tpu.memory_space<vmem>>, %arg8: memref<1x256x1xf32, #tpu.memory_space<vmem>>, %arg9: memref<1x256x1xf32, #tpu.memory_space<vmem>>, %arg10: memref<18x18x8xf32, #tpu.memory_space<vmem>>, %arg11: memref<18x18x64xf32, #tpu.memory_space<vmem>>, %arg12: memref<18x18x64xf32, #tpu.memory_space<vmem>>) attributes {dimension_semantics = [#tpu.dimension_semantics<parallel>], iteration_bounds = array<i64: 2>, scalar_prefetch = 0 : i64, scratch_operands = 3 : i64, tpu.core_type = #tpu.core_type<tc>, window_params = [{transform_indices = @transform_0, window_bounds = array<i64: 1, 16, 16, 8>}, {pipeline_mode = #tpu.pipeline_mode<synchronous>, transform_indices = @transform_1, window_bounds = array<i64: 9, 8, 64>}, {pipeline_mode = #tpu.pipeline_mode<synchronous>, transform_indices = @transform_2, window_bounds = array<i64: 1, 64>}, {pipeline_mode = #tpu.pipeline_mode<synchronous>, transform_indices = @transform_3, window_bounds = array<i64: 6, 9, 64, 64>}, {pipeline_mode = #tpu.pipeline_mode<synchronous>, transform_indices = @transform_4, window_bounds = array<i64: 6, 64>}, {pipeline_mode = #tpu.pipeline_mode<synchronous>, transform_indices = @transform_5, window_bounds = array<i64: 9, 64, 8>}, {pipeline_mode = #tpu.pipeline_mode<synchronous>, transform_indices = @transform_6, window_bounds = array<i64: 1, 8>}, {transform_indices = @transform_7, window_bounds = array<i64: 1, 256, 1>}, {transform_indices = @transform_8, window_bounds = array<i64: 1, 256, 1>}]} {
    %cst = arith.constant 0.000000e+00 : f32
    %0 = vector.broadcast %cst : f32 to vector<1x18x8xf32>
    %cst_0 = arith.constant 0.000000e+00 : f32
    %1 = vector.broadcast %cst_0 : f32 to vector<18x1x8xf32>
    %c0 = arith.constant 0 : index
    %c0_1 = arith.constant 0 : index
    %c0_2 = arith.constant 0 : index
    %2 = vector.load %arg10[%c0, %c0_1, %c0_2] : memref<18x18x8xf32, #tpu.memory_space<vmem>>, vector<1x18x8xf32>
    tpu.vector_store %arg10[%c0, %c0_1, %c0_2], %0 {strides = array<i32>} : memref<18x18x8xf32, #tpu.memory_space<vmem>>, vector<1x18x8xf32>,
    %c17 = arith.constant 17 : index
    %c0_3 = arith.constant 0 : index
    %c0_4 = arith.constant 0 : index
    %3 = vector.load %arg10[%c17, %c0_3, %c0_4] : memref<18x18x8xf32, #tpu.memory_space<vmem>>, vector<1x18x8xf32>
    tpu.vector_store %arg10[%c17, %c0_3, %c0_4], %0 {strides = array<i32>} : memref<18x18x8xf32, #tpu.memory_space<vmem>>, vector<1x18x8xf32>,
    %c0_5 = arith.constant 0 : index
    %c0_6 = arith.constant 0 : index
    %c0_7 = arith.constant 0 : index
    %4 = vector.load %arg10[%c0_5, %c0_6, %c0_7] : memref<18x18x8xf32, #tpu.memory_space<vmem>>, vector<18x1x8xf32>
    tpu.vector_store %arg10[%c0_5, %c0_6, %c0_7], %1 {strides = array<i32>} : memref<18x18x8xf32, #tpu.memory_space<vmem>>, vector<18x1x8xf32>,
    %c0_8 = arith.constant 0 : index
    %c17_9 = arith.constant 17 : index
    %c0_10 = arith.constant 0 : index
    %5 = vector.load %arg10[%c0_8, %c17_9, %c0_10] : memref<18x18x8xf32, #tpu.memory_space<vmem>>, vector<18x1x8xf32>
    tpu.vector_store %arg10[%c0_8, %c17_9, %c0_10], %1 {strides = array<i32>} : memref<18x18x8xf32, #tpu.memory_space<vmem>>, vector<18x1x8xf32>,
    %cst_11 = arith.constant 0.000000e+00 : f32
    %6 = vector.broadcast %cst_11 : f32 to vector<1x18x64xf32>
    %cst_12 = arith.constant 0.000000e+00 : f32
    %7 = vector.broadcast %cst_12 : f32 to vector<18x1x64xf32>
    %c0_13 = arith.constant 0 : index
    %c0_14 = arith.constant 0 : index
    %c0_15 = arith.constant 0 : index
    %8 = vector.load %arg11[%c0_13, %c0_14, %c0_15] : memref<18x18x64xf32, #tpu.memory_space<vmem>>, vector<1x18x64xf32>
    tpu.vector_store %arg11[%c0_13, %c0_14, %c0_15], %6 {strides = array<i32>} : memref<18x18x64xf32, #tpu.memory_space<vmem>>, vector<1x18x64xf32>,
    %c17_16 = arith.constant 17 : index
    %c0_17 = arith.constant 0 : index
    %c0_18 = arith.constant 0 : index
    %9 = vector.load %arg11[%c17_16, %c0_17, %c0_18] : memref<18x18x64xf32, #tpu.memory_space<vmem>>, vector<1x18x64xf32>
    tpu.vector_store %arg11[%c17_16, %c0_17, %c0_18], %6 {strides = array<i32>} : memref<18x18x64xf32, #tpu.memory_space<vmem>>, vector<1x18x64xf32>,
    %c0_19 = arith.constant 0 : index
    %c0_20 = arith.constant 0 : index
    %c0_21 = arith.constant 0 : index
    %10 = vector.load %arg11[%c0_19, %c0_20, %c0_21] : memref<18x18x64xf32, #tpu.memory_space<vmem>>, vector<18x1x64xf32>
    tpu.vector_store %arg11[%c0_19, %c0_20, %c0_21], %7 {strides = array<i32>} : memref<18x18x64xf32, #tpu.memory_space<vmem>>, vector<18x1x64xf32>,
    %c0_22 = arith.constant 0 : index
    %c17_23 = arith.constant 17 : index
    %c0_24 = arith.constant 0 : index
    %11 = vector.load %arg11[%c0_22, %c17_23, %c0_24] : memref<18x18x64xf32, #tpu.memory_space<vmem>>, vector<18x1x64xf32>
    tpu.vector_store %arg11[%c0_22, %c17_23, %c0_24], %7 {strides = array<i32>} : memref<18x18x64xf32, #tpu.memory_space<vmem>>, vector<18x1x64xf32>,
    %cst_25 = arith.constant 0.000000e+00 : f32
    %12 = vector.broadcast %cst_25 : f32 to vector<1x18x64xf32>
    %cst_26 = arith.constant 0.000000e+00 : f32
    %13 = vector.broadcast %cst_26 : f32 to vector<18x1x64xf32>
    %c0_27 = arith.constant 0 : index
    %c0_28 = arith.constant 0 : index
    %c0_29 = arith.constant 0 : index
    %14 = vector.load %arg12[%c0_27, %c0_28, %c0_29] : memref<18x18x64xf32, #tpu.memory_space<vmem>>, vector<1x18x64xf32>
    tpu.vector_store %arg12[%c0_27, %c0_28, %c0_29], %12 {strides = array<i32>} : memref<18x18x64xf32, #tpu.memory_space<vmem>>, vector<1x18x64xf32>,
    %c17_30 = arith.constant 17 : index
    %c0_31 = arith.constant 0 : index
    %c0_32 = arith.constant 0 : index
    %15 = vector.load %arg12[%c17_30, %c0_31, %c0_32] : memref<18x18x64xf32, #tpu.memory_space<vmem>>, vector<1x18x64xf32>
    tpu.vector_store %arg12[%c17_30, %c0_31, %c0_32], %12 {strides = array<i32>} : memref<18x18x64xf32, #tpu.memory_space<vmem>>, vector<1x18x64xf32>,
    %c0_33 = arith.constant 0 : index
    %c0_34 = arith.constant 0 : index
    %c0_35 = arith.constant 0 : index
    %16 = vector.load %arg12[%c0_33, %c0_34, %c0_35] : memref<18x18x64xf32, #tpu.memory_space<vmem>>, vector<18x1x64xf32>
    tpu.vector_store %arg12[%c0_33, %c0_34, %c0_35], %13 {strides = array<i32>} : memref<18x18x64xf32, #tpu.memory_space<vmem>>, vector<18x1x64xf32>,
    %c0_36 = arith.constant 0 : index
    %c17_37 = arith.constant 17 : index
    %c0_38 = arith.constant 0 : index
    %17 = vector.load %arg12[%c0_36, %c17_37, %c0_38] : memref<18x18x64xf32, #tpu.memory_space<vmem>>, vector<18x1x64xf32>
    tpu.vector_store %arg12[%c0_36, %c17_37, %c0_38], %13 {strides = array<i32>} : memref<18x18x64xf32, #tpu.memory_space<vmem>>, vector<18x1x64xf32>,
    %c0_39 = arith.constant 0 : index
    %c0_40 = arith.constant 0 : index
    %c0_41 = arith.constant 0 : index
    %c0_42 = arith.constant 0 : index
    %18 = vector.load %arg1[%c0_39, %c0_40, %c0_41, %c0_42] : memref<1x16x16x8xf32, #tpu.memory_space<vmem>>, vector<1x16x16x8xf32>
    %19 = vector.shape_cast %18 : vector<1x16x16x8xf32> to vector<16x16x8xf32>
    %c1 = arith.constant 1 : index
    %c1_43 = arith.constant 1 : index
    %c0_44 = arith.constant 0 : index
    %20 = vector.load %arg10[%c1, %c1_43, %c0_44] : memref<18x18x8xf32, #tpu.memory_space<vmem>>, vector<16x16x8xf32>
    tpu.vector_store %arg10[%c1, %c1_43, %c0_44], %19 {strides = array<i32>} : memref<18x18x8xf32, #tpu.memory_space<vmem>>, vector<16x16x8xf32>,
    %c0_45 = arith.constant 0 : index
    %c0_46 = arith.constant 0 : index
    %21 = vector.load %arg3[%c0_45, %c0_46] : memref<1x64xf32, #tpu.memory_space<vmem>>, vector<1x64xf32>
    %cst_47 = arith.constant 0.000000e+00 : f32
    %22 = vector.broadcast %cst_47 : f32 to vector<256x64xf32>
    %c0_48 = arith.constant 0 : index
    %c0_49 = arith.constant 0 : index
    %c0_50 = arith.constant 0 : index
    %23 = vector.load %arg10[%c0_48, %c0_49, %c0_50] : memref<18x18x8xf32, #tpu.memory_space<vmem>>, vector<16x16x8xf32>
    %24 = vector.shape_cast %23 : vector<16x16x8xf32> to vector<256x8xf32>
    %25 = arith.truncf %24 : vector<256x8xf32> to vector<256x8xbf16>
    %c0_51 = arith.constant 0 : index
    %c0_52 = arith.constant 0 : index
    %c0_53 = arith.constant 0 : index
    %26 = vector.load %arg2[%c0_51, %c0_52, %c0_53] : memref<9x8x64xbf16, #tpu.memory_space<vmem>>, vector<1x8x64xbf16>
    %27 = vector.shape_cast %26 : vector<1x8x64xbf16> to vector<8x64xbf16>
    %cst_54 = arith.constant dense<0.000000e+00> : vector<256x64xf32>
    %28 = tpu.matmul %25, %27, %cst_54 {dimension_numbers = #tpu.dot_dimension_numbers<[1], [0], [0], [1], [0, 0, 1, 1], [], []>} : vector<256x8xbf16>, vector<8x64xbf16>, vector<256x64xf32> -> vector<256x64xf32>
    %29 = arith.addf %22, %28 : vector<256x64xf32>
    %c0_55 = arith.constant 0 : index
    %c1_56 = arith.constant 1 : index
    %c0_57 = arith.constant 0 : index
    %30 = vector.load %arg10[%c0_55, %c1_56, %c0_57] : memref<18x18x8xf32, #tpu.memory_space<vmem>>, vector<16x16x8xf32>
    %31 = vector.shape_cast %30 : vector<16x16x8xf32> to vector<256x8xf32>
    %32 = arith.truncf %31 : vector<256x8xf32> to vector<256x8xbf16>
    %c1_58 = arith.constant 1 : index
    %c0_59 = arith.constant 0 : index
    %c0_60 = arith.constant 0 : index
    %33 = vector.load %arg2[%c1_58, %c0_59, %c0_60] : memref<9x8x64xbf16, #tpu.memory_space<vmem>>, vector<1x8x64xbf16>
    %34 = vector.shape_cast %33 : vector<1x8x64xbf16> to vector<8x64xbf16>
    %cst_61 = arith.constant dense<0.000000e+00> : vector<256x64xf32>
    %35 = tpu.matmul %32, %34, %cst_61 {dimension_numbers = #tpu.dot_dimension_numbers<[1], [0], [0], [1], [0, 0, 1, 1], [], []>} : vector<256x8xbf16>, vector<8x64xbf16>, vector<256x64xf32> -> vector<256x64xf32>
    %36 = arith.addf %29, %35 : vector<256x64xf32>
    %c0_62 = arith.constant 0 : index
    %c2 = arith.constant 2 : index
    %c0_63 = arith.constant 0 : index
    %37 = vector.load %arg10[%c0_62, %c2, %c0_63] : memref<18x18x8xf32, #tpu.memory_space<vmem>>, vector<16x16x8xf32>
    %38 = vector.shape_cast %37 : vector<16x16x8xf32> to vector<256x8xf32>
    %39 = arith.truncf %38 : vector<256x8xf32> to vector<256x8xbf16>
    %c2_64 = arith.constant 2 : index
    %c0_65 = arith.constant 0 : index
    %c0_66 = arith.constant 0 : index
    %40 = vector.load %arg2[%c2_64, %c0_65, %c0_66] : memref<9x8x64xbf16, #tpu.memory_space<vmem>>, vector<1x8x64xbf16>
    %41 = vector.shape_cast %40 : vector<1x8x64xbf16> to vector<8x64xbf16>
    %cst_67 = arith.constant dense<0.000000e+00> : vector<256x64xf32>
    %42 = tpu.matmul %39, %41, %cst_67 {dimension_numbers = #tpu.dot_dimension_numbers<[1], [0], [0], [1], [0, 0, 1, 1], [], []>} : vector<256x8xbf16>, vector<8x64xbf16>, vector<256x64xf32> -> vector<256x64xf32>
    %43 = arith.addf %36, %42 : vector<256x64xf32>
    %c1_68 = arith.constant 1 : index
    %c0_69 = arith.constant 0 : index
    %c0_70 = arith.constant 0 : index
    %44 = vector.load %arg10[%c1_68, %c0_69, %c0_70] : memref<18x18x8xf32, #tpu.memory_space<vmem>>, vector<16x16x8xf32>
    %45 = vector.shape_cast %44 : vector<16x16x8xf32> to vector<256x8xf32>
    %46 = arith.truncf %45 : vector<256x8xf32> to vector<256x8xbf16>
    %c3 = arith.constant 3 : index
    %c0_71 = arith.constant 0 : index
    %c0_72 = arith.constant 0 : index
    %47 = vector.load %arg2[%c3, %c0_71, %c0_72] : memref<9x8x64xbf16, #tpu.memory_space<vmem>>, vector<1x8x64xbf16>
    %48 = vector.shape_cast %47 : vector<1x8x64xbf16> to vector<8x64xbf16>
    %cst_73 = arith.constant dense<0.000000e+00> : vector<256x64xf32>
    %49 = tpu.matmul %46, %48, %cst_73 {dimension_numbers = #tpu.dot_dimension_numbers<[1], [0], [0], [1], [0, 0, 1, 1], [], []>} : vector<256x8xbf16>, vector<8x64xbf16>, vector<256x64xf32> -> vector<256x64xf32>
    %50 = arith.addf %43, %49 : vector<256x64xf32>
    %c1_74 = arith.constant 1 : index
    %c1_75 = arith.constant 1 : index
    %c0_76 = arith.constant 0 : index
    %51 = vector.load %arg10[%c1_74, %c1_75, %c0_76] : memref<18x18x8xf32, #tpu.memory_space<vmem>>, vector<16x16x8xf32>
    %52 = vector.shape_cast %51 : vector<16x16x8xf32> to vector<256x8xf32>
    %53 = arith.truncf %52 : vector<256x8xf32> to vector<256x8xbf16>
    %c4 = arith.constant 4 : index
    %c0_77 = arith.constant 0 : index
    %c0_78 = arith.constant 0 : index
    %54 = vector.load %arg2[%c4, %c0_77, %c0_78] : memref<9x8x64xbf16, #tpu.memory_space<vmem>>, vector<1x8x64xbf16>
    %55 = vector.shape_cast %54 : vector<1x8x64xbf16> to vector<8x64xbf16>
    %cst_79 = arith.constant dense<0.000000e+00> : vector<256x64xf32>
    %56 = tpu.matmul %53, %55, %cst_79 {dimension_numbers = #tpu.dot_dimension_numbers<[1], [0], [0], [1], [0, 0, 1, 1], [], []>} : vector<256x8xbf16>, vector<8x64xbf16>, vector<256x64xf32> -> vector<256x64xf32>
    %57 = arith.addf %50, %56 : vector<256x64xf32>
    %c1_80 = arith.constant 1 : index
    %c2_81 = arith.constant 2 : index
    %c0_82 = arith.constant 0 : index
    %58 = vector.load %arg10[%c1_80, %c2_81, %c0_82] : memref<18x18x8xf32, #tpu.memory_space<vmem>>, vector<16x16x8xf32>
    %59 = vector.shape_cast %58 : vector<16x16x8xf32> to vector<256x8xf32>
    %60 = arith.truncf %59 : vector<256x8xf32> to vector<256x8xbf16>
    %c5 = arith.constant 5 : index
    %c0_83 = arith.constant 0 : index
    %c0_84 = arith.constant 0 : index
    %61 = vector.load %arg2[%c5, %c0_83, %c0_84] : memref<9x8x64xbf16, #tpu.memory_space<vmem>>, vector<1x8x64xbf16>
    %62 = vector.shape_cast %61 : vector<1x8x64xbf16> to vector<8x64xbf16>
    %cst_85 = arith.constant dense<0.000000e+00> : vector<256x64xf32>
    %63 = tpu.matmul %60, %62, %cst_85 {dimension_numbers = #tpu.dot_dimension_numbers<[1], [0], [0], [1], [0, 0, 1, 1], [], []>} : vector<256x8xbf16>, vector<8x64xbf16>, vector<256x64xf32> -> vector<256x64xf32>
    %64 = arith.addf %57, %63 : vector<256x64xf32>
    %c2_86 = arith.constant 2 : index
    %c0_87 = arith.constant 0 : index
    %c0_88 = arith.constant 0 : index
    %65 = vector.load %arg10[%c2_86, %c0_87, %c0_88] : memref<18x18x8xf32, #tpu.memory_space<vmem>>, vector<16x16x8xf32>
    %66 = vector.shape_cast %65 : vector<16x16x8xf32> to vector<256x8xf32>
    %67 = arith.truncf %66 : vector<256x8xf32> to vector<256x8xbf16>
    %c6 = arith.constant 6 : index
    %c0_89 = arith.constant 0 : index
    %c0_90 = arith.constant 0 : index
    %68 = vector.load %arg2[%c6, %c0_89, %c0_90] : memref<9x8x64xbf16, #tpu.memory_space<vmem>>, vector<1x8x64xbf16>
    %69 = vector.shape_cast %68 : vector<1x8x64xbf16> to vector<8x64xbf16>
    %cst_91 = arith.constant dense<0.000000e+00> : vector<256x64xf32>
    %70 = tpu.matmul %67, %69, %cst_91 {dimension_numbers = #tpu.dot_dimension_numbers<[1], [0], [0], [1], [0, 0, 1, 1], [], []>} : vector<256x8xbf16>, vector<8x64xbf16>, vector<256x64xf32> -> vector<256x64xf32>
    %71 = arith.addf %64, %70 : vector<256x64xf32>
    %c2_92 = arith.constant 2 : index
    %c1_93 = arith.constant 1 : index
    %c0_94 = arith.constant 0 : index
    %72 = vector.load %arg10[%c2_92, %c1_93, %c0_94] : memref<18x18x8xf32, #tpu.memory_space<vmem>>, vector<16x16x8xf32>
    %73 = vector.shape_cast %72 : vector<16x16x8xf32> to vector<256x8xf32>
    %74 = arith.truncf %73 : vector<256x8xf32> to vector<256x8xbf16>
    %c7 = arith.constant 7 : index
    %c0_95 = arith.constant 0 : index
    %c0_96 = arith.constant 0 : index
    %75 = vector.load %arg2[%c7, %c0_95, %c0_96] : memref<9x8x64xbf16, #tpu.memory_space<vmem>>, vector<1x8x64xbf16>
    %76 = vector.shape_cast %75 : vector<1x8x64xbf16> to vector<8x64xbf16>
    %cst_97 = arith.constant dense<0.000000e+00> : vector<256x64xf32>
    %77 = tpu.matmul %74, %76, %cst_97 {dimension_numbers = #tpu.dot_dimension_numbers<[1], [0], [0], [1], [0, 0, 1, 1], [], []>} : vector<256x8xbf16>, vector<8x64xbf16>, vector<256x64xf32> -> vector<256x64xf32>
    %78 = arith.addf %71, %77 : vector<256x64xf32>
    %c2_98 = arith.constant 2 : index
    %c2_99 = arith.constant 2 : index
    %c0_100 = arith.constant 0 : index
    %79 = vector.load %arg10[%c2_98, %c2_99, %c0_100] : memref<18x18x8xf32, #tpu.memory_space<vmem>>, vector<16x16x8xf32>
    %80 = vector.shape_cast %79 : vector<16x16x8xf32> to vector<256x8xf32>
    %81 = arith.truncf %80 : vector<256x8xf32> to vector<256x8xbf16>
    %c8 = arith.constant 8 : index
    %c0_101 = arith.constant 0 : index
    %c0_102 = arith.constant 0 : index
    %82 = vector.load %arg2[%c8, %c0_101, %c0_102] : memref<9x8x64xbf16, #tpu.memory_space<vmem>>, vector<1x8x64xbf16>
    %83 = vector.shape_cast %82 : vector<1x8x64xbf16> to vector<8x64xbf16>
    %cst_103 = arith.constant dense<0.000000e+00> : vector<256x64xf32>
    %84 = tpu.matmul %81, %83, %cst_103 {dimension_numbers = #tpu.dot_dimension_numbers<[1], [0], [0], [1], [0, 0, 1, 1], [], []>} : vector<256x8xbf16>, vector<8x64xbf16>, vector<256x64xf32> -> vector<256x64xf32>
    %85 = arith.addf %78, %84 : vector<256x64xf32>
    %86 = vector.broadcast %21 : vector<1x64xf32> to vector<256x64xf32>
    %87 = arith.addf %85, %86 : vector<256x64xf32>
    %88 = vector.shape_cast %87 : vector<256x64xf32> to vector<16x16x64xf32>
    %c1_104 = arith.constant 1 : index
    %c1_105 = arith.constant 1 : index
    %c0_106 = arith.constant 0 : index
    %89 = vector.load %arg11[%c1_104, %c1_105, %c0_106] : memref<18x18x64xf32, #tpu.memory_space<vmem>>, vector<16x16x64xf32>
    tpu.vector_store %arg11[%c1_104, %c1_105, %c0_106], %88 {strides = array<i32>} : memref<18x18x64xf32, #tpu.memory_space<vmem>>, vector<16x16x64xf32>,
    %c0_107 = arith.constant 0 : index
    %c0_108 = arith.constant 0 : index
    %90 = vector.load %arg5[%c0_107, %c0_108] : memref<6x64xf32, #tpu.memory_space<vmem>>, vector<1x64xf32>
    %cst_109 = arith.constant 0.000000e+00 : f32
    %91 = vector.broadcast %cst_109 : f32 to vector<256x64xf32>
    %c0_110 = arith.constant 0 : index
    %c0_111 = arith.constant 0 : index
    %c0_112 = arith.constant 0 : index
    %92 = vector.load %arg11[%c0_110, %c0_111, %c0_112] : memref<18x18x64xf32, #tpu.memory_space<vmem>>, vector<16x16x64xf32>
    %93 = vector.shape_cast %92 : vector<16x16x64xf32> to vector<256x64xf32>
    %94 = arith.truncf %93 : vector<256x64xf32> to vector<256x64xbf16>
    %c0_113 = arith.constant 0 : index
    %c0_114 = arith.constant 0 : index
    %c0_115 = arith.constant 0 : index
    %c0_116 = arith.constant 0 : index
    %95 = vector.load %arg4[%c0_113, %c0_114, %c0_115, %c0_116] : memref<6x9x64x64xbf16, #tpu.memory_space<vmem>>, vector<1x1x64x64xbf16>
    %96 = vector.shape_cast %95 : vector<1x1x64x64xbf16> to vector<64x64xbf16>
    %cst_117 = arith.constant dense<0.000000e+00> : vector<256x64xf32>
    %97 = tpu.matmul %94, %96, %cst_117 {dimension_numbers = #tpu.dot_dimension_numbers<[1], [0], [0], [1], [0, 0, 1, 1], [], []>} : vector<256x64xbf16>, vector<64x64xbf16>, vector<256x64xf32> -> vector<256x64xf32>
    %98 = arith.addf %91, %97 : vector<256x64xf32>
    %c0_118 = arith.constant 0 : index
    %c1_119 = arith.constant 1 : index
    %c0_120 = arith.constant 0 : index
    %99 = vector.load %arg11[%c0_118, %c1_119, %c0_120] : memref<18x18x64xf32, #tpu.memory_space<vmem>>, vector<16x16x64xf32>
    %100 = vector.shape_cast %99 : vector<16x16x64xf32> to vector<256x64xf32>
    %101 = arith.truncf %100 : vector<256x64xf32> to vector<256x64xbf16>
    %c0_121 = arith.constant 0 : index
    %c1_122 = arith.constant 1 : index
    %c0_123 = arith.constant 0 : index
    %c0_124 = arith.constant 0 : index
    %102 = vector.load %arg4[%c0_121, %c1_122, %c0_123, %c0_124] : memref<6x9x64x64xbf16, #tpu.memory_space<vmem>>, vector<1x1x64x64xbf16>
    %103 = vector.shape_cast %102 : vector<1x1x64x64xbf16> to vector<64x64xbf16>
    %cst_125 = arith.constant dense<0.000000e+00> : vector<256x64xf32>
    %104 = tpu.matmul %101, %103, %cst_125 {dimension_numbers = #tpu.dot_dimension_numbers<[1], [0], [0], [1], [0, 0, 1, 1], [], []>} : vector<256x64xbf16>, vector<64x64xbf16>, vector<256x64xf32> -> vector<256x64xf32>
    %105 = arith.addf %98, %104 : vector<256x64xf32>
    %c0_126 = arith.constant 0 : index
    %c2_127 = arith.constant 2 : index
    %c0_128 = arith.constant 0 : index
    %106 = vector.load %arg11[%c0_126, %c2_127, %c0_128] : memref<18x18x64xf32, #tpu.memory_space<vmem>>, vector<16x16x64xf32>
    %107 = vector.shape_cast %106 : vector<16x16x64xf32> to vector<256x64xf32>
    %108 = arith.truncf %107 : vector<256x64xf32> to vector<256x64xbf16>
    %c0_129 = arith.constant 0 : index
    %c2_130 = arith.constant 2 : index
    %c0_131 = arith.constant 0 : index
    %c0_132 = arith.constant 0 : index
    %109 = vector.load %arg4[%c0_129, %c2_130, %c0_131, %c0_132] : memref<6x9x64x64xbf16, #tpu.memory_space<vmem>>, vector<1x1x64x64xbf16>
    %110 = vector.shape_cast %109 : vector<1x1x64x64xbf16> to vector<64x64xbf16>
    %cst_133 = arith.constant dense<0.000000e+00> : vector<256x64xf32>
    %111 = tpu.matmul %108, %110, %cst_133 {dimension_numbers = #tpu.dot_dimension_numbers<[1], [0], [0], [1], [0, 0, 1, 1], [], []>} : vector<256x64xbf16>, vector<64x64xbf16>, vector<256x64xf32> -> vector<256x64xf32>
    %112 = arith.addf %105, %111 : vector<256x64xf32>
    %c1_134 = arith.constant 1 : index
    %c0_135 = arith.constant 0 : index
    %c0_136 = arith.constant 0 : index
    %113 = vector.load %arg11[%c1_134, %c0_135, %c0_136] : memref<18x18x64xf32, #tpu.memory_space<vmem>>, vector<16x16x64xf32>
    %114 = vector.shape_cast %113 : vector<16x16x64xf32> to vector<256x64xf32>
    %115 = arith.truncf %114 : vector<256x64xf32> to vector<256x64xbf16>
    %c0_137 = arith.constant 0 : index
    %c3_138 = arith.constant 3 : index
    %c0_139 = arith.constant 0 : index
    %c0_140 = arith.constant 0 : index
    %116 = vector.load %arg4[%c0_137, %c3_138, %c0_139, %c0_140] : memref<6x9x64x64xbf16, #tpu.memory_space<vmem>>, vector<1x1x64x64xbf16>
    %117 = vector.shape_cast %116 : vector<1x1x64x64xbf16> to vector<64x64xbf16>
    %cst_141 = arith.constant dense<0.000000e+00> : vector<256x64xf32>
    %118 = tpu.matmul %115, %117, %cst_141 {dimension_numbers = #tpu.dot_dimension_numbers<[1], [0], [0], [1], [0, 0, 1, 1], [], []>} : vector<256x64xbf16>, vector<64x64xbf16>, vector<256x64xf32> -> vector<256x64xf32>
    %119 = arith.addf %112, %118 : vector<256x64xf32>
    %c1_142 = arith.constant 1 : index
    %c1_143 = arith.constant 1 : index
    %c0_144 = arith.constant 0 : index
    %120 = vector.load %arg11[%c1_142, %c1_143, %c0_144] : memref<18x18x64xf32, #tpu.memory_space<vmem>>, vector<16x16x64xf32>
    %121 = vector.shape_cast %120 : vector<16x16x64xf32> to vector<256x64xf32>
    %122 = arith.truncf %121 : vector<256x64xf32> to vector<256x64xbf16>
    %c0_145 = arith.constant 0 : index
    %c4_146 = arith.constant 4 : index
    %c0_147 = arith.constant 0 : index
    %c0_148 = arith.constant 0 : index
    %123 = vector.load %arg4[%c0_145, %c4_146, %c0_147, %c0_148] : memref<6x9x64x64xbf16, #tpu.memory_space<vmem>>, vector<1x1x64x64xbf16>
    %124 = vector.shape_cast %123 : vector<1x1x64x64xbf16> to vector<64x64xbf16>
    %cst_149 = arith.constant dense<0.000000e+00> : vector<256x64xf32>
    %125 = tpu.matmul %122, %124, %cst_149 {dimension_numbers = #tpu.dot_dimension_numbers<[1], [0], [0], [1], [0, 0, 1, 1], [], []>} : vector<256x64xbf16>, vector<64x64xbf16>, vector<256x64xf32> -> vector<256x64xf32>
    %126 = arith.addf %119, %125 : vector<256x64xf32>
    %c1_150 = arith.constant 1 : index
    %c2_151 = arith.constant 2 : index
    %c0_152 = arith.constant 0 : index
    %127 = vector.load %arg11[%c1_150, %c2_151, %c0_152] : memref<18x18x64xf32, #tpu.memory_space<vmem>>, vector<16x16x64xf32>
    %128 = vector.shape_cast %127 : vector<16x16x64xf32> to vector<256x64xf32>
    %129 = arith.truncf %128 : vector<256x64xf32> to vector<256x64xbf16>
    %c0_153 = arith.constant 0 : index
    %c5_154 = arith.constant 5 : index
    %c0_155 = arith.constant 0 : index
    %c0_156 = arith.constant 0 : index
    %130 = vector.load %arg4[%c0_153, %c5_154, %c0_155, %c0_156] : memref<6x9x64x64xbf16, #tpu.memory_space<vmem>>, vector<1x1x64x64xbf16>
    %131 = vector.shape_cast %130 : vector<1x1x64x64xbf16> to vector<64x64xbf16>
    %cst_157 = arith.constant dense<0.000000e+00> : vector<256x64xf32>
    %132 = tpu.matmul %129, %131, %cst_157 {dimension_numbers = #tpu.dot_dimension_numbers<[1], [0], [0], [1], [0, 0, 1, 1], [], []>} : vector<256x64xbf16>, vector<64x64xbf16>, vector<256x64xf32> -> vector<256x64xf32>
    %133 = arith.addf %126, %132 : vector<256x64xf32>
    %c2_158 = arith.constant 2 : index
    %c0_159 = arith.constant 0 : index
    %c0_160 = arith.constant 0 : index
    %134 = vector.load %arg11[%c2_158, %c0_159, %c0_160] : memref<18x18x64xf32, #tpu.memory_space<vmem>>, vector<16x16x64xf32>
    %135 = vector.shape_cast %134 : vector<16x16x64xf32> to vector<256x64xf32>
    %136 = arith.truncf %135 : vector<256x64xf32> to vector<256x64xbf16>
    %c0_161 = arith.constant 0 : index
    %c6_162 = arith.constant 6 : index
    %c0_163 = arith.constant 0 : index
    %c0_164 = arith.constant 0 : index
    %137 = vector.load %arg4[%c0_161, %c6_162, %c0_163, %c0_164] : memref<6x9x64x64xbf16, #tpu.memory_space<vmem>>, vector<1x1x64x64xbf16>
    %138 = vector.shape_cast %137 : vector<1x1x64x64xbf16> to vector<64x64xbf16>
    %cst_165 = arith.constant dense<0.000000e+00> : vector<256x64xf32>
    %139 = tpu.matmul %136, %138, %cst_165 {dimension_numbers = #tpu.dot_dimension_numbers<[1], [0], [0], [1], [0, 0, 1, 1], [], []>} : vector<256x64xbf16>, vector<64x64xbf16>, vector<256x64xf32> -> vector<256x64xf32>
    %140 = arith.addf %133, %139 : vector<256x64xf32>
    %c2_166 = arith.constant 2 : index
    %c1_167 = arith.constant 1 : index
    %c0_168 = arith.constant 0 : index
    %141 = vector.load %arg11[%c2_166, %c1_167, %c0_168] : memref<18x18x64xf32, #tpu.memory_space<vmem>>, vector<16x16x64xf32>
    %142 = vector.shape_cast %141 : vector<16x16x64xf32> to vector<256x64xf32>
    %143 = arith.truncf %142 : vector<256x64xf32> to vector<256x64xbf16>
    %c0_169 = arith.constant 0 : index
    %c7_170 = arith.constant 7 : index
    %c0_171 = arith.constant 0 : index
    %c0_172 = arith.constant 0 : index
    %144 = vector.load %arg4[%c0_169, %c7_170, %c0_171, %c0_172] : memref<6x9x64x64xbf16, #tpu.memory_space<vmem>>, vector<1x1x64x64xbf16>
    %145 = vector.shape_cast %144 : vector<1x1x64x64xbf16> to vector<64x64xbf16>
    %cst_173 = arith.constant dense<0.000000e+00> : vector<256x64xf32>
    %146 = tpu.matmul %143, %145, %cst_173 {dimension_numbers = #tpu.dot_dimension_numbers<[1], [0], [0], [1], [0, 0, 1, 1], [], []>} : vector<256x64xbf16>, vector<64x64xbf16>, vector<256x64xf32> -> vector<256x64xf32>
    %147 = arith.addf %140, %146 : vector<256x64xf32>
    %c2_174 = arith.constant 2 : index
    %c2_175 = arith.constant 2 : index
    %c0_176 = arith.constant 0 : index
    %148 = vector.load %arg11[%c2_174, %c2_175, %c0_176] : memref<18x18x64xf32, #tpu.memory_space<vmem>>, vector<16x16x64xf32>
    %149 = vector.shape_cast %148 : vector<16x16x64xf32> to vector<256x64xf32>
    %150 = arith.truncf %149 : vector<256x64xf32> to vector<256x64xbf16>
    %c0_177 = arith.constant 0 : index
    %c8_178 = arith.constant 8 : index
    %c0_179 = arith.constant 0 : index
    %c0_180 = arith.constant 0 : index
    %151 = vector.load %arg4[%c0_177, %c8_178, %c0_179, %c0_180] : memref<6x9x64x64xbf16, #tpu.memory_space<vmem>>, vector<1x1x64x64xbf16>
    %152 = vector.shape_cast %151 : vector<1x1x64x64xbf16> to vector<64x64xbf16>
    %cst_181 = arith.constant dense<0.000000e+00> : vector<256x64xf32>
    %153 = tpu.matmul %150, %152, %cst_181 {dimension_numbers = #tpu.dot_dimension_numbers<[1], [0], [0], [1], [0, 0, 1, 1], [], []>} : vector<256x64xbf16>, vector<64x64xbf16>, vector<256x64xf32> -> vector<256x64xf32>
    %154 = arith.addf %147, %153 : vector<256x64xf32>
    %155 = vector.broadcast %90 : vector<1x64xf32> to vector<256x64xf32>
    %156 = arith.addf %154, %155 : vector<256x64xf32>
    %cst_182 = arith.constant 0.000000e+00 : f32
    %157 = vector.broadcast %cst_182 : f32 to vector<256x64xf32>
    %158 = arith.maximumf %156, %157 : vector<256x64xf32>
    %159 = vector.shape_cast %158 : vector<256x64xf32> to vector<16x16x64xf32>
    %c1_183 = arith.constant 1 : index
    %c1_184 = arith.constant 1 : index
    %c0_185 = arith.constant 0 : index
    %160 = vector.load %arg12[%c1_183, %c1_184, %c0_185] : memref<18x18x64xf32, #tpu.memory_space<vmem>>, vector<16x16x64xf32>
    tpu.vector_store %arg12[%c1_183, %c1_184, %c0_185], %159 {strides = array<i32>} : memref<18x18x64xf32, #tpu.memory_space<vmem>>, vector<16x16x64xf32>,
    %c1_186 = arith.constant 1 : index
    %c0_187 = arith.constant 0 : index
    %161 = vector.load %arg5[%c1_186, %c0_187] : memref<6x64xf32, #tpu.memory_space<vmem>>, vector<1x64xf32>
    %cst_188 = arith.constant 0.000000e+00 : f32
    %162 = vector.broadcast %cst_188 : f32 to vector<256x64xf32>
    %c0_189 = arith.constant 0 : index
    %c0_190 = arith.constant 0 : index
    %c0_191 = arith.constant 0 : index
    %163 = vector.load %arg12[%c0_189, %c0_190, %c0_191] : memref<18x18x64xf32, #tpu.memory_space<vmem>>, vector<16x16x64xf32>
    %164 = vector.shape_cast %163 : vector<16x16x64xf32> to vector<256x64xf32>
    %165 = arith.truncf %164 : vector<256x64xf32> to vector<256x64xbf16>
    %c1_192 = arith.constant 1 : index
    %c0_193 = arith.constant 0 : index
    %c0_194 = arith.constant 0 : index
    %c0_195 = arith.constant 0 : index
    %166 = vector.load %arg4[%c1_192, %c0_193, %c0_194, %c0_195] : memref<6x9x64x64xbf16, #tpu.memory_space<vmem>>, vector<1x1x64x64xbf16>
    %167 = vector.shape_cast %166 : vector<1x1x64x64xbf16> to vector<64x64xbf16>
    %cst_196 = arith.constant dense<0.000000e+00> : vector<256x64xf32>
    %168 = tpu.matmul %165, %167, %cst_196 {dimension_numbers = #tpu.dot_dimension_numbers<[1], [0], [0], [1], [0, 0, 1, 1], [], []>} : vector<256x64xbf16>, vector<64x64xbf16>, vector<256x64xf32> -> vector<256x64xf32>
    %169 = arith.addf %162, %168 : vector<256x64xf32>
    %c0_197 = arith.constant 0 : index
    %c1_198 = arith.constant 1 : index
    %c0_199 = arith.constant 0 : index
    %170 = vector.load %arg12[%c0_197, %c1_198, %c0_199] : memref<18x18x64xf32, #tpu.memory_space<vmem>>, vector<16x16x64xf32>
    %171 = vector.shape_cast %170 : vector<16x16x64xf32> to vector<256x64xf32>
    %172 = arith.truncf %171 : vector<256x64xf32> to vector<256x64xbf16>
    %c1_200 = arith.constant 1 : index
    %c1_201 = arith.constant 1 : index
    %c0_202 = arith.constant 0 : index
    %c0_203 = arith.constant 0 : index
    %173 = vector.load %arg4[%c1_200, %c1_201, %c0_202, %c0_203] : memref<6x9x64x64xbf16, #tpu.memory_space<vmem>>, vector<1x1x64x64xbf16>
    %174 = vector.shape_cast %173 : vector<1x1x64x64xbf16> to vector<64x64xbf16>
    %cst_204 = arith.constant dense<0.000000e+00> : vector<256x64xf32>
    %175 = tpu.matmul %172, %174, %cst_204 {dimension_numbers = #tpu.dot_dimension_numbers<[1], [0], [0], [1], [0, 0, 1, 1], [], []>} : vector<256x64xbf16>, vector<64x64xbf16>, vector<256x64xf32> -> vector<256x64xf32>
    %176 = arith.addf %169, %175 : vector<256x64xf32>
    %c0_205 = arith.constant 0 : index
    %c2_206 = arith.constant 2 : index
    %c0_207 = arith.constant 0 : index
    %177 = vector.load %arg12[%c0_205, %c2_206, %c0_207] : memref<18x18x64xf32, #tpu.memory_space<vmem>>, vector<16x16x64xf32>
    %178 = vector.shape_cast %177 : vector<16x16x64xf32> to vector<256x64xf32>
    %179 = arith.truncf %178 : vector<256x64xf32> to vector<256x64xbf16>
    %c1_208 = arith.constant 1 : index
    %c2_209 = arith.constant 2 : index
    %c0_210 = arith.constant 0 : index
    %c0_211 = arith.constant 0 : index
    %180 = vector.load %arg4[%c1_208, %c2_209, %c0_210, %c0_211] : memref<6x9x64x64xbf16, #tpu.memory_space<vmem>>, vector<1x1x64x64xbf16>
    %181 = vector.shape_cast %180 : vector<1x1x64x64xbf16> to vector<64x64xbf16>
    %cst_212 = arith.constant dense<0.000000e+00> : vector<256x64xf32>
    %182 = tpu.matmul %179, %181, %cst_212 {dimension_numbers = #tpu.dot_dimension_numbers<[1], [0], [0], [1], [0, 0, 1, 1], [], []>} : vector<256x64xbf16>, vector<64x64xbf16>, vector<256x64xf32> -> vector<256x64xf32>
    %183 = arith.addf %176, %182 : vector<256x64xf32>
    %c1_213 = arith.constant 1 : index
    %c0_214 = arith.constant 0 : index
    %c0_215 = arith.constant 0 : index
    %184 = vector.load %arg12[%c1_213, %c0_214, %c0_215] : memref<18x18x64xf32, #tpu.memory_space<vmem>>, vector<16x16x64xf32>
    %185 = vector.shape_cast %184 : vector<16x16x64xf32> to vector<256x64xf32>
    %186 = arith.truncf %185 : vector<256x64xf32> to vector<256x64xbf16>
    %c1_216 = arith.constant 1 : index
    %c3_217 = arith.constant 3 : index
    %c0_218 = arith.constant 0 : index
    %c0_219 = arith.constant 0 : index
    %187 = vector.load %arg4[%c1_216, %c3_217, %c0_218, %c0_219] : memref<6x9x64x64xbf16, #tpu.memory_space<vmem>>, vector<1x1x64x64xbf16>
    %188 = vector.shape_cast %187 : vector<1x1x64x64xbf16> to vector<64x64xbf16>
    %cst_220 = arith.constant dense<0.000000e+00> : vector<256x64xf32>
    %189 = tpu.matmul %186, %188, %cst_220 {dimension_numbers = #tpu.dot_dimension_numbers<[1], [0], [0], [1], [0, 0, 1, 1], [], []>} : vector<256x64xbf16>, vector<64x64xbf16>, vector<256x64xf32> -> vector<256x64xf32>
    %190 = arith.addf %183, %189 : vector<256x64xf32>
    %c1_221 = arith.constant 1 : index
    %c1_222 = arith.constant 1 : index
    %c0_223 = arith.constant 0 : index
    %191 = vector.load %arg12[%c1_221, %c1_222, %c0_223] : memref<18x18x64xf32, #tpu.memory_space<vmem>>, vector<16x16x64xf32>
    %192 = vector.shape_cast %191 : vector<16x16x64xf32> to vector<256x64xf32>
    %193 = arith.truncf %192 : vector<256x64xf32> to vector<256x64xbf16>
    %c1_224 = arith.constant 1 : index
    %c4_225 = arith.constant 4 : index
    %c0_226 = arith.constant 0 : index
    %c0_227 = arith.constant 0 : index
    %194 = vector.load %arg4[%c1_224, %c4_225, %c0_226, %c0_227] : memref<6x9x64x64xbf16, #tpu.memory_space<vmem>>, vector<1x1x64x64xbf16>
    %195 = vector.shape_cast %194 : vector<1x1x64x64xbf16> to vector<64x64xbf16>
    %cst_228 = arith.constant dense<0.000000e+00> : vector<256x64xf32>
    %196 = tpu.matmul %193, %195, %cst_228 {dimension_numbers = #tpu.dot_dimension_numbers<[1], [0], [0], [1], [0, 0, 1, 1], [], []>} : vector<256x64xbf16>, vector<64x64xbf16>, vector<256x64xf32> -> vector<256x64xf32>
    %197 = arith.addf %190, %196 : vector<256x64xf32>
    %c1_229 = arith.constant 1 : index
    %c2_230 = arith.constant 2 : index
    %c0_231 = arith.constant 0 : index
    %198 = vector.load %arg12[%c1_229, %c2_230, %c0_231] : memref<18x18x64xf32, #tpu.memory_space<vmem>>, vector<16x16x64xf32>
    %199 = vector.shape_cast %198 : vector<16x16x64xf32> to vector<256x64xf32>
    %200 = arith.truncf %199 : vector<256x64xf32> to vector<256x64xbf16>
    %c1_232 = arith.constant 1 : index
    %c5_233 = arith.constant 5 : index
    %c0_234 = arith.constant 0 : index
    %c0_235 = arith.constant 0 : index
    %201 = vector.load %arg4[%c1_232, %c5_233, %c0_234, %c0_235] : memref<6x9x64x64xbf16, #tpu.memory_space<vmem>>, vector<1x1x64x64xbf16>
    %202 = vector.shape_cast %201 : vector<1x1x64x64xbf16> to vector<64x64xbf16>
    %cst_236 = arith.constant dense<0.000000e+00> : vector<256x64xf32>
    %203 = tpu.matmul %200, %202, %cst_236 {dimension_numbers = #tpu.dot_dimension_numbers<[1], [0], [0], [1], [0, 0, 1, 1], [], []>} : vector<256x64xbf16>, vector<64x64xbf16>, vector<256x64xf32> -> vector<256x64xf32>
    %204 = arith.addf %197, %203 : vector<256x64xf32>
    %c2_237 = arith.constant 2 : index
    %c0_238 = arith.constant 0 : index
    %c0_239 = arith.constant 0 : index
    %205 = vector.load %arg12[%c2_237, %c0_238, %c0_239] : memref<18x18x64xf32, #tpu.memory_space<vmem>>, vector<16x16x64xf32>
    %206 = vector.shape_cast %205 : vector<16x16x64xf32> to vector<256x64xf32>
    %207 = arith.truncf %206 : vector<256x64xf32> to vector<256x64xbf16>
    %c1_240 = arith.constant 1 : index
    %c6_241 = arith.constant 6 : index
    %c0_242 = arith.constant 0 : index
    %c0_243 = arith.constant 0 : index
    %208 = vector.load %arg4[%c1_240, %c6_241, %c0_242, %c0_243] : memref<6x9x64x64xbf16, #tpu.memory_space<vmem>>, vector<1x1x64x64xbf16>
    %209 = vector.shape_cast %208 : vector<1x1x64x64xbf16> to vector<64x64xbf16>
    %cst_244 = arith.constant dense<0.000000e+00> : vector<256x64xf32>
    %210 = tpu.matmul %207, %209, %cst_244 {dimension_numbers = #tpu.dot_dimension_numbers<[1], [0], [0], [1], [0, 0, 1, 1], [], []>} : vector<256x64xbf16>, vector<64x64xbf16>, vector<256x64xf32> -> vector<256x64xf32>
    %211 = arith.addf %204, %210 : vector<256x64xf32>
    %c2_245 = arith.constant 2 : index
    %c1_246 = arith.constant 1 : index
    %c0_247 = arith.constant 0 : index
    %212 = vector.load %arg12[%c2_245, %c1_246, %c0_247] : memref<18x18x64xf32, #tpu.memory_space<vmem>>, vector<16x16x64xf32>
    %213 = vector.shape_cast %212 : vector<16x16x64xf32> to vector<256x64xf32>
    %214 = arith.truncf %213 : vector<256x64xf32> to vector<256x64xbf16>
    %c1_248 = arith.constant 1 : index
    %c7_249 = arith.constant 7 : index
    %c0_250 = arith.constant 0 : index
    %c0_251 = arith.constant 0 : index
    %215 = vector.load %arg4[%c1_248, %c7_249, %c0_250, %c0_251] : memref<6x9x64x64xbf16, #tpu.memory_space<vmem>>, vector<1x1x64x64xbf16>
    %216 = vector.shape_cast %215 : vector<1x1x64x64xbf16> to vector<64x64xbf16>
    %cst_252 = arith.constant dense<0.000000e+00> : vector<256x64xf32>
    %217 = tpu.matmul %214, %216, %cst_252 {dimension_numbers = #tpu.dot_dimension_numbers<[1], [0], [0], [1], [0, 0, 1, 1], [], []>} : vector<256x64xbf16>, vector<64x64xbf16>, vector<256x64xf32> -> vector<256x64xf32>
    %218 = arith.addf %211, %217 : vector<256x64xf32>
    %c2_253 = arith.constant 2 : index
    %c2_254 = arith.constant 2 : index
    %c0_255 = arith.constant 0 : index
    %219 = vector.load %arg12[%c2_253, %c2_254, %c0_255] : memref<18x18x64xf32, #tpu.memory_space<vmem>>, vector<16x16x64xf32>
    %220 = vector.shape_cast %219 : vector<16x16x64xf32> to vector<256x64xf32>
    %221 = arith.truncf %220 : vector<256x64xf32> to vector<256x64xbf16>
    %c1_256 = arith.constant 1 : index
    %c8_257 = arith.constant 8 : index
    %c0_258 = arith.constant 0 : index
    %c0_259 = arith.constant 0 : index
    %222 = vector.load %arg4[%c1_256, %c8_257, %c0_258, %c0_259] : memref<6x9x64x64xbf16, #tpu.memory_space<vmem>>, vector<1x1x64x64xbf16>
    %223 = vector.shape_cast %222 : vector<1x1x64x64xbf16> to vector<64x64xbf16>
    %cst_260 = arith.constant dense<0.000000e+00> : vector<256x64xf32>
    %224 = tpu.matmul %221, %223, %cst_260 {dimension_numbers = #tpu.dot_dimension_numbers<[1], [0], [0], [1], [0, 0, 1, 1], [], []>} : vector<256x64xbf16>, vector<64x64xbf16>, vector<256x64xf32> -> vector<256x64xf32>
    %225 = arith.addf %218, %224 : vector<256x64xf32>
    %226 = vector.broadcast %161 : vector<1x64xf32> to vector<256x64xf32>
    %227 = arith.addf %225, %226 : vector<256x64xf32>
    %c1_261 = arith.constant 1 : index
    %c1_262 = arith.constant 1 : index
    %c0_263 = arith.constant 0 : index
    %228 = vector.load %arg11[%c1_261, %c1_262, %c0_263] : memref<18x18x64xf32, #tpu.memory_space<vmem>>, vector<16x16x64xf32>
    %229 = vector.shape_cast %228 : vector<16x16x64xf32> to vector<256x64xf32>
    %230 = arith.addf %229, %227 : vector<256x64xf32>
    %231 = vector.shape_cast %230 : vector<256x64xf32> to vector<16x16x64xf32>
    %c1_264 = arith.constant 1 : index
    %c1_265 = arith.constant 1 : index
    %c0_266 = arith.constant 0 : index
    %232 = vector.load %arg11[%c1_264, %c1_265, %c0_266] : memref<18x18x64xf32, #tpu.memory_space<vmem>>, vector<16x16x64xf32>
    tpu.vector_store %arg11[%c1_264, %c1_265, %c0_266], %231 {strides = array<i32>} : memref<18x18x64xf32, #tpu.memory_space<vmem>>, vector<16x16x64xf32>,
    %c2_267 = arith.constant 2 : index
    %c0_268 = arith.constant 0 : index
    %233 = vector.load %arg5[%c2_267, %c0_268] : memref<6x64xf32, #tpu.memory_space<vmem>>, vector<1x64xf32>
    %cst_269 = arith.constant 0.000000e+00 : f32
    %234 = vector.broadcast %cst_269 : f32 to vector<256x64xf32>
    %c0_270 = arith.constant 0 : index
    %c0_271 = arith.constant 0 : index
    %c0_272 = arith.constant 0 : index
    %235 = vector.load %arg11[%c0_270, %c0_271, %c0_272] : memref<18x18x64xf32, #tpu.memory_space<vmem>>, vector<16x16x64xf32>
    %236 = vector.shape_cast %235 : vector<16x16x64xf32> to vector<256x64xf32>
    %237 = arith.truncf %236 : vector<256x64xf32> to vector<256x64xbf16>
    %c2_273 = arith.constant 2 : index
    %c0_274 = arith.constant 0 : index
    %c0_275 = arith.constant 0 : index
    %c0_276 = arith.constant 0 : index
    %238 = vector.load %arg4[%c2_273, %c0_274, %c0_275, %c0_276] : memref<6x9x64x64xbf16, #tpu.memory_space<vmem>>, vector<1x1x64x64xbf16>
    %239 = vector.shape_cast %238 : vector<1x1x64x64xbf16> to vector<64x64xbf16>
    %cst_277 = arith.constant dense<0.000000e+00> : vector<256x64xf32>
    %240 = tpu.matmul %237, %239, %cst_277 {dimension_numbers = #tpu.dot_dimension_numbers<[1], [0], [0], [1], [0, 0, 1, 1], [], []>} : vector<256x64xbf16>, vector<64x64xbf16>, vector<256x64xf32> -> vector<256x64xf32>
    %241 = arith.addf %234, %240 : vector<256x64xf32>
    %c0_278 = arith.constant 0 : index
    %c1_279 = arith.constant 1 : index
    %c0_280 = arith.constant 0 : index
    %242 = vector.load %arg11[%c0_278, %c1_279, %c0_280] : memref<18x18x64xf32, #tpu.memory_space<vmem>>, vector<16x16x64xf32>
    %243 = vector.shape_cast %242 : vector<16x16x64xf32> to vector<256x64xf32>
    %244 = arith.truncf %243 : vector<256x64xf32> to vector<256x64xbf16>
    %c2_281 = arith.constant 2 : index
    %c1_282 = arith.constant 1 : index
    %c0_283 = arith.constant 0 : index
    %c0_284 = arith.constant 0 : index
    %245 = vector.load %arg4[%c2_281, %c1_282, %c0_283, %c0_284] : memref<6x9x64x64xbf16, #tpu.memory_space<vmem>>, vector<1x1x64x64xbf16>
    %246 = vector.shape_cast %245 : vector<1x1x64x64xbf16> to vector<64x64xbf16>
    %cst_285 = arith.constant dense<0.000000e+00> : vector<256x64xf32>
    %247 = tpu.matmul %244, %246, %cst_285 {dimension_numbers = #tpu.dot_dimension_numbers<[1], [0], [0], [1], [0, 0, 1, 1], [], []>} : vector<256x64xbf16>, vector<64x64xbf16>, vector<256x64xf32> -> vector<256x64xf32>
    %248 = arith.addf %241, %247 : vector<256x64xf32>
    %c0_286 = arith.constant 0 : index
    %c2_287 = arith.constant 2 : index
    %c0_288 = arith.constant 0 : index
    %249 = vector.load %arg11[%c0_286, %c2_287, %c0_288] : memref<18x18x64xf32, #tpu.memory_space<vmem>>, vector<16x16x64xf32>
    %250 = vector.shape_cast %249 : vector<16x16x64xf32> to vector<256x64xf32>
    %251 = arith.truncf %250 : vector<256x64xf32> to vector<256x64xbf16>
    %c2_289 = arith.constant 2 : index
    %c2_290 = arith.constant 2 : index
    %c0_291 = arith.constant 0 : index
    %c0_292 = arith.constant 0 : index
    %252 = vector.load %arg4[%c2_289, %c2_290, %c0_291, %c0_292] : memref<6x9x64x64xbf16, #tpu.memory_space<vmem>>, vector<1x1x64x64xbf16>
    %253 = vector.shape_cast %252 : vector<1x1x64x64xbf16> to vector<64x64xbf16>
    %cst_293 = arith.constant dense<0.000000e+00> : vector<256x64xf32>
    %254 = tpu.matmul %251, %253, %cst_293 {dimension_numbers = #tpu.dot_dimension_numbers<[1], [0], [0], [1], [0, 0, 1, 1], [], []>} : vector<256x64xbf16>, vector<64x64xbf16>, vector<256x64xf32> -> vector<256x64xf32>
    %255 = arith.addf %248, %254 : vector<256x64xf32>
    %c1_294 = arith.constant 1 : index
    %c0_295 = arith.constant 0 : index
    %c0_296 = arith.constant 0 : index
    %256 = vector.load %arg11[%c1_294, %c0_295, %c0_296] : memref<18x18x64xf32, #tpu.memory_space<vmem>>, vector<16x16x64xf32>
    %257 = vector.shape_cast %256 : vector<16x16x64xf32> to vector<256x64xf32>
    %258 = arith.truncf %257 : vector<256x64xf32> to vector<256x64xbf16>
    %c2_297 = arith.constant 2 : index
    %c3_298 = arith.constant 3 : index
    %c0_299 = arith.constant 0 : index
    %c0_300 = arith.constant 0 : index
    %259 = vector.load %arg4[%c2_297, %c3_298, %c0_299, %c0_300] : memref<6x9x64x64xbf16, #tpu.memory_space<vmem>>, vector<1x1x64x64xbf16>
    %260 = vector.shape_cast %259 : vector<1x1x64x64xbf16> to vector<64x64xbf16>
    %cst_301 = arith.constant dense<0.000000e+00> : vector<256x64xf32>
    %261 = tpu.matmul %258, %260, %cst_301 {dimension_numbers = #tpu.dot_dimension_numbers<[1], [0], [0], [1], [0, 0, 1, 1], [], []>} : vector<256x64xbf16>, vector<64x64xbf16>, vector<256x64xf32> -> vector<256x64xf32>
    %262 = arith.addf %255, %261 : vector<256x64xf32>
    %c1_302 = arith.constant 1 : index
    %c1_303 = arith.constant 1 : index
    %c0_304 = arith.constant 0 : index
    %263 = vector.load %arg11[%c1_302, %c1_303, %c0_304] : memref<18x18x64xf32, #tpu.memory_space<vmem>>, vector<16x16x64xf32>
    %264 = vector.shape_cast %263 : vector<16x16x64xf32> to vector<256x64xf32>
    %265 = arith.truncf %264 : vector<256x64xf32> to vector<256x64xbf16>
    %c2_305 = arith.constant 2 : index
    %c4_306 = arith.constant 4 : index
    %c0_307 = arith.constant 0 : index
    %c0_308 = arith.constant 0 : index
    %266 = vector.load %arg4[%c2_305, %c4_306, %c0_307, %c0_308] : memref<6x9x64x64xbf16, #tpu.memory_space<vmem>>, vector<1x1x64x64xbf16>
    %267 = vector.shape_cast %266 : vector<1x1x64x64xbf16> to vector<64x64xbf16>
    %cst_309 = arith.constant dense<0.000000e+00> : vector<256x64xf32>
    %268 = tpu.matmul %265, %267, %cst_309 {dimension_numbers = #tpu.dot_dimension_numbers<[1], [0], [0], [1], [0, 0, 1, 1], [], []>} : vector<256x64xbf16>, vector<64x64xbf16>, vector<256x64xf32> -> vector<256x64xf32>
    %269 = arith.addf %262, %268 : vector<256x64xf32>
    %c1_310 = arith.constant 1 : index
    %c2_311 = arith.constant 2 : index
    %c0_312 = arith.constant 0 : index
    %270 = vector.load %arg11[%c1_310, %c2_311, %c0_312] : memref<18x18x64xf32, #tpu.memory_space<vmem>>, vector<16x16x64xf32>
    %271 = vector.shape_cast %270 : vector<16x16x64xf32> to vector<256x64xf32>
    %272 = arith.truncf %271 : vector<256x64xf32> to vector<256x64xbf16>
    %c2_313 = arith.constant 2 : index
    %c5_314 = arith.constant 5 : index
    %c0_315 = arith.constant 0 : index
    %c0_316 = arith.constant 0 : index
    %273 = vector.load %arg4[%c2_313, %c5_314, %c0_315, %c0_316] : memref<6x9x64x64xbf16, #tpu.memory_space<vmem>>, vector<1x1x64x64xbf16>
    %274 = vector.shape_cast %273 : vector<1x1x64x64xbf16> to vector<64x64xbf16>
    %cst_317 = arith.constant dense<0.000000e+00> : vector<256x64xf32>
    %275 = tpu.matmul %272, %274, %cst_317 {dimension_numbers = #tpu.dot_dimension_numbers<[1], [0], [0], [1], [0, 0, 1, 1], [], []>} : vector<256x64xbf16>, vector<64x64xbf16>, vector<256x64xf32> -> vector<256x64xf32>
    %276 = arith.addf %269, %275 : vector<256x64xf32>
    %c2_318 = arith.constant 2 : index
    %c0_319 = arith.constant 0 : index
    %c0_320 = arith.constant 0 : index
    %277 = vector.load %arg11[%c2_318, %c0_319, %c0_320] : memref<18x18x64xf32, #tpu.memory_space<vmem>>, vector<16x16x64xf32>
    %278 = vector.shape_cast %277 : vector<16x16x64xf32> to vector<256x64xf32>
    %279 = arith.truncf %278 : vector<256x64xf32> to vector<256x64xbf16>
    %c2_321 = arith.constant 2 : index
    %c6_322 = arith.constant 6 : index
    %c0_323 = arith.constant 0 : index
    %c0_324 = arith.constant 0 : index
    %280 = vector.load %arg4[%c2_321, %c6_322, %c0_323, %c0_324] : memref<6x9x64x64xbf16, #tpu.memory_space<vmem>>, vector<1x1x64x64xbf16>
    %281 = vector.shape_cast %280 : vector<1x1x64x64xbf16> to vector<64x64xbf16>
    %cst_325 = arith.constant dense<0.000000e+00> : vector<256x64xf32>
    %282 = tpu.matmul %279, %281, %cst_325 {dimension_numbers = #tpu.dot_dimension_numbers<[1], [0], [0], [1], [0, 0, 1, 1], [], []>} : vector<256x64xbf16>, vector<64x64xbf16>, vector<256x64xf32> -> vector<256x64xf32>
    %283 = arith.addf %276, %282 : vector<256x64xf32>
    %c2_326 = arith.constant 2 : index
    %c1_327 = arith.constant 1 : index
    %c0_328 = arith.constant 0 : index
    %284 = vector.load %arg11[%c2_326, %c1_327, %c0_328] : memref<18x18x64xf32, #tpu.memory_space<vmem>>, vector<16x16x64xf32>
    %285 = vector.shape_cast %284 : vector<16x16x64xf32> to vector<256x64xf32>
    %286 = arith.truncf %285 : vector<256x64xf32> to vector<256x64xbf16>
    %c2_329 = arith.constant 2 : index
    %c7_330 = arith.constant 7 : index
    %c0_331 = arith.constant 0 : index
    %c0_332 = arith.constant 0 : index
    %287 = vector.load %arg4[%c2_329, %c7_330, %c0_331, %c0_332] : memref<6x9x64x64xbf16, #tpu.memory_space<vmem>>, vector<1x1x64x64xbf16>
    %288 = vector.shape_cast %287 : vector<1x1x64x64xbf16> to vector<64x64xbf16>
    %cst_333 = arith.constant dense<0.000000e+00> : vector<256x64xf32>
    %289 = tpu.matmul %286, %288, %cst_333 {dimension_numbers = #tpu.dot_dimension_numbers<[1], [0], [0], [1], [0, 0, 1, 1], [], []>} : vector<256x64xbf16>, vector<64x64xbf16>, vector<256x64xf32> -> vector<256x64xf32>
    %290 = arith.addf %283, %289 : vector<256x64xf32>
    %c2_334 = arith.constant 2 : index
    %c2_335 = arith.constant 2 : index
    %c0_336 = arith.constant 0 : index
    %291 = vector.load %arg11[%c2_334, %c2_335, %c0_336] : memref<18x18x64xf32, #tpu.memory_space<vmem>>, vector<16x16x64xf32>
    %292 = vector.shape_cast %291 : vector<16x16x64xf32> to vector<256x64xf32>
    %293 = arith.truncf %292 : vector<256x64xf32> to vector<256x64xbf16>
    %c2_337 = arith.constant 2 : index
    %c8_338 = arith.constant 8 : index
    %c0_339 = arith.constant 0 : index
    %c0_340 = arith.constant 0 : index
    %294 = vector.load %arg4[%c2_337, %c8_338, %c0_339, %c0_340] : memref<6x9x64x64xbf16, #tpu.memory_space<vmem>>, vector<1x1x64x64xbf16>
    %295 = vector.shape_cast %294 : vector<1x1x64x64xbf16> to vector<64x64xbf16>
    %cst_341 = arith.constant dense<0.000000e+00> : vector<256x64xf32>
    %296 = tpu.matmul %293, %295, %cst_341 {dimension_numbers = #tpu.dot_dimension_numbers<[1], [0], [0], [1], [0, 0, 1, 1], [], []>} : vector<256x64xbf16>, vector<64x64xbf16>, vector<256x64xf32> -> vector<256x64xf32>
    %297 = arith.addf %290, %296 : vector<256x64xf32>
    %298 = vector.broadcast %233 : vector<1x64xf32> to vector<256x64xf32>
    %299 = arith.addf %297, %298 : vector<256x64xf32>
    %cst_342 = arith.constant 0.000000e+00 : f32
    %300 = vector.broadcast %cst_342 : f32 to vector<256x64xf32>
    %301 = arith.maximumf %299, %300 : vector<256x64xf32>
    %302 = vector.shape_cast %301 : vector<256x64xf32> to vector<16x16x64xf32>
    %c1_343 = arith.constant 1 : index
    %c1_344 = arith.constant 1 : index
    %c0_345 = arith.constant 0 : index
    %303 = vector.load %arg12[%c1_343, %c1_344, %c0_345] : memref<18x18x64xf32, #tpu.memory_space<vmem>>, vector<16x16x64xf32>
    tpu.vector_store %arg12[%c1_343, %c1_344, %c0_345], %302 {strides = array<i32>} : memref<18x18x64xf32, #tpu.memory_space<vmem>>, vector<16x16x64xf32>,
    %c3_346 = arith.constant 3 : index
    %c0_347 = arith.constant 0 : index
    %304 = vector.load %arg5[%c3_346, %c0_347] : memref<6x64xf32, #tpu.memory_space<vmem>>, vector<1x64xf32>
    %cst_348 = arith.constant 0.000000e+00 : f32
    %305 = vector.broadcast %cst_348 : f32 to vector<256x64xf32>
    %c0_349 = arith.constant 0 : index
    %c0_350 = arith.constant 0 : index
    %c0_351 = arith.constant 0 : index
    %306 = vector.load %arg12[%c0_349, %c0_350, %c0_351] : memref<18x18x64xf32, #tpu.memory_space<vmem>>, vector<16x16x64xf32>
    %307 = vector.shape_cast %306 : vector<16x16x64xf32> to vector<256x64xf32>
    %308 = arith.truncf %307 : vector<256x64xf32> to vector<256x64xbf16>
    %c3_352 = arith.constant 3 : index
    %c0_353 = arith.constant 0 : index
    %c0_354 = arith.constant 0 : index
    %c0_355 = arith.constant 0 : index
    %309 = vector.load %arg4[%c3_352, %c0_353, %c0_354, %c0_355] : memref<6x9x64x64xbf16, #tpu.memory_space<vmem>>, vector<1x1x64x64xbf16>
    %310 = vector.shape_cast %309 : vector<1x1x64x64xbf16> to vector<64x64xbf16>
    %cst_356 = arith.constant dense<0.000000e+00> : vector<256x64xf32>
    %311 = tpu.matmul %308, %310, %cst_356 {dimension_numbers = #tpu.dot_dimension_numbers<[1], [0], [0], [1], [0, 0, 1, 1], [], []>} : vector<256x64xbf16>, vector<64x64xbf16>, vector<256x64xf32> -> vector<256x64xf32>
    %312 = arith.addf %305, %311 : vector<256x64xf32>
    %c0_357 = arith.constant 0 : index
    %c1_358 = arith.constant 1 : index
    %c0_359 = arith.constant 0 : index
    %313 = vector.load %arg12[%c0_357, %c1_358, %c0_359] : memref<18x18x64xf32, #tpu.memory_space<vmem>>, vector<16x16x64xf32>
    %314 = vector.shape_cast %313 : vector<16x16x64xf32> to vector<256x64xf32>
    %315 = arith.truncf %314 : vector<256x64xf32> to vector<256x64xbf16>
    %c3_360 = arith.constant 3 : index
    %c1_361 = arith.constant 1 : index
    %c0_362 = arith.constant 0 : index
    %c0_363 = arith.constant 0 : index
    %316 = vector.load %arg4[%c3_360, %c1_361, %c0_362, %c0_363] : memref<6x9x64x64xbf16, #tpu.memory_space<vmem>>, vector<1x1x64x64xbf16>
    %317 = vector.shape_cast %316 : vector<1x1x64x64xbf16> to vector<64x64xbf16>
    %cst_364 = arith.constant dense<0.000000e+00> : vector<256x64xf32>
    %318 = tpu.matmul %315, %317, %cst_364 {dimension_numbers = #tpu.dot_dimension_numbers<[1], [0], [0], [1], [0, 0, 1, 1], [], []>} : vector<256x64xbf16>, vector<64x64xbf16>, vector<256x64xf32> -> vector<256x64xf32>
    %319 = arith.addf %312, %318 : vector<256x64xf32>
    %c0_365 = arith.constant 0 : index
    %c2_366 = arith.constant 2 : index
    %c0_367 = arith.constant 0 : index
    %320 = vector.load %arg12[%c0_365, %c2_366, %c0_367] : memref<18x18x64xf32, #tpu.memory_space<vmem>>, vector<16x16x64xf32>
    %321 = vector.shape_cast %320 : vector<16x16x64xf32> to vector<256x64xf32>
    %322 = arith.truncf %321 : vector<256x64xf32> to vector<256x64xbf16>
    %c3_368 = arith.constant 3 : index
    %c2_369 = arith.constant 2 : index
    %c0_370 = arith.constant 0 : index
    %c0_371 = arith.constant 0 : index
    %323 = vector.load %arg4[%c3_368, %c2_369, %c0_370, %c0_371] : memref<6x9x64x64xbf16, #tpu.memory_space<vmem>>, vector<1x1x64x64xbf16>
    %324 = vector.shape_cast %323 : vector<1x1x64x64xbf16> to vector<64x64xbf16>
    %cst_372 = arith.constant dense<0.000000e+00> : vector<256x64xf32>
    %325 = tpu.matmul %322, %324, %cst_372 {dimension_numbers = #tpu.dot_dimension_numbers<[1], [0], [0], [1], [0, 0, 1, 1], [], []>} : vector<256x64xbf16>, vector<64x64xbf16>, vector<256x64xf32> -> vector<256x64xf32>
    %326 = arith.addf %319, %325 : vector<256x64xf32>
    %c1_373 = arith.constant 1 : index
    %c0_374 = arith.constant 0 : index
    %c0_375 = arith.constant 0 : index
    %327 = vector.load %arg12[%c1_373, %c0_374, %c0_375] : memref<18x18x64xf32, #tpu.memory_space<vmem>>, vector<16x16x64xf32>
    %328 = vector.shape_cast %327 : vector<16x16x64xf32> to vector<256x64xf32>
    %329 = arith.truncf %328 : vector<256x64xf32> to vector<256x64xbf16>
    %c3_376 = arith.constant 3 : index
    %c3_377 = arith.constant 3 : index
    %c0_378 = arith.constant 0 : index
    %c0_379 = arith.constant 0 : index
    %330 = vector.load %arg4[%c3_376, %c3_377, %c0_378, %c0_379] : memref<6x9x64x64xbf16, #tpu.memory_space<vmem>>, vector<1x1x64x64xbf16>
    %331 = vector.shape_cast %330 : vector<1x1x64x64xbf16> to vector<64x64xbf16>
    %cst_380 = arith.constant dense<0.000000e+00> : vector<256x64xf32>
    %332 = tpu.matmul %329, %331, %cst_380 {dimension_numbers = #tpu.dot_dimension_numbers<[1], [0], [0], [1], [0, 0, 1, 1], [], []>} : vector<256x64xbf16>, vector<64x64xbf16>, vector<256x64xf32> -> vector<256x64xf32>
    %333 = arith.addf %326, %332 : vector<256x64xf32>
    %c1_381 = arith.constant 1 : index
    %c1_382 = arith.constant 1 : index
    %c0_383 = arith.constant 0 : index
    %334 = vector.load %arg12[%c1_381, %c1_382, %c0_383] : memref<18x18x64xf32, #tpu.memory_space<vmem>>, vector<16x16x64xf32>
    %335 = vector.shape_cast %334 : vector<16x16x64xf32> to vector<256x64xf32>
    %336 = arith.truncf %335 : vector<256x64xf32> to vector<256x64xbf16>
    %c3_384 = arith.constant 3 : index
    %c4_385 = arith.constant 4 : index
    %c0_386 = arith.constant 0 : index
    %c0_387 = arith.constant 0 : index
    %337 = vector.load %arg4[%c3_384, %c4_385, %c0_386, %c0_387] : memref<6x9x64x64xbf16, #tpu.memory_space<vmem>>, vector<1x1x64x64xbf16>
    %338 = vector.shape_cast %337 : vector<1x1x64x64xbf16> to vector<64x64xbf16>
    %cst_388 = arith.constant dense<0.000000e+00> : vector<256x64xf32>
    %339 = tpu.matmul %336, %338, %cst_388 {dimension_numbers = #tpu.dot_dimension_numbers<[1], [0], [0], [1], [0, 0, 1, 1], [], []>} : vector<256x64xbf16>, vector<64x64xbf16>, vector<256x64xf32> -> vector<256x64xf32>
    %340 = arith.addf %333, %339 : vector<256x64xf32>
    %c1_389 = arith.constant 1 : index
    %c2_390 = arith.constant 2 : index
    %c0_391 = arith.constant 0 : index
    %341 = vector.load %arg12[%c1_389, %c2_390, %c0_391] : memref<18x18x64xf32, #tpu.memory_space<vmem>>, vector<16x16x64xf32>
    %342 = vector.shape_cast %341 : vector<16x16x64xf32> to vector<256x64xf32>
    %343 = arith.truncf %342 : vector<256x64xf32> to vector<256x64xbf16>
    %c3_392 = arith.constant 3 : index
    %c5_393 = arith.constant 5 : index
    %c0_394 = arith.constant 0 : index
    %c0_395 = arith.constant 0 : index
    %344 = vector.load %arg4[%c3_392, %c5_393, %c0_394, %c0_395] : memref<6x9x64x64xbf16, #tpu.memory_space<vmem>>, vector<1x1x64x64xbf16>
    %345 = vector.shape_cast %344 : vector<1x1x64x64xbf16> to vector<64x64xbf16>
    %cst_396 = arith.constant dense<0.000000e+00> : vector<256x64xf32>
    %346 = tpu.matmul %343, %345, %cst_396 {dimension_numbers = #tpu.dot_dimension_numbers<[1], [0], [0], [1], [0, 0, 1, 1], [], []>} : vector<256x64xbf16>, vector<64x64xbf16>, vector<256x64xf32> -> vector<256x64xf32>
    %347 = arith.addf %340, %346 : vector<256x64xf32>
    %c2_397 = arith.constant 2 : index
    %c0_398 = arith.constant 0 : index
    %c0_399 = arith.constant 0 : index
    %348 = vector.load %arg12[%c2_397, %c0_398, %c0_399] : memref<18x18x64xf32, #tpu.memory_space<vmem>>, vector<16x16x64xf32>
    %349 = vector.shape_cast %348 : vector<16x16x64xf32> to vector<256x64xf32>
    %350 = arith.truncf %349 : vector<256x64xf32> to vector<256x64xbf16>
    %c3_400 = arith.constant 3 : index
    %c6_401 = arith.constant 6 : index
    %c0_402 = arith.constant 0 : index
    %c0_403 = arith.constant 0 : index
    %351 = vector.load %arg4[%c3_400, %c6_401, %c0_402, %c0_403] : memref<6x9x64x64xbf16, #tpu.memory_space<vmem>>, vector<1x1x64x64xbf16>
    %352 = vector.shape_cast %351 : vector<1x1x64x64xbf16> to vector<64x64xbf16>
    %cst_404 = arith.constant dense<0.000000e+00> : vector<256x64xf32>
    %353 = tpu.matmul %350, %352, %cst_404 {dimension_numbers = #tpu.dot_dimension_numbers<[1], [0], [0], [1], [0, 0, 1, 1], [], []>} : vector<256x64xbf16>, vector<64x64xbf16>, vector<256x64xf32> -> vector<256x64xf32>
    %354 = arith.addf %347, %353 : vector<256x64xf32>
    %c2_405 = arith.constant 2 : index
    %c1_406 = arith.constant 1 : index
    %c0_407 = arith.constant 0 : index
    %355 = vector.load %arg12[%c2_405, %c1_406, %c0_407] : memref<18x18x64xf32, #tpu.memory_space<vmem>>, vector<16x16x64xf32>
    %356 = vector.shape_cast %355 : vector<16x16x64xf32> to vector<256x64xf32>
    %357 = arith.truncf %356 : vector<256x64xf32> to vector<256x64xbf16>
    %c3_408 = arith.constant 3 : index
    %c7_409 = arith.constant 7 : index
    %c0_410 = arith.constant 0 : index
    %c0_411 = arith.constant 0 : index
    %358 = vector.load %arg4[%c3_408, %c7_409, %c0_410, %c0_411] : memref<6x9x64x64xbf16, #tpu.memory_space<vmem>>, vector<1x1x64x64xbf16>
    %359 = vector.shape_cast %358 : vector<1x1x64x64xbf16> to vector<64x64xbf16>
    %cst_412 = arith.constant dense<0.000000e+00> : vector<256x64xf32>
    %360 = tpu.matmul %357, %359, %cst_412 {dimension_numbers = #tpu.dot_dimension_numbers<[1], [0], [0], [1], [0, 0, 1, 1], [], []>} : vector<256x64xbf16>, vector<64x64xbf16>, vector<256x64xf32> -> vector<256x64xf32>
    %361 = arith.addf %354, %360 : vector<256x64xf32>
    %c2_413 = arith.constant 2 : index
    %c2_414 = arith.constant 2 : index
    %c0_415 = arith.constant 0 : index
    %362 = vector.load %arg12[%c2_413, %c2_414, %c0_415] : memref<18x18x64xf32, #tpu.memory_space<vmem>>, vector<16x16x64xf32>
    %363 = vector.shape_cast %362 : vector<16x16x64xf32> to vector<256x64xf32>
    %364 = arith.truncf %363 : vector<256x64xf32> to vector<256x64xbf16>
    %c3_416 = arith.constant 3 : index
    %c8_417 = arith.constant 8 : index
    %c0_418 = arith.constant 0 : index
    %c0_419 = arith.constant 0 : index
    %365 = vector.load %arg4[%c3_416, %c8_417, %c0_418, %c0_419] : memref<6x9x64x64xbf16, #tpu.memory_space<vmem>>, vector<1x1x64x64xbf16>
    %366 = vector.shape_cast %365 : vector<1x1x64x64xbf16> to vector<64x64xbf16>
    %cst_420 = arith.constant dense<0.000000e+00> : vector<256x64xf32>
    %367 = tpu.matmul %364, %366, %cst_420 {dimension_numbers = #tpu.dot_dimension_numbers<[1], [0], [0], [1], [0, 0, 1, 1], [], []>} : vector<256x64xbf16>, vector<64x64xbf16>, vector<256x64xf32> -> vector<256x64xf32>
    %368 = arith.addf %361, %367 : vector<256x64xf32>
    %369 = vector.broadcast %304 : vector<1x64xf32> to vector<256x64xf32>
    %370 = arith.addf %368, %369 : vector<256x64xf32>
    %c1_421 = arith.constant 1 : index
    %c1_422 = arith.constant 1 : index
    %c0_423 = arith.constant 0 : index
    %371 = vector.load %arg11[%c1_421, %c1_422, %c0_423] : memref<18x18x64xf32, #tpu.memory_space<vmem>>, vector<16x16x64xf32>
    %372 = vector.shape_cast %371 : vector<16x16x64xf32> to vector<256x64xf32>
    %373 = arith.addf %372, %370 : vector<256x64xf32>
    %374 = vector.shape_cast %373 : vector<256x64xf32> to vector<16x16x64xf32>
    %c1_424 = arith.constant 1 : index
    %c1_425 = arith.constant 1 : index
    %c0_426 = arith.constant 0 : index
    %375 = vector.load %arg11[%c1_424, %c1_425, %c0_426] : memref<18x18x64xf32, #tpu.memory_space<vmem>>, vector<16x16x64xf32>
    tpu.vector_store %arg11[%c1_424, %c1_425, %c0_426], %374 {strides = array<i32>} : memref<18x18x64xf32, #tpu.memory_space<vmem>>, vector<16x16x64xf32>,
    %c4_427 = arith.constant 4 : index
    %c0_428 = arith.constant 0 : index
    %376 = vector.load %arg5[%c4_427, %c0_428] : memref<6x64xf32, #tpu.memory_space<vmem>>, vector<1x64xf32>
    %cst_429 = arith.constant 0.000000e+00 : f32
    %377 = vector.broadcast %cst_429 : f32 to vector<256x64xf32>
    %c0_430 = arith.constant 0 : index
    %c0_431 = arith.constant 0 : index
    %c0_432 = arith.constant 0 : index
    %378 = vector.load %arg11[%c0_430, %c0_431, %c0_432] : memref<18x18x64xf32, #tpu.memory_space<vmem>>, vector<16x16x64xf32>
    %379 = vector.shape_cast %378 : vector<16x16x64xf32> to vector<256x64xf32>
    %380 = arith.truncf %379 : vector<256x64xf32> to vector<256x64xbf16>
    %c4_433 = arith.constant 4 : index
    %c0_434 = arith.constant 0 : index
    %c0_435 = arith.constant 0 : index
    %c0_436 = arith.constant 0 : index
    %381 = vector.load %arg4[%c4_433, %c0_434, %c0_435, %c0_436] : memref<6x9x64x64xbf16, #tpu.memory_space<vmem>>, vector<1x1x64x64xbf16>
    %382 = vector.shape_cast %381 : vector<1x1x64x64xbf16> to vector<64x64xbf16>
    %cst_437 = arith.constant dense<0.000000e+00> : vector<256x64xf32>
    %383 = tpu.matmul %380, %382, %cst_437 {dimension_numbers = #tpu.dot_dimension_numbers<[1], [0], [0], [1], [0, 0, 1, 1], [], []>} : vector<256x64xbf16>, vector<64x64xbf16>, vector<256x64xf32> -> vector<256x64xf32>
    %384 = arith.addf %377, %383 : vector<256x64xf32>
    %c0_438 = arith.constant 0 : index
    %c1_439 = arith.constant 1 : index
    %c0_440 = arith.constant 0 : index
    %385 = vector.load %arg11[%c0_438, %c1_439, %c0_440] : memref<18x18x64xf32, #tpu.memory_space<vmem>>, vector<16x16x64xf32>
    %386 = vector.shape_cast %385 : vector<16x16x64xf32> to vector<256x64xf32>
    %387 = arith.truncf %386 : vector<256x64xf32> to vector<256x64xbf16>
    %c4_441 = arith.constant 4 : index
    %c1_442 = arith.constant 1 : index
    %c0_443 = arith.constant 0 : index
    %c0_444 = arith.constant 0 : index
    %388 = vector.load %arg4[%c4_441, %c1_442, %c0_443, %c0_444] : memref<6x9x64x64xbf16, #tpu.memory_space<vmem>>, vector<1x1x64x64xbf16>
    %389 = vector.shape_cast %388 : vector<1x1x64x64xbf16> to vector<64x64xbf16>
    %cst_445 = arith.constant dense<0.000000e+00> : vector<256x64xf32>
    %390 = tpu.matmul %387, %389, %cst_445 {dimension_numbers = #tpu.dot_dimension_numbers<[1], [0], [0], [1], [0, 0, 1, 1], [], []>} : vector<256x64xbf16>, vector<64x64xbf16>, vector<256x64xf32> -> vector<256x64xf32>
    %391 = arith.addf %384, %390 : vector<256x64xf32>
    %c0_446 = arith.constant 0 : index
    %c2_447 = arith.constant 2 : index
    %c0_448 = arith.constant 0 : index
    %392 = vector.load %arg11[%c0_446, %c2_447, %c0_448] : memref<18x18x64xf32, #tpu.memory_space<vmem>>, vector<16x16x64xf32>
    %393 = vector.shape_cast %392 : vector<16x16x64xf32> to vector<256x64xf32>
    %394 = arith.truncf %393 : vector<256x64xf32> to vector<256x64xbf16>
    %c4_449 = arith.constant 4 : index
    %c2_450 = arith.constant 2 : index
    %c0_451 = arith.constant 0 : index
    %c0_452 = arith.constant 0 : index
    %395 = vector.load %arg4[%c4_449, %c2_450, %c0_451, %c0_452] : memref<6x9x64x64xbf16, #tpu.memory_space<vmem>>, vector<1x1x64x64xbf16>
    %396 = vector.shape_cast %395 : vector<1x1x64x64xbf16> to vector<64x64xbf16>
    %cst_453 = arith.constant dense<0.000000e+00> : vector<256x64xf32>
    %397 = tpu.matmul %394, %396, %cst_453 {dimension_numbers = #tpu.dot_dimension_numbers<[1], [0], [0], [1], [0, 0, 1, 1], [], []>} : vector<256x64xbf16>, vector<64x64xbf16>, vector<256x64xf32> -> vector<256x64xf32>
    %398 = arith.addf %391, %397 : vector<256x64xf32>
    %c1_454 = arith.constant 1 : index
    %c0_455 = arith.constant 0 : index
    %c0_456 = arith.constant 0 : index
    %399 = vector.load %arg11[%c1_454, %c0_455, %c0_456] : memref<18x18x64xf32, #tpu.memory_space<vmem>>, vector<16x16x64xf32>
    %400 = vector.shape_cast %399 : vector<16x16x64xf32> to vector<256x64xf32>
    %401 = arith.truncf %400 : vector<256x64xf32> to vector<256x64xbf16>
    %c4_457 = arith.constant 4 : index
    %c3_458 = arith.constant 3 : index
    %c0_459 = arith.constant 0 : index
    %c0_460 = arith.constant 0 : index
    %402 = vector.load %arg4[%c4_457, %c3_458, %c0_459, %c0_460] : memref<6x9x64x64xbf16, #tpu.memory_space<vmem>>, vector<1x1x64x64xbf16>
    %403 = vector.shape_cast %402 : vector<1x1x64x64xbf16> to vector<64x64xbf16>
    %cst_461 = arith.constant dense<0.000000e+00> : vector<256x64xf32>
    %404 = tpu.matmul %401, %403, %cst_461 {dimension_numbers = #tpu.dot_dimension_numbers<[1], [0], [0], [1], [0, 0, 1, 1], [], []>} : vector<256x64xbf16>, vector<64x64xbf16>, vector<256x64xf32> -> vector<256x64xf32>
    %405 = arith.addf %398, %404 : vector<256x64xf32>
    %c1_462 = arith.constant 1 : index
    %c1_463 = arith.constant 1 : index
    %c0_464 = arith.constant 0 : index
    %406 = vector.load %arg11[%c1_462, %c1_463, %c0_464] : memref<18x18x64xf32, #tpu.memory_space<vmem>>, vector<16x16x64xf32>
    %407 = vector.shape_cast %406 : vector<16x16x64xf32> to vector<256x64xf32>
    %408 = arith.truncf %407 : vector<256x64xf32> to vector<256x64xbf16>
    %c4_465 = arith.constant 4 : index
    %c4_466 = arith.constant 4 : index
    %c0_467 = arith.constant 0 : index
    %c0_468 = arith.constant 0 : index
    %409 = vector.load %arg4[%c4_465, %c4_466, %c0_467, %c0_468] : memref<6x9x64x64xbf16, #tpu.memory_space<vmem>>, vector<1x1x64x64xbf16>
    %410 = vector.shape_cast %409 : vector<1x1x64x64xbf16> to vector<64x64xbf16>
    %cst_469 = arith.constant dense<0.000000e+00> : vector<256x64xf32>
    %411 = tpu.matmul %408, %410, %cst_469 {dimension_numbers = #tpu.dot_dimension_numbers<[1], [0], [0], [1], [0, 0, 1, 1], [], []>} : vector<256x64xbf16>, vector<64x64xbf16>, vector<256x64xf32> -> vector<256x64xf32>
    %412 = arith.addf %405, %411 : vector<256x64xf32>
    %c1_470 = arith.constant 1 : index
    %c2_471 = arith.constant 2 : index
    %c0_472 = arith.constant 0 : index
    %413 = vector.load %arg11[%c1_470, %c2_471, %c0_472] : memref<18x18x64xf32, #tpu.memory_space<vmem>>, vector<16x16x64xf32>
    %414 = vector.shape_cast %413 : vector<16x16x64xf32> to vector<256x64xf32>
    %415 = arith.truncf %414 : vector<256x64xf32> to vector<256x64xbf16>
    %c4_473 = arith.constant 4 : index
    %c5_474 = arith.constant 5 : index
    %c0_475 = arith.constant 0 : index
    %c0_476 = arith.constant 0 : index
    %416 = vector.load %arg4[%c4_473, %c5_474, %c0_475, %c0_476] : memref<6x9x64x64xbf16, #tpu.memory_space<vmem>>, vector<1x1x64x64xbf16>
    %417 = vector.shape_cast %416 : vector<1x1x64x64xbf16> to vector<64x64xbf16>
    %cst_477 = arith.constant dense<0.000000e+00> : vector<256x64xf32>
    %418 = tpu.matmul %415, %417, %cst_477 {dimension_numbers = #tpu.dot_dimension_numbers<[1], [0], [0], [1], [0, 0, 1, 1], [], []>} : vector<256x64xbf16>, vector<64x64xbf16>, vector<256x64xf32> -> vector<256x64xf32>
    %419 = arith.addf %412, %418 : vector<256x64xf32>
    %c2_478 = arith.constant 2 : index
    %c0_479 = arith.constant 0 : index
    %c0_480 = arith.constant 0 : index
    %420 = vector.load %arg11[%c2_478, %c0_479, %c0_480] : memref<18x18x64xf32, #tpu.memory_space<vmem>>, vector<16x16x64xf32>
    %421 = vector.shape_cast %420 : vector<16x16x64xf32> to vector<256x64xf32>
    %422 = arith.truncf %421 : vector<256x64xf32> to vector<256x64xbf16>
    %c4_481 = arith.constant 4 : index
    %c6_482 = arith.constant 6 : index
    %c0_483 = arith.constant 0 : index
    %c0_484 = arith.constant 0 : index
    %423 = vector.load %arg4[%c4_481, %c6_482, %c0_483, %c0_484] : memref<6x9x64x64xbf16, #tpu.memory_space<vmem>>, vector<1x1x64x64xbf16>
    %424 = vector.shape_cast %423 : vector<1x1x64x64xbf16> to vector<64x64xbf16>
    %cst_485 = arith.constant dense<0.000000e+00> : vector<256x64xf32>
    %425 = tpu.matmul %422, %424, %cst_485 {dimension_numbers = #tpu.dot_dimension_numbers<[1], [0], [0], [1], [0, 0, 1, 1], [], []>} : vector<256x64xbf16>, vector<64x64xbf16>, vector<256x64xf32> -> vector<256x64xf32>
    %426 = arith.addf %419, %425 : vector<256x64xf32>
    %c2_486 = arith.constant 2 : index
    %c1_487 = arith.constant 1 : index
    %c0_488 = arith.constant 0 : index
    %427 = vector.load %arg11[%c2_486, %c1_487, %c0_488] : memref<18x18x64xf32, #tpu.memory_space<vmem>>, vector<16x16x64xf32>
    %428 = vector.shape_cast %427 : vector<16x16x64xf32> to vector<256x64xf32>
    %429 = arith.truncf %428 : vector<256x64xf32> to vector<256x64xbf16>
    %c4_489 = arith.constant 4 : index
    %c7_490 = arith.constant 7 : index
    %c0_491 = arith.constant 0 : index
    %c0_492 = arith.constant 0 : index
    %430 = vector.load %arg4[%c4_489, %c7_490, %c0_491, %c0_492] : memref<6x9x64x64xbf16, #tpu.memory_space<vmem>>, vector<1x1x64x64xbf16>
    %431 = vector.shape_cast %430 : vector<1x1x64x64xbf16> to vector<64x64xbf16>
    %cst_493 = arith.constant dense<0.000000e+00> : vector<256x64xf32>
    %432 = tpu.matmul %429, %431, %cst_493 {dimension_numbers = #tpu.dot_dimension_numbers<[1], [0], [0], [1], [0, 0, 1, 1], [], []>} : vector<256x64xbf16>, vector<64x64xbf16>, vector<256x64xf32> -> vector<256x64xf32>
    %433 = arith.addf %426, %432 : vector<256x64xf32>
    %c2_494 = arith.constant 2 : index
    %c2_495 = arith.constant 2 : index
    %c0_496 = arith.constant 0 : index
    %434 = vector.load %arg11[%c2_494, %c2_495, %c0_496] : memref<18x18x64xf32, #tpu.memory_space<vmem>>, vector<16x16x64xf32>
    %435 = vector.shape_cast %434 : vector<16x16x64xf32> to vector<256x64xf32>
    %436 = arith.truncf %435 : vector<256x64xf32> to vector<256x64xbf16>
    %c4_497 = arith.constant 4 : index
    %c8_498 = arith.constant 8 : index
    %c0_499 = arith.constant 0 : index
    %c0_500 = arith.constant 0 : index
    %437 = vector.load %arg4[%c4_497, %c8_498, %c0_499, %c0_500] : memref<6x9x64x64xbf16, #tpu.memory_space<vmem>>, vector<1x1x64x64xbf16>
    %438 = vector.shape_cast %437 : vector<1x1x64x64xbf16> to vector<64x64xbf16>
    %cst_501 = arith.constant dense<0.000000e+00> : vector<256x64xf32>
    %439 = tpu.matmul %436, %438, %cst_501 {dimension_numbers = #tpu.dot_dimension_numbers<[1], [0], [0], [1], [0, 0, 1, 1], [], []>} : vector<256x64xbf16>, vector<64x64xbf16>, vector<256x64xf32> -> vector<256x64xf32>
    %440 = arith.addf %433, %439 : vector<256x64xf32>
    %441 = vector.broadcast %376 : vector<1x64xf32> to vector<256x64xf32>
    %442 = arith.addf %440, %441 : vector<256x64xf32>
    %cst_502 = arith.constant 0.000000e+00 : f32
    %443 = vector.broadcast %cst_502 : f32 to vector<256x64xf32>
    %444 = arith.maximumf %442, %443 : vector<256x64xf32>
    %445 = vector.shape_cast %444 : vector<256x64xf32> to vector<16x16x64xf32>
    %c1_503 = arith.constant 1 : index
    %c1_504 = arith.constant 1 : index
    %c0_505 = arith.constant 0 : index
    %446 = vector.load %arg12[%c1_503, %c1_504, %c0_505] : memref<18x18x64xf32, #tpu.memory_space<vmem>>, vector<16x16x64xf32>
    tpu.vector_store %arg12[%c1_503, %c1_504, %c0_505], %445 {strides = array<i32>} : memref<18x18x64xf32, #tpu.memory_space<vmem>>, vector<16x16x64xf32>,
    %c5_506 = arith.constant 5 : index
    %c0_507 = arith.constant 0 : index
    %447 = vector.load %arg5[%c5_506, %c0_507] : memref<6x64xf32, #tpu.memory_space<vmem>>, vector<1x64xf32>
    %cst_508 = arith.constant 0.000000e+00 : f32
    %448 = vector.broadcast %cst_508 : f32 to vector<256x64xf32>
    %c0_509 = arith.constant 0 : index
    %c0_510 = arith.constant 0 : index
    %c0_511 = arith.constant 0 : index
    %449 = vector.load %arg12[%c0_509, %c0_510, %c0_511] : memref<18x18x64xf32, #tpu.memory_space<vmem>>, vector<16x16x64xf32>
    %450 = vector.shape_cast %449 : vector<16x16x64xf32> to vector<256x64xf32>
    %451 = arith.truncf %450 : vector<256x64xf32> to vector<256x64xbf16>
    %c5_512 = arith.constant 5 : index
    %c0_513 = arith.constant 0 : index
    %c0_514 = arith.constant 0 : index
    %c0_515 = arith.constant 0 : index
    %452 = vector.load %arg4[%c5_512, %c0_513, %c0_514, %c0_515] : memref<6x9x64x64xbf16, #tpu.memory_space<vmem>>, vector<1x1x64x64xbf16>
    %453 = vector.shape_cast %452 : vector<1x1x64x64xbf16> to vector<64x64xbf16>
    %cst_516 = arith.constant dense<0.000000e+00> : vector<256x64xf32>
    %454 = tpu.matmul %451, %453, %cst_516 {dimension_numbers = #tpu.dot_dimension_numbers<[1], [0], [0], [1], [0, 0, 1, 1], [], []>} : vector<256x64xbf16>, vector<64x64xbf16>, vector<256x64xf32> -> vector<256x64xf32>
    %455 = arith.addf %448, %454 : vector<256x64xf32>
    %c0_517 = arith.constant 0 : index
    %c1_518 = arith.constant 1 : index
    %c0_519 = arith.constant 0 : index
    %456 = vector.load %arg12[%c0_517, %c1_518, %c0_519] : memref<18x18x64xf32, #tpu.memory_space<vmem>>, vector<16x16x64xf32>
    %457 = vector.shape_cast %456 : vector<16x16x64xf32> to vector<256x64xf32>
    %458 = arith.truncf %457 : vector<256x64xf32> to vector<256x64xbf16>
    %c5_520 = arith.constant 5 : index
    %c1_521 = arith.constant 1 : index
    %c0_522 = arith.constant 0 : index
    %c0_523 = arith.constant 0 : index
    %459 = vector.load %arg4[%c5_520, %c1_521, %c0_522, %c0_523] : memref<6x9x64x64xbf16, #tpu.memory_space<vmem>>, vector<1x1x64x64xbf16>
    %460 = vector.shape_cast %459 : vector<1x1x64x64xbf16> to vector<64x64xbf16>
    %cst_524 = arith.constant dense<0.000000e+00> : vector<256x64xf32>
    %461 = tpu.matmul %458, %460, %cst_524 {dimension_numbers = #tpu.dot_dimension_numbers<[1], [0], [0], [1], [0, 0, 1, 1], [], []>} : vector<256x64xbf16>, vector<64x64xbf16>, vector<256x64xf32> -> vector<256x64xf32>
    %462 = arith.addf %455, %461 : vector<256x64xf32>
    %c0_525 = arith.constant 0 : index
    %c2_526 = arith.constant 2 : index
    %c0_527 = arith.constant 0 : index
    %463 = vector.load %arg12[%c0_525, %c2_526, %c0_527] : memref<18x18x64xf32, #tpu.memory_space<vmem>>, vector<16x16x64xf32>
    %464 = vector.shape_cast %463 : vector<16x16x64xf32> to vector<256x64xf32>
    %465 = arith.truncf %464 : vector<256x64xf32> to vector<256x64xbf16>
    %c5_528 = arith.constant 5 : index
    %c2_529 = arith.constant 2 : index
    %c0_530 = arith.constant 0 : index
    %c0_531 = arith.constant 0 : index
    %466 = vector.load %arg4[%c5_528, %c2_529, %c0_530, %c0_531] : memref<6x9x64x64xbf16, #tpu.memory_space<vmem>>, vector<1x1x64x64xbf16>
    %467 = vector.shape_cast %466 : vector<1x1x64x64xbf16> to vector<64x64xbf16>
    %cst_532 = arith.constant dense<0.000000e+00> : vector<256x64xf32>
    %468 = tpu.matmul %465, %467, %cst_532 {dimension_numbers = #tpu.dot_dimension_numbers<[1], [0], [0], [1], [0, 0, 1, 1], [], []>} : vector<256x64xbf16>, vector<64x64xbf16>, vector<256x64xf32> -> vector<256x64xf32>
    %469 = arith.addf %462, %468 : vector<256x64xf32>
    %c1_533 = arith.constant 1 : index
    %c0_534 = arith.constant 0 : index
    %c0_535 = arith.constant 0 : index
    %470 = vector.load %arg12[%c1_533, %c0_534, %c0_535] : memref<18x18x64xf32, #tpu.memory_space<vmem>>, vector<16x16x64xf32>
    %471 = vector.shape_cast %470 : vector<16x16x64xf32> to vector<256x64xf32>
    %472 = arith.truncf %471 : vector<256x64xf32> to vector<256x64xbf16>
    %c5_536 = arith.constant 5 : index
    %c3_537 = arith.constant 3 : index
    %c0_538 = arith.constant 0 : index
    %c0_539 = arith.constant 0 : index
    %473 = vector.load %arg4[%c5_536, %c3_537, %c0_538, %c0_539] : memref<6x9x64x64xbf16, #tpu.memory_space<vmem>>, vector<1x1x64x64xbf16>
    %474 = vector.shape_cast %473 : vector<1x1x64x64xbf16> to vector<64x64xbf16>
    %cst_540 = arith.constant dense<0.000000e+00> : vector<256x64xf32>
    %475 = tpu.matmul %472, %474, %cst_540 {dimension_numbers = #tpu.dot_dimension_numbers<[1], [0], [0], [1], [0, 0, 1, 1], [], []>} : vector<256x64xbf16>, vector<64x64xbf16>, vector<256x64xf32> -> vector<256x64xf32>
    %476 = arith.addf %469, %475 : vector<256x64xf32>
    %c1_541 = arith.constant 1 : index
    %c1_542 = arith.constant 1 : index
    %c0_543 = arith.constant 0 : index
    %477 = vector.load %arg12[%c1_541, %c1_542, %c0_543] : memref<18x18x64xf32, #tpu.memory_space<vmem>>, vector<16x16x64xf32>
    %478 = vector.shape_cast %477 : vector<16x16x64xf32> to vector<256x64xf32>
    %479 = arith.truncf %478 : vector<256x64xf32> to vector<256x64xbf16>
    %c5_544 = arith.constant 5 : index
    %c4_545 = arith.constant 4 : index
    %c0_546 = arith.constant 0 : index
    %c0_547 = arith.constant 0 : index
    %480 = vector.load %arg4[%c5_544, %c4_545, %c0_546, %c0_547] : memref<6x9x64x64xbf16, #tpu.memory_space<vmem>>, vector<1x1x64x64xbf16>
    %481 = vector.shape_cast %480 : vector<1x1x64x64xbf16> to vector<64x64xbf16>
    %cst_548 = arith.constant dense<0.000000e+00> : vector<256x64xf32>
    %482 = tpu.matmul %479, %481, %cst_548 {dimension_numbers = #tpu.dot_dimension_numbers<[1], [0], [0], [1], [0, 0, 1, 1], [], []>} : vector<256x64xbf16>, vector<64x64xbf16>, vector<256x64xf32> -> vector<256x64xf32>
    %483 = arith.addf %476, %482 : vector<256x64xf32>
    %c1_549 = arith.constant 1 : index
    %c2_550 = arith.constant 2 : index
    %c0_551 = arith.constant 0 : index
    %484 = vector.load %arg12[%c1_549, %c2_550, %c0_551] : memref<18x18x64xf32, #tpu.memory_space<vmem>>, vector<16x16x64xf32>
    %485 = vector.shape_cast %484 : vector<16x16x64xf32> to vector<256x64xf32>
    %486 = arith.truncf %485 : vector<256x64xf32> to vector<256x64xbf16>
    %c5_552 = arith.constant 5 : index
    %c5_553 = arith.constant 5 : index
    %c0_554 = arith.constant 0 : index
    %c0_555 = arith.constant 0 : index
    %487 = vector.load %arg4[%c5_552, %c5_553, %c0_554, %c0_555] : memref<6x9x64x64xbf16, #tpu.memory_space<vmem>>, vector<1x1x64x64xbf16>
    %488 = vector.shape_cast %487 : vector<1x1x64x64xbf16> to vector<64x64xbf16>
    %cst_556 = arith.constant dense<0.000000e+00> : vector<256x64xf32>
    %489 = tpu.matmul %486, %488, %cst_556 {dimension_numbers = #tpu.dot_dimension_numbers<[1], [0], [0], [1], [0, 0, 1, 1], [], []>} : vector<256x64xbf16>, vector<64x64xbf16>, vector<256x64xf32> -> vector<256x64xf32>
    %490 = arith.addf %483, %489 : vector<256x64xf32>
    %c2_557 = arith.constant 2 : index
    %c0_558 = arith.constant 0 : index
    %c0_559 = arith.constant 0 : index
    %491 = vector.load %arg12[%c2_557, %c0_558, %c0_559] : memref<18x18x64xf32, #tpu.memory_space<vmem>>, vector<16x16x64xf32>
    %492 = vector.shape_cast %491 : vector<16x16x64xf32> to vector<256x64xf32>
    %493 = arith.truncf %492 : vector<256x64xf32> to vector<256x64xbf16>
    %c5_560 = arith.constant 5 : index
    %c6_561 = arith.constant 6 : index
    %c0_562 = arith.constant 0 : index
    %c0_563 = arith.constant 0 : index
    %494 = vector.load %arg4[%c5_560, %c6_561, %c0_562, %c0_563] : memref<6x9x64x64xbf16, #tpu.memory_space<vmem>>, vector<1x1x64x64xbf16>
    %495 = vector.shape_cast %494 : vector<1x1x64x64xbf16> to vector<64x64xbf16>
    %cst_564 = arith.constant dense<0.000000e+00> : vector<256x64xf32>
    %496 = tpu.matmul %493, %495, %cst_564 {dimension_numbers = #tpu.dot_dimension_numbers<[1], [0], [0], [1], [0, 0, 1, 1], [], []>} : vector<256x64xbf16>, vector<64x64xbf16>, vector<256x64xf32> -> vector<256x64xf32>
    %497 = arith.addf %490, %496 : vector<256x64xf32>
    %c2_565 = arith.constant 2 : index
    %c1_566 = arith.constant 1 : index
    %c0_567 = arith.constant 0 : index
    %498 = vector.load %arg12[%c2_565, %c1_566, %c0_567] : memref<18x18x64xf32, #tpu.memory_space<vmem>>, vector<16x16x64xf32>
    %499 = vector.shape_cast %498 : vector<16x16x64xf32> to vector<256x64xf32>
    %500 = arith.truncf %499 : vector<256x64xf32> to vector<256x64xbf16>
    %c5_568 = arith.constant 5 : index
    %c7_569 = arith.constant 7 : index
    %c0_570 = arith.constant 0 : index
    %c0_571 = arith.constant 0 : index
    %501 = vector.load %arg4[%c5_568, %c7_569, %c0_570, %c0_571] : memref<6x9x64x64xbf16, #tpu.memory_space<vmem>>, vector<1x1x64x64xbf16>
    %502 = vector.shape_cast %501 : vector<1x1x64x64xbf16> to vector<64x64xbf16>
    %cst_572 = arith.constant dense<0.000000e+00> : vector<256x64xf32>
    %503 = tpu.matmul %500, %502, %cst_572 {dimension_numbers = #tpu.dot_dimension_numbers<[1], [0], [0], [1], [0, 0, 1, 1], [], []>} : vector<256x64xbf16>, vector<64x64xbf16>, vector<256x64xf32> -> vector<256x64xf32>
    %504 = arith.addf %497, %503 : vector<256x64xf32>
    %c2_573 = arith.constant 2 : index
    %c2_574 = arith.constant 2 : index
    %c0_575 = arith.constant 0 : index
    %505 = vector.load %arg12[%c2_573, %c2_574, %c0_575] : memref<18x18x64xf32, #tpu.memory_space<vmem>>, vector<16x16x64xf32>
    %506 = vector.shape_cast %505 : vector<16x16x64xf32> to vector<256x64xf32>
    %507 = arith.truncf %506 : vector<256x64xf32> to vector<256x64xbf16>
    %c5_576 = arith.constant 5 : index
    %c8_577 = arith.constant 8 : index
    %c0_578 = arith.constant 0 : index
    %c0_579 = arith.constant 0 : index
    %508 = vector.load %arg4[%c5_576, %c8_577, %c0_578, %c0_579] : memref<6x9x64x64xbf16, #tpu.memory_space<vmem>>, vector<1x1x64x64xbf16>
    %509 = vector.shape_cast %508 : vector<1x1x64x64xbf16> to vector<64x64xbf16>
    %cst_580 = arith.constant dense<0.000000e+00> : vector<256x64xf32>
    %510 = tpu.matmul %507, %509, %cst_580 {dimension_numbers = #tpu.dot_dimension_numbers<[1], [0], [0], [1], [0, 0, 1, 1], [], []>} : vector<256x64xbf16>, vector<64x64xbf16>, vector<256x64xf32> -> vector<256x64xf32>
    %511 = arith.addf %504, %510 : vector<256x64xf32>
    %512 = vector.broadcast %447 : vector<1x64xf32> to vector<256x64xf32>
    %513 = arith.addf %511, %512 : vector<256x64xf32>
    %c1_581 = arith.constant 1 : index
    %c1_582 = arith.constant 1 : index
    %c0_583 = arith.constant 0 : index
    %514 = vector.load %arg11[%c1_581, %c1_582, %c0_583] : memref<18x18x64xf32, #tpu.memory_space<vmem>>, vector<16x16x64xf32>
    %515 = vector.shape_cast %514 : vector<16x16x64xf32> to vector<256x64xf32>
    %516 = arith.addf %515, %513 : vector<256x64xf32>
    %517 = vector.shape_cast %516 : vector<256x64xf32> to vector<16x16x64xf32>
    %c1_584 = arith.constant 1 : index
    %c1_585 = arith.constant 1 : index
    %c0_586 = arith.constant 0 : index
    %518 = vector.load %arg11[%c1_584, %c1_585, %c0_586] : memref<18x18x64xf32, #tpu.memory_space<vmem>>, vector<16x16x64xf32>
    tpu.vector_store %arg11[%c1_584, %c1_585, %c0_586], %517 {strides = array<i32>} : memref<18x18x64xf32, #tpu.memory_space<vmem>>, vector<16x16x64xf32>,
    %c0_587 = arith.constant 0 : index
    %c0_588 = arith.constant 0 : index
    %519 = vector.load %arg7[%c0_587, %c0_588] : memref<1x8xf32, #tpu.memory_space<vmem>>, vector<1x8xf32>
    %cst_589 = arith.constant 0.000000e+00 : f32
    %520 = vector.broadcast %cst_589 : f32 to vector<256x8xf32>
    %c0_590 = arith.constant 0 : index
    %c0_591 = arith.constant 0 : index
    %c0_592 = arith.constant 0 : index
    %521 = vector.load %arg11[%c0_590, %c0_591, %c0_592] : memref<18x18x64xf32, #tpu.memory_space<vmem>>, vector<16x16x64xf32>
    %522 = vector.shape_cast %521 : vector<16x16x64xf32> to vector<256x64xf32>
    %523 = arith.truncf %522 : vector<256x64xf32> to vector<256x64xbf16>
    %c0_593 = arith.constant 0 : index
    %c0_594 = arith.constant 0 : index
    %c0_595 = arith.constant 0 : index
    %524 = vector.load %arg6[%c0_593, %c0_594, %c0_595] : memref<9x64x8xbf16, #tpu.memory_space<vmem>>, vector<1x64x8xbf16>
    %525 = vector.shape_cast %524 : vector<1x64x8xbf16> to vector<64x8xbf16>
    %cst_596 = arith.constant dense<0.000000e+00> : vector<256x8xf32>
    %526 = tpu.matmul %523, %525, %cst_596 {dimension_numbers = #tpu.dot_dimension_numbers<[1], [0], [0], [1], [0, 0, 1, 1], [], []>} : vector<256x64xbf16>, vector<64x8xbf16>, vector<256x8xf32> -> vector<256x8xf32>
    %527 = arith.addf %520, %526 : vector<256x8xf32>
    %c0_597 = arith.constant 0 : index
    %c1_598 = arith.constant 1 : index
    %c0_599 = arith.constant 0 : index
    %528 = vector.load %arg11[%c0_597, %c1_598, %c0_599] : memref<18x18x64xf32, #tpu.memory_space<vmem>>, vector<16x16x64xf32>
    %529 = vector.shape_cast %528 : vector<16x16x64xf32> to vector<256x64xf32>
    %530 = arith.truncf %529 : vector<256x64xf32> to vector<256x64xbf16>
    %c1_600 = arith.constant 1 : index
    %c0_601 = arith.constant 0 : index
    %c0_602 = arith.constant 0 : index
    %531 = vector.load %arg6[%c1_600, %c0_601, %c0_602] : memref<9x64x8xbf16, #tpu.memory_space<vmem>>, vector<1x64x8xbf16>
    %532 = vector.shape_cast %531 : vector<1x64x8xbf16> to vector<64x8xbf16>
    %cst_603 = arith.constant dense<0.000000e+00> : vector<256x8xf32>
    %533 = tpu.matmul %530, %532, %cst_603 {dimension_numbers = #tpu.dot_dimension_numbers<[1], [0], [0], [1], [0, 0, 1, 1], [], []>} : vector<256x64xbf16>, vector<64x8xbf16>, vector<256x8xf32> -> vector<256x8xf32>
    %534 = arith.addf %527, %533 : vector<256x8xf32>
    %c0_604 = arith.constant 0 : index
    %c2_605 = arith.constant 2 : index
    %c0_606 = arith.constant 0 : index
    %535 = vector.load %arg11[%c0_604, %c2_605, %c0_606] : memref<18x18x64xf32, #tpu.memory_space<vmem>>, vector<16x16x64xf32>
    %536 = vector.shape_cast %535 : vector<16x16x64xf32> to vector<256x64xf32>
    %537 = arith.truncf %536 : vector<256x64xf32> to vector<256x64xbf16>
    %c2_607 = arith.constant 2 : index
    %c0_608 = arith.constant 0 : index
    %c0_609 = arith.constant 0 : index
    %538 = vector.load %arg6[%c2_607, %c0_608, %c0_609] : memref<9x64x8xbf16, #tpu.memory_space<vmem>>, vector<1x64x8xbf16>
    %539 = vector.shape_cast %538 : vector<1x64x8xbf16> to vector<64x8xbf16>
    %cst_610 = arith.constant dense<0.000000e+00> : vector<256x8xf32>
    %540 = tpu.matmul %537, %539, %cst_610 {dimension_numbers = #tpu.dot_dimension_numbers<[1], [0], [0], [1], [0, 0, 1, 1], [], []>} : vector<256x64xbf16>, vector<64x8xbf16>, vector<256x8xf32> -> vector<256x8xf32>
    %541 = arith.addf %534, %540 : vector<256x8xf32>
    %c1_611 = arith.constant 1 : index
    %c0_612 = arith.constant 0 : index
    %c0_613 = arith.constant 0 : index
    %542 = vector.load %arg11[%c1_611, %c0_612, %c0_613] : memref<18x18x64xf32, #tpu.memory_space<vmem>>, vector<16x16x64xf32>
    %543 = vector.shape_cast %542 : vector<16x16x64xf32> to vector<256x64xf32>
    %544 = arith.truncf %543 : vector<256x64xf32> to vector<256x64xbf16>
    %c3_614 = arith.constant 3 : index
    %c0_615 = arith.constant 0 : index
    %c0_616 = arith.constant 0 : index
    %545 = vector.load %arg6[%c3_614, %c0_615, %c0_616] : memref<9x64x8xbf16, #tpu.memory_space<vmem>>, vector<1x64x8xbf16>
    %546 = vector.shape_cast %545 : vector<1x64x8xbf16> to vector<64x8xbf16>
    %cst_617 = arith.constant dense<0.000000e+00> : vector<256x8xf32>
    %547 = tpu.matmul %544, %546, %cst_617 {dimension_numbers = #tpu.dot_dimension_numbers<[1], [0], [0], [1], [0, 0, 1, 1], [], []>} : vector<256x64xbf16>, vector<64x8xbf16>, vector<256x8xf32> -> vector<256x8xf32>
    %548 = arith.addf %541, %547 : vector<256x8xf32>
    %c1_618 = arith.constant 1 : index
    %c1_619 = arith.constant 1 : index
    %c0_620 = arith.constant 0 : index
    %549 = vector.load %arg11[%c1_618, %c1_619, %c0_620] : memref<18x18x64xf32, #tpu.memory_space<vmem>>, vector<16x16x64xf32>
    %550 = vector.shape_cast %549 : vector<16x16x64xf32> to vector<256x64xf32>
    %551 = arith.truncf %550 : vector<256x64xf32> to vector<256x64xbf16>
    %c4_621 = arith.constant 4 : index
    %c0_622 = arith.constant 0 : index
    %c0_623 = arith.constant 0 : index
    %552 = vector.load %arg6[%c4_621, %c0_622, %c0_623] : memref<9x64x8xbf16, #tpu.memory_space<vmem>>, vector<1x64x8xbf16>
    %553 = vector.shape_cast %552 : vector<1x64x8xbf16> to vector<64x8xbf16>
    %cst_624 = arith.constant dense<0.000000e+00> : vector<256x8xf32>
    %554 = tpu.matmul %551, %553, %cst_624 {dimension_numbers = #tpu.dot_dimension_numbers<[1], [0], [0], [1], [0, 0, 1, 1], [], []>} : vector<256x64xbf16>, vector<64x8xbf16>, vector<256x8xf32> -> vector<256x8xf32>
    %555 = arith.addf %548, %554 : vector<256x8xf32>
    %c1_625 = arith.constant 1 : index
    %c2_626 = arith.constant 2 : index
    %c0_627 = arith.constant 0 : index
    %556 = vector.load %arg11[%c1_625, %c2_626, %c0_627] : memref<18x18x64xf32, #tpu.memory_space<vmem>>, vector<16x16x64xf32>
    %557 = vector.shape_cast %556 : vector<16x16x64xf32> to vector<256x64xf32>
    %558 = arith.truncf %557 : vector<256x64xf32> to vector<256x64xbf16>
    %c5_628 = arith.constant 5 : index
    %c0_629 = arith.constant 0 : index
    %c0_630 = arith.constant 0 : index
    %559 = vector.load %arg6[%c5_628, %c0_629, %c0_630] : memref<9x64x8xbf16, #tpu.memory_space<vmem>>, vector<1x64x8xbf16>
    %560 = vector.shape_cast %559 : vector<1x64x8xbf16> to vector<64x8xbf16>
    %cst_631 = arith.constant dense<0.000000e+00> : vector<256x8xf32>
    %561 = tpu.matmul %558, %560, %cst_631 {dimension_numbers = #tpu.dot_dimension_numbers<[1], [0], [0], [1], [0, 0, 1, 1], [], []>} : vector<256x64xbf16>, vector<64x8xbf16>, vector<256x8xf32> -> vector<256x8xf32>
    %562 = arith.addf %555, %561 : vector<256x8xf32>
    %c2_632 = arith.constant 2 : index
    %c0_633 = arith.constant 0 : index
    %c0_634 = arith.constant 0 : index
    %563 = vector.load %arg11[%c2_632, %c0_633, %c0_634] : memref<18x18x64xf32, #tpu.memory_space<vmem>>, vector<16x16x64xf32>
    %564 = vector.shape_cast %563 : vector<16x16x64xf32> to vector<256x64xf32>
    %565 = arith.truncf %564 : vector<256x64xf32> to vector<256x64xbf16>
    %c6_635 = arith.constant 6 : index
    %c0_636 = arith.constant 0 : index
    %c0_637 = arith.constant 0 : index
    %566 = vector.load %arg6[%c6_635, %c0_636, %c0_637] : memref<9x64x8xbf16, #tpu.memory_space<vmem>>, vector<1x64x8xbf16>
    %567 = vector.shape_cast %566 : vector<1x64x8xbf16> to vector<64x8xbf16>
    %cst_638 = arith.constant dense<0.000000e+00> : vector<256x8xf32>
    %568 = tpu.matmul %565, %567, %cst_638 {dimension_numbers = #tpu.dot_dimension_numbers<[1], [0], [0], [1], [0, 0, 1, 1], [], []>} : vector<256x64xbf16>, vector<64x8xbf16>, vector<256x8xf32> -> vector<256x8xf32>
    %569 = arith.addf %562, %568 : vector<256x8xf32>
    %c2_639 = arith.constant 2 : index
    %c1_640 = arith.constant 1 : index
    %c0_641 = arith.constant 0 : index
    %570 = vector.load %arg11[%c2_639, %c1_640, %c0_641] : memref<18x18x64xf32, #tpu.memory_space<vmem>>, vector<16x16x64xf32>
    %571 = vector.shape_cast %570 : vector<16x16x64xf32> to vector<256x64xf32>
    %572 = arith.truncf %571 : vector<256x64xf32> to vector<256x64xbf16>
    %c7_642 = arith.constant 7 : index
    %c0_643 = arith.constant 0 : index
    %c0_644 = arith.constant 0 : index
    %573 = vector.load %arg6[%c7_642, %c0_643, %c0_644] : memref<9x64x8xbf16, #tpu.memory_space<vmem>>, vector<1x64x8xbf16>
    %574 = vector.shape_cast %573 : vector<1x64x8xbf16> to vector<64x8xbf16>
    %cst_645 = arith.constant dense<0.000000e+00> : vector<256x8xf32>
    %575 = tpu.matmul %572, %574, %cst_645 {dimension_numbers = #tpu.dot_dimension_numbers<[1], [0], [0], [1], [0, 0, 1, 1], [], []>} : vector<256x64xbf16>, vector<64x8xbf16>, vector<256x8xf32> -> vector<256x8xf32>
    %576 = arith.addf %569, %575 : vector<256x8xf32>
    %c2_646 = arith.constant 2 : index
    %c2_647 = arith.constant 2 : index
    %c0_648 = arith.constant 0 : index
    %577 = vector.load %arg11[%c2_646, %c2_647, %c0_648] : memref<18x18x64xf32, #tpu.memory_space<vmem>>, vector<16x16x64xf32>
    %578 = vector.shape_cast %577 : vector<16x16x64xf32> to vector<256x64xf32>
    %579 = arith.truncf %578 : vector<256x64xf32> to vector<256x64xbf16>
    %c8_649 = arith.constant 8 : index
    %c0_650 = arith.constant 0 : index
    %c0_651 = arith.constant 0 : index
    %580 = vector.load %arg6[%c8_649, %c0_650, %c0_651] : memref<9x64x8xbf16, #tpu.memory_space<vmem>>, vector<1x64x8xbf16>
    %581 = vector.shape_cast %580 : vector<1x64x8xbf16> to vector<64x8xbf16>
    %cst_652 = arith.constant dense<0.000000e+00> : vector<256x8xf32>
    %582 = tpu.matmul %579, %581, %cst_652 {dimension_numbers = #tpu.dot_dimension_numbers<[1], [0], [0], [1], [0, 0, 1, 1], [], []>} : vector<256x64xbf16>, vector<64x8xbf16>, vector<256x8xf32> -> vector<256x8xf32>
    %583 = arith.addf %576, %582 : vector<256x8xf32>
    %584 = vector.broadcast %519 : vector<1x8xf32> to vector<256x8xf32>
    %585 = arith.addf %583, %584 : vector<256x8xf32>
    %586 = vector.extract_strided_slice %585 {offsets = [0, 0], sizes = [256, 1], strides = [1, 1]} : vector<256x8xf32> to vector<256x1xf32>
    %cst_653 = arith.constant dense<0xFF800000> : vector<256xf32>
    %587 = vector.multi_reduction <maximumf>, %586, %cst_653 [1] : vector<256x1xf32> to vector<256xf32>
    %588 = vector.shape_cast %587 : vector<256xf32> to vector<256x1xf32>
    %589 = arith.subf %586, %588 : vector<256x1xf32>
    %590 = math.exp %589 : vector<256x1xf32>
    %cst_654 = arith.constant dense<0.000000e+00> : vector<256xf32>
    %591 = vector.multi_reduction <add>, %590, %cst_654 [1] : vector<256x1xf32> to vector<256xf32>
    %592 = vector.shape_cast %591 : vector<256xf32> to vector<256x1xf32>
    %593 = arith.divf %590, %592 : vector<256x1xf32>
    %c0_655 = arith.constant 0 : index
    %c0_656 = arith.constant 0 : index
    %c0_657 = arith.constant 0 : index
    %594 = vector.load %arg9[%c0_655, %c0_656, %c0_657] : memref<1x256x1xf32, #tpu.memory_space<vmem>>, vector<1x256x1xf32>
    %595 = vector.shape_cast %594 : vector<1x256x1xf32> to vector<256x1xf32>
    %596 = vector.shape_cast %586 : vector<256x1xf32> to vector<1x256x1xf32>
    tpu.vector_store %arg9[%c0_655, %c0_656, %c0_657], %596 {strides = array<i32>} : memref<1x256x1xf32, #tpu.memory_space<vmem>>, vector<1x256x1xf32>,
    %c0_658 = arith.constant 0 : index
    %c0_659 = arith.constant 0 : index
    %c0_660 = arith.constant 0 : index
    %597 = vector.load %arg8[%c0_658, %c0_659, %c0_660] : memref<1x256x1xf32, #tpu.memory_space<vmem>>, vector<1x256x1xf32>
    %598 = vector.shape_cast %597 : vector<1x256x1xf32> to vector<256x1xf32>
    %599 = vector.shape_cast %593 : vector<256x1xf32> to vector<1x256x1xf32>
    tpu.vector_store %arg8[%c0_658, %c0_659, %c0_660], %599 {strides = array<i32>} : memref<1x256x1xf32, #tpu.memory_space<vmem>>, vector<1x256x1xf32>,
    return
  }
  func.func @transform_0(%arg0: i32) -> (i32, i32, i32, i32) {
    %c0_i32 = arith.constant 0 : i32
    %c0_i32_0 = arith.constant 0 : i32
    %c0_i32_1 = arith.constant 0 : i32
    %c0_i32_2 = arith.constant 0 : i32
    return %arg0, %c0_i32, %c0_i32_0, %c0_i32_1 : i32, i32, i32, i32
  }
  func.func @transform_1(%arg0: i32) -> (i32, i32, i32) {
    %c0_i32 = arith.constant 0 : i32
    %c0_i32_0 = arith.constant 0 : i32
    %c0_i32_1 = arith.constant 0 : i32
    %c0_i32_2 = arith.constant 0 : i32
    return %c0_i32, %c0_i32_0, %c0_i32_1 : i32, i32, i32
  }
  func.func @transform_2(%arg0: i32) -> (i32, i32) {
    %c0_i32 = arith.constant 0 : i32
    %c0_i32_0 = arith.constant 0 : i32
    %c0_i32_1 = arith.constant 0 : i32
    return %c0_i32, %c0_i32_0 : i32, i32
  }
  func.func @transform_3(%arg0: i32) -> (i32, i32, i32, i32) {
    %c0_i32 = arith.constant 0 : i32
    %c0_i32_0 = arith.constant 0 : i32
    %c0_i32_1 = arith.constant 0 : i32
    %c0_i32_2 = arith.constant 0 : i32
    %c0_i32_3 = arith.constant 0 : i32
    return %c0_i32, %c0_i32_0, %c0_i32_1, %c0_i32_2 : i32, i32, i32, i32
  }
  func.func @transform_4(%arg0: i32) -> (i32, i32) {
    %c0_i32 = arith.constant 0 : i32
    %c0_i32_0 = arith.constant 0 : i32
    %c0_i32_1 = arith.constant 0 : i32
    return %c0_i32, %c0_i32_0 : i32, i32
  }
  func.func @transform_5(%arg0: i32) -> (i32, i32, i32) {
    %c0_i32 = arith.constant 0 : i32
    %c0_i32_0 = arith.constant 0 : i32
    %c0_i32_1 = arith.constant 0 : i32
    %c0_i32_2 = arith.constant 0 : i32
    return %c0_i32, %c0_i32_0, %c0_i32_1 : i32, i32, i32
  }
  func.func @transform_6(%arg0: i32) -> (i32, i32) {
    %c0_i32 = arith.constant 0 : i32
    %c0_i32_0 = arith.constant 0 : i32
    %c0_i32_1 = arith.constant 0 : i32
    return %c0_i32, %c0_i32_0 : i32, i32
  }
  func.func @transform_7(%arg0: i32) -> (i32, i32, i32) {
    %c0_i32 = arith.constant 0 : i32
    %c0_i32_0 = arith.constant 0 : i32
    %c0_i32_1 = arith.constant 0 : i32
    return %arg0, %c0_i32, %c0_i32_0 : i32, i32, i32
  }
  func.func @transform_8(%arg0: i32) -> (i32, i32, i32) {
    %c0_i32 = arith.constant 0 : i32
    %c0_i32_0 = arith.constant 0 : i32
    %c0_i32_1 = arith.constant 0 : i32
    return %arg0, %c0_i32, %c0_i32_0 : i32, i32, i32
  }
}

</mosaic_0001>

<bundles_post_ra>
// kernel: kernel_map_forward.1
= control target key start
LH: loop header
LB: loop body
LE: loop exit
PB: predicated region body
PF: predicated region fallthrough
CT: control target
= control target key end

     0   :  { %s32763_s27 = smov 0   ;;  %s37578_s0 = inlined_call_operand.vmem [shape: f32[2,16,16,8], index: 0, kind: input, shape index: {}]   ;;  %s37579_s1 = inlined_call_operand.vmem [shape: bf16[9,8,64], index: 1, kind: input, shape index: {}]   ;;  %s37580_s2 = inlined_call_operand.vmem [shape: f32[1,64], index: 2, kind: input, shape index: {}]   ;;  %s37581_s3 = inlined_call_operand.vmem [shape: bf16[6,9,64,64], index: 3, kind: input, shape index: {}]   ;;  %s37582_s4 = inlined_call_operand.vmem [shape: f32[6,64], index: 4, kind: input, shape index: {}]   ;;  %s37583_s5 = inlined_call_operand.vmem [shape: bf16[9,64,8], index: 5, kind: input, shape index: {}]   ;;  %s37584_s6 = inlined_call_operand.vmem [shape: f32[1,8], index: 6, kind: input, shape index: {}]   ;;  %s37585_s7 = inlined_call_operand.vmem [shape: f32[2,256,1], index: 7, kind: output, shape index: {0}]   ;;  %s37586_s8 = inlined_call_operand.vmem [shape: f32[2,256,1], index: 8, kind: output, shape index: {1}]  }
   0x1 LB: > { %s24100_s28 = sadd.s32 4294967295, %s32715_s27   ;;  %p24104_p0 = scmp.ge.s32.totalorder %s32715_s27, 1  ;;  %s32715_s27 = sphi %s32763_s27, %s19_s27  }
   0x2   : > { %p265_p1 = scmp.lt.s32.totalorder %s32715_s27, 3 }
   0x4   : > { %p266_p2 = pnand %p24104_p0, %p265_p1 }
   0x5   : > { %v24111_v0 = vld [vmem:[%s37579_s1 + $0x4] sm:$0xf] (!%p266_p2)  ;;  %vm668_vm0 = vcmask (!%p266_p2), 1043456   ;;  %vm320_vm1 = vcmask (!%p266_p2), 64512   ;;  %vm323_vm2 = vcmask (!%p266_p2), 58368   ;;  %v32717_v2 = vmov (!%p266_p2), 0.0  }
   0x6   : > { %269 = sbr.rel (%p266_p2) target bundleno = 6039 (0x1797), region = 48  ;;  %32311 = vmatprep.subr.msk.bf16.mxu0 (!%p266_p2), %vm668_vm0, %v24111_v0  ;;  %v670_v1 = vsel (!%p266_p2), %vm668_vm0, %v24111_v0, 0  ;;  %321 = vst.msk [vmem:[#allocation2] sm:$0xff] (!%p266_p2), %vm320_vm1, %v32717_v2  ;;  %322 = vst.msk [vmem:[#allocation2 + $0x8] sm:$0xff] (!%p266_p2), %vm320_vm1, %v32717_v2  ;;  %vm329_vm3 = vcmask (!%p266_p2), 57344   ;;  %p32793_p3 = scmp.lt.s32.totalorder (!%p266_p2), %s24100_s28, 1 }
   0x7   : > { %324 = vst.msk [vmem:[#allocation2 + $0x10] sm:$0x3] (!%p266_p2), %vm323_vm2, %v32717_v2  ;;  %328 = vst.msk [vmem:[#allocation2 + $0x1a8] sm:$0x3] (!%p266_p2), %vm323_vm2, %v32717_v2  ;;  %v32789_v3 = vld [vmem:[%s37579_s1] sm:$0xf] (!%p266_p2)  ;;  %27438 = vmatpush3.bf16.msra.mxu0 (!%p266_p2), %v670_v1 }
   0x8   : > { %326 = vst.msk [vmem:[#allocation2 + $0x198] sm:$0xff] (!%p266_p2), %vm320_vm1, %v32717_v2  ;;  %327 = vst.msk [vmem:[#allocation2 + $0x1a0] sm:$0xff] (!%p266_p2), %vm320_vm1, %v32717_v2  ;;  %32312 = vmatprep.subr.msk.bf16.mxu0 (!%p266_p2), %vm668_vm0, %v32789_v3  ;;  %v882_v33 = vsel (!%p266_p2), %vm668_vm0, %v32789_v3, 0  ;;  %v32941_v38 = vld [vmem:[%s37579_s1 + $0x8] sm:$0xf] (!%p266_p2)  ;;  %vm366_vm4 = vcmask (!%p266_p2), 523264  }
   0x9   : > { %330 = vst.msk [vmem:[#allocation2] sm:$0x1] (!%p266_p2), %vm329_vm3, %v32717_v2  ;;  %348 = vst.msk [vmem:[#allocation2 + $0x11] sm:$0x1] (!%p266_p2), %vm329_vm3, %v32717_v2  ;;  %vm375_vm5 = vcmask (!%p266_p2), 516096   ;;  %vm369_vm6 = vcmask (!%p266_p2), 517120  }
   0xa   : > { %365 = vst.msk [vmem:[#allocation2 + $0x1a9] sm:$0x1] (!%p266_p2), %vm329_vm3, %v32717_v2  ;;  %331 = vst.msk [vmem:[#allocation2 + $0x18] sm:$0x1] (!%p266_p2), %vm329_vm3, %v32717_v2  ;;  %vm23947_vm7 = vcmask (!%p266_p2), 7168  }
   0xb   : > { %332 = vst.msk [vmem:[#allocation2 + $0x30] sm:$0x1] (!%p266_p2), %vm329_vm3, %v32717_v2  ;;  %333 = vst.msk [vmem:[#allocation2 + $0x48] sm:$0x1] (!%p266_p2), %vm329_vm3, %v32717_v2 }
   0xc   : > { %334 = vst.msk [vmem:[#allocation2 + $0x60] sm:$0x1] (!%p266_p2), %vm329_vm3, %v32717_v2  ;;  %335 = vst.msk [vmem:[#allocation2 + $0x78] sm:$0x1] (!%p266_p2), %vm329_vm3, %v32717_v2 }
   0xd   : > { %336 = vst.msk [vmem:[#allocation2 + $0x90] sm:$0x1] %vm329_vm3, %v32717_v2  ;;  %337 = vst.msk [vmem:[#allocation2 + $0xa8] sm:$0x1] %vm329_vm3, %v32717_v2  ;;  %s37589_s28 = smov (!%p32793_p3, %s24100_s28), 1  ;;  %v570_v7 = vld [vmem:[#allocation2 + $0x1] sm:$0xff] }
   0xe   : > { %338 = vst.msk [vmem:[#allocation2 + $0xc0] sm:$0x1] %vm329_vm3, %v32717_v2  ;;  %339 = vst.msk [vmem:[#allocation2 + $0xd8] sm:$0x1] %vm329_vm3, %v32717_v2  ;;  %s32875_s12 = sshll.u32 %s37589_s28, 8  ;;  %v571_v8 = vld [vmem:[#allocation2 + $0x9] sm:$0xff] }
   0xf   : > { %340 = vst.msk [vmem:[#allocation2 + $0xf0] sm:$0x1] %vm329_vm3, %v32717_v2  ;;  %341 = vst.msk [vmem:[#allocation2 + $0x108] sm:$0x1] %vm329_vm3, %v32717_v2  ;;  %s32881_s15 = scalar_lea.vmem %s37578_s0, %s32875_s12  ;;  %v602_v10 = vpack.c.bf16 %v571_v8, %v570_v7  ;;  %s37359_s11 = scalar_lea.vmem %s37586_s8, %s32875_s12 }
  0x10   : > { %342 = vst.msk [vmem:[#allocation2 + $0x120] sm:$0x1] %vm329_vm3, %v32717_v2  ;;  %343 = vst.msk [vmem:[#allocation2 + $0x138] sm:$0x1] %vm329_vm3, %v32717_v2  ;;  %v455_v4 = vld [vmem:[%s32881_s15] sm:$0xff]  ;;  %v456_v5 = vld [vmem:[%s32881_s15 + $0x8] sm:$0xff] }
  0x11   : > { %344 = vst.msk [vmem:[#allocation2 + $0x150] sm:$0x1] %vm329_vm3, %v32717_v2  ;;  %345 = vst.msk [vmem:[#allocation2 + $0x168] sm:$0x1] %vm329_vm3, %v32717_v2  ;;  %v457_v6 = vld [vmem:[%s32881_s15 + $0x10] sm:$0xff]  ;;  %v458_v9 = vld [vmem:[%s32881_s15 + $0x18] sm:$0xff]  ;;  %27439 = vmatprep.mubr.msk.bf16.mxu0 %vm320_vm1, %v602_v10 }
  0x12   : > { %346 = vst.msk [vmem:[#allocation2 + $0x180] sm:$0x1] %vm329_vm3, %v32717_v2  ;;  %349 = vst.msk [vmem:[#allocation2 + $0x29] sm:$0x1] %vm329_vm3, %v32717_v2  ;;  %v459_v11 = vld [vmem:[%s32881_s15 + $0x20] sm:$0xff]  ;;  %v460_v12 = vld [vmem:[%s32881_s15 + $0x28] sm:$0xff] }
  0x13   : > { %350 = vst.msk [vmem:[#allocation2 + $0x41] sm:$0x1] %vm329_vm3, %v32717_v2  ;;  %351 = vst.msk [vmem:[#allocation2 + $0x59] sm:$0x1] %vm329_vm3, %v32717_v2  ;;  %v461_v13 = vld [vmem:[%s32881_s15 + $0x30] sm:$0xff]  ;;  %v462_v14 = vld [vmem:[%s32881_s15 + $0x38] sm:$0xff] }
  0x14   : > { %352 = vst.msk [vmem:[#allocation2 + $0x71] sm:$0x1] %vm329_vm3, %v32717_v2  ;;  %353 = vst.msk [vmem:[#allocation2 + $0x89] sm:$0x1] %vm329_vm3, %v32717_v2  ;;  %v463_v15 = vld [vmem:[%s32881_s15 + $0x40] sm:$0xff]  ;;  %v464_v16 = vld [vmem:[%s32881_s15 + $0x48] sm:$0xff] }
  0x15   : > { %354 = vst.msk [vmem:[#allocation2 + $0xa1] sm:$0x1] %vm329_vm3, %v32717_v2  ;;  %355 = vst.msk [vmem:[#allocation2 + $0xb9] sm:$0x1] %vm329_vm3, %v32717_v2  ;;  %v465_v17 = vld [vmem:[%s32881_s15 + $0x50] sm:$0xff]  ;;  %v466_v18 = vld [vmem:[%s32881_s15 + $0x58] sm:$0xff] }
  0x16   : > { %356 = vst.msk [vmem:[#allocation2 + $0xd1] sm:$0x1] %vm329_vm3, %v32717_v2  ;;  %357 = vst.msk [vmem:[#allocation2 + $0xe9] sm:$0x1] %vm329_vm3, %v32717_v2  ;;  %v467_v19 = vld [vmem:[%s32881_s15 + $0x60] sm:$0xff]  ;;  %v468_v20 = vld [vmem:[%s32881_s15 + $0x68] sm:$0xff] }
  0x17   : > { %358 = vst.msk [vmem:[#allocation2 + $0x101] sm:$0x1] %vm329_vm3, %v32717_v2  ;;  %359 = vst.msk [vmem:[#allocation2 + $0x119] sm:$0x1] %vm329_vm3, %v32717_v2  ;;  %v469_v21 = vld [vmem:[%s32881_s15 + $0x70] sm:$0xff]  ;;  %v470_v22 = vld [vmem:[%s32881_s15 + $0x78] sm:$0xff] }
  0x18   : > { %360 = vst.msk [vmem:[#allocation2 + $0x131] sm:$0x1] %vm329_vm3, %v32717_v2  ;;  %361 = vst.msk [vmem:[#allocation2 + $0x149] sm:$0x1] %vm329_vm3, %v32717_v2  ;;  %v471_v23 = vld [vmem:[%s32881_s15 + $0x80] sm:$0xff]  ;;  %v472_v24 = vld [vmem:[%s32881_s15 + $0x88] sm:$0xff] }
  0x19   : > { %362 = vst.msk [vmem:[#allocation2 + $0x161] sm:$0x1] %vm329_vm3, %v32717_v2  ;;  %363 = vst.msk [vmem:[#allocation2 + $0x179] sm:$0x1] %vm329_vm3, %v32717_v2  ;;  %v473_v25 = vld [vmem:[%s32881_s15 + $0x90] sm:$0xff]  ;;  %v474_v26 = vld [vmem:[%s32881_s15 + $0x98] sm:$0xff] }
  0x1a   : > { %364 = vst.msk [vmem:[#allocation2 + $0x191] sm:$0x1] %vm329_vm3, %v32717_v2  ;;  %347 = vst.msk [vmem:[#allocation2 + $0x198] sm:$0x1] %vm329_vm3, %v32717_v2  ;;  %v475_v27 = vld [vmem:[%s32881_s15 + $0xa0] sm:$0xff]  ;;  %v476_v28 = vld [vmem:[%s32881_s15 + $0xa8] sm:$0xff] }
  0x1b   : > { %488 = vst.msk [vmem:[#allocation2 + $0x19] sm:$0xff] %vm320_vm1, %v455_v4  ;;  %489 = vst.msk [vmem:[#allocation2 + $0x21] sm:$0xff] %vm320_vm1, %v456_v5  ;;  %v477_v35 = vld [vmem:[%s32881_s15 + $0xb0] sm:$0xff]  ;;  %v478_v36 = vld [vmem:[%s32881_s15 + $0xb8] sm:$0xff] }
  0x1c   : > { %490 = vst.msk [vmem:[#allocation2 + $0x31] sm:$0xff] %vm320_vm1, %v457_v6  ;;  %491 = vst.msk [vmem:[#allocation2 + $0x39] sm:$0xff] %vm320_vm1, %v458_v9  ;;  %v479_v45 = vld [vmem:[%s32881_s15 + $0xc0] sm:$0xff]  ;;  %v480_v46 = vld [vmem:[%s32881_s15 + $0xc8] sm:$0xff] }
  0x1d   : > { %492 = vst.msk [vmem:[#allocation2 + $0x49] sm:$0xff] %vm320_vm1, %v459_v11  ;;  %493 = vst.msk [vmem:[#allocation2 + $0x51] sm:$0xff] %vm320_vm1, %v460_v12  ;;  %v481_v47 = vld [vmem:[%s32881_s15 + $0xd0] sm:$0xff]  ;;  %v482_v48 = vld [vmem:[%s32881_s15 + $0xd8] sm:$0xff] }
  0x1e   : > { %494 = vst.msk [vmem:[#allocation2 + $0x61] sm:$0xff] %vm320_vm1, %v461_v13  ;;  %495 = vst.msk [vmem:[#allocation2 + $0x69] sm:$0xff] %vm320_vm1, %v462_v14  ;;  %v483_v49 = vld [vmem:[%s32881_s15 + $0xe0] sm:$0xff]  ;;  %v484_v50 = vld [vmem:[%s32881_s15 + $0xe8] sm:$0xff] }
  0x1f   : > { %496 = vst.msk [vmem:[#allocation2 + $0x79] sm:$0xff] %vm320_vm1, %v463_v15  ;;  %497 = vst.msk [vmem:[#allocation2 + $0x81] sm:$0xff] %vm320_vm1, %v464_v16 }
  0x20   : > { %498 = vst.msk [vmem:[#allocation2 + $0x91] sm:$0xff] %vm320_vm1, %v465_v17  ;;  %499 = vst.msk [vmem:[#allocation2 + $0x99] sm:$0xff] %vm320_vm1, %v466_v18  ;;  %v521_v18 = vld [vmem:[#allocation2] sm:$0xff] }
  0x21   : > { %500 = vst.msk [vmem:[#allocation2 + $0xa9] sm:$0xff] %vm320_vm1, %v467_v19  ;;  %501 = vst.msk [vmem:[#allocation2 + $0xb1] sm:$0xff] %vm320_vm1, %v468_v20  ;;  %v522_v19 = vld [vmem:[#allocation2 + $0x8] sm:$0xff] }
  0x22   : > { %502 = vst.msk [vmem:[#allocation2 + $0xc1] sm:$0xff] %vm320_vm1, %v469_v21  ;;  %503 = vst.msk [vmem:[#allocation2 + $0xc9] sm:$0xff] %vm320_vm1, %v470_v22  ;;  %v572_v29 = vld [vmem:[#allocation2 + $0x19] sm:$0xff]  ;;  %v573_v30 = vld [vmem:[#allocation2 + $0x21] sm:$0xff] }
  0x23   : > { %504 = vst.msk [vmem:[#allocation2 + $0xd9] sm:$0xff] %vm320_vm1, %v471_v23  ;;  %505 = vst.msk [vmem:[#allocation2 + $0xe1] sm:$0xff] %vm320_vm1, %v472_v24  ;;  %v574_v31 = vld [vmem:[#allocation2 + $0x31] sm:$0xff]  ;;  %v32928_v32 = vpack.c.bf16 %v573_v30, %v572_v29  ;;  %v575_v34 = vld [vmem:[#allocation2 + $0x39] sm:$0xff]  ;;  %v553_v23 = vpack.c.bf16 %v522_v19, %v521_v18 }
  0x24   : > { %506 = vst.msk [vmem:[#allocation2 + $0xf1] sm:$0xff] %vm320_vm1, %v473_v25  ;;  %507 = vst.msk [vmem:[#allocation2 + $0xf9] sm:$0xff] %vm320_vm1, %v474_v26  ;;  %v32934_v37 = vpack.c.bf16 %v575_v34, %v574_v31  ;;  %v576_v39 = vld [vmem:[#allocation2 + $0x49] sm:$0xff]  ;;  %v577_v40 = vld [vmem:[#allocation2 + $0x51] sm:$0xff] }
  0x25   : > { %508 = vst.msk [vmem:[#allocation2 + $0x109] sm:$0xff] %vm320_vm1, %v475_v27  ;;  %509 = vst.msk [vmem:[#allocation2 + $0x111] sm:$0xff] %vm320_vm1, %v476_v28  ;;  %27440 = vmatmul.mubr.msk.bf16.vlgmr.msra.gmra.mrb[0].mxu0 %vm320_vm1, %v32928_v32  ;;  %v578_v41 = vld [vmem:[#allocation2 + $0x61] sm:$0xff]  ;;  %v579_v42 = vld [vmem:[#allocation2 + $0x69] sm:$0xff]  ;;  %v32949_v43 = vpack.c.bf16 %v577_v40, %v576_v39  ;;  %v1144_v27 = vsel %vm668_vm0, %v32941_v38, 0 }
  0x26   : > { %510 = vst.msk [vmem:[#allocation2 + $0x121] sm:$0xff] %vm320_vm1, %v477_v35  ;;  %511 = vst.msk [vmem:[#allocation2 + $0x129] sm:$0xff] %vm320_vm1, %v478_v36  ;;  %27472 = vmatpush3.bf16.msra.mxu0 %v882_v33  ;;  %27443 = vmatprep.mubr.msk.bf16.mxu0 %vm320_vm1, %v32934_v37  ;;  %v32951_v44 = vpack.c.bf16 %v579_v42, %v578_v41  ;;  %v580_v51 = vld [vmem:[#allocation2 + $0x79] sm:$0xff]  ;;  %v581_v52 = vld [vmem:[#allocation2 + $0x81] sm:$0xff] }
  0x27   : > { %32313 = vmatprep.subr.msk.bf16.mxu0 %vm668_vm0, %v32941_v38  ;;  %512 = vst.msk [vmem:[#allocation2 + $0x139] sm:$0xff] %vm320_vm1, %v479_v45  ;;  %513 = vst.msk [vmem:[#allocation2 + $0x141] sm:$0xff] %vm320_vm1, %v480_v46  ;;  %v582_v53 = vld [vmem:[#allocation2 + $0x91] sm:$0xff]  ;;  %v583_v54 = vld [vmem:[#allocation2 + $0x99] sm:$0xff]  ;;  %v32969_v55 = vpack.c.bf16 %v581_v52, %v580_v51 }
  0x28   : > { %514 = vst.msk [vmem:[#allocation2 + $0x151] sm:$0xff] %vm320_vm1, %v481_v47  ;;  %515 = vst.msk [vmem:[#allocation2 + $0x159] sm:$0xff] %vm320_vm1, %v482_v48  ;;  %v32971_v56 = vpack.c.bf16 %v583_v54, %v582_v53  ;;  %v584_v57 = vld [vmem:[#allocation2 + $0xa9] sm:$0xff]  ;;  %v585_v58 = vld [vmem:[#allocation2 + $0xb1] sm:$0xff] }
  0x29   : > { %516 = vst.msk [vmem:[#allocation2 + $0x169] sm:$0xff] %vm320_vm1, %v483_v49  ;;  %517 = vst.msk [vmem:[#allocation2 + $0x171] sm:$0xff] %vm320_vm1, %v484_v50  ;;  %v586_v59 = vld [vmem:[#allocation2 + $0xc1] sm:$0xff]  ;;  %v587_v60 = vld [vmem:[#allocation2 + $0xc9] sm:$0xff]  ;;  %v32977_v61 = vpack.c.bf16 %v585_v58, %v584_v57 }
  0x2a   : > { %v32979_v62 = vpack.c.bf16 %v587_v60, %v586_v59  ;;  %v588_v63 = vld [vmem:[#allocation2 + $0xd9] sm:$0xff]  ;;  %v589_v0 = vld [vmem:[#allocation2 + $0xe1] sm:$0xff]  ;;  %v525_v26 = vld [vmem:[#allocation2 + $0x30] sm:$0xff]  ;;  %367 = vst.msk [vmem:[#allocation3] sm:$0xff] %vm366_vm4, %v32717_v2 }
  0x2b   : > { %v590_v1 = vld [vmem:[#allocation2 + $0xf1] sm:$0xff]  ;;  %v591_v3 = vld [vmem:[#allocation2 + $0xf9] sm:$0xff]  ;;  %v32985_v4 = vpack.c.bf16 %v589_v0, %v588_v63  ;;  %v33023_v31 = vld [vmem:[%s37579_s1 + $0xc] sm:$0xf]  ;;  %368 = vst.msk [vmem:[#allocation3 + $0x8] sm:$0xff] %vm366_vm4, %v32717_v2 }
  0x2c   : > { %v32987_v5 = vpack.c.bf16 %v591_v3, %v590_v1  ;;  %v592_v6 = vld [vmem:[#allocation2 + $0x109] sm:$0xff]  ;;  %v593_v7 = vld [vmem:[#allocation2 + $0x111] sm:$0xff]  ;;  %v524_v25 = vld [vmem:[#allocation2 + $0x20] sm:$0xff]  ;;  %372 = vst.msk [vmem:[#allocation3 + $0x198] sm:$0xff] %vm366_vm4, %v32717_v2 }
  0x2d   : > { %27444 = vmatmul.mubr.msk.bf16.gmra.mrb[4].mxu0 %vm320_vm1, %v32949_v43  ;;  %v594_v8 = vld [vmem:[#allocation2 + $0x121] sm:$0xff]  ;;  %v595_v9 = vld [vmem:[#allocation2 + $0x129] sm:$0xff]  ;;  %v32993_v10 = vpack.c.bf16 %v593_v7, %v592_v6  ;;  %v523_v24 = vld [vmem:[#allocation2 + $0x18] sm:$0xff]  ;;  %373 = vst.msk [vmem:[#allocation3 + $0x1a0] sm:$0xff] %vm366_vm4, %v32717_v2 }
  0x2e   : > { %27447 = vmatprep.mubr.msk.bf16.mxu0 %vm320_vm1, %v32951_v44  ;;  %v32995_v11 = vpack.c.bf16 %v595_v9, %v594_v8  ;;  %v596_v12 = vld [vmem:[#allocation2 + $0x139] sm:$0xff]  ;;  %v597_v13 = vld [vmem:[#allocation2 + $0x141] sm:$0xff]  ;;  %v33016_v29 = vpack.c.bf16 %v524_v25, %v523_v24  ;;  %v528_v34 = vld [vmem:[#allocation2 + $0x50] sm:$0xff]  ;;  %412 = vst.msk [vmem:[#allocation4] sm:$0xff] %vm366_vm4, %v32717_v2 }
  0x2f   : > { %v598_v14 = vld [vmem:[#allocation2 + $0x151] sm:$0xff]  ;;  %v599_v15 = vld [vmem:[#allocation2 + $0x159] sm:$0xff]  ;;  %v33001_v16 = vpack.c.bf16 %v597_v13, %v596_v12  ;;  %v527_v33 = vld [vmem:[#allocation2 + $0x48] sm:$0xff]  ;;  %413 = vst.msk [vmem:[#allocation4 + $0x8] sm:$0xff] %vm366_vm4, %v32717_v2 }
  0x30   : > { %v33003_v17 = vpack.c.bf16 %v599_v15, %v598_v14  ;;  %v600_v20 = vld [vmem:[#allocation2 + $0x169] sm:$0xff]  ;;  %v601_v21 = vld [vmem:[#allocation2 + $0x171] sm:$0xff]  ;;  %v529_v35 = vld [vmem:[#allocation2 + $0x60] sm:$0xff]  ;;  %v33031_v38 = vpack.c.bf16 %v528_v34, %v527_v33  ;;  %416 = vst.msk [vmem:[#allocation4 + $0x198] sm:$0xff] %vm366_vm4, %v32717_v2 }
  0x31   : > { %v33009_v22 = vpack.c.bf16 %v601_v21, %v600_v20  ;;  %v526_v28 = vld [vmem:[#allocation2 + $0x38] sm:$0xff]  ;;  %v530_v36 = vld [vmem:[#allocation2 + $0x68] sm:$0xff]  ;;  %v532_v41 = vld [vmem:[#allocation2 + $0x80] sm:$0xff]  ;;  %417 = vst.msk [vmem:[#allocation4 + $0x1a0] sm:$0xff] %vm366_vm4, %v32717_v2 }
  0x32   : > { %v33018_v30 = vpack.c.bf16 %v526_v28, %v525_v26  ;;  %v33033_v39 = vpack.c.bf16 %v530_v36, %v529_v35  ;;  %v531_v40 = vld [vmem:[#allocation2 + $0x78] sm:$0xff]  ;;  %v533_v42 = vld [vmem:[#allocation2 + $0x90] sm:$0xff]  ;;  %v535_v48 = vld [vmem:[#allocation2 + $0xa8] sm:$0xff]  ;;  %v1438_v35 = vsel %vm668_vm0, %v33023_v31, 0  ;;  %376 = vst.msk [vmem:[#allocation3] sm:$0x1] %vm375_vm5, %v32717_v2 }
  0x33   : > { %v534_v45 = vld [vmem:[#allocation2 + $0x98] sm:$0xff]  ;;  %v33039_v46 = vpack.c.bf16 %v532_v41, %v531_v40  ;;  %v536_v49 = vld [vmem:[#allocation2 + $0xb0] sm:$0xff]  ;;  %v537_v50 = vld [vmem:[#allocation2 + $0xc0] sm:$0xff]  ;;  %377 = vst.msk [vmem:[#allocation3 + $0x18] sm:$0x1] %vm375_vm5, %v32717_v2 }
  0x34   : > { %v33041_v47 = vpack.c.bf16 %v534_v45, %v533_v42  ;;  %v538_v51 = vld [vmem:[#allocation2 + $0xc8] sm:$0xff]  ;;  %v33047_v52 = vpack.c.bf16 %v536_v49, %v535_v48  ;;  %v539_v54 = vld [vmem:[#allocation2 + $0xd8] sm:$0xff]  ;;  %v540_v57 = vld [vmem:[#allocation2 + $0xe0] sm:$0xff]  ;;  %378 = vst.msk [vmem:[#allocation3 + $0x30] sm:$0x1] %vm375_vm5, %v32717_v2 }
  0x35   : > { %27448 = vmatmul.mubr.msk.bf16.gmra.mrb[8].mxu0 %vm320_vm1, %v32969_v55  ;;  %v33049_v53 = vpack.c.bf16 %v538_v51, %v537_v50  ;;  %v541_v58 = vld [vmem:[#allocation2 + $0xf0] sm:$0xff]  ;;  %v542_v59 = vld [vmem:[#allocation2 + $0xf8] sm:$0xff]  ;;  %v33055_v60 = vpack.c.bf16 %v540_v57, %v539_v54  ;;  %v543_v0 = vld [vmem:[#allocation2 + $0x108] sm:$0xff]  ;;  %379 = vst.msk [vmem:[#allocation3 + $0x48] sm:$0x1] %vm375_vm5, %v32717_v2 }
  0x36   : > { %27451 = vmatprep.mubr.msk.bf16.mxu0 %vm320_vm1, %v32971_v56  ;;  %v33057_v63 = vpack.c.bf16 %v542_v59, %v541_v58  ;;  %v544_v1 = vld [vmem:[#allocation2 + $0x110] sm:$0xff]  ;;  %v545_v3 = vld [vmem:[#allocation2 + $0x120] sm:$0xff]  ;;  %v546_v6 = vld [vmem:[#allocation2 + $0x128] sm:$0xff]  ;;  %380 = vst.msk [vmem:[#allocation3 + $0x60] sm:$0x1] %vm375_vm5, %v32717_v2 }
  0x37   : > { %v33063_v7 = vpack.c.bf16 %v544_v1, %v543_v0  ;;  %v33065_v8 = vpack.c.bf16 %v546_v6, %v545_v3  ;;  %v547_v9 = vld [vmem:[#allocation2 + $0x138] sm:$0xff]  ;;  %v548_v12 = vld [vmem:[#allocation2 + $0x140] sm:$0xff]  ;;  %v549_v13 = vld [vmem:[#allocation2 + $0x150] sm:$0xff]  ;;  %381 = vst.msk [vmem:[#allocation3 + $0x78] sm:$0x1] %vm375_vm5, %v32717_v2 }
  0x38   : > { %v550_v14 = vld [vmem:[#allocation2 + $0x158] sm:$0xff]  ;;  %v33071_v15 = vpack.c.bf16 %v548_v12, %v547_v9  ;;  %v485_v19 = vld [vmem:[%s32881_s15 + $0xf0] sm:$0xff]  ;;  %v551_v21 = vld [vmem:[#allocation2 + $0x168] sm:$0xff]  ;;  %382 = vst.msk [vmem:[#allocation3 + $0x90] sm:$0x1] %vm375_vm5, %v32717_v2 }
  0x39   : > { %v33073_v18 = vpack.c.bf16 %v550_v14, %v549_v13  ;;  %v486_v20 = vld [vmem:[%s32881_s15 + $0xf8] sm:$0xff]  ;;  %518 = vst.msk [vmem:[#allocation2 + $0x181] sm:$0xff] %vm320_vm1, %v485_v19  ;;  %v1045_v24 = vld [vmem:[#allocation2 + $0x2] sm:$0xff]  ;;  %v1046_v25 = vld [vmem:[#allocation2 + $0xa] sm:$0xff]  ;;  %s37414_s15 = scalar_lea.vmem %s37585_s7, %s32875_s12 }
  0x3a   : > { %519 = vst.msk [vmem:[#allocation2 + $0x189] sm:$0xff] %vm320_vm1, %v486_v20  ;;  %v1047_v28 = vld [vmem:[#allocation2 + $0x1a] sm:$0xff]  ;;  %v1048_v33 = vld [vmem:[#allocation2 + $0x22] sm:$0xff]  ;;  %v1049_v34 = vld [vmem:[#allocation2 + $0x32] sm:$0xff] }
  0x3b   : > { %v1050_v36 = vld [vmem:[#allocation2 + $0x3a] sm:$0xff]  ;;  %v33090_v40 = vpack.c.bf16 %v1048_v33, %v1047_v28  ;;  %v24178_v42 = vld [vmem:[%s37579_s1 + $0x10] sm:$0xf]  ;;  %v1053_v49 = vld [vmem:[#allocation2 + $0x62] sm:$0xff]  ;;  %383 = vst.msk [vmem:[#allocation3 + $0xa8] sm:$0x1] %vm375_vm5, %v32717_v2 }
  0x3c   : > { %v33092_v41 = vpack.c.bf16 %v1050_v36, %v1049_v34  ;;  %v1051_v45 = vld [vmem:[#allocation2 + $0x4a] sm:$0xff]  ;;  %v1052_v48 = vld [vmem:[#allocation2 + $0x52] sm:$0xff]  ;;  %v1055_v54 = vld [vmem:[#allocation2 + $0x7a] sm:$0xff]  ;;  %384 = vst.msk [vmem:[#allocation3 + $0xc0] sm:$0x1] %vm375_vm5, %v32717_v2 }
  0x3d   : > { %27452 = vmatmul.mubr.msk.bf16.gmra.mrb[12].mxu0 %vm320_vm1, %v32977_v61  ;;  %v1054_v50 = vld [vmem:[#allocation2 + $0x6a] sm:$0xff]  ;;  %v1056_v57 = vld [vmem:[#allocation2 + $0x82] sm:$0xff]  ;;  %v1057_v58 = vld [vmem:[#allocation2 + $0x92] sm:$0xff]  ;;  %385 = vst.msk [vmem:[#allocation3 + $0xd8] sm:$0x1] %vm375_vm5, %v32717_v2 }
  0x3e   : > { %27455 = vmatprep.mubr.msk.bf16.mxu0 %vm320_vm1, %v32979_v62  ;;  %v33104_v51 = vpack.c.bf16 %v1054_v50, %v1053_v49  ;;  %v1058_v59 = vld [vmem:[#allocation2 + $0x9a] sm:$0xff]  ;;  %v33110_v0 = vpack.c.bf16 %v1056_v57, %v1055_v54  ;;  %v1059_v3 = vld [vmem:[#allocation2 + $0xaa] sm:$0xff]  ;;  %v1060_v6 = vld [vmem:[#allocation2 + $0xb2] sm:$0xff]  ;;  %386 = vst.msk [vmem:[#allocation3 + $0xf0] sm:$0x1] %vm375_vm5, %v32717_v2 }
  0x3f   : > { %v33112_v1 = vpack.c.bf16 %v1058_v59, %v1057_v58  ;;  %v1061_v9 = vld [vmem:[#allocation2 + $0xc2] sm:$0xff]  ;;  %v1062_v12 = vld [vmem:[#allocation2 + $0xca] sm:$0xff]  ;;  %v33118_v13 = vpack.c.bf16 %v1060_v6, %v1059_v3  ;;  %v1063_v19 = vld [vmem:[#allocation2 + $0xda] sm:$0xff]  ;;  %v1732_v6 = vsel %vm668_vm0, %v24178_v42, 0  ;;  %387 = vst.msk [vmem:[#allocation3 + $0x108] sm:$0x1] %vm375_vm5, %v32717_v2 }
  0x40   : > { %v33120_v14 = vpack.c.bf16 %v1062_v12, %v1061_v9  ;;  %v1064_v20 = vld [vmem:[#allocation2 + $0xe2] sm:$0xff]  ;;  %v1068_v28 = vld [vmem:[#allocation2 + $0x112] sm:$0xff]  ;;  %v1070_v34 = vld [vmem:[#allocation2 + $0x12a] sm:$0xff]  ;;  %388 = vst.msk [vmem:[#allocation3 + $0x120] sm:$0x1] %vm375_vm5, %v32717_v2 }
  0x41   : > { %v1069_v33 = vld [vmem:[#allocation2 + $0x122] sm:$0xff]  ;;  %v1073_v49 = vld [vmem:[#allocation2 + $0x152] sm:$0xff]  ;;  %v1074_v50 = vld [vmem:[#allocation2 + $0x15a] sm:$0xff]  ;;  %389 = vst.msk [vmem:[#allocation3 + $0x138] sm:$0x1] %vm375_vm5, %v32717_v2 }
  0x42   : > { %v33136_v36 = vpack.c.bf16 %v1070_v34, %v1069_v33  ;;  %v33144_v57 = vpack.c.bf16 %v1074_v50, %v1073_v49  ;;  %v1075_v58 = vld [vmem:[#allocation2 + $0x16a] sm:$0xff]  ;;  %v1076_v59 = vld [vmem:[#allocation2 + $0x172] sm:$0xff]  ;;  %v24246_v33 = vld [vmem:[%s37579_s1 + $0x20] sm:$0xf]  ;;  %390 = vst.msk [vmem:[#allocation3 + $0x150] sm:$0x1] %vm375_vm5, %v32717_v2 }
  0x43   : > { %v33150_v3 = vpack.c.bf16 %v1076_v59, %v1075_v58  ;;  %v24195_v9 = vld [vmem:[%s37579_s1 + $0x14] sm:$0xf]  ;;  %391 = vst.msk [vmem:[#allocation3 + $0x168] sm:$0x1] %vm375_vm5, %v32717_v2  ;;  %392 = vst.msk [vmem:[#allocation3 + $0x180] sm:$0x1] %vm375_vm5, %v32717_v2 }
  0x44   : > { %393 = vst.msk [vmem:[#allocation3 + $0x198] sm:$0x1] %vm375_vm5, %v32717_v2  ;;  %395 = vst.msk [vmem:[#allocation3 + $0x29] sm:$0x1] %vm375_vm5, %v32717_v2 }
  0x45   : > { %27456 = vmatmul.mubr.msk.bf16.gmra.mrb[16].mxu0 %vm320_vm1, %v32985_v4  ;;  %396 = vst.msk [vmem:[#allocation3 + $0x41] sm:$0x1] %vm375_vm5, %v32717_v2  ;;  %397 = vst.msk [vmem:[#allocation3 + $0x59] sm:$0x1] %vm375_vm5, %v32717_v2 }
  0x46   : > { %27459 = vmatprep.mubr.msk.bf16.mxu0 %vm320_vm1, %v32987_v5  ;;  %398 = vst.msk [vmem:[#allocation3 + $0x71] sm:$0x1] %vm375_vm5, %v32717_v2  ;;  %399 = vst.msk [vmem:[#allocation3 + $0x89] sm:$0x1] %vm375_vm5, %v32717_v2 }
  0x47   : > { %400 = vst.msk [vmem:[#allocation3 + $0xa1] sm:$0x1] %vm375_vm5, %v32717_v2  ;;  %401 = vst.msk [vmem:[#allocation3 + $0xb9] sm:$0x1] %vm375_vm5, %v32717_v2 }
  0x48   : > { %402 = vst.msk [vmem:[#allocation3 + $0xd1] sm:$0x1] %vm375_vm5, %v32717_v2  ;;  %403 = vst.msk [vmem:[#allocation3 + $0xe9] sm:$0x1] %vm375_vm5, %v32717_v2 }
  0x49   : > { %404 = vst.msk [vmem:[#allocation3 + $0x101] sm:$0x1] %vm375_vm5, %v32717_v2  ;;  %405 = vst.msk [vmem:[#allocation3 + $0x119] sm:$0x1] %vm375_vm5, %v32717_v2 }
  0x4a   : > { %406 = vst.msk [vmem:[#allocation3 + $0x131] sm:$0x1] %vm375_vm5, %v32717_v2  ;;  %407 = vst.msk [vmem:[#allocation3 + $0x149] sm:$0x1] %vm375_vm5, %v32717_v2 }
  0x4b   : > { %408 = vst.msk [vmem:[#allocation3 + $0x161] sm:$0x1] %vm375_vm5, %v32717_v2  ;;  %409 = vst.msk [vmem:[#allocation3 + $0x179] sm:$0x1] %vm375_vm5, %v32717_v2 }
  0x4c   : > { %410 = vst.msk [vmem:[#allocation3 + $0x191] sm:$0x1] %vm375_vm5, %v32717_v2  ;;  %419 = vst.msk [vmem:[#allocation4] sm:$0x1] %vm375_vm5, %v32717_v2 }
  0x4d   : > { %27460 = vmatmul.mubr.msk.bf16.gmra.mrb[20].mxu0 %vm320_vm1, %v32993_v10  ;;  %420 = vst.msk [vmem:[#allocation4 + $0x18] sm:$0x1] %vm375_vm5, %v32717_v2  ;;  %421 = vst.msk [vmem:[#allocation4 + $0x30] sm:$0x1] %vm375_vm5, %v32717_v2 }
  0x4e   : > { %27463 = vmatprep.mubr.msk.bf16.mxu0 %vm320_vm1, %v32995_v11  ;;  %422 = vst.msk [vmem:[#allocation4 + $0x48] sm:$0x1] %vm375_vm5, %v32717_v2  ;;  %423 = vst.msk [vmem:[#allocation4 + $0x60] sm:$0x1] %vm375_vm5, %v32717_v2 }
  0x4f   : > { %424 = vst.msk [vmem:[#allocation4 + $0x78] sm:$0x1] %vm375_vm5, %v32717_v2  ;;  %425 = vst.msk [vmem:[#allocation4 + $0x90] sm:$0x1] %vm375_vm5, %v32717_v2 }
  0x50   : > { %426 = vst.msk [vmem:[#allocation4 + $0xa8] sm:$0x1] %vm375_vm5, %v32717_v2  ;;  %427 = vst.msk [vmem:[#allocation4 + $0xc0] sm:$0x1] %vm375_vm5, %v32717_v2 }
  0x51   : > { %428 = vst.msk [vmem:[#allocation4 + $0xd8] sm:$0x1] %vm375_vm5, %v32717_v2  ;;  %429 = vst.msk [vmem:[#allocation4 + $0xf0] sm:$0x1] %vm375_vm5, %v32717_v2 }
  0x52   : > { %430 = vst.msk [vmem:[#allocation4 + $0x108] sm:$0x1] %vm375_vm5, %v32717_v2  ;;  %431 = vst.msk [vmem:[#allocation4 + $0x120] sm:$0x1] %vm375_vm5, %v32717_v2 }
  0x53   : > { %432 = vst.msk [vmem:[#allocation4 + $0x138] sm:$0x1] %vm375_vm5, %v32717_v2  ;;  %433 = vst.msk [vmem:[#allocation4 + $0x150] sm:$0x1] %vm375_vm5, %v32717_v2 }
  0x54   : > { %434 = vst.msk [vmem:[#allocation4 + $0x168] sm:$0x1] %vm375_vm5, %v32717_v2  ;;  %435 = vst.msk [vmem:[#allocation4 + $0x180] sm:$0x1] %vm375_vm5, %v32717_v2 }
  0x55   : > { %27464 = vmatmul.mubr.msk.bf16.gmra.mrb[24].mxu0 %vm320_vm1, %v33001_v16  ;;  %436 = vst.msk [vmem:[#allocation4 + $0x198] sm:$0x1] %vm375_vm5, %v32717_v2  ;;  %438 = vst.msk [vmem:[#allocation4 + $0x29] sm:$0x1] %vm375_vm5, %v32717_v2 }
  0x56   : > { %27467 = vmatprep.mubr.msk.bf16.mxu0 %vm320_vm1, %v33003_v17  ;;  %439 = vst.msk [vmem:[#allocation4 + $0x41] sm:$0x1] %vm375_vm5, %v32717_v2  ;;  %440 = vst.msk [vmem:[#allocation4 + $0x59] sm:$0x1] %vm375_vm5, %v32717_v2 }
  0x57   : > { %441 = vst.msk [vmem:[#allocation4 + $0x71] sm:$0x1] %vm375_vm5, %v32717_v2  ;;  %442 = vst.msk [vmem:[#allocation4 + $0x89] sm:$0x1] %vm375_vm5, %v32717_v2 }
  0x58   : > { %443 = vst.msk [vmem:[#allocation4 + $0xa1] sm:$0x1] %vm375_vm5, %v32717_v2  ;;  %444 = vst.msk [vmem:[#allocation4 + $0xb9] sm:$0x1] %vm375_vm5, %v32717_v2 }
  0x59   : > { %445 = vst.msk [vmem:[#allocation4 + $0xd1] sm:$0x1] %vm375_vm5, %v32717_v2  ;;  %446 = vst.msk [vmem:[#allocation4 + $0xe9] sm:$0x1] %vm375_vm5, %v32717_v2 }
  0x5a   : > { %447 = vst.msk [vmem:[#allocation4 + $0x101] sm:$0x1] %vm375_vm5, %v32717_v2  ;;  %448 = vst.msk [vmem:[#allocation4 + $0x119] sm:$0x1] %vm375_vm5, %v32717_v2 }
  0x5b   : > { %449 = vst.msk [vmem:[#allocation4 + $0x131] sm:$0x1] %vm375_vm5, %v32717_v2  ;;  %450 = vst.msk [vmem:[#allocation4 + $0x149] sm:$0x1] %vm375_vm5, %v32717_v2 }
  0x5c   : > { %451 = vst.msk [vmem:[#allocation4 + $0x161] sm:$0x1] %vm375_vm5, %v32717_v2  ;;  %452 = vst.msk [vmem:[#allocation4 + $0x179] sm:$0x1] %vm375_vm5, %v32717_v2 }
  0x5d   : > { %27468 = vmatmul.mubr.msk.bf16.gmra.mrb[28].mxu0 %vm320_vm1, %v33009_v22  ;;  %453 = vst.msk [vmem:[#allocation4 + $0x191] sm:$0x1] %vm375_vm5, %v32717_v2 }
  0x5e   : > { %27473 = vmatprep.mubr.msk.bf16.mxu0 %vm320_vm1, %v553_v23  ;;  %v552_v23 = vld [vmem:[#allocation2 + $0x170] sm:$0xff]  ;;  %370 = vst.msk [vmem:[#allocation3 + $0x10] sm:$0x3] %vm369_vm6, %v32717_v2  ;;  %374 = vst.msk [vmem:[#allocation3 + $0x1a8] sm:$0x3] %vm369_vm6, %v32717_v2 }
  0x5f   : > { %v33083_v26 = vpack.c.bf16 %v552_v23, %v551_v21  ;;  %v1065_v21 = vld [vmem:[#allocation2 + $0xf2] sm:$0xff]  ;;  %v1066_v23 = vld [vmem:[#allocation2 + $0xfa] sm:$0xff]  ;;  %414 = vst.msk [vmem:[#allocation4 + $0x10] sm:$0x3] %vm369_vm6, %v32717_v2  ;;  %418 = vst.msk [vmem:[#allocation4 + $0x1a8] sm:$0x3] %vm369_vm6, %v32717_v2 }
  0x60   : > { %394 = vst.msk [vmem:[#allocation3 + $0x11] sm:$0x1] %vm375_vm5, %v32717_v2  ;;  %411 = vst.msk [vmem:[#allocation3 + $0x1a9] sm:$0x1] %vm375_vm5, %v32717_v2 }
  0x61   : > { %437 = vst.msk [vmem:[#allocation4 + $0x11] sm:$0x1] %vm375_vm5, %v32717_v2  ;;  %454 = vst.msk [vmem:[#allocation4 + $0x1a9] sm:$0x1] %vm375_vm5, %v32717_v2  ;;  %v33554_v2 = vld [vmem:[%s37580_s2] ss:$0 sm:$0xff] }
  0x65   : > { %27474 = vmatmul.mubr.msk.bf16.vlgmr.msra.gmra.mrb[0].mxu0 %vm320_vm1, %v33016_v29 }
  0x66   : > { %27506 = vmatpush3.bf16.msra.mxu0 %v1144_v27  ;;  %27477 = vmatprep.mubr.msk.bf16.mxu0 %vm320_vm1, %v33018_v30  ;;  %v1077_v27 = vpack.c.bf16 %v1046_v25, %v1045_v24  ;;  %v33126_v24 = vpack.c.bf16 %v1064_v20, %v1063_v19  ;;  %v33128_v25 = vpack.c.bf16 %v1066_v23, %v1065_v21  ;;  %v2026_v19 = vsel %vm668_vm0, %v24195_v9, 0  ;;  %v24212_v20 = vld [vmem:[%s37579_s1 + $0x18] sm:$0xf]  ;;  %v24229_v21 = vld [vmem:[%s37579_s1 + $0x1c] sm:$0xf]  ;;  %v1958_v23 = vld [vmem:[#allocation2 + $0x18a] sm:$0xff] }
  0x67   : > { %32314 = vmatprep.subr.msk.bf16.mxu0 %vm668_vm0, %v33023_v31  ;;  %v33102_v31 = vpack.c.bf16 %v1052_v48, %v1051_v45  ;;  %v1071_v45 = vld [vmem:[#allocation2 + $0x13a] sm:$0xff]  ;;  %v1072_v48 = vld [vmem:[#allocation2 + $0x142] sm:$0xff] }
  0x68   : > { %v33142_v54 = vpack.c.bf16 %v1072_v48, %v1071_v45 }
  0x6d   : > { %27478 = vmatmul.mubr.msk.bf16.gmra.mrb[4].mxu0 %vm320_vm1, %v33031_v38 }
  0x6e   : > { %27481 = vmatprep.mubr.msk.bf16.mxu0 %vm320_vm1, %v33033_v39 }
  0x75   : > { %27482 = vmatmul.mubr.msk.bf16.gmra.mrb[8].mxu0 %vm320_vm1, %v33039_v46 }
  0x76   : > { %27485 = vmatprep.mubr.msk.bf16.mxu0 %vm320_vm1, %v33041_v47 }
  0x7d   : > { %27486 = vmatmul.mubr.msk.bf16.gmra.mrb[12].mxu0 %vm320_vm1, %v33047_v52 }
  0x7e   : > { %27489 = vmatprep.mubr.msk.bf16.mxu0 %vm320_vm1, %v33049_v53 }
  0x85   : > { %27490 = vmatmul.mubr.msk.bf16.gmra.mrb[16].mxu0 %vm320_vm1, %v33055_v60 }
  0x86   : > { %27493 = vmatprep.mubr.msk.bf16.mxu0 %vm320_vm1, %v33057_v63 }
  0x8d   : > { %27494 = vmatmul.mubr.msk.bf16.gmra.mrb[20].mxu0 %vm320_vm1, %v33063_v7 }
  0x8e   : > { %27497 = vmatprep.mubr.msk.bf16.mxu0 %vm320_vm1, %v33065_v8 }
  0x95   : > { %27498 = vmatmul.mubr.msk.bf16.gmra.mrb[24].mxu0 %vm320_vm1, %v33071_v15 }
  0x96   : > { %27501 = vmatprep.mubr.msk.bf16.mxu0 %vm320_vm1, %v33073_v18 }
  0x9d   : > { %27502 = vmatmul.mubr.msk.bf16.gmra.mrb[28].mxu0 %vm320_vm1, %v33083_v26 }
  0x9e   : > { %27507 = vmatprep.mubr.msk.bf16.mxu0 %vm320_vm1, %v1077_v27  ;;  %v1067_v27 = vld [vmem:[#allocation2 + $0x10a] sm:$0xff] }
  0xa5   : > { %27508 = vmatmul.mubr.msk.bf16.vlgmr.msra.gmra.mrb[0].mxu0 %vm320_vm1, %v33090_v40 }
  0xa6   : > { %27540 = vmatpush3.bf16.msra.mxu0 %v1438_v35  ;;  %27511 = vmatprep.mubr.msk.bf16.mxu0 %vm320_vm1, %v33092_v41  ;;  %v33134_v35 = vpack.c.bf16 %v1068_v28, %v1067_v27  ;;  %v2615_v28 = vsel %vm668_vm0, %v24229_v21, 0 }
  0xa7   : > { %32315 = vmatprep.subr.msk.bf16.mxu0 %vm668_vm0, %v24178_v42  ;;  %v1370_v42 = vld [vmem:[#allocation2 + $0x188] sm:$0xff] }
  0xad   : > { %27512 = vmatmul.mubr.msk.bf16.gmra.mrb[4].mxu0 %vm320_vm1, %v33102_v31 }
  0xae   : > { %27515 = vmatprep.mubr.msk.bf16.mxu0 %vm320_vm1, %v33104_v51 }
  0xb5   : > { %27516 = vmatmul.mubr.msk.bf16.gmra.mrb[8].mxu0 %vm320_vm1, %v33110_v0 }
  0xb6   : > { %27519 = vmatprep.mubr.msk.bf16.mxu0 %vm320_vm1, %v33112_v1 }
  0xbd   : > { %27520 = vmatmul.mubr.msk.bf16.gmra.mrb[12].mxu0 %vm320_vm1, %v33118_v13 }
  0xbe   : > { %27523 = vmatprep.mubr.msk.bf16.mxu0 %vm320_vm1, %v33120_v14 }
  0xc5   : > { %27524 = vmatmul.mubr.msk.bf16.gmra.mrb[16].mxu0 %vm320_vm1, %v33126_v24 }
  0xc6   : > { %27527 = vmatprep.mubr.msk.bf16.mxu0 %vm320_vm1, %v33128_v25 }
  0xcd   : > { %27528 = vmatmul.mubr.msk.bf16.gmra.mrb[20].mxu0 %vm320_vm1, %v33134_v35 }
  0xce   : > { %27531 = vmatprep.mubr.msk.bf16.mxu0 %vm320_vm1, %v33136_v36 }
  0xd5   : > { %27532 = vmatmul.mubr.msk.bf16.gmra.mrb[24].mxu0 %vm320_vm1, %v33142_v54 }
  0xd6   : > { %27535 = vmatprep.mubr.msk.bf16.mxu0 %vm320_vm1, %v33144_v57 }
  0xdd   : > { %27536 = vmatmul.mubr.msk.bf16.gmra.mrb[28].mxu0 %vm320_vm1, %v33150_v3 }
  0xde   : > { %27541 = vmatprep.mubr.msk.bf16.mxu0 %vm320_vm1, %v33016_v29  ;;  %v1369_v29 = vld [vmem:[#allocation2 + $0x180] sm:$0xff] }
  0xdf   : > { %v33189_v12 = vpack.c.bf16 %v1370_v42, %v1369_v29  ;;  %v32334_v29 = vld [vmem:[%s37581_s3 + $0x8] sm:$0xff]  }
  0xe5   : > { %27542 = vmatmul.mubr.msk.bf16.vlgmr.msra.gmra.mrb[0].mxu0 %vm320_vm1, %v33018_v30 }
  0xe6   : > { %27574 = vmatpush3.bf16.msra.mxu0 %v1732_v6  ;;  %27545 = vmatprep.mubr.msk.bf16.mxu0 %vm320_vm1, %v33031_v38 }
  0xe7   : > { %32316 = vmatprep.subr.msk.bf16.mxu0 %vm668_vm0, %v24195_v9 }
  0xed   : > { %27546 = vmatmul.mubr.msk.bf16.gmra.mrb[4].mxu0 %vm320_vm1, %v33033_v39 }
  0xee   : > { %27549 = vmatprep.mubr.msk.bf16.mxu0 %vm320_vm1, %v33039_v46 }
  0xf5   : > { %27550 = vmatmul.mubr.msk.bf16.gmra.mrb[8].mxu0 %vm320_vm1, %v33041_v47 }
  0xf6   : > { %27553 = vmatprep.mubr.msk.bf16.mxu0 %vm320_vm1, %v33047_v52 }
  0xfd   : > { %27554 = vmatmul.mubr.msk.bf16.gmra.mrb[12].mxu0 %vm320_vm1, %v33049_v53 }
  0xfe   : > { %27557 = vmatprep.mubr.msk.bf16.mxu0 %vm320_vm1, %v33055_v60 }
 0x105   : > { %27558 = vmatmul.mubr.msk.bf16.gmra.mrb[16].mxu0 %vm320_vm1, %v33057_v63 }
 0x106   : > { %27561 = vmatprep.mubr.msk.bf16.mxu0 %vm320_vm1, %v33063_v7 }
 0x10d   : > { %27562 = vmatmul.mubr.msk.bf16.gmra.mrb[20].mxu0 %vm320_vm1, %v33065_v8 }
 0x10e   : > { %27565 = vmatprep.mubr.msk.bf16.mxu0 %vm320_vm1, %v33071_v15 }
 0x115   : > { %27566 = vmatmul.mubr.msk.bf16.gmra.mrb[24].mxu0 %vm320_vm1, %v33073_v18 }
 0x116   : > { %27569 = vmatprep.mubr.msk.bf16.mxu0 %vm320_vm1, %v33083_v26 }
 0x11d   : > { %27570 = vmatmul.mubr.msk.bf16.gmra.mrb[28].mxu0 %vm320_vm1, %v33189_v12 }
 0x11e   : > { %27575 = vmatprep.mubr.msk.bf16.mxu0 %vm320_vm1, %v32928_v32  ;;  %v1663_v32 = vld [vmem:[#allocation2 + $0x181] sm:$0xff] }
 0x125   : > { %27576 = vmatmul.mubr.msk.bf16.vlgmr.msra.gmra.mrb[0].mxu0 %vm320_vm1, %v32934_v37  ;;  %v1664_v37 = vld [vmem:[#allocation2 + $0x189] sm:$0xff] }
 0x126   : > { %27608 = vmatpush3.bf16.msra.mxu0 %v2026_v19  ;;  %27579 = vmatprep.mubr.msk.bf16.mxu0 %vm320_vm1, %v32949_v43  ;;  %v33228_v43 = vpack.c.bf16 %v1664_v37, %v1663_v32 }
 0x127   : > { %32317 = vmatprep.subr.msk.bf16.mxu0 %vm668_vm0, %v24212_v20 }
 0x12d   : > { %27580 = vmatmul.mubr.msk.bf16.gmra.mrb[4].mxu0 %vm320_vm1, %v32951_v44  ;;  %v2321_v44 = vsel %vm668_vm0, %v24212_v20, 0 }
 0x12e   : > { %27583 = vmatprep.mubr.msk.bf16.mxu0 %vm320_vm1, %v32969_v55 }
 0x135   : > { %27584 = vmatmul.mubr.msk.bf16.gmra.mrb[8].mxu0 %vm320_vm1, %v32971_v56 }
 0x136   : > { %27587 = vmatprep.mubr.msk.bf16.mxu0 %vm320_vm1, %v32977_v61 }
 0x13d   : > { %27588 = vmatmul.mubr.msk.bf16.gmra.mrb[12].mxu0 %vm320_vm1, %v32979_v62 }
 0x13e   : > { %27591 = vmatprep.mubr.msk.bf16.mxu0 %vm320_vm1, %v32985_v4 }
 0x145   : > { %27592 = vmatmul.mubr.msk.bf16.gmra.mrb[16].mxu0 %vm320_vm1, %v32987_v5 }
 0x146   : > { %27595 = vmatprep.mubr.msk.bf16.mxu0 %vm320_vm1, %v32993_v10 }
 0x14d   : > { %27596 = vmatmul.mubr.msk.bf16.gmra.mrb[20].mxu0 %vm320_vm1, %v32995_v11 }
 0x14e   : > { %27599 = vmatprep.mubr.msk.bf16.mxu0 %vm320_vm1, %v33001_v16 }
 0x155   : > { %27600 = vmatmul.mubr.msk.bf16.gmra.mrb[24].mxu0 %vm320_vm1, %v33003_v17 }
 0x156   : > { %27603 = vmatprep.mubr.msk.bf16.mxu0 %vm320_vm1, %v33009_v22 }
 0x15d   : > { %27604 = vmatmul.mubr.msk.bf16.gmra.mrb[28].mxu0 %vm320_vm1, %v33228_v43 }
 0x15e   : > { %27609 = vmatprep.mubr.msk.bf16.mxu0 %vm320_vm1, %v33090_v40  ;;  %v1957_v40 = vld [vmem:[#allocation2 + $0x182] sm:$0xff] }
 0x15f   : > { %v33267_v27 = vpack.c.bf16 %v1958_v23, %v1957_v40 }
 0x165   : > { %27610 = vmatmul.mubr.msk.bf16.vlgmr.msra.gmra.mrb[0].mxu0 %vm320_vm1, %v33092_v41 }
 0x166   : > { %27642 = vmatpush3.bf16.msra.mxu0 %v2321_v44  ;;  %27613 = vmatprep.mubr.msk.bf16.mxu0 %vm320_vm1, %v33102_v31 }
 0x167   : > { %32318 = vmatprep.subr.msk.bf16.mxu0 %vm668_vm0, %v24229_v21 }
 0x16d   : > { %27614 = vmatmul.mubr.msk.bf16.gmra.mrb[4].mxu0 %vm320_vm1, %v33104_v51 }
 0x16e   : > { %27617 = vmatprep.mubr.msk.bf16.mxu0 %vm320_vm1, %v33110_v0 }
 0x175   : > { %27618 = vmatmul.mubr.msk.bf16.gmra.mrb[8].mxu0 %vm320_vm1, %v33112_v1 }
 0x176   : > { %27621 = vmatprep.mubr.msk.bf16.mxu0 %vm320_vm1, %v33118_v13 }
 0x17d   : > { %27622 = vmatmul.mubr.msk.bf16.gmra.mrb[12].mxu0 %vm320_vm1, %v33120_v14 }
 0x17e   : > { %27625 = vmatprep.mubr.msk.bf16.mxu0 %vm320_vm1, %v33126_v24 }
 0x185   : > { %27626 = vmatmul.mubr.msk.bf16.gmra.mrb[16].mxu0 %vm320_vm1, %v33128_v25 }
 0x186   : > { %27629 = vmatprep.mubr.msk.bf16.mxu0 %vm320_vm1, %v33134_v35 }
 0x18d   : > { %27630 = vmatmul.mubr.msk.bf16.gmra.mrb[20].mxu0 %vm320_vm1, %v33136_v36 }
 0x18e   : > { %27633 = vmatprep.mubr.msk.bf16.mxu0 %vm320_vm1, %v33142_v54 }
 0x195   : > { %27634 = vmatmul.mubr.msk.bf16.gmra.mrb[24].mxu0 %vm320_vm1, %v33144_v57 }
 0x196   : > { %27637 = vmatprep.mubr.msk.bf16.mxu0 %vm320_vm1, %v33150_v3 }
 0x19d   : > { %27638 = vmatmul.mubr.msk.bf16.gmra.mrb[28].mxu0 %vm320_vm1, %v33267_v27 }
 0x19e   : > { %27643 = vmatprep.mubr.msk.bf16.mxu0 %vm320_vm1, %v33018_v30  ;;  %v2252_v30 = vld [vmem:[#allocation2 + $0x198] sm:$0xff] }
 0x1a5   : > { %27644 = vmatmul.mubr.msk.bf16.vlgmr.msra.gmra.mrb[0].mxu0 %vm320_vm1, %v33031_v38  ;;  %v2253_v38 = vld [vmem:[#allocation2 + $0x1a0] sm:$0xff] }
 0x1a6   : > { %27676 = vmatpush3.bf16.msra.mxu0 %v2615_v28  ;;  %27647 = vmatprep.mubr.msk.bf16.mxu0 %vm320_vm1, %v33033_v39  ;;  %v2516_v39 = vld [vmem:[#allocation2 + $0x31] sm:$0xff] }
 0x1a7   : > { %32319 = vmatprep.subr.msk.bf16.mxu0 %vm668_vm0, %v24246_v33 }
 0x1ad   : > { %27648 = vmatmul.mubr.msk.bf16.gmra.mrb[4].mxu0 %vm320_vm1, %v33039_v46  ;;  %v2517_v46 = vld [vmem:[#allocation2 + $0x39] sm:$0xff] }
 0x1ae   : > { %27651 = vmatprep.mubr.msk.bf16.mxu0 %vm320_vm1, %v33041_v47  ;;  %v2269_v47 = vpack.c.bf16 %v2253_v38, %v2252_v30  ;;  %v32336_v38 = vld [vmem:[%s37581_s3 + $0x18] sm:$0xff]  }
 0x1b5   : > { %27652 = vmatmul.mubr.msk.bf16.gmra.mrb[8].mxu0 %vm320_vm1, %v33047_v52  ;;  %v2548_v52 = vpack.c.bf16 %v2517_v46, %v2516_v39 }
 0x1b6   : > { %27655 = vmatprep.mubr.msk.bf16.mxu0 %vm320_vm1, %v33049_v53  ;;  %v32329_v53 = vld [vmem:[%s37581_s3 + $0x20] sm:$0xff]  }
 0x1b7   : > { %27743 = vmatprep.subr.bf16.mxu1 %v32329_v53 }
 0x1b8   : > { %27744 = vmatpush3.bf16.msra.mxu1 %v32329_v53 }
 0x1bd   : > { %27656 = vmatmul.mubr.msk.bf16.gmra.mrb[12].mxu0 %vm320_vm1, %v33055_v60  ;;  %v2518_v60 = vld [vmem:[#allocation2 + $0x49] sm:$0xff] }
 0x1be   : > { %27659 = vmatprep.mubr.msk.bf16.mxu0 %vm320_vm1, %v33057_v63  ;;  %v2519_v63 = vld [vmem:[#allocation2 + $0x51] sm:$0xff] }
 0x1c5   : > { %27660 = vmatmul.mubr.msk.bf16.gmra.mrb[16].mxu0 %vm320_vm1, %v33063_v7  ;;  %v2520_v7 = vld [vmem:[#allocation2 + $0x61] sm:$0xff] }
 0x1c6   : > { %27663 = vmatprep.mubr.msk.bf16.mxu0 %vm320_vm1, %v33065_v8  ;;  %v2521_v8 = vld [vmem:[#allocation2 + $0x69] sm:$0xff] }
 0x1cd   : > { %27664 = vmatmul.mubr.msk.bf16.gmra.mrb[20].mxu0 %vm320_vm1, %v33071_v15  ;;  %v2549_v15 = vpack.c.bf16 %v2519_v63, %v2518_v60  ;;  %v33610_v63 = vld [vmem:[%s37581_s3 + $0x40] sm:$0xff]  }
 0x1ce   : > { %27667 = vmatprep.mubr.msk.bf16.mxu0 %vm320_vm1, %v33073_v18  ;;  %v2550_v18 = vpack.c.bf16 %v2521_v8, %v2520_v7 }
 0x1d5   : > { %27668 = vmatmul.mubr.msk.bf16.gmra.mrb[24].mxu0 %vm320_vm1, %v33083_v26  ;;  %v2909_v26 = vsel %vm668_vm0, %v24246_v33, 0 }
 0x1d6   : > { %27671 = vmatprep.mubr.msk.bf16.mxu0 %vm320_vm1, %v33189_v12 }
 0x1dd   : > { %27672 = vmatmul.mubr.msk.bf16.gmra.mrb[28].mxu0 %vm320_vm1, %v2269_v47 }
 0x1de   : > { %27677 = vmatprep.mubr.msk.bf16.mxu0 %vm320_vm1, %v2548_v52 }
 0x1e5   : > { %27678 = vmatmul.mubr.msk.bf16.vlgmr.msra.gmra.mrb[0].mxu0 %vm320_vm1, %v2549_v15 }
 0x1e6   : > { %27710 = vmatpush3.bf16.msra.mxu0 %v2909_v26  ;;  %27681 = vmatprep.mubr.msk.bf16.mxu0 %vm320_vm1, %v2550_v18 }
 0x1ed   : > { %27682 = vmatmul.mubr.msk.bf16.gmra.mrb[4].mxu0 %vm320_vm1, %v32969_v55  ;;  %v2546_v55 = vld [vmem:[#allocation2 + $0x199] sm:$0xff] }
 0x1ee   : > { %27685 = vmatprep.mubr.msk.bf16.mxu0 %vm320_vm1, %v32971_v56  ;;  %v2547_v56 = vld [vmem:[#allocation2 + $0x1a1] sm:$0xff] }
 0x1f5   : > { %27686 = vmatmul.mubr.msk.bf16.gmra.mrb[8].mxu0 %vm320_vm1, %v32977_v61  ;;  %v2563_v61 = vpack.c.bf16 %v2547_v56, %v2546_v55 }
 0x1f6   : > { %27689 = vmatprep.mubr.msk.bf16.mxu0 %vm320_vm1, %v32979_v62  ;;  %v2840_v62 = vld [vmem:[#allocation2 + $0x19a] sm:$0xff] }
 0x1fd   : > { %27690 = vmatmul.mubr.msk.bf16.gmra.mrb[12].mxu0 %vm320_vm1, %v32985_v4  ;;  %v2841_v4 = vld [vmem:[#allocation2 + $0x1a2] sm:$0xff] }
 0x1fe   : > { %27693 = vmatprep.mubr.msk.bf16.mxu0 %vm320_vm1, %v32987_v5  ;;  %v2857_v5 = vpack.c.bf16 %v2841_v4, %v2840_v62 }
 0x205   : > { %27694 = vmatmul.mubr.msk.bf16.gmra.mrb[16].mxu0 %vm320_vm1, %v32993_v10  ;;  %v33389_v10 = vld [vmem:[%s37581_s3 + $0x28] sm:$0xff]  }
 0x206   : > { %27697 = vmatprep.mubr.msk.bf16.mxu0 %vm320_vm1, %v32995_v11  ;;  %27745 = vmatprep.subr.bf16.mxu1 %v33389_v10  ;;  %v32331_v11 = vld [vmem:[%s37581_s3 + $0x30] sm:$0xff]  }
 0x207   : > { %27746 = vmatpush3.bf16.msra.mxu1 %v33389_v10 }
 0x208   : > { %27747 = vmatprep.subr.bf16.mxu1 %v32331_v11 }
 0x20b   : > { %27748 = vmatpush3.bf16.msra.mxu1 %v32331_v11 }
 0x20d   : > { %27698 = vmatmul.mubr.msk.bf16.gmra.mrb[20].mxu0 %vm320_vm1, %v33001_v16  ;;  %v32332_v16 = vld [vmem:[%s37581_s3 + $0x38] sm:$0xff]  }
 0x20e   : > { %27701 = vmatprep.mubr.msk.bf16.mxu0 %vm320_vm1, %v33003_v17  ;;  %27749 = vmatprep.subr.bf16.mxu1 %v32332_v16  ;;  %v3232_v17 = vld [vmem:[#allocation3 + $0x1] sm:$0xff] }
 0x20f   : > { %27750 = vmatpush3.bf16.msra.mxu1 %v32332_v16 }
 0x215   : > { %27702 = vmatmul.mubr.msk.bf16.gmra.mrb[24].mxu0 %vm320_vm1, %v33009_v22  ;;  %v3233_v22 = vld [vmem:[#allocation3 + $0x9] sm:$0xff] }
 0x216   : > { %27705 = vmatprep.mubr.msk.bf16.mxu0 %vm320_vm1, %v33228_v43  ;;  %v32335_v43 = vld [vmem:[%s37581_s3 + $0x10] sm:$0xff]  }
 0x21d   : > { %27706 = vmatmul.mubr.msk.bf16.gmra.mrb[28].mxu0 %vm320_vm1, %v2563_v61 }
 0x21e   : > { %27711 = vmatprep.mubr.msk.bf16.mxu0 %vm320_vm1, %v33092_v41  ;;  %v3264_v41 = vpack.c.bf16 %v3233_v22, %v3232_v17 }
 0x220   : > { %27751 = vmatprep.mubr.msk.bf16.mxu1 %vm366_vm4, %v3264_v41 }
 0x225   : > { %27712 = vmatmul.mubr.msk.bf16.vlgmr.msra.gmra.mrb[0].mxu0 %vm320_vm1, %v33102_v31  ;;  %v32333_v31 = vld [vmem:[%s37581_s3] sm:$0xff]  }
 0x226   : > { %27715 = vmatprep.mubr.msk.bf16.mxu0 %vm320_vm1, %v33104_v51  ;;  %27783 = vmatprep.subr.bf16.mxu1 %v32333_v31 }
 0x22d   : > { %27716 = vmatmul.mubr.msk.bf16.gmra.mrb[4].mxu0 %vm320_vm1, %v33110_v0 }
 0x22e   : > { %27719 = vmatprep.mubr.msk.bf16.mxu0 %vm320_vm1, %v33112_v1 }
 0x235   : > { %27720 = vmatmul.mubr.msk.bf16.gmra.mrb[8].mxu0 %vm320_vm1, %v33118_v13 }
 0x236   : > { %27723 = vmatprep.mubr.msk.bf16.mxu0 %vm320_vm1, %v33120_v14 }
 0x23d   : > { %27724 = vmatmul.mubr.msk.bf16.gmra.mrb[12].mxu0 %vm320_vm1, %v33126_v24 }
 0x23e   : > { %27727 = vmatprep.mubr.msk.bf16.mxu0 %vm320_vm1, %v33128_v25 }
 0x245   : > { %27728 = vmatmul.mubr.msk.bf16.gmra.mrb[16].mxu0 %vm320_vm1, %v33134_v35 }
 0x246   : > { %27731 = vmatprep.mubr.msk.bf16.mxu0 %vm320_vm1, %v33136_v36 }
 0x24d   : > { %27732 = vmatmul.mubr.msk.bf16.gmra.mrb[20].mxu0 %vm320_vm1, %v33142_v54 }
 0x24e   : > { %27735 = vmatprep.mubr.msk.bf16.mxu0 %vm320_vm1, %v33144_v57 }
 0x255   : > { %27736 = vmatmul.mubr.msk.bf16.gmra.mrb[24].mxu0 %vm320_vm1, %v33150_v3 }
 0x256   : > { %27739 = vmatprep.mubr.msk.bf16.mxu0 %vm320_vm1, %v33267_v27 }
 0x25d   : > { %27740 = vmatmul.mubr.msk.bf16.gmra.mrb[28].mxu0 %vm320_vm1, %v2857_v5 }
 0x2f8   : > { %v27713_v51 = vpop.f32.mrb[0].mxu0 }
 0x2f9   : > { %v3112_v0 = vadd.f32 %v27713_v51, %v33554_v2  ;;  %v2945_v1 = vpop.f32.mrb[1].mxu0 }
 0x2fa   : > { %v3110_v13 = vadd.f32 %v33554_v2, %v2945_v1  ;;  %v27714_v14 = vpop.f32.mrb[2].mxu0 }
 0x2fb   : > { %3145 = vst.msk [vmem:[#allocation3 + $0x31] sm:$0xff] %vm366_vm4, %v3112_v0  ;;  %v3113_v24 = vadd.f32 %v27714_v14, %v33554_v2  ;;  %v2948_v25 = vpop.f32.mrb[3].mxu0 }
 0x2fc   : > { %3143 = vst.msk [vmem:[#allocation3 + $0x19] sm:$0xff] %vm366_vm4, %v3110_v13  ;;  %v3111_v34 = vadd.f32 %v33554_v2, %v2948_v25 }
 0x2fd   : > { %3146 = vst.msk [vmem:[#allocation3 + $0x39] sm:$0xff] %vm366_vm4, %v3113_v24 }
 0x2fe   : > { %3144 = vst.msk [vmem:[#allocation3 + $0x21] sm:$0xff] %vm366_vm4, %v3111_v34 }
 0x300   : > { %v27717_v35 = vpop.f32.mrb[4].mxu0 }
 0x301   : > { %v3116_v36 = vadd.f32 %v27717_v35, %v33554_v2  ;;  %v2961_v45 = vpop.f32.mrb[5].mxu0 }
 0x302   : > { %v3114_v48 = vadd.f32 %v33554_v2, %v2961_v45  ;;  %v27718_v49 = vpop.f32.mrb[6].mxu0  ;;  %v3236_v9 = vld [vmem:[#allocation3 + $0x31] sm:$0xff] }
 0x303   : > { %3149 = vst.msk [vmem:[#allocation3 + $0x61] sm:$0xff] %vm366_vm4, %v3116_v36  ;;  %v3117_v50 = vadd.f32 %v27718_v49, %v33554_v2  ;;  %v2964_v54 = vpop.f32.mrb[7].mxu0  ;;  %v3234_v59 = vld [vmem:[#allocation3 + $0x19] sm:$0xff] }
 0x304   : > { %3147 = vst.msk [vmem:[#allocation3 + $0x49] sm:$0xff] %vm366_vm4, %v3114_v48  ;;  %v3115_v57 = vadd.f32 %v33554_v2, %v2964_v54  ;;  %v3237_v58 = vld [vmem:[#allocation3 + $0x39] sm:$0xff] }
 0x305   : > { %3150 = vst.msk [vmem:[#allocation3 + $0x69] sm:$0xff] %vm366_vm4, %v3117_v50  ;;  %v3235_v3 = vld [vmem:[#allocation3 + $0x21] sm:$0xff]  ;;  %v33577_v42 = vpack.c.bf16 %v3237_v58, %v3236_v9 }
 0x306   : > { %3148 = vst.msk [vmem:[#allocation3 + $0x51] sm:$0xff] %vm366_vm4, %v3115_v57  ;;  %v33572_v6 = vpack.c.bf16 %v3235_v3, %v3234_v59 }
 0x308   : > { %v27721_v12 = vpop.f32.mrb[8].mxu0  ;;  %27752 = vmatmul.mubr.msk.bf16.vlgmr.msra.gmra.mrb[0].mxu1 %vm366_vm4, %v33572_v6 }
 0x309   : > { %v3120_v19 = vadd.f32 %v27721_v12, %v33554_v2  ;;  %27784 = vmatpush3.bf16.msra.mxu1 %v32333_v31  ;;  %v2977_v20 = vpop.f32.mrb[9].mxu0  ;;  %27755 = vmatprep.mubr.msk.bf16.mxu1 %vm366_vm4, %v33577_v42 }
 0x30a   : > { %v3118_v32 = vadd.f32 %v33554_v2, %v2977_v20  ;;  %v27722_v37 = vpop.f32.mrb[10].mxu0  ;;  %27785 = vmatprep.subr.bf16.mxu1 %v32334_v29  ;;  %v3240_v30 = vld [vmem:[#allocation3 + $0x61] sm:$0xff] }
 0x30b   : > { %3153 = vst.msk [vmem:[#allocation3 + $0x91] sm:$0xff] %vm366_vm4, %v3120_v19  ;;  %v3121_v44 = vadd.f32 %v27722_v37, %v33554_v2  ;;  %v2980_v21 = vpop.f32.mrb[11].mxu0  ;;  %v3238_v27 = vld [vmem:[#allocation3 + $0x49] sm:$0xff] }
 0x30c   : > { %3151 = vst.msk [vmem:[#allocation3 + $0x79] sm:$0xff] %vm366_vm4, %v3118_v32  ;;  %v3119_v40 = vadd.f32 %v33554_v2, %v2980_v21  ;;  %v3241_v23 = vld [vmem:[#allocation3 + $0x69] sm:$0xff] }
 0x30d   : > { %3154 = vst.msk [vmem:[#allocation3 + $0x99] sm:$0xff] %vm366_vm4, %v3121_v44  ;;  %v3239_v28 = vld [vmem:[#allocation3 + $0x51] sm:$0xff]  ;;  %27786 = vmatpush3.bf16.msra.mxu1 %v32334_v29  ;;  %v33599_v39 = vpack.c.bf16 %v3241_v23, %v3240_v30 }
 0x30e   : > { %3152 = vst.msk [vmem:[#allocation3 + $0x81] sm:$0xff] %vm366_vm4, %v3119_v40  ;;  %v33594_v33 = vpack.c.bf16 %v3239_v28, %v3238_v27  ;;  %27787 = vmatprep.subr.bf16.mxu1 %v32335_v43 }
 0x310   : > { %v27725_v46 = vpop.f32.mrb[12].mxu0  ;;  %27756 = vmatmul.mubr.msk.bf16.gmra.mrb[4].mxu1 %vm366_vm4, %v33594_v33 }
 0x311   : > { %v3124_v47 = vadd.f32 %v27725_v46, %v33554_v2  ;;  %v2993_v52 = vpop.f32.mrb[13].mxu0  ;;  %27759 = vmatprep.mubr.msk.bf16.mxu1 %vm366_vm4, %v33599_v39  ;;  %27788 = vmatpush3.bf16.msra.mxu1 %v32335_v43 }
 0x312   : > { %v3122_v53 = vadd.f32 %v33554_v2, %v2993_v52  ;;  %v27726_v60 = vpop.f32.mrb[14].mxu0  ;;  %27789 = vmatprep.subr.bf16.mxu1 %v32336_v38  ;;  %v3244_v61 = vld [vmem:[#allocation3 + $0x91] sm:$0xff] }
 0x313   : > { %3157 = vst.msk [vmem:[#allocation3 + $0xc1] sm:$0xff] %vm366_vm4, %v3124_v47  ;;  %v3125_v7 = vadd.f32 %v27726_v60, %v33554_v2  ;;  %v2996_v8 = vpop.f32.mrb[15].mxu0  ;;  %v3242_v26 = vld [vmem:[#allocation3 + $0x79] sm:$0xff] }
 0x314   : > { %3155 = vst.msk [vmem:[#allocation3 + $0xa9] sm:$0xff] %vm366_vm4, %v3122_v53  ;;  %v3123_v15 = vadd.f32 %v33554_v2, %v2996_v8  ;;  %v3245_v18 = vld [vmem:[#allocation3 + $0x99] sm:$0xff] }
 0x315   : > { %3158 = vst.msk [vmem:[#allocation3 + $0xc9] sm:$0xff] %vm366_vm4, %v3125_v7  ;;  %v3243_v55 = vld [vmem:[#allocation3 + $0x81] sm:$0xff]  ;;  %27790 = vmatpush3.bf16.msra.mxu1 %v32336_v38  ;;  %v33621_v62 = vpack.c.bf16 %v3245_v18, %v3244_v61 }
 0x316   : > { %3156 = vst.msk [vmem:[#allocation3 + $0xb1] sm:$0xff] %vm366_vm4, %v3123_v15  ;;  %v33618_v56 = vpack.c.bf16 %v3243_v55, %v3242_v26  ;;  %27823 = vmatprep.subr.bf16.mxu1 %v33610_v63 }
 0x318   : > { %v27729_v4 = vpop.f32.mrb[16].mxu0  ;;  %27760 = vmatmul.mubr.msk.bf16.gmra.mrb[8].mxu1 %vm366_vm4, %v33618_v56 }
 0x319   : > { %v3128_v5 = vadd.f32 %v27729_v4, %v33554_v2  ;;  %v3009_v10 = vpop.f32.mrb[17].mxu0  ;;  %27763 = vmatprep.mubr.msk.bf16.mxu1 %vm366_vm4, %v33621_v62  ;;  %v3176_v4 = vld [vmem:[#allocation3] sm:$0xff] }
 0x31a   : > { %v3126_v11 = vadd.f32 %v33554_v2, %v3009_v10  ;;  %v27730_v16 = vpop.f32.mrb[18].mxu0  ;;  %v3248_v13 = vld [vmem:[#allocation3 + $0xc1] sm:$0xff] }
 0x31b   : > { %3161 = vst.msk [vmem:[#allocation3 + $0xf1] sm:$0xff] %vm366_vm4, %v3128_v5  ;;  %v3129_v17 = vadd.f32 %v27730_v16, %v33554_v2  ;;  %v3012_v22 = vpop.f32.mrb[19].mxu0  ;;  %v3246_v51 = vld [vmem:[#allocation3 + $0xa9] sm:$0xff] }
 0x31c   : > { %3159 = vst.msk [vmem:[#allocation3 + $0xd9] sm:$0xff] %vm366_vm4, %v3126_v11  ;;  %v3127_v41 = vadd.f32 %v33554_v2, %v3012_v22  ;;  %v3249_v31 = vld [vmem:[#allocation3 + $0xc9] sm:$0xff]  ;;  %v3181_v22 = vld [vmem:[#allocation3 + $0x38] sm:$0xff] }
 0x31d   : > { %3162 = vst.msk [vmem:[#allocation3 + $0xf9] sm:$0xff] %vm366_vm4, %v3129_v17  ;;  %v3247_v0 = vld [vmem:[#allocation3 + $0xb1] sm:$0xff]  ;;  %v33637_v14 = vpack.c.bf16 %v3249_v31, %v3248_v13  ;;  %v3179_v17 = vld [vmem:[#allocation3 + $0x20] sm:$0xff] }
 0x31e   : > { %3160 = vst.msk [vmem:[#allocation3 + $0xe1] sm:$0xff] %vm366_vm4, %v3127_v41  ;;  %v33635_v1 = vpack.c.bf16 %v3247_v0, %v3246_v51  ;;  %v3178_v41 = vld [vmem:[#allocation3 + $0x18] sm:$0xff]  ;;  %v3180_v51 = vld [vmem:[#allocation3 + $0x30] sm:$0xff] }
 0x31f   : > { %v33696_v31 = vpack.c.bf16 %v3179_v17, %v3178_v41  ;;  %v32338_v0 = vld [vmem:[%s37581_s3 + $0x48] sm:$0xff]   ;;  %v33701_v13 = vpack.c.bf16 %v3181_v22, %v3180_v51 }
 0x320   : > { %v27733_v24 = vpop.f32.mrb[20].mxu0  ;;  %27764 = vmatmul.mubr.msk.bf16.gmra.mrb[12].mxu1 %vm366_vm4, %v33635_v1  ;;  %v3757_v51 = vld [vmem:[#allocation3 + $0x1a] sm:$0xff] }
 0x321   : > { %v3132_v25 = vadd.f32 %v27733_v24, %v33554_v2  ;;  %v3025_v34 = vpop.f32.mrb[21].mxu0  ;;  %27767 = vmatprep.mubr.msk.bf16.mxu1 %vm366_vm4, %v33637_v14  ;;  %v32339_v24 = vld [vmem:[%s37581_s3 + $0x50] sm:$0xff]  }
 0x322   : > { %v3130_v35 = vadd.f32 %v33554_v2, %v3025_v34  ;;  %v27734_v36 = vpop.f32.mrb[22].mxu0  ;;  %v3252_v59 = vld [vmem:[#allocation3 + $0xf1] sm:$0xff]  ;;  %v3185_v34 = vld [vmem:[#allocation3 + $0x68] sm:$0xff] }
 0x323   : > { %3165 = vst.msk [vmem:[#allocation3 + $0x121] sm:$0xff] %vm366_vm4, %v3132_v25  ;;  %v3133_v45 = vadd.f32 %v27734_v36, %v33554_v2  ;;  %v3028_v48 = vpop.f32.mrb[23].mxu0  ;;  %v3250_v54 = vld [vmem:[#allocation3 + $0xd9] sm:$0xff]  ;;  %v3183_v25 = vld [vmem:[#allocation3 + $0x50] sm:$0xff] }
 0x324   : > { %3163 = vst.msk [vmem:[#allocation3 + $0x109] sm:$0xff] %vm366_vm4, %v3130_v35  ;;  %v3131_v49 = vadd.f32 %v33554_v2, %v3028_v48  ;;  %v3253_v50 = vld [vmem:[#allocation3 + $0xf9] sm:$0xff]  ;;  %v3182_v35 = vld [vmem:[#allocation3 + $0x48] sm:$0xff] }
 0x325   : > { %3166 = vst.msk [vmem:[#allocation3 + $0x129] sm:$0xff] %vm366_vm4, %v3133_v45  ;;  %v3251_v57 = vld [vmem:[#allocation3 + $0xe1] sm:$0xff]  ;;  %v33653_v3 = vpack.c.bf16 %v3253_v50, %v3252_v59  ;;  %v33711_v36 = vpack.c.bf16 %v3183_v25, %v3182_v35  ;;  %v32342_v35 = vld [vmem:[%s37581_s3 + $0x68] sm:$0xff]  }
 0x326   : > { %3164 = vst.msk [vmem:[#allocation3 + $0x111] sm:$0xff] %vm366_vm4, %v3131_v49  ;;  %v33651_v58 = vpack.c.bf16 %v3251_v57, %v3250_v54  ;;  %v3184_v45 = vld [vmem:[#allocation3 + $0x60] sm:$0xff]  ;;  %v32341_v49 = vld [vmem:[%s37581_s3 + $0x60] sm:$0xff]   ;;  %v3189_v54 = vld [vmem:[#allocation3 + $0x98] sm:$0xff] }
 0x327   : > { %v33716_v48 = vpack.c.bf16 %v3185_v34, %v3184_v45  ;;  %v3187_v50 = vld [vmem:[#allocation3 + $0x80] sm:$0xff]  ;;  %v3186_v57 = vld [vmem:[#allocation3 + $0x78] sm:$0xff] }
 0x328   : > { %v27737_v9 = vpop.f32.mrb[24].mxu0  ;;  %27768 = vmatmul.mubr.msk.bf16.gmra.mrb[16].mxu1 %vm366_vm4, %v33651_v58  ;;  %v33725_v59 = vpack.c.bf16 %v3187_v50, %v3186_v57  ;;  %v3760_v25 = vld [vmem:[#allocation3 + $0x3a] sm:$0xff]  ;;  %v3761_v50 = vld [vmem:[#allocation3 + $0x4a] sm:$0xff]  ;;  %v3763_v57 = vld [vmem:[#allocation3 + $0x62] sm:$0xff] }
 0x329   : > { %v3136_v29 = vadd.f32 %v27737_v9, %v33554_v2  ;;  %v3041_v12 = vpop.f32.mrb[25].mxu0  ;;  %27771 = vmatprep.mubr.msk.bf16.mxu1 %vm366_vm4, %v33653_v3  ;;  %v3188_v9 = vld [vmem:[#allocation3 + $0x90] sm:$0xff] }
 0x32a   : > { %v3134_v19 = vadd.f32 %v33554_v2, %v3041_v12  ;;  %v27738_v20 = vpop.f32.mrb[26].mxu0  ;;  %v3256_v27 = vld [vmem:[#allocation3 + $0x121] sm:$0xff]  ;;  %v3191_v12 = vld [vmem:[#allocation3 + $0xb0] sm:$0xff] }
 0x32b   : > { %3169 = vst.msk [vmem:[#allocation3 + $0x151] sm:$0xff] %vm366_vm4, %v3136_v29  ;;  %v3137_v32 = vadd.f32 %v27738_v20, %v33554_v2  ;;  %v3044_v37 = vpop.f32.mrb[27].mxu0  ;;  %v3254_v21 = vld [vmem:[#allocation3 + $0x109] sm:$0xff]  ;;  %v33727_v29 = vpack.c.bf16 %v3189_v54, %v3188_v9  ;;  %v3762_v54 = vld [vmem:[#allocation3 + $0x52] sm:$0xff] }
 0x32c   : > { %3167 = vst.msk [vmem:[#allocation3 + $0x139] sm:$0xff] %vm366_vm4, %v3134_v19  ;;  %v3135_v43 = vadd.f32 %v33554_v2, %v3044_v37  ;;  %v3257_v44 = vld [vmem:[#allocation3 + $0x129] sm:$0xff]  ;;  %v3192_v37 = vld [vmem:[#allocation3 + $0xc0] sm:$0xff] }
 0x32d   : > { %3170 = vst.msk [vmem:[#allocation3 + $0x159] sm:$0xff] %vm366_vm4, %v3137_v32  ;;  %v3255_v40 = vld [vmem:[#allocation3 + $0x111] sm:$0xff]  ;;  %v33669_v28 = vpack.c.bf16 %v3257_v44, %v3256_v27  ;;  %v3193_v19 = vld [vmem:[#allocation3 + $0xc8] sm:$0xff]  ;;  %v3195_v44 = vld [vmem:[#allocation3 + $0xe0] sm:$0xff] }
 0x32e   : > { %3168 = vst.msk [vmem:[#allocation3 + $0x141] sm:$0xff] %vm366_vm4, %v3135_v43  ;;  %v33667_v23 = vpack.c.bf16 %v3255_v40, %v3254_v21  ;;  %v3190_v20 = vld [vmem:[#allocation3 + $0xa8] sm:$0xff]  ;;  %v33735_v43 = vpack.c.bf16 %v3193_v19, %v3192_v37  ;;  %v3197_v21 = vld [vmem:[#allocation3 + $0xf8] sm:$0xff] }
 0x32f   : > { %v33733_v32 = vpack.c.bf16 %v3191_v12, %v3190_v20  ;;  %v3194_v40 = vld [vmem:[#allocation3 + $0xd8] sm:$0xff]  ;;  %v3764_v9 = vld [vmem:[#allocation3 + $0x6a] sm:$0xff]  ;;  %v33784_v12 = vpack.c.bf16 %v3762_v54, %v3761_v50 }
 0x330   : > { %v27741_v30 = vpop.f32.mrb[28].mxu0  ;;  %27772 = vmatmul.mubr.msk.bf16.gmra.mrb[20].mxu1 %vm366_vm4, %v33667_v23  ;;  %v33741_v27 = vpack.c.bf16 %v3195_v44, %v3194_v40  ;;  %v33789_v19 = vpack.c.bf16 %v3764_v9, %v3763_v57  ;;  %v32345_v20 = vld [vmem:[%s37581_s3 + $0x80] sm:$0xff]   ;;  %v3765_v37 = vld [vmem:[#allocation3 + $0x7a] sm:$0xff]  ;;  %v3766_v44 = vld [vmem:[#allocation3 + $0x82] sm:$0xff] }
 0x331   : > { %v3140_v38 = vadd.f32 %v27741_v30, %v33554_v2  ;;  %v3057_v46 = vpop.f32.mrb[29].mxu0  ;;  %27775 = vmatprep.mubr.msk.bf16.mxu1 %vm366_vm4, %v33669_v28  ;;  %v3196_v30 = vld [vmem:[#allocation3 + $0xf0] sm:$0xff]  ;;  %v3768_v40 = vld [vmem:[#allocation3 + $0x9a] sm:$0xff] }
 0x332   : > { %v3138_v47 = vadd.f32 %v33554_v2, %v3057_v46  ;;  %v27742_v52 = vpop.f32.mrb[30].mxu0  ;;  %v3260_v55 = vld [vmem:[#allocation3 + $0x151] sm:$0xff] }
 0x333   : > { %3173 = vst.msk [vmem:[#allocation3 + $0x181] sm:$0xff] %vm366_vm4, %v3140_v38  ;;  %v3141_v53 = vadd.f32 %v27742_v52, %v33554_v2  ;;  %v3060_v60 = vpop.f32.mrb[31].mxu0  ;;  %v3258_v15 = vld [vmem:[#allocation3 + $0x139] sm:$0xff]  ;;  %v33743_v38 = vpack.c.bf16 %v3197_v21, %v3196_v30  ;;  %v3199_v46 = vld [vmem:[#allocation3 + $0x110] sm:$0xff]  ;;  %v3198_v52 = vld [vmem:[#allocation3 + $0x108] sm:$0xff]  ;;  %v33798_v30 = vpack.c.bf16 %v3766_v44, %v3765_v37 }
 0x334   : > { %3171 = vst.msk [vmem:[#allocation3 + $0x169] sm:$0xff] %vm366_vm4, %v3138_v47  ;;  %v3139_v7 = vadd.f32 %v33554_v2, %v3060_v60  ;;  %v3261_v8 = vld [vmem:[#allocation3 + $0x159] sm:$0xff]  ;;  %v3177_v2 = vld [vmem:[#allocation3 + $0x8] sm:$0xff] }
 0x335   : > { %3174 = vst.msk [vmem:[#allocation3 + $0x189] sm:$0xff] %vm366_vm4, %v3141_v53  ;;  %v3259_v18 = vld [vmem:[#allocation3 + $0x141] sm:$0xff]  ;;  %v33685_v61 = vpack.c.bf16 %v3261_v8, %v3260_v55  ;;  %v3208_v11 = vpack.c.bf16 %v3177_v2, %v3176_v4  ;;  %v33749_v53 = vpack.c.bf16 %v3199_v46, %v3198_v52  ;;  %v3204_v4 = vld [vmem:[#allocation3 + $0x150] sm:$0xff] }
 0x336   : > { %3172 = vst.msk [vmem:[#allocation3 + $0x171] sm:$0xff] %vm366_vm4, %v3139_v7  ;;  %v33683_v26 = vpack.c.bf16 %v3259_v18, %v3258_v15  ;;  %v3201_v47 = vld [vmem:[#allocation3 + $0x128] sm:$0xff]  ;;  %v3200_v60 = vld [vmem:[#allocation3 + $0x120] sm:$0xff]  ;;  %v3205_v15 = vld [vmem:[#allocation3 + $0x158] sm:$0xff] }
 0x337   : > { %v33751_v7 = vpack.c.bf16 %v3201_v47, %v3200_v60  ;;  %v3203_v8 = vld [vmem:[#allocation3 + $0x140] sm:$0xff]  ;;  %v3202_v18 = vld [vmem:[#allocation3 + $0x138] sm:$0xff]  ;;  %v33759_v2 = vpack.c.bf16 %v3205_v15, %v3204_v4  ;;  %v3769_v47 = vld [vmem:[#allocation3 + $0xaa] sm:$0xff] }
 0x338   : > { %27776 = vmatmul.mubr.msk.bf16.gmra.mrb[24].mxu1 %vm366_vm4, %v33683_v26  ;;  %v33757_v55 = vpack.c.bf16 %v3203_v8, %v3202_v18  ;;  %v3767_v21 = vld [vmem:[#allocation3 + $0x92] sm:$0xff]  ;;  %v3771_v60 = vld [vmem:[#allocation3 + $0xc2] sm:$0xff]  ;;  %v3772_v8 = vld [vmem:[#allocation3 + $0xca] sm:$0xff] }
 0x339   : > { %27779 = vmatprep.mubr.msk.bf16.mxu1 %vm366_vm4, %v33685_v61  ;;  %v33800_v46 = vpack.c.bf16 %v3768_v40, %v3767_v21  ;;  %v3770_v52 = vld [vmem:[#allocation3 + $0xb2] sm:$0xff]  ;;  %v33808_v18 = vpack.c.bf16 %v3772_v8, %v3771_v60  ;;  %v3773_v4 = vld [vmem:[#allocation3 + $0xda] sm:$0xff]  ;;  %v3782_v54 = vld [vmem:[#allocation3 + $0x142] sm:$0xff] }
 0x33a   : > { %v33806_v15 = vpack.c.bf16 %v3770_v52, %v3769_v47  ;;  %v3781_v50 = vld [vmem:[#allocation3 + $0x13a] sm:$0xff]  ;;  %v3783_v57 = vld [vmem:[#allocation3 + $0x152] sm:$0xff] }
 0x33b   : > { %v3262_v5 = vld [vmem:[#allocation3 + $0x169] sm:$0xff]  ;;  %v3784_v9 = vld [vmem:[#allocation3 + $0x15a] sm:$0xff] }
 0x33c   : > { %v3206_v17 = vld [vmem:[#allocation3 + $0x168] sm:$0xff]  ;;  %v33832_v37 = vpack.c.bf16 %v3784_v9, %v3783_v57  ;;  %v32346_v47 = vld [vmem:[%s37581_s3 + $0x88] sm:$0xff]   ;;  %v32347_v52 = vld [vmem:[%s37581_s3 + $0x90] sm:$0xff]  }
 0x33d   : > { %v3263_v10 = vld [vmem:[#allocation3 + $0x171] sm:$0xff]  ;;  %v4108_v60 = vld [vmem:[#allocation3 + $0x188] sm:$0xff]  ;;  %v4107_v8 = vld [vmem:[#allocation3 + $0x180] sm:$0xff] }
 0x33e   : > { %v33691_v16 = vpack.c.bf16 %v3263_v10, %v3262_v5  ;;  %v3755_v5 = vld [vmem:[#allocation3 + $0x2] sm:$0xff]  ;;  %v3756_v10 = vld [vmem:[#allocation3 + $0xa] sm:$0xff]  ;;  %v3786_v21 = vld [vmem:[#allocation3 + $0x172] sm:$0xff] }
 0x33f   : > { %v3787_v22 = vpack.c.bf16 %v3756_v10, %v3755_v5  ;;  %v3774_v5 = vld [vmem:[#allocation3 + $0xe2] sm:$0xff]  ;;  %v3775_v10 = vld [vmem:[#allocation3 + $0xf2] sm:$0xff]  ;;  %v3785_v44 = vld [vmem:[#allocation3 + $0x16a] sm:$0xff] }
 0x340   : > { %27780 = vmatmul.mubr.msk.bf16.gmra.mrb[28].mxu1 %vm366_vm4, %v33691_v16  ;;  %v33838_v40 = vpack.c.bf16 %v3786_v21, %v3785_v44  ;;  %v5374_v57 = vld [vmem:[#allocation3 + $0x91] sm:$0xff]  ;;  %v32364_v9 = vld [vmem:[%s37581_s3 + $0x118] sm:$0xff]  }
 0x341   : > { %27791 = vmatprep.mubr.msk.bf16.mxu1 %vm366_vm4, %v3208_v11  ;;  %v3207_v11 = vld [vmem:[#allocation3 + $0x170] sm:$0xff] }
 0x342   : > { %v33765_v41 = vpack.c.bf16 %v3207_v11, %v3206_v17  ;;  %v3776_v11 = vld [vmem:[#allocation3 + $0xfa] sm:$0xff]  ;;  %v33814_v17 = vpack.c.bf16 %v3774_v5, %v3773_v4  ;;  %v33884_v4 = vpack.c.bf16 %v4108_v60, %v4107_v8  ;;  %v5377_v21 = vld [vmem:[#allocation3 + $0xb1] sm:$0xff] }
 0x343   : > { %v32350_v5 = vld [vmem:[%s37581_s3 + $0xa8] sm:$0xff]   ;;  %v5381_v8 = vld [vmem:[#allocation3 + $0xe1] sm:$0xff] }
 0x348   : > { %27792 = vmatmul.mubr.msk.bf16.vlgmr.msra.gmra.mrb[0].mxu1 %vm366_vm4, %v33696_v31 }
 0x349   : > { %27824 = vmatpush3.bf16.msra.mxu1 %v33610_v63  ;;  %27795 = vmatprep.mubr.msk.bf16.mxu1 %vm366_vm4, %v33701_v13  ;;  %v32340_v63 = vld [vmem:[%s37581_s3 + $0x58] sm:$0xff]  }
 0x34a   : > { %27825 = vmatprep.subr.bf16.mxu1 %v32338_v0 }
 0x34d   : > { %27826 = vmatpush3.bf16.msra.mxu1 %v32338_v0  ;;  %v3758_v0 = vld [vmem:[#allocation3 + $0x22] sm:$0xff] }
 0x34e   : > { %27827 = vmatprep.subr.bf16.mxu1 %v32339_v24  ;;  %v33770_v34 = vpack.c.bf16 %v3758_v0, %v3757_v51  ;;  %v3777_v51 = vld [vmem:[#allocation3 + $0x10a] sm:$0xff]  ;;  %v3778_v0 = vld [vmem:[#allocation3 + $0x112] sm:$0xff] }
 0x350   : > { %27796 = vmatmul.mubr.msk.bf16.gmra.mrb[4].mxu1 %vm366_vm4, %v33711_v36 }
 0x351   : > { %27799 = vmatprep.mubr.msk.bf16.mxu1 %vm366_vm4, %v33716_v48  ;;  %27828 = vmatpush3.bf16.msra.mxu1 %v32339_v24  ;;  %v3759_v24 = vld [vmem:[#allocation3 + $0x32] sm:$0xff] }
 0x352   : > { %27829 = vmatprep.subr.bf16.mxu1 %v32340_v63  ;;  %v33775_v45 = vpack.c.bf16 %v3760_v25, %v3759_v24  ;;  %v3779_v24 = vld [vmem:[#allocation3 + $0x122] sm:$0xff]  ;;  %v3780_v25 = vld [vmem:[#allocation3 + $0x12a] sm:$0xff] }
 0x355   : > { %27830 = vmatpush3.bf16.msra.mxu1 %v32340_v63  ;;  %v32343_v63 = vld [vmem:[%s37581_s3 + $0x70] sm:$0xff]  }
 0x356   : > { %27863 = vmatprep.subr.bf16.mxu1 %v32341_v49 }
 0x358   : > { %27800 = vmatmul.mubr.msk.bf16.gmra.mrb[8].mxu1 %vm366_vm4, %v33725_v59 }
 0x359   : > { %27803 = vmatprep.mubr.msk.bf16.mxu1 %vm366_vm4, %v33727_v29 }
 0x360   : > { %27804 = vmatmul.mubr.msk.bf16.gmra.mrb[12].mxu1 %vm366_vm4, %v33733_v32 }
 0x361   : > { %27807 = vmatprep.mubr.msk.bf16.mxu1 %vm366_vm4, %v33735_v43 }
 0x368   : > { %27808 = vmatmul.mubr.msk.bf16.gmra.mrb[16].mxu1 %vm366_vm4, %v33741_v27 }
 0x369   : > { %27811 = vmatprep.mubr.msk.bf16.mxu1 %vm366_vm4, %v33743_v38 }
 0x370   : > { %27812 = vmatmul.mubr.msk.bf16.gmra.mrb[20].mxu1 %vm366_vm4, %v33749_v53 }
 0x371   : > { %27815 = vmatprep.mubr.msk.bf16.mxu1 %vm366_vm4, %v33751_v7 }
 0x378   : > { %27816 = vmatmul.mubr.msk.bf16.gmra.mrb[24].mxu1 %vm366_vm4, %v33757_v55 }
 0x379   : > { %27819 = vmatprep.mubr.msk.bf16.mxu1 %vm366_vm4, %v33759_v2 }
 0x380   : > { %27820 = vmatmul.mubr.msk.bf16.gmra.mrb[28].mxu1 %vm366_vm4, %v33765_v41 }
 0x381   : > { %27831 = vmatprep.mubr.msk.bf16.mxu1 %vm366_vm4, %v3787_v22  ;;  %v33816_v22 = vpack.c.bf16 %v3776_v11, %v3775_v10  ;;  %v32351_v10 = vld [vmem:[%s37581_s3 + $0xb0] sm:$0xff]   ;;  %v32362_v11 = vld [vmem:[%s37581_s3 + $0x108] sm:$0xff]  }
 0x388   : > { %27832 = vmatmul.mubr.msk.bf16.vlgmr.msra.gmra.mrb[0].mxu1 %vm366_vm4, %v33770_v34 }
 0x389   : > { %27864 = vmatpush3.bf16.msra.mxu1 %v32341_v49  ;;  %27835 = vmatprep.mubr.msk.bf16.mxu1 %vm366_vm4, %v33775_v45  ;;  %v32344_v49 = vld [vmem:[%s37581_s3 + $0x78] sm:$0xff]  }
 0x38a   : > { %27865 = vmatprep.subr.bf16.mxu1 %v32342_v35 }
 0x38d   : > { %27866 = vmatpush3.bf16.msra.mxu1 %v32342_v35  ;;  %v33822_v35 = vpack.c.bf16 %v3778_v0, %v3777_v51  ;;  %v32363_v0 = vld [vmem:[%s37581_s3 + $0x110] sm:$0xff]  }
 0x38e   : > { %27867 = vmatprep.subr.bf16.mxu1 %v32343_v63 }
 0x390   : > { %27836 = vmatmul.mubr.msk.bf16.gmra.mrb[4].mxu1 %vm366_vm4, %v33784_v12 }
 0x391   : > { %27839 = vmatprep.mubr.msk.bf16.mxu1 %vm366_vm4, %v33789_v19  ;;  %27868 = vmatpush3.bf16.msra.mxu1 %v32343_v63  ;;  %v33824_v63 = vpack.c.bf16 %v3780_v25, %v3779_v24  ;;  %v5373_v24 = vld [vmem:[#allocation3 + $0x81] sm:$0xff]  ;;  %v5375_v25 = vld [vmem:[#allocation3 + $0x99] sm:$0xff] }
 0x392   : > { %27869 = vmatprep.subr.bf16.mxu1 %v32344_v49  ;;  %v5402_v44 = vpack.c.bf16 %v5375_v25, %v5374_v57 }
 0x395   : > { %27870 = vmatpush3.bf16.msra.mxu1 %v32344_v49  ;;  %v33830_v49 = vpack.c.bf16 %v3782_v54, %v3781_v50  ;;  %v5372_v50 = vld [vmem:[#allocation3 + $0x79] sm:$0xff] }
 0x396   : > { %27903 = vmatprep.subr.bf16.mxu1 %v32345_v20  ;;  %v5401_v54 = vpack.c.bf16 %v5373_v24, %v5372_v50 }
 0x398   : > { %27840 = vmatmul.mubr.msk.bf16.gmra.mrb[8].mxu1 %vm366_vm4, %v33798_v30 }
 0x399   : > { %27843 = vmatprep.mubr.msk.bf16.mxu1 %vm366_vm4, %v33800_v46 }
 0x3a0   : > { %27844 = vmatmul.mubr.msk.bf16.gmra.mrb[12].mxu1 %vm366_vm4, %v33806_v15 }
 0x3a1   : > { %27847 = vmatprep.mubr.msk.bf16.mxu1 %vm366_vm4, %v33808_v18 }
 0x3a8   : > { %27848 = vmatmul.mubr.msk.bf16.gmra.mrb[16].mxu1 %vm366_vm4, %v33814_v17 }
 0x3a9   : > { %27851 = vmatprep.mubr.msk.bf16.mxu1 %vm366_vm4, %v33816_v22 }
 0x3b0   : > { %27852 = vmatmul.mubr.msk.bf16.gmra.mrb[20].mxu1 %vm366_vm4, %v33822_v35 }
 0x3b1   : > { %27855 = vmatprep.mubr.msk.bf16.mxu1 %vm366_vm4, %v33824_v63 }
 0x3b8   : > { %27856 = vmatmul.mubr.msk.bf16.gmra.mrb[24].mxu1 %vm366_vm4, %v33830_v49 }
 0x3b9   : > { %27859 = vmatprep.mubr.msk.bf16.mxu1 %vm366_vm4, %v33832_v37 }
 0x3c0   : > { %27860 = vmatmul.mubr.msk.bf16.gmra.mrb[28].mxu1 %vm366_vm4, %v33838_v40 }
 0x3c1   : > { %27871 = vmatprep.mubr.msk.bf16.mxu1 %vm366_vm4, %v33696_v31  ;;  %v32348_v31 = vld [vmem:[%s37581_s3 + $0x98] sm:$0xff]  }
 0x3c8   : > { %27872 = vmatmul.mubr.msk.bf16.vlgmr.msra.gmra.mrb[0].mxu1 %vm366_vm4, %v33701_v13 }
 0x3c9   : > { %27904 = vmatpush3.bf16.msra.mxu1 %v32345_v20  ;;  %27875 = vmatprep.mubr.msk.bf16.mxu1 %vm366_vm4, %v33711_v36  ;;  %v32349_v20 = vld [vmem:[%s37581_s3 + $0xa0] sm:$0xff]  }
 0x3ca   : > { %27905 = vmatprep.subr.bf16.mxu1 %v32346_v47 }
 0x3cd   : > { %27906 = vmatpush3.bf16.msra.mxu1 %v32346_v47  ;;  %v5379_v47 = vld [vmem:[#allocation3 + $0xc9] sm:$0xff] }
 0x3ce   : > { %27907 = vmatprep.subr.bf16.mxu1 %v32347_v52 }
 0x3d0   : > { %27876 = vmatmul.mubr.msk.bf16.gmra.mrb[4].mxu1 %vm366_vm4, %v33716_v48 }
 0x3d1   : > { %27879 = vmatprep.mubr.msk.bf16.mxu1 %vm366_vm4, %v33725_v59  ;;  %27908 = vmatpush3.bf16.msra.mxu1 %v32347_v52  ;;  %v5376_v52 = vld [vmem:[#allocation3 + $0xa9] sm:$0xff] }
 0x3d2   : > { %27909 = vmatprep.subr.bf16.mxu1 %v32348_v31 }
 0x3d5   : > { %27910 = vmatpush3.bf16.msra.mxu1 %v32348_v31  ;;  %v5403_v31 = vpack.c.bf16 %v5377_v21, %v5376_v52 }
 0x3d6   : > { %27943 = vmatprep.subr.bf16.mxu1 %v32349_v20 }
 0x3d8   : > { %27880 = vmatmul.mubr.msk.bf16.gmra.mrb[8].mxu1 %vm366_vm4, %v33727_v29 }
 0x3d9   : > { %27883 = vmatprep.mubr.msk.bf16.mxu1 %vm366_vm4, %v33733_v32 }
 0x3e0   : > { %27884 = vmatmul.mubr.msk.bf16.gmra.mrb[12].mxu1 %vm366_vm4, %v33735_v43 }
 0x3e1   : > { %27887 = vmatprep.mubr.msk.bf16.mxu1 %vm366_vm4, %v33741_v27 }
 0x3e8   : > { %27888 = vmatmul.mubr.msk.bf16.gmra.mrb[16].mxu1 %vm366_vm4, %v33743_v38 }
 0x3e9   : > { %27891 = vmatprep.mubr.msk.bf16.mxu1 %vm366_vm4, %v33749_v53 }
 0x3f0   : > { %27892 = vmatmul.mubr.msk.bf16.gmra.mrb[20].mxu1 %vm366_vm4, %v33751_v7 }
 0x3f1   : > { %27895 = vmatprep.mubr.msk.bf16.mxu1 %vm366_vm4, %v33757_v55 }
 0x3f8   : > { %27896 = vmatmul.mubr.msk.bf16.gmra.mrb[24].mxu1 %vm366_vm4, %v33759_v2 }
 0x3f9   : > { %27899 = vmatprep.mubr.msk.bf16.mxu1 %vm366_vm4, %v33765_v41 }
 0x400   : > { %27900 = vmatmul.mubr.msk.bf16.gmra.mrb[28].mxu1 %vm366_vm4, %v33884_v4 }
 0x401   : > { %27911 = vmatprep.mubr.msk.bf16.mxu1 %vm366_vm4, %v33572_v6  ;;  %v32352_v6 = vld [vmem:[%s37581_s3 + $0xb8] sm:$0xff]  }
 0x408   : > { %27912 = vmatmul.mubr.msk.bf16.vlgmr.msra.gmra.mrb[0].mxu1 %vm366_vm4, %v33577_v42  ;;  %v32353_v42 = vld [vmem:[%s37581_s3 + $0xc0] sm:$0xff]  }
 0x409   : > { %27944 = vmatpush3.bf16.msra.mxu1 %v32349_v20  ;;  %27915 = vmatprep.mubr.msk.bf16.mxu1 %vm366_vm4, %v33594_v33  ;;  %v4430_v33 = vld [vmem:[#allocation3 + $0x189] sm:$0xff]  ;;  %v5378_v20 = vld [vmem:[#allocation3 + $0xc1] sm:$0xff] }
 0x40a   : > { %27945 = vmatprep.subr.bf16.mxu1 %v32350_v5  ;;  %v5404_v60 = vpack.c.bf16 %v5379_v47, %v5378_v20 }
 0x40d   : > { %27946 = vmatpush3.bf16.msra.mxu1 %v32350_v5  ;;  %v5380_v5 = vld [vmem:[#allocation3 + $0xd9] sm:$0xff] }
 0x40e   : > { %27947 = vmatprep.subr.bf16.mxu1 %v32351_v10 }
 0x410   : > { %27916 = vmatmul.mubr.msk.bf16.gmra.mrb[4].mxu1 %vm366_vm4, %v33599_v39  ;;  %v4429_v39 = vld [vmem:[#allocation3 + $0x181] sm:$0xff] }
 0x411   : > { %27919 = vmatprep.mubr.msk.bf16.mxu1 %vm366_vm4, %v33618_v56  ;;  %27948 = vmatpush3.bf16.msra.mxu1 %v32351_v10  ;;  %v33930_v56 = vpack.c.bf16 %v4430_v33, %v4429_v39  ;;  %v5405_v10 = vpack.c.bf16 %v5381_v8, %v5380_v5  ;;  %v5385_v33 = vld [vmem:[#allocation3 + $0x111] sm:$0xff]  ;;  %v5387_v39 = vld [vmem:[#allocation3 + $0x129] sm:$0xff] }
 0x412   : > { %27949 = vmatprep.subr.bf16.mxu1 %v32352_v6 }
 0x415   : > { %27950 = vmatpush3.bf16.msra.mxu1 %v32352_v6  ;;  %v5382_v6 = vld [vmem:[#allocation3 + $0xf1] sm:$0xff] }
 0x416   : > { %27983 = vmatprep.subr.bf16.mxu1 %v32353_v42 }
 0x418   : > { %27920 = vmatmul.mubr.msk.bf16.gmra.mrb[8].mxu1 %vm366_vm4, %v33621_v62  ;;  %v32354_v62 = vld [vmem:[%s37581_s3 + $0xc8] sm:$0xff]  }
 0x419   : > { %27923 = vmatprep.mubr.msk.bf16.mxu1 %vm366_vm4, %v33635_v1  ;;  %v32355_v1 = vld [vmem:[%s37581_s3 + $0xd0] sm:$0xff]  }
 0x420   : > { %27924 = vmatmul.mubr.msk.bf16.gmra.mrb[12].mxu1 %vm366_vm4, %v33637_v14  ;;  %v32356_v14 = vld [vmem:[%s37581_s3 + $0xd8] sm:$0xff]  }
 0x421   : > { %27927 = vmatprep.mubr.msk.bf16.mxu1 %vm366_vm4, %v33651_v58  ;;  %v32357_v58 = vld [vmem:[%s37581_s3 + $0xe0] sm:$0xff]  }
 0x428   : > { %27928 = vmatmul.mubr.msk.bf16.gmra.mrb[16].mxu1 %vm366_vm4, %v33653_v3  ;;  %v4751_v3 = vld [vmem:[#allocation3 + $0x182] sm:$0xff] }
 0x429   : > { %27931 = vmatprep.mubr.msk.bf16.mxu1 %vm366_vm4, %v33667_v23  ;;  %v4752_v23 = vld [vmem:[#allocation3 + $0x18a] sm:$0xff] }
 0x430   : > { %27932 = vmatmul.mubr.msk.bf16.gmra.mrb[20].mxu1 %vm366_vm4, %v33669_v28  ;;  %v33976_v28 = vpack.c.bf16 %v4752_v23, %v4751_v3  ;;  %v5389_v3 = vld [vmem:[#allocation3 + $0x141] sm:$0xff]  ;;  %v5391_v23 = vld [vmem:[#allocation3 + $0x159] sm:$0xff] }
 0x431   : > { %27935 = vmatprep.mubr.msk.bf16.mxu1 %vm366_vm4, %v33683_v26  ;;  %v32358_v26 = vld [vmem:[%s37581_s3 + $0xe8] sm:$0xff]  }
 0x438   : > { %27936 = vmatmul.mubr.msk.bf16.gmra.mrb[24].mxu1 %vm366_vm4, %v33685_v61  ;;  %v32359_v61 = vld [vmem:[%s37581_s3 + $0xf0] sm:$0xff]  }
 0x439   : > { %27939 = vmatprep.mubr.msk.bf16.mxu1 %vm366_vm4, %v33691_v16  ;;  %v32360_v16 = vld [vmem:[%s37581_s3 + $0xf8] sm:$0xff]  }
 0x440   : > { %27940 = vmatmul.mubr.msk.bf16.gmra.mrb[28].mxu1 %vm366_vm4, %v33930_v56 }
 0x441   : > { %27951 = vmatprep.mubr.msk.bf16.mxu1 %vm366_vm4, %v33770_v34  ;;  %v5370_v34 = vld [vmem:[#allocation3 + $0x61] sm:$0xff] }
 0x448   : > { %27952 = vmatmul.mubr.msk.bf16.vlgmr.msra.gmra.mrb[0].mxu1 %vm366_vm4, %v33775_v45 }
 0x449   : > { %27984 = vmatpush3.bf16.msra.mxu1 %v32353_v42  ;;  %27955 = vmatprep.mubr.msk.bf16.mxu1 %vm366_vm4, %v33784_v12 }
 0x44a   : > { %27985 = vmatprep.subr.bf16.mxu1 %v32354_v62 }
 0x44d   : > { %27986 = vmatpush3.bf16.msra.mxu1 %v32354_v62  ;;  %v5384_v62 = vld [vmem:[#allocation3 + $0x109] sm:$0xff] }
 0x44e   : > { %27987 = vmatprep.subr.bf16.mxu1 %v32355_v1 }
 0x450   : > { %27956 = vmatmul.mubr.msk.bf16.gmra.mrb[4].mxu1 %vm366_vm4, %v33789_v19 }
 0x451   : > { %27959 = vmatprep.mubr.msk.bf16.mxu1 %vm366_vm4, %v33798_v30  ;;  %27988 = vmatpush3.bf16.msra.mxu1 %v32355_v1  ;;  %v5407_v1 = vpack.c.bf16 %v5385_v33, %v5384_v62 }
 0x452   : > { %27989 = vmatprep.subr.bf16.mxu1 %v32356_v14 }
 0x455   : > { %27990 = vmatpush3.bf16.msra.mxu1 %v32356_v14  ;;  %v5386_v14 = vld [vmem:[#allocation3 + $0x121] sm:$0xff] }
 0x456   : > { %28023 = vmatprep.subr.bf16.mxu1 %v32357_v58 }
 0x458   : > { %27960 = vmatmul.mubr.msk.bf16.gmra.mrb[8].mxu1 %vm366_vm4, %v33800_v46 }
 0x459   : > { %27963 = vmatprep.mubr.msk.bf16.mxu1 %vm366_vm4, %v33806_v15 }
 0x460   : > { %27964 = vmatmul.mubr.msk.bf16.gmra.mrb[12].mxu1 %vm366_vm4, %v33808_v18 }
 0x461   : > { %27967 = vmatprep.mubr.msk.bf16.mxu1 %vm366_vm4, %v33814_v17 }
 0x468   : > { %27968 = vmatmul.mubr.msk.bf16.gmra.mrb[16].mxu1 %vm366_vm4, %v33816_v22 }
 0x469   : > { %27971 = vmatprep.mubr.msk.bf16.mxu1 %vm366_vm4, %v33822_v35 }
 0x470   : > { %27972 = vmatmul.mubr.msk.bf16.gmra.mrb[20].mxu1 %vm366_vm4, %v33824_v63 }
 0x471   : > { %27975 = vmatprep.mubr.msk.bf16.mxu1 %vm366_vm4, %v33830_v49 }
 0x478   : > { %27976 = vmatmul.mubr.msk.bf16.gmra.mrb[24].mxu1 %vm366_vm4, %v33832_v37 }
 0x479   : > { %27979 = vmatprep.mubr.msk.bf16.mxu1 %vm366_vm4, %v33838_v40 }
 0x480   : > { %27980 = vmatmul.mubr.msk.bf16.gmra.mrb[28].mxu1 %vm366_vm4, %v33976_v28 }
 0x481   : > { %27991 = vmatprep.mubr.msk.bf16.mxu1 %vm366_vm4, %v33701_v13  ;;  %v32361_v13 = vld [vmem:[%s37581_s3 + $0x100] sm:$0xff]  }
 0x488   : > { %27992 = vmatmul.mubr.msk.bf16.vlgmr.msra.gmra.mrb[0].mxu1 %vm366_vm4, %v33711_v36  ;;  %v5074_v36 = vld [vmem:[#allocation3 + $0x198] sm:$0xff] }
 0x489   : > { %28024 = vmatpush3.bf16.msra.mxu1 %v32357_v58  ;;  %27995 = vmatprep.mubr.msk.bf16.mxu1 %vm366_vm4, %v33716_v48  ;;  %v5075_v48 = vld [vmem:[#allocation3 + $0x1a0] sm:$0xff]  ;;  %v5408_v58 = vpack.c.bf16 %v5387_v39, %v5386_v14 }
 0x48a   : > { %28025 = vmatprep.subr.bf16.mxu1 %v32358_v26  ;;  %v32371_v14 = vld [vmem:[%s37581_s3 + $0x130] sm:$0xff]  }
 0x48d   : > { %28026 = vmatpush3.bf16.msra.mxu1 %v32358_v26  ;;  %v5388_v26 = vld [vmem:[#allocation3 + $0x139] sm:$0xff] }
 0x48e   : > { %28027 = vmatprep.subr.bf16.mxu1 %v32359_v61 }
 0x490   : > { %27996 = vmatmul.mubr.msk.bf16.gmra.mrb[4].mxu1 %vm366_vm4, %v33725_v59  ;;  %v5091_v59 = vpack.c.bf16 %v5075_v48, %v5074_v36  ;;  %v5393_v36 = vld [vmem:[#allocation3 + $0x171] sm:$0xff]  ;;  %v5392_v48 = vld [vmem:[#allocation3 + $0x169] sm:$0xff] }
 0x491   : > { %27999 = vmatprep.mubr.msk.bf16.mxu1 %vm366_vm4, %v33727_v29  ;;  %28028 = vmatpush3.bf16.msra.mxu1 %v32359_v61  ;;  %v5367_v29 = vld [vmem:[#allocation3 + $0x39] sm:$0xff]  ;;  %v5409_v61 = vpack.c.bf16 %v5389_v3, %v5388_v26 }
 0x492   : > { %28029 = vmatprep.subr.bf16.mxu1 %v32360_v16 }
 0x495   : > { %28030 = vmatpush3.bf16.msra.mxu1 %v32360_v16  ;;  %v5390_v16 = vld [vmem:[#allocation3 + $0x151] sm:$0xff] }
 0x496   : > { %28063 = vmatprep.subr.bf16.mxu1 %v32361_v13 }
 0x498   : > { %28000 = vmatmul.mubr.msk.bf16.gmra.mrb[8].mxu1 %vm366_vm4, %v33733_v32  ;;  %v5366_v32 = vld [vmem:[#allocation3 + $0x31] sm:$0xff] }
 0x499   : > { %28003 = vmatprep.mubr.msk.bf16.mxu1 %vm366_vm4, %v33735_v43  ;;  %v5398_v43 = vpack.c.bf16 %v5367_v29, %v5366_v32  ;;  %v5396_v29 = vld [vmem:[#allocation3 + $0x199] sm:$0xff]  ;;  %v5397_v32 = vld [vmem:[#allocation3 + $0x1a1] sm:$0xff] }
 0x4a0   : > { %28004 = vmatmul.mubr.msk.bf16.gmra.mrb[12].mxu1 %vm366_vm4, %v33741_v27  ;;  %v32365_v27 = vld [vmem:[%s37581_s3 + $0x140] sm:$0xff]  }
 0x4a1   : > { %28007 = vmatprep.mubr.msk.bf16.mxu1 %vm366_vm4, %v33743_v38  ;;  %v32366_v38 = vld [vmem:[%s37581_s3 + $0x148] sm:$0xff]   ;;  %28103 = vmatprep.subr.bf16.mxu0 %v32365_v27 }
 0x4a2   : > { %28104 = vmatpush3.bf16.msra.mxu0 %v32365_v27 }
 0x4a3   : > { %28105 = vmatprep.subr.bf16.mxu0 %v32366_v38 }
 0x4a6   : > { %28106 = vmatpush3.bf16.msra.mxu0 %v32366_v38 }
 0x4a8   : > { %28008 = vmatmul.mubr.msk.bf16.gmra.mrb[16].mxu1 %vm366_vm4, %v33749_v53  ;;  %v5369_v53 = vld [vmem:[#allocation3 + $0x51] sm:$0xff] }
 0x4a9   : > { %28011 = vmatprep.mubr.msk.bf16.mxu1 %vm366_vm4, %v33751_v7  ;;  %v5371_v7 = vld [vmem:[#allocation3 + $0x69] sm:$0xff] }
 0x4aa   : > { %v5400_v51 = vpack.c.bf16 %v5371_v7, %v5370_v34 }
 0x4b0   : > { %28012 = vmatmul.mubr.msk.bf16.gmra.mrb[20].mxu1 %vm366_vm4, %v33757_v55  ;;  %v32367_v55 = vld [vmem:[%s37581_s3 + $0x150] sm:$0xff]  }
 0x4b1   : > { %28015 = vmatprep.mubr.msk.bf16.mxu1 %vm366_vm4, %v33759_v2  ;;  %v5368_v2 = vld [vmem:[#allocation3 + $0x49] sm:$0xff]  ;;  %28107 = vmatprep.subr.bf16.mxu0 %v32367_v55 }
 0x4b2   : > { %28108 = vmatpush3.bf16.msra.mxu0 %v32367_v55 }
 0x4b8   : > { %28016 = vmatmul.mubr.msk.bf16.gmra.mrb[24].mxu1 %vm366_vm4, %v33765_v41  ;;  %v5399_v41 = vpack.c.bf16 %v5369_v53, %v5368_v2 }
 0x4b9   : > { %28019 = vmatprep.mubr.msk.bf16.mxu1 %vm366_vm4, %v33884_v4  ;;  %v5383_v4 = vld [vmem:[#allocation3 + $0xf9] sm:$0xff] }
 0x4ba   : > { %v5406_v42 = vpack.c.bf16 %v5383_v4, %v5382_v6 }
 0x4c0   : > { %28020 = vmatmul.mubr.msk.bf16.gmra.mrb[28].mxu1 %vm366_vm4, %v5091_v59  ;;  %v5411_v59 = vpack.c.bf16 %v5393_v36, %v5392_v48  ;;  %v32372_v48 = vld [vmem:[%s37581_s3 + $0x138] sm:$0xff]  }
 0x4c1   : > { %28031 = vmatprep.mubr.msk.bf16.mxu1 %vm366_vm4, %v5398_v43  ;;  %v5413_v43 = vpack.c.bf16 %v5397_v32, %v5396_v29 }
 0x4c8   : > { %28032 = vmatmul.mubr.msk.bf16.vlgmr.msra.gmra.mrb[0].mxu1 %vm366_vm4, %v5399_v41 }
 0x4c9   : > { %28064 = vmatpush3.bf16.msra.mxu1 %v32361_v13  ;;  %28035 = vmatprep.mubr.msk.bf16.mxu1 %vm366_vm4, %v5400_v51  ;;  %v5410_v13 = vpack.c.bf16 %v5391_v23, %v5390_v16 }
 0x4ca   : > { %28065 = vmatprep.subr.bf16.mxu1 %v32362_v11 }
 0x4cd   : > { %28066 = vmatpush3.bf16.msra.mxu1 %v32362_v11 }
 0x4ce   : > { %28067 = vmatprep.subr.bf16.mxu1 %v32363_v0 }
 0x4d0   : > { %28036 = vmatmul.mubr.msk.bf16.gmra.mrb[4].mxu1 %vm366_vm4, %v5401_v54 }
 0x4d1   : > { %28039 = vmatprep.mubr.msk.bf16.mxu1 %vm366_vm4, %v5402_v44  ;;  %28068 = vmatpush3.bf16.msra.mxu1 %v32363_v0 }
 0x4d2   : > { %28069 = vmatprep.subr.bf16.mxu1 %v32364_v9 }
 0x4d5   : > { %28070 = vmatpush3.bf16.msra.mxu1 %v32364_v9 }
 0x4d8   : > { %28040 = vmatmul.mubr.msk.bf16.gmra.mrb[8].mxu1 %vm366_vm4, %v5403_v31 }
 0x4d9   : > { %28043 = vmatprep.mubr.msk.bf16.mxu1 %vm366_vm4, %v5404_v60  ;;  %v32370_v60 = vld [vmem:[%s37581_s3 + $0x128] sm:$0xff]  }
 0x4e0   : > { %28044 = vmatmul.mubr.msk.bf16.gmra.mrb[12].mxu1 %vm366_vm4, %v5405_v10 }
 0x4e1   : > { %28047 = vmatprep.mubr.msk.bf16.mxu1 %vm366_vm4, %v5406_v42 }
 0x4e8   : > { %28048 = vmatmul.mubr.msk.bf16.gmra.mrb[16].mxu1 %vm366_vm4, %v5407_v1 }
 0x4e9   : > { %28051 = vmatprep.mubr.msk.bf16.mxu1 %vm366_vm4, %v5408_v58 }
 0x4f0   : > { %28052 = vmatmul.mubr.msk.bf16.gmra.mrb[20].mxu1 %vm366_vm4, %v5409_v61 }
 0x4f1   : > { %28055 = vmatprep.mubr.msk.bf16.mxu1 %vm366_vm4, %v5410_v13 }
 0x4f8   : > { %28056 = vmatmul.mubr.msk.bf16.gmra.mrb[24].mxu1 %vm366_vm4, %v5411_v59 }
 0x4f9   : > { %28059 = vmatprep.mubr.msk.bf16.mxu1 %vm366_vm4, %v33930_v56 }
 0x500   : > { %28060 = vmatmul.mubr.msk.bf16.gmra.mrb[28].mxu1 %vm366_vm4, %v5413_v43 }
 0x501   : > { %28071 = vmatprep.mubr.msk.bf16.mxu1 %vm366_vm4, %v33775_v45  ;;  %v5718_v45 = vld [vmem:[#allocation3 + $0x19a] sm:$0xff] }
 0x508   : > { %28072 = vmatmul.mubr.msk.bf16.vlgmr.msra.gmra.mrb[0].mxu1 %vm366_vm4, %v33784_v12  ;;  %v5719_v12 = vld [vmem:[#allocation3 + $0x1a2] sm:$0xff] }
 0x509   : > { %28075 = vmatprep.mubr.msk.bf16.mxu1 %vm366_vm4, %v33789_v19  ;;  %v5735_v19 = vpack.c.bf16 %v5719_v12, %v5718_v45 }
 0x510   : > { %28076 = vmatmul.mubr.msk.bf16.gmra.mrb[4].mxu1 %vm366_vm4, %v33798_v30  ;;  %v32368_v30 = vld [vmem:[%s37581_s3 + $0x158] sm:$0xff]  }
 0x511   : > { %28079 = vmatprep.mubr.msk.bf16.mxu1 %vm366_vm4, %v33800_v46  ;;  %28109 = vmatprep.subr.bf16.mxu0 %v32368_v30  ;;  %v6169_v46 = vld [vmem:[#allocation4 + $0x1] sm:$0xff] }
 0x512   : > { %28110 = vmatpush3.bf16.msra.mxu0 %v32368_v30 }
 0x518   : > { %28080 = vmatmul.mubr.msk.bf16.gmra.mrb[8].mxu1 %vm366_vm4, %v33806_v15  ;;  %v6170_v15 = vld [vmem:[#allocation4 + $0x9] sm:$0xff] }
 0x519   : > { %28083 = vmatprep.mubr.msk.bf16.mxu1 %vm366_vm4, %v33808_v18  ;;  %v6201_v18 = vpack.c.bf16 %v6170_v15, %v6169_v46 }
 0x51b   : > { %28111 = vmatprep.mubr.msk.bf16.mxu0 %vm366_vm4, %v6201_v18  ;;  %v34157_v18 = vld [vmem:[%s37581_s3 + $0x160] sm:$0xff]  }
 0x520   : > { %28084 = vmatmul.mubr.msk.bf16.gmra.mrb[12].mxu1 %vm366_vm4, %v33814_v17  ;;  %v32369_v17 = vld [vmem:[%s37581_s3 + $0x120] sm:$0xff]  }
 0x521   : > { %28087 = vmatprep.mubr.msk.bf16.mxu1 %vm366_vm4, %v33816_v22  ;;  %28143 = vmatprep.subr.bf16.mxu0 %v32369_v17  ;;  %v34099_v22 = vld [vmem:[%s37582_s4] ss:$0 sm:$0xff] }
 0x528   : > { %28088 = vmatmul.mubr.msk.bf16.gmra.mrb[16].mxu1 %vm366_vm4, %v33822_v35 }
 0x529   : > { %28091 = vmatprep.mubr.msk.bf16.mxu1 %vm366_vm4, %v33824_v63 }
 0x530   : > { %28092 = vmatmul.mubr.msk.bf16.gmra.mrb[20].mxu1 %vm366_vm4, %v33830_v49 }
 0x531   : > { %28095 = vmatprep.mubr.msk.bf16.mxu1 %vm366_vm4, %v33832_v37 }
 0x538   : > { %28096 = vmatmul.mubr.msk.bf16.gmra.mrb[24].mxu1 %vm366_vm4, %v33838_v40 }
 0x539   : > { %28099 = vmatprep.mubr.msk.bf16.mxu1 %vm366_vm4, %v33976_v28 }
 0x540   : > { %28100 = vmatmul.mubr.msk.bf16.gmra.mrb[28].mxu1 %vm366_vm4, %v5735_v19 }
 0x5db   : > { %v28073_v35 = vpop.f32.mrb[0].mxu1 }
 0x5dc   : > { %v6016_v63 = vadd.f32 %v28073_v35, %v34099_v22  ;;  %v5851_v49 = vpop.f32.mrb[1].mxu1 }
 0x5dd   : > { %v6014_v37 = vadd.f32 %v34099_v22, %v5851_v49  ;;  %v28074_v40 = vpop.f32.mrb[2].mxu1 }
 0x5de   : > { %v6048_v56 = vmax.f32 %v6016_v63, 0.0  ;;  %v6017_v28 = vadd.f32 %v28074_v40, %v34099_v22  ;;  %v5854_v27 = vpop.f32.mrb[3].mxu1 }
 0x5df   : > { %v6046_v38 = vmax.f32 %v6014_v37, 0.0  ;;  %v6015_v53 = vadd.f32 %v34099_v22, %v5854_v27 }
 0x5e0   : > { %6081 = vst.msk [vmem:[#allocation4 + $0x31] sm:$0xff] %vm366_vm4, %v6048_v56  ;;  %v6049_v7 = vmax.f32 %v6017_v28, 0.0 }
 0x5e1   : > { %6079 = vst.msk [vmem:[#allocation4 + $0x19] sm:$0xff] %vm366_vm4, %v6046_v38  ;;  %v6047_v55 = vmax.f32 %v6015_v53, 0.0 }
 0x5e2   : > { %6082 = vst.msk [vmem:[#allocation4 + $0x39] sm:$0xff] %vm366_vm4, %v6049_v7 }
 0x5e3   : > { %6080 = vst.msk [vmem:[#allocation4 + $0x21] sm:$0xff] %vm366_vm4, %v6047_v55  ;;  %v28077_v2 = vpop.f32.mrb[4].mxu1 }
 0x5e4   : > { %v6020_v41 = vadd.f32 %v28077_v2, %v34099_v22  ;;  %v5867_v34 = vpop.f32.mrb[5].mxu1 }
 0x5e5   : > { %v6018_v11 = vadd.f32 %v34099_v22, %v5867_v34  ;;  %v28078_v51 = vpop.f32.mrb[6].mxu1 }
 0x5e6   : > { %v6052_v0 = vmax.f32 %v6020_v41, 0.0  ;;  %v6021_v24 = vadd.f32 %v28078_v51, %v34099_v22  ;;  %v5870_v25 = vpop.f32.mrb[7].mxu1 }
 0x5e7   : > { %v6050_v50 = vmax.f32 %v6018_v11, 0.0  ;;  %v6019_v54 = vadd.f32 %v34099_v22, %v5870_v25  ;;  %v6173_v20 = vld [vmem:[#allocation4 + $0x31] sm:$0xff] }
 0x5e8   : > { %6085 = vst.msk [vmem:[#allocation4 + $0x61] sm:$0xff] %vm366_vm4, %v6052_v0  ;;  %v6053_v57 = vmax.f32 %v6021_v24, 0.0  ;;  %v6171_v21 = vld [vmem:[#allocation4 + $0x19] sm:$0xff] }
 0x5e9   : > { %6083 = vst.msk [vmem:[#allocation4 + $0x49] sm:$0xff] %vm366_vm4, %v6050_v50  ;;  %v6051_v9 = vmax.f32 %v6019_v54, 0.0  ;;  %v6174_v44 = vld [vmem:[#allocation4 + $0x39] sm:$0xff] }
 0x5ea   : > { %6086 = vst.msk [vmem:[#allocation4 + $0x69] sm:$0xff] %vm366_vm4, %v6053_v57  ;;  %v6172_v47 = vld [vmem:[#allocation4 + $0x21] sm:$0xff]  ;;  %v34123_v5 = vpack.c.bf16 %v6174_v44, %v6173_v20 }
 0x5eb   : > { %6084 = vst.msk [vmem:[#allocation4 + $0x51] sm:$0xff] %vm366_vm4, %v6051_v9  ;;  %v28081_v52 = vpop.f32.mrb[8].mxu1  ;;  %v34117_v31 = vpack.c.bf16 %v6172_v47, %v6171_v21 }
 0x5ec   : > { %v6024_v8 = vadd.f32 %v28081_v52, %v34099_v22  ;;  %v5883_v4 = vpop.f32.mrb[9].mxu1 }
 0x5ed   : > { %v6022_v10 = vadd.f32 %v34099_v22, %v5883_v4  ;;  %v28082_v6 = vpop.f32.mrb[10].mxu1  ;;  %28112 = vmatmul.mubr.msk.bf16.vlgmr.msra.gmra.mrb[32].mxu0 %vm366_vm4, %v34117_v31 }
 0x5ee   : > { %v6056_v42 = vmax.f32 %v6024_v8, 0.0  ;;  %v6025_v33 = vadd.f32 %v28082_v6, %v34099_v22  ;;  %28144 = vmatpush3.bf16.msra.mxu0 %v32369_v17  ;;  %v5886_v39 = vpop.f32.mrb[11].mxu1  ;;  %28115 = vmatprep.mubr.msk.bf16.mxu0 %vm366_vm4, %v34123_v5 }
 0x5ef   : > { %v6054_v62 = vmax.f32 %v6022_v10, 0.0  ;;  %v6023_v1 = vadd.f32 %v34099_v22, %v5886_v39  ;;  %28145 = vmatprep.subr.bf16.mxu0 %v32370_v60  ;;  %v6177_v36 = vld [vmem:[#allocation4 + $0x61] sm:$0xff] }
 0x5f0   : > { %6089 = vst.msk [vmem:[#allocation4 + $0x91] sm:$0xff] %vm366_vm4, %v6056_v42  ;;  %v6057_v58 = vmax.f32 %v6025_v33, 0.0  ;;  %v6175_v26 = vld [vmem:[#allocation4 + $0x49] sm:$0xff] }
 0x5f1   : > { %6087 = vst.msk [vmem:[#allocation4 + $0x79] sm:$0xff] %vm366_vm4, %v6054_v62  ;;  %v6055_v3 = vmax.f32 %v6023_v1, 0.0  ;;  %v6178_v23 = vld [vmem:[#allocation4 + $0x69] sm:$0xff] }
 0x5f2   : > { %6090 = vst.msk [vmem:[#allocation4 + $0x99] sm:$0xff] %vm366_vm4, %v6057_v58  ;;  %v6176_v61 = vld [vmem:[#allocation4 + $0x51] sm:$0xff]  ;;  %28146 = vmatpush3.bf16.msra.mxu0 %v32370_v60  ;;  %v34145_v32 = vpack.c.bf16 %v6178_v23, %v6177_v36 }
 0x5f3   : > { %6088 = vst.msk [vmem:[#allocation4 + $0x81] sm:$0xff] %vm366_vm4, %v6055_v3  ;;  %v28085_v16 = vpop.f32.mrb[12].mxu1  ;;  %v34139_v13 = vpack.c.bf16 %v6176_v61, %v6175_v26  ;;  %28147 = vmatprep.subr.bf16.mxu0 %v32371_v14 }
 0x5f4   : > { %v6028_v59 = vadd.f32 %v28085_v16, %v34099_v22  ;;  %v5899_v29 = vpop.f32.mrb[13].mxu1 }
 0x5f5   : > { %v6026_v43 = vadd.f32 %v34099_v22, %v5899_v29  ;;  %v28086_v45 = vpop.f32.mrb[14].mxu1  ;;  %28116 = vmatmul.mubr.msk.bf16.gmra.mrb[36].mxu0 %vm366_vm4, %v34139_v13 }
 0x5f6   : > { %v6060_v12 = vmax.f32 %v6028_v59, 0.0  ;;  %v6029_v19 = vadd.f32 %v28086_v45, %v34099_v22  ;;  %v5902_v30 = vpop.f32.mrb[15].mxu1  ;;  %28119 = vmatprep.mubr.msk.bf16.mxu0 %vm366_vm4, %v34145_v32  ;;  %28148 = vmatpush3.bf16.msra.mxu0 %v32371_v14 }
 0x5f7   : > { %v6058_v46 = vmax.f32 %v6026_v43, 0.0  ;;  %v6027_v15 = vadd.f32 %v34099_v22, %v5902_v30  ;;  %28149 = vmatprep.subr.bf16.mxu0 %v32372_v48  ;;  %v6181_v28 = vld [vmem:[#allocation4 + $0x91] sm:$0xff] }
 0x5f8   : > { %6093 = vst.msk [vmem:[#allocation4 + $0xc1] sm:$0xff] %vm366_vm4, %v6060_v12  ;;  %v6061_v17 = vmax.f32 %v6029_v19, 0.0  ;;  %v6179_v49 = vld [vmem:[#allocation4 + $0x79] sm:$0xff] }
 0x5f9   : > { %6091 = vst.msk [vmem:[#allocation4 + $0xa9] sm:$0xff] %vm366_vm4, %v6058_v46  ;;  %v6059_v35 = vmax.f32 %v6027_v15, 0.0  ;;  %v6182_v63 = vld [vmem:[#allocation4 + $0x99] sm:$0xff] }
 0x5fa   : > { %6094 = vst.msk [vmem:[#allocation4 + $0xc9] sm:$0xff] %vm366_vm4, %v6061_v17  ;;  %v6180_v37 = vld [vmem:[#allocation4 + $0x81] sm:$0xff]  ;;  %28150 = vmatpush3.bf16.msra.mxu0 %v32372_v48  ;;  %v34167_v53 = vpack.c.bf16 %v6182_v63, %v6181_v28 }
 0x5fb   : > { %6092 = vst.msk [vmem:[#allocation4 + $0xb1] sm:$0xff] %vm366_vm4, %v6059_v35  ;;  %v28089_v40 = vpop.f32.mrb[16].mxu1  ;;  %v34163_v56 = vpack.c.bf16 %v6180_v37, %v6179_v49  ;;  %28183 = vmatprep.subr.bf16.mxu0 %v34157_v18 }
 0x5fc   : > { %v6032_v27 = vadd.f32 %v28089_v40, %v34099_v22  ;;  %v5915_v38 = vpop.f32.mrb[17].mxu1 }
 0x5fd   : > { %v6030_v7 = vadd.f32 %v34099_v22, %v5915_v38  ;;  %v28090_v55 = vpop.f32.mrb[18].mxu1  ;;  %28120 = vmatmul.mubr.msk.bf16.gmra.mrb[40].mxu0 %vm366_vm4, %v34163_v56 }
 0x5fe   : > { %v6064_v2 = vmax.f32 %v6032_v27, 0.0  ;;  %v6033_v41 = vadd.f32 %v28090_v55, %v34099_v22  ;;  %v5918_v34 = vpop.f32.mrb[19].mxu1  ;;  %28123 = vmatprep.mubr.msk.bf16.mxu0 %vm366_vm4, %v34167_v53 }
 0x5ff   : > { %v6062_v11 = vmax.f32 %v6030_v7, 0.0  ;;  %v6031_v51 = vadd.f32 %v34099_v22, %v5918_v34  ;;  %v6185_v44 = vld [vmem:[#allocation4 + $0xc1] sm:$0xff] }
 0x600   : > { %6097 = vst.msk [vmem:[#allocation4 + $0xf1] sm:$0xff] %vm366_vm4, %v6064_v2  ;;  %v6065_v0 = vmax.f32 %v6033_v41, 0.0  ;;  %v6183_v50 = vld [vmem:[#allocation4 + $0xa9] sm:$0xff] }
 0x601   : > { %6095 = vst.msk [vmem:[#allocation4 + $0xd9] sm:$0xff] %vm366_vm4, %v6062_v11  ;;  %v6063_v24 = vmax.f32 %v6031_v51, 0.0  ;;  %v6186_v25 = vld [vmem:[#allocation4 + $0xc9] sm:$0xff] }
 0x602   : > { %6098 = vst.msk [vmem:[#allocation4 + $0xf9] sm:$0xff] %vm366_vm4, %v6065_v0  ;;  %v6184_v54 = vld [vmem:[#allocation4 + $0xb1] sm:$0xff]  ;;  %v34183_v52 = vpack.c.bf16 %v6186_v25, %v6185_v44  ;;  %v6113_v44 = vld [vmem:[#allocation4 + $0x8] sm:$0xff] }
 0x603   : > { %6096 = vst.msk [vmem:[#allocation4 + $0xe1] sm:$0xff] %vm366_vm4, %v6063_v24  ;;  %v28093_v57 = vpop.f32.mrb[20].mxu1  ;;  %v34180_v9 = vpack.c.bf16 %v6184_v54, %v6183_v50 }
 0x604   : > { %v6036_v21 = vadd.f32 %v28093_v57, %v34099_v22  ;;  %v5931_v47 = vpop.f32.mrb[21].mxu1 }
 0x605   : > { %v6034_v20 = vadd.f32 %v34099_v22, %v5931_v47  ;;  %v28094_v60 = vpop.f32.mrb[22].mxu1  ;;  %28124 = vmatmul.mubr.msk.bf16.gmra.mrb[44].mxu0 %vm366_vm4, %v34180_v9 }
 0x606   : > { %v6068_v8 = vmax.f32 %v6036_v21, 0.0  ;;  %v6037_v4 = vadd.f32 %v28094_v60, %v34099_v22  ;;  %v5934_v10 = vpop.f32.mrb[23].mxu1  ;;  %28127 = vmatprep.mubr.msk.bf16.mxu0 %vm366_vm4, %v34183_v52 }
 0x607   : > { %v6066_v6 = vmax.f32 %v6034_v20, 0.0  ;;  %v6035_v42 = vadd.f32 %v34099_v22, %v5934_v10  ;;  %v6189_v23 = vld [vmem:[#allocation4 + $0xf1] sm:$0xff] }
 0x608   : > { %6101 = vst.msk [vmem:[#allocation4 + $0x121] sm:$0xff] %vm366_vm4, %v6068_v8  ;;  %v6069_v33 = vmax.f32 %v6037_v4, 0.0  ;;  %v6187_v1 = vld [vmem:[#allocation4 + $0xd9] sm:$0xff] }
 0x609   : > { %6099 = vst.msk [vmem:[#allocation4 + $0x109] sm:$0xff] %vm366_vm4, %v6066_v6  ;;  %v6067_v39 = vmax.f32 %v6035_v42, 0.0  ;;  %v6190_v62 = vld [vmem:[#allocation4 + $0xf9] sm:$0xff]  ;;  %v6116_v42 = vld [vmem:[#allocation4 + $0x30] sm:$0xff] }
 0x60a   : > { %6102 = vst.msk [vmem:[#allocation4 + $0x129] sm:$0xff] %vm366_vm4, %v6069_v33  ;;  %v6188_v14 = vld [vmem:[#allocation4 + $0xe1] sm:$0xff]  ;;  %v34199_v16 = vpack.c.bf16 %v6190_v62, %v6189_v23  ;;  %v6117_v4 = vld [vmem:[#allocation4 + $0x38] sm:$0xff]  ;;  %v32375_v62 = vld [vmem:[%s37581_s3 + $0x170] sm:$0xff]  }
 0x60b   : > { %6100 = vst.msk [vmem:[#allocation4 + $0x111] sm:$0xff] %vm366_vm4, %v6067_v39  ;;  %v28097_v58 = vpop.f32.mrb[24].mxu1  ;;  %v34196_v3 = vpack.c.bf16 %v6188_v14, %v6187_v1  ;;  %v6115_v8 = vld [vmem:[#allocation4 + $0x20] sm:$0xff]  ;;  %v6114_v10 = vld [vmem:[#allocation4 + $0x18] sm:$0xff]  ;;  %v32374_v33 = vld [vmem:[%s37581_s3 + $0x168] sm:$0xff]   ;;  %v34246_v39 = vpack.c.bf16 %v6117_v4, %v6116_v42 }
 0x60c   : > { %v6040_v26 = vadd.f32 %v28097_v58, %v34099_v22  ;;  %v5947_v61 = vpop.f32.mrb[25].mxu1  ;;  %v34241_v6 = vpack.c.bf16 %v6115_v8, %v6114_v10  ;;  %v6119_v1 = vld [vmem:[#allocation4 + $0x50] sm:$0xff]  ;;  %v6121_v14 = vld [vmem:[#allocation4 + $0x68] sm:$0xff]  ;;  %v6694_v42 = vld [vmem:[#allocation4 + $0x1a] sm:$0xff] }
 0x60d   : > { %v6038_v36 = vadd.f32 %v34099_v22, %v5947_v61  ;;  %v28098_v48 = vpop.f32.mrb[26].mxu1  ;;  %28128 = vmatmul.mubr.msk.bf16.gmra.mrb[48].mxu0 %vm366_vm4, %v34196_v3  ;;  %v6118_v58 = vld [vmem:[#allocation4 + $0x48] sm:$0xff] }
 0x60e   : > { %v6072_v59 = vmax.f32 %v6040_v26, 0.0  ;;  %v6041_v29 = vadd.f32 %v28098_v48, %v34099_v22  ;;  %v5950_v43 = vpop.f32.mrb[27].mxu1  ;;  %28131 = vmatprep.mubr.msk.bf16.mxu0 %vm366_vm4, %v34199_v16  ;;  %v34256_v23 = vpack.c.bf16 %v6119_v1, %v6118_v58  ;;  %v6120_v26 = vld [vmem:[#allocation4 + $0x60] sm:$0xff]  ;;  %v32378_v58 = vld [vmem:[%s37581_s3 + $0x188] sm:$0xff]  }
 0x60f   : > { %v6070_v45 = vmax.f32 %v6038_v36, 0.0  ;;  %v6039_v12 = vadd.f32 %v34099_v22, %v5950_v43  ;;  %v6193_v49 = vld [vmem:[#allocation4 + $0x121] sm:$0xff]  ;;  %v34261_v61 = vpack.c.bf16 %v6121_v14, %v6120_v26 }
 0x610   : > { %6105 = vst.msk [vmem:[#allocation4 + $0x151] sm:$0xff] %vm366_vm4, %v6072_v59  ;;  %v6073_v19 = vmax.f32 %v6041_v29, 0.0  ;;  %v6191_v15 = vld [vmem:[#allocation4 + $0x109] sm:$0xff]  ;;  %v32377_v36 = vld [vmem:[%s37581_s3 + $0x180] sm:$0xff]   ;;  %v6125_v59 = vld [vmem:[#allocation4 + $0x98] sm:$0xff] }
 0x611   : > { %6103 = vst.msk [vmem:[#allocation4 + $0x139] sm:$0xff] %vm366_vm4, %v6070_v45  ;;  %v6071_v30 = vmax.f32 %v6039_v12, 0.0  ;;  %v6194_v46 = vld [vmem:[#allocation4 + $0x129] sm:$0xff]  ;;  %v6123_v48 = vld [vmem:[#allocation4 + $0x80] sm:$0xff]  ;;  %v6122_v29 = vld [vmem:[#allocation4 + $0x78] sm:$0xff] }
 0x612   : > { %6106 = vst.msk [vmem:[#allocation4 + $0x159] sm:$0xff] %vm366_vm4, %v6073_v19  ;;  %v6192_v17 = vld [vmem:[#allocation4 + $0x111] sm:$0xff]  ;;  %v34215_v28 = vpack.c.bf16 %v6194_v46, %v6193_v49  ;;  %v34270_v43 = vpack.c.bf16 %v6123_v48, %v6122_v29  ;;  %v6126_v46 = vld [vmem:[#allocation4 + $0xa8] sm:$0xff]  ;;  %v6131_v49 = vld [vmem:[#allocation4 + $0xe0] sm:$0xff] }
 0x613   : > { %6104 = vst.msk [vmem:[#allocation4 + $0x141] sm:$0xff] %vm366_vm4, %v6071_v30  ;;  %v28101_v35 = vpop.f32.mrb[28].mxu1  ;;  %v34212_v63 = vpack.c.bf16 %v6192_v17, %v6191_v15  ;;  %v6124_v45 = vld [vmem:[#allocation4 + $0x90] sm:$0xff]  ;;  %v6129_v30 = vld [vmem:[#allocation4 + $0xc8] sm:$0xff]  ;;  %v6128_v17 = vld [vmem:[#allocation4 + $0xc0] sm:$0xff] }
 0x614   : > { %v6044_v37 = vadd.f32 %v28101_v35, %v34099_v22  ;;  %v5963_v40 = vpop.f32.mrb[29].mxu1  ;;  %v34272_v12 = vpack.c.bf16 %v6125_v59, %v6124_v45  ;;  %v6127_v19 = vld [vmem:[#allocation4 + $0xb0] sm:$0xff]  ;;  %v34280_v35 = vpack.c.bf16 %v6129_v30, %v6128_v17  ;;  %v6697_v1 = vld [vmem:[#allocation4 + $0x3a] sm:$0xff]  ;;  %v6700_v29 = vld [vmem:[#allocation4 + $0x62] sm:$0xff] }
 0x615   : > { %v6042_v27 = vadd.f32 %v34099_v22, %v5963_v40  ;;  %v28102_v38 = vpop.f32.mrb[30].mxu1  ;;  %28132 = vmatmul.mubr.msk.bf16.gmra.mrb[52].mxu0 %vm366_vm4, %v34212_v63  ;;  %v34278_v15 = vpack.c.bf16 %v6127_v19, %v6126_v46  ;;  %v6130_v40 = vld [vmem:[#allocation4 + $0xd8] sm:$0xff]  ;;  %v6698_v48 = vld [vmem:[#allocation4 + $0x4a] sm:$0xff]  ;;  %v32381_v46 = vld [vmem:[%s37581_s3 + $0x1a0] sm:$0xff]  }
 0x616   : > { %v6076_v7 = vmax.f32 %v6044_v37, 0.0  ;;  %v6045_v55 = vadd.f32 %v28102_v38, %v34099_v22  ;;  %v5966_v2 = vpop.f32.mrb[31].mxu1  ;;  %28135 = vmatprep.mubr.msk.bf16.mxu0 %vm366_vm4, %v34215_v28  ;;  %v6133_v37 = vld [vmem:[#allocation4 + $0xf8] sm:$0xff]  ;;  %v6132_v38 = vld [vmem:[#allocation4 + $0xf0] sm:$0xff] }
 0x617   : > { %v6074_v41 = vmax.f32 %v6042_v27, 0.0  ;;  %v6043_v34 = vadd.f32 %v34099_v22, %v5966_v2  ;;  %v6197_v54 = vld [vmem:[#allocation4 + $0x151] sm:$0xff]  ;;  %v6112_v22 = vld [vmem:[#allocation4] sm:$0xff]  ;;  %v34286_v27 = vpack.c.bf16 %v6131_v49, %v6130_v40  ;;  %v6137_v2 = vld [vmem:[#allocation4 + $0x128] sm:$0xff] }
 0x618   : > { %6109 = vst.msk [vmem:[#allocation4 + $0x181] sm:$0xff] %vm366_vm4, %v6076_v7  ;;  %v6077_v11 = vmax.f32 %v6045_v55, 0.0  ;;  %v6195_v24 = vld [vmem:[#allocation4 + $0x139] sm:$0xff]  ;;  %v6144_v20 = vpack.c.bf16 %v6113_v44, %v6112_v22  ;;  %v34288_v7 = vpack.c.bf16 %v6133_v37, %v6132_v38  ;;  %v6135_v55 = vld [vmem:[#allocation4 + $0x110] sm:$0xff]  ;;  %v6703_v49 = vld [vmem:[#allocation4 + $0x82] sm:$0xff] }
 0x619   : > { %6107 = vst.msk [vmem:[#allocation4 + $0x169] sm:$0xff] %vm366_vm4, %v6074_v41  ;;  %v6075_v51 = vmax.f32 %v6043_v34, 0.0  ;;  %v6198_v0 = vld [vmem:[#allocation4 + $0x159] sm:$0xff]  ;;  %v6134_v41 = vld [vmem:[#allocation4 + $0x108] sm:$0xff]  ;;  %v6140_v22 = vld [vmem:[#allocation4 + $0x150] sm:$0xff] }
 0x61a   : > { %6110 = vst.msk [vmem:[#allocation4 + $0x189] sm:$0xff] %vm366_vm4, %v6077_v11  ;;  %v6196_v25 = vld [vmem:[#allocation4 + $0x141] sm:$0xff]  ;;  %v34230_v57 = vpack.c.bf16 %v6198_v0, %v6197_v54  ;;  %v34294_v34 = vpack.c.bf16 %v6135_v55, %v6134_v41  ;;  %v6699_v59 = vld [vmem:[#allocation4 + $0x52] sm:$0xff]  ;;  %v6701_v45 = vld [vmem:[#allocation4 + $0x6a] sm:$0xff] }
 0x61b   : > { %6108 = vst.msk [vmem:[#allocation4 + $0x171] sm:$0xff] %vm366_vm4, %v6075_v51  ;;  %v34228_v50 = vpack.c.bf16 %v6196_v25, %v6195_v24  ;;  %v6136_v11 = vld [vmem:[#allocation4 + $0x120] sm:$0xff]  ;;  %v6141_v24 = vld [vmem:[#allocation4 + $0x158] sm:$0xff]  ;;  %v34329_v19 = vpack.c.bf16 %v6699_v59, %v6698_v48  ;;  %v34334_v30 = vpack.c.bf16 %v6701_v45, %v6700_v29 }
 0x61c   : > { %v34296_v51 = vpack.c.bf16 %v6137_v2, %v6136_v11  ;;  %v6139_v0 = vld [vmem:[#allocation4 + $0x140] sm:$0xff]  ;;  %v6138_v25 = vld [vmem:[#allocation4 + $0x138] sm:$0xff]  ;;  %v34304_v44 = vpack.c.bf16 %v6141_v24, %v6140_v22  ;;  %v6706_v2 = vld [vmem:[#allocation4 + $0xaa] sm:$0xff] }
 0x61d   : > { %28136 = vmatmul.mubr.msk.bf16.gmra.mrb[56].mxu0 %vm366_vm4, %v34228_v50  ;;  %v34302_v54 = vpack.c.bf16 %v6139_v0, %v6138_v25  ;;  %v6702_v17 = vld [vmem:[#allocation4 + $0x7a] sm:$0xff]  ;;  %v6704_v37 = vld [vmem:[#allocation4 + $0x92] sm:$0xff]  ;;  %v6708_v11 = vld [vmem:[#allocation4 + $0xc2] sm:$0xff] }
 0x61e   : > { %28139 = vmatprep.mubr.msk.bf16.mxu0 %vm366_vm4, %v34230_v57  ;;  %v6705_v40 = vld [vmem:[#allocation4 + $0x9a] sm:$0xff]  ;;  %v34343_v38 = vpack.c.bf16 %v6703_v49, %v6702_v17  ;;  %v6707_v41 = vld [vmem:[#allocation4 + $0xb2] sm:$0xff]  ;;  %v6709_v0 = vld [vmem:[#allocation4 + $0xca] sm:$0xff] }
 0x61f   : > { %v34345_v55 = vpack.c.bf16 %v6705_v40, %v6704_v37  ;;  %v34351_v24 = vpack.c.bf16 %v6707_v41, %v6706_v2  ;;  %v34353_v25 = vpack.c.bf16 %v6709_v0, %v6708_v11  ;;  %v6710_v22 = vld [vmem:[#allocation4 + $0xda] sm:$0xff]  ;;  %v6719_v59 = vld [vmem:[#allocation4 + $0x142] sm:$0xff]  ;;  %v6720_v29 = vld [vmem:[#allocation4 + $0x152] sm:$0xff] }
 0x620   : > { %v6199_v21 = vld [vmem:[#allocation4 + $0x169] sm:$0xff]  ;;  %v6718_v48 = vld [vmem:[#allocation4 + $0x13a] sm:$0xff] }
 0x621   : > { %v6142_v8 = vld [vmem:[#allocation4 + $0x168] sm:$0xff]  ;;  %v6721_v45 = vld [vmem:[#allocation4 + $0x15a] sm:$0xff]  ;;  %v32383_v41 = vld [vmem:[%s37581_s3 + $0x1b0] sm:$0xff]  }
 0x622   : > { %v6200_v47 = vld [vmem:[#allocation4 + $0x171] sm:$0xff]  ;;  %v34377_v17 = vpack.c.bf16 %v6721_v45, %v6720_v29  ;;  %v32382_v2 = vld [vmem:[%s37581_s3 + $0x1a8] sm:$0xff]   ;;  %v7044_v0 = vld [vmem:[#allocation4 + $0x180] sm:$0xff] }
 0x623   : > { %v34236_v60 = vpack.c.bf16 %v6200_v47, %v6199_v21  ;;  %v6692_v21 = vld [vmem:[#allocation4 + $0x2] sm:$0xff]  ;;  %v6693_v47 = vld [vmem:[#allocation4 + $0xa] sm:$0xff]  ;;  %v6723_v37 = vld [vmem:[#allocation4 + $0x172] sm:$0xff] }
 0x624   : > { %v6724_v4 = vpack.c.bf16 %v6693_v47, %v6692_v21  ;;  %v6711_v21 = vld [vmem:[#allocation4 + $0xe2] sm:$0xff]  ;;  %v6712_v47 = vld [vmem:[#allocation4 + $0xf2] sm:$0xff]  ;;  %v6722_v49 = vld [vmem:[#allocation4 + $0x16a] sm:$0xff] }
 0x625   : > { %28140 = vmatmul.mubr.msk.bf16.gmra.mrb[60].mxu0 %vm366_vm4, %v34236_v60  ;;  %v34383_v40 = vpack.c.bf16 %v6723_v37, %v6722_v49  ;;  %v7045_v11 = vld [vmem:[#allocation4 + $0x188] sm:$0xff]  ;;  %v8311_v29 = vld [vmem:[#allocation4 + $0x91] sm:$0xff] }
 0x626   : > { %28151 = vmatprep.mubr.msk.bf16.mxu0 %vm366_vm4, %v6144_v20  ;;  %v6143_v20 = vld [vmem:[#allocation4 + $0x170] sm:$0xff]  ;;  %v32400_v45 = vld [vmem:[%s37581_s3 + $0x238] sm:$0xff]  }
 0x627   : > { %v34310_v10 = vpack.c.bf16 %v6143_v20, %v6142_v8  ;;  %v6713_v20 = vld [vmem:[#allocation4 + $0xfa] sm:$0xff]  ;;  %v34359_v8 = vpack.c.bf16 %v6711_v21, %v6710_v22  ;;  %v34429_v22 = vpack.c.bf16 %v7045_v11, %v7044_v0  ;;  %v32386_v21 = vld [vmem:[%s37581_s3 + $0x1c8] sm:$0xff]   ;;  %v8314_v37 = vld [vmem:[#allocation4 + $0xb1] sm:$0xff] }
 0x628   : > { %v8318_v0 = vld [vmem:[#allocation4 + $0xe1] sm:$0xff] }
 0x62d   : > { %28152 = vmatmul.mubr.msk.bf16.vlgmr.msra.gmra.mrb[32].mxu0 %vm366_vm4, %v34241_v6 }
 0x62e   : > { %28184 = vmatpush3.bf16.msra.mxu0 %v34157_v18  ;;  %28155 = vmatprep.mubr.msk.bf16.mxu0 %vm366_vm4, %v34246_v39  ;;  %v32376_v18 = vld [vmem:[%s37581_s3 + $0x178] sm:$0xff]  }
 0x62f   : > { %28185 = vmatprep.subr.bf16.mxu0 %v32374_v33 }
 0x632   : > { %28186 = vmatpush3.bf16.msra.mxu0 %v32374_v33  ;;  %v6695_v33 = vld [vmem:[#allocation4 + $0x22] sm:$0xff] }
 0x633   : > { %28187 = vmatprep.subr.bf16.mxu0 %v32375_v62  ;;  %v34315_v14 = vpack.c.bf16 %v6695_v33, %v6694_v42  ;;  %v6714_v42 = vld [vmem:[#allocation4 + $0x10a] sm:$0xff]  ;;  %v6715_v33 = vld [vmem:[#allocation4 + $0x112] sm:$0xff] }
 0x635   : > { %28156 = vmatmul.mubr.msk.bf16.gmra.mrb[36].mxu0 %vm366_vm4, %v34256_v23 }
 0x636   : > { %28159 = vmatprep.mubr.msk.bf16.mxu0 %vm366_vm4, %v34261_v61  ;;  %28188 = vmatpush3.bf16.msra.mxu0 %v32375_v62  ;;  %v6696_v62 = vld [vmem:[#allocation4 + $0x32] sm:$0xff] }
 0x637   : > { %28189 = vmatprep.subr.bf16.mxu0 %v32376_v18  ;;  %v34320_v26 = vpack.c.bf16 %v6697_v1, %v6696_v62  ;;  %v6716_v62 = vld [vmem:[#allocation4 + $0x122] sm:$0xff]  ;;  %v6717_v1 = vld [vmem:[#allocation4 + $0x12a] sm:$0xff] }
 0x63a   : > { %28190 = vmatpush3.bf16.msra.mxu0 %v32376_v18  ;;  %v32379_v18 = vld [vmem:[%s37581_s3 + $0x190] sm:$0xff]  }
 0x63b   : > { %28223 = vmatprep.subr.bf16.mxu0 %v32377_v36 }
 0x63d   : > { %28160 = vmatmul.mubr.msk.bf16.gmra.mrb[40].mxu0 %vm366_vm4, %v34270_v43 }
 0x63e   : > { %28163 = vmatprep.mubr.msk.bf16.mxu0 %vm366_vm4, %v34272_v12 }
 0x645   : > { %28164 = vmatmul.mubr.msk.bf16.gmra.mrb[44].mxu0 %vm366_vm4, %v34278_v15 }
 0x646   : > { %28167 = vmatprep.mubr.msk.bf16.mxu0 %vm366_vm4, %v34280_v35 }
 0x64d   : > { %28168 = vmatmul.mubr.msk.bf16.gmra.mrb[48].mxu0 %vm366_vm4, %v34286_v27 }
 0x64e   : > { %28171 = vmatprep.mubr.msk.bf16.mxu0 %vm366_vm4, %v34288_v7 }
 0x655   : > { %28172 = vmatmul.mubr.msk.bf16.gmra.mrb[52].mxu0 %vm366_vm4, %v34294_v34 }
 0x656   : > { %28175 = vmatprep.mubr.msk.bf16.mxu0 %vm366_vm4, %v34296_v51 }
 0x65d   : > { %28176 = vmatmul.mubr.msk.bf16.gmra.mrb[56].mxu0 %vm366_vm4, %v34302_v54 }
 0x65e   : > { %28179 = vmatprep.mubr.msk.bf16.mxu0 %vm366_vm4, %v34304_v44 }
 0x665   : > { %28180 = vmatmul.mubr.msk.bf16.gmra.mrb[60].mxu0 %vm366_vm4, %v34310_v10 }
 0x666   : > { %28191 = vmatprep.mubr.msk.bf16.mxu0 %vm366_vm4, %v6724_v4  ;;  %v34361_v4 = vpack.c.bf16 %v6713_v20, %v6712_v47  ;;  %v32387_v47 = vld [vmem:[%s37581_s3 + $0x1d0] sm:$0xff]   ;;  %v32398_v20 = vld [vmem:[%s37581_s3 + $0x228] sm:$0xff]  }
 0x66d   : > { %28192 = vmatmul.mubr.msk.bf16.vlgmr.msra.gmra.mrb[32].mxu0 %vm366_vm4, %v34315_v14 }
 0x66e   : > { %28224 = vmatpush3.bf16.msra.mxu0 %v32377_v36  ;;  %28195 = vmatprep.mubr.msk.bf16.mxu0 %vm366_vm4, %v34320_v26  ;;  %v32380_v36 = vld [vmem:[%s37581_s3 + $0x198] sm:$0xff]  }
 0x66f   : > { %28225 = vmatprep.subr.bf16.mxu0 %v32378_v58 }
 0x672   : > { %28226 = vmatpush3.bf16.msra.mxu0 %v32378_v58  ;;  %v34367_v58 = vpack.c.bf16 %v6715_v33, %v6714_v42  ;;  %v32399_v33 = vld [vmem:[%s37581_s3 + $0x230] sm:$0xff]  }
 0x673   : > { %28227 = vmatprep.subr.bf16.mxu0 %v32379_v18 }
 0x675   : > { %28196 = vmatmul.mubr.msk.bf16.gmra.mrb[36].mxu0 %vm366_vm4, %v34329_v19 }
 0x676   : > { %28199 = vmatprep.mubr.msk.bf16.mxu0 %vm366_vm4, %v34334_v30  ;;  %28228 = vmatpush3.bf16.msra.mxu0 %v32379_v18  ;;  %v34369_v18 = vpack.c.bf16 %v6717_v1, %v6716_v62  ;;  %v8310_v62 = vld [vmem:[#allocation4 + $0x81] sm:$0xff]  ;;  %v8312_v1 = vld [vmem:[#allocation4 + $0x99] sm:$0xff] }
 0x677   : > { %28229 = vmatprep.subr.bf16.mxu0 %v32380_v36  ;;  %v8339_v49 = vpack.c.bf16 %v8312_v1, %v8311_v29  ;;  %v8989_v1 = vld [vmem:[#allocation3 + $0x61] sm:$0xff] }
 0x67a   : > { %28230 = vmatpush3.bf16.msra.mxu0 %v32380_v36  ;;  %v34375_v36 = vpack.c.bf16 %v6719_v59, %v6718_v48  ;;  %v8309_v48 = vld [vmem:[#allocation4 + $0x79] sm:$0xff] }
 0x67b   : > { %28263 = vmatprep.subr.bf16.mxu0 %v32381_v46  ;;  %v8338_v59 = vpack.c.bf16 %v8310_v62, %v8309_v48 }
 0x67d   : > { %28200 = vmatmul.mubr.msk.bf16.gmra.mrb[40].mxu0 %vm366_vm4, %v34343_v38 }
 0x67e   : > { %28203 = vmatprep.mubr.msk.bf16.mxu0 %vm366_vm4, %v34345_v55 }
 0x685   : > { %28204 = vmatmul.mubr.msk.bf16.gmra.mrb[44].mxu0 %vm366_vm4, %v34351_v24 }
 0x686   : > { %28207 = vmatprep.mubr.msk.bf16.mxu0 %vm366_vm4, %v34353_v25 }
 0x68d   : > { %28208 = vmatmul.mubr.msk.bf16.gmra.mrb[48].mxu0 %vm366_vm4, %v34359_v8 }
 0x68e   : > { %28211 = vmatprep.mubr.msk.bf16.mxu0 %vm366_vm4, %v34361_v4 }
 0x695   : > { %28212 = vmatmul.mubr.msk.bf16.gmra.mrb[52].mxu0 %vm366_vm4, %v34367_v58 }
 0x696   : > { %28215 = vmatprep.mubr.msk.bf16.mxu0 %vm366_vm4, %v34369_v18 }
 0x69d   : > { %28216 = vmatmul.mubr.msk.bf16.gmra.mrb[56].mxu0 %vm366_vm4, %v34375_v36 }
 0x69e   : > { %28219 = vmatprep.mubr.msk.bf16.mxu0 %vm366_vm4, %v34377_v17 }
 0x6a5   : > { %28220 = vmatmul.mubr.msk.bf16.gmra.mrb[60].mxu0 %vm366_vm4, %v34383_v40 }
 0x6a6   : > { %28231 = vmatprep.mubr.msk.bf16.mxu0 %vm366_vm4, %v34241_v6  ;;  %v32384_v6 = vld [vmem:[%s37581_s3 + $0x1b8] sm:$0xff]  }
 0x6ad   : > { %28232 = vmatmul.mubr.msk.bf16.vlgmr.msra.gmra.mrb[32].mxu0 %vm366_vm4, %v34246_v39 }
 0x6ae   : > { %28264 = vmatpush3.bf16.msra.mxu0 %v32381_v46  ;;  %28235 = vmatprep.mubr.msk.bf16.mxu0 %vm366_vm4, %v34256_v23  ;;  %v32385_v46 = vld [vmem:[%s37581_s3 + $0x1c0] sm:$0xff]  }
 0x6af   : > { %28265 = vmatprep.subr.bf16.mxu0 %v32382_v2 }
 0x6b2   : > { %28266 = vmatpush3.bf16.msra.mxu0 %v32382_v2  ;;  %v8316_v2 = vld [vmem:[#allocation4 + $0xc9] sm:$0xff] }
 0x6b3   : > { %28267 = vmatprep.subr.bf16.mxu0 %v32383_v41 }
 0x6b5   : > { %28236 = vmatmul.mubr.msk.bf16.gmra.mrb[36].mxu0 %vm366_vm4, %v34261_v61 }
 0x6b6   : > { %28239 = vmatprep.mubr.msk.bf16.mxu0 %vm366_vm4, %v34270_v43  ;;  %28268 = vmatpush3.bf16.msra.mxu0 %v32383_v41  ;;  %v8313_v41 = vld [vmem:[#allocation4 + $0xa9] sm:$0xff] }
 0x6b7   : > { %28269 = vmatprep.subr.bf16.mxu0 %v32384_v6 }
 0x6ba   : > { %28270 = vmatpush3.bf16.msra.mxu0 %v32384_v6  ;;  %v8340_v6 = vpack.c.bf16 %v8314_v37, %v8313_v41  ;;  %v8990_v41 = vld [vmem:[#allocation3 + $0x69] sm:$0xff] }
 0x6bb   : > { %28303 = vmatprep.subr.bf16.mxu0 %v32385_v46 }
 0x6bd   : > { %28240 = vmatmul.mubr.msk.bf16.gmra.mrb[40].mxu0 %vm366_vm4, %v34272_v12 }
 0x6be   : > { %28243 = vmatprep.mubr.msk.bf16.mxu0 %vm366_vm4, %v34278_v15 }
 0x6c5   : > { %28244 = vmatmul.mubr.msk.bf16.gmra.mrb[44].mxu0 %vm366_vm4, %v34280_v35 }
 0x6c6   : > { %28247 = vmatprep.mubr.msk.bf16.mxu0 %vm366_vm4, %v34286_v27 }
 0x6cd   : > { %28248 = vmatmul.mubr.msk.bf16.gmra.mrb[48].mxu0 %vm366_vm4, %v34288_v7 }
 0x6ce   : > { %28251 = vmatprep.mubr.msk.bf16.mxu0 %vm366_vm4, %v34294_v34 }
 0x6d5   : > { %28252 = vmatmul.mubr.msk.bf16.gmra.mrb[52].mxu0 %vm366_vm4, %v34296_v51 }
 0x6d6   : > { %28255 = vmatprep.mubr.msk.bf16.mxu0 %vm366_vm4, %v34302_v54 }
 0x6dd   : > { %28256 = vmatmul.mubr.msk.bf16.gmra.mrb[56].mxu0 %vm366_vm4, %v34304_v44 }
 0x6de   : > { %28259 = vmatprep.mubr.msk.bf16.mxu0 %vm366_vm4, %v34310_v10 }
 0x6e5   : > { %28260 = vmatmul.mubr.msk.bf16.gmra.mrb[60].mxu0 %vm366_vm4, %v34429_v22 }
 0x6e6   : > { %28271 = vmatprep.mubr.msk.bf16.mxu0 %vm366_vm4, %v34117_v31  ;;  %v32388_v31 = vld [vmem:[%s37581_s3 + $0x1d8] sm:$0xff]  }
 0x6ed   : > { %28272 = vmatmul.mubr.msk.bf16.vlgmr.msra.gmra.mrb[32].mxu0 %vm366_vm4, %v34123_v5  ;;  %v32389_v5 = vld [vmem:[%s37581_s3 + $0x1e0] sm:$0xff]  }
 0x6ee   : > { %28304 = vmatpush3.bf16.msra.mxu0 %v32385_v46  ;;  %28275 = vmatprep.mubr.msk.bf16.mxu0 %vm366_vm4, %v34139_v13  ;;  %v7367_v13 = vld [vmem:[#allocation4 + $0x189] sm:$0xff]  ;;  %v8315_v46 = vld [vmem:[#allocation4 + $0xc1] sm:$0xff] }
 0x6ef   : > { %28305 = vmatprep.subr.bf16.mxu0 %v32386_v21  ;;  %v8341_v11 = vpack.c.bf16 %v8316_v2, %v8315_v46 }
 0x6f2   : > { %28306 = vmatpush3.bf16.msra.mxu0 %v32386_v21  ;;  %v8317_v21 = vld [vmem:[#allocation4 + $0xd9] sm:$0xff] }
 0x6f3   : > { %28307 = vmatprep.subr.bf16.mxu0 %v32387_v47 }
 0x6f5   : > { %28276 = vmatmul.mubr.msk.bf16.gmra.mrb[36].mxu0 %vm366_vm4, %v34145_v32  ;;  %v7366_v32 = vld [vmem:[#allocation4 + $0x181] sm:$0xff] }
 0x6f6   : > { %28279 = vmatprep.mubr.msk.bf16.mxu0 %vm366_vm4, %v34163_v56  ;;  %28308 = vmatpush3.bf16.msra.mxu0 %v32387_v47  ;;  %v34475_v56 = vpack.c.bf16 %v7367_v13, %v7366_v32  ;;  %v8342_v47 = vpack.c.bf16 %v8318_v0, %v8317_v21  ;;  %v8322_v13 = vld [vmem:[#allocation4 + $0x111] sm:$0xff]  ;;  %v8324_v32 = vld [vmem:[#allocation4 + $0x129] sm:$0xff] }
 0x6f7   : > { %28309 = vmatprep.subr.bf16.mxu0 %v32388_v31 }
 0x6fa   : > { %28310 = vmatpush3.bf16.msra.mxu0 %v32388_v31  ;;  %v8319_v31 = vld [vmem:[#allocation4 + $0xf1] sm:$0xff] }
 0x6fb   : > { %28343 = vmatprep.subr.bf16.mxu0 %v32389_v5 }
 0x6fd   : > { %28280 = vmatmul.mubr.msk.bf16.gmra.mrb[40].mxu0 %vm366_vm4, %v34167_v53  ;;  %v32390_v53 = vld [vmem:[%s37581_s3 + $0x1e8] sm:$0xff]  }
 0x6fe   : > { %28283 = vmatprep.mubr.msk.bf16.mxu0 %vm366_vm4, %v34180_v9  ;;  %v32391_v9 = vld [vmem:[%s37581_s3 + $0x1f0] sm:$0xff]  }
 0x705   : > { %28284 = vmatmul.mubr.msk.bf16.gmra.mrb[44].mxu0 %vm366_vm4, %v34183_v52  ;;  %v32392_v52 = vld [vmem:[%s37581_s3 + $0x1f8] sm:$0xff]  }
 0x706   : > { %28287 = vmatprep.mubr.msk.bf16.mxu0 %vm366_vm4, %v34196_v3  ;;  %v32393_v3 = vld [vmem:[%s37581_s3 + $0x200] sm:$0xff]  }
 0x70d   : > { %28288 = vmatmul.mubr.msk.bf16.gmra.mrb[48].mxu0 %vm366_vm4, %v34199_v16  ;;  %v7688_v16 = vld [vmem:[#allocation4 + $0x182] sm:$0xff] }
 0x70e   : > { %28291 = vmatprep.mubr.msk.bf16.mxu0 %vm366_vm4, %v34212_v63  ;;  %v7689_v63 = vld [vmem:[#allocation4 + $0x18a] sm:$0xff] }
 0x715   : > { %28292 = vmatmul.mubr.msk.bf16.gmra.mrb[52].mxu0 %vm366_vm4, %v34215_v28  ;;  %v34521_v28 = vpack.c.bf16 %v7689_v63, %v7688_v16  ;;  %v8326_v16 = vld [vmem:[#allocation4 + $0x141] sm:$0xff]  ;;  %v8328_v63 = vld [vmem:[#allocation4 + $0x159] sm:$0xff] }
 0x716   : > { %28295 = vmatprep.mubr.msk.bf16.mxu0 %vm366_vm4, %v34228_v50  ;;  %v32394_v50 = vld [vmem:[%s37581_s3 + $0x208] sm:$0xff]  }
 0x71d   : > { %28296 = vmatmul.mubr.msk.bf16.gmra.mrb[56].mxu0 %vm366_vm4, %v34230_v57  ;;  %v32395_v57 = vld [vmem:[%s37581_s3 + $0x210] sm:$0xff]  }
 0x71e   : > { %28299 = vmatprep.mubr.msk.bf16.mxu0 %vm366_vm4, %v34236_v60  ;;  %v32396_v60 = vld [vmem:[%s37581_s3 + $0x218] sm:$0xff]  }
 0x725   : > { %28300 = vmatmul.mubr.msk.bf16.gmra.mrb[60].mxu0 %vm366_vm4, %v34475_v56 }
 0x726   : > { %28311 = vmatprep.mubr.msk.bf16.mxu0 %vm366_vm4, %v34315_v14  ;;  %v8307_v14 = vld [vmem:[#allocation4 + $0x61] sm:$0xff] }
 0x72d   : > { %28312 = vmatmul.mubr.msk.bf16.vlgmr.msra.gmra.mrb[32].mxu0 %vm366_vm4, %v34320_v26 }
 0x72e   : > { %28344 = vmatpush3.bf16.msra.mxu0 %v32389_v5  ;;  %28315 = vmatprep.mubr.msk.bf16.mxu0 %vm366_vm4, %v34329_v19 }
 0x72f   : > { %28345 = vmatprep.subr.bf16.mxu0 %v32390_v53 }
 0x732   : > { %28346 = vmatpush3.bf16.msra.mxu0 %v32390_v53  ;;  %v8321_v53 = vld [vmem:[#allocation4 + $0x109] sm:$0xff] }
 0x733   : > { %28347 = vmatprep.subr.bf16.mxu0 %v32391_v9 }
 0x735   : > { %28316 = vmatmul.mubr.msk.bf16.gmra.mrb[36].mxu0 %vm366_vm4, %v34334_v30 }
 0x736   : > { %28319 = vmatprep.mubr.msk.bf16.mxu0 %vm366_vm4, %v34343_v38  ;;  %28348 = vmatpush3.bf16.msra.mxu0 %v32391_v9  ;;  %v8344_v9 = vpack.c.bf16 %v8322_v13, %v8321_v53 }
 0x737   : > { %28349 = vmatprep.subr.bf16.mxu0 %v32392_v52 }
 0x73a   : > { %28350 = vmatpush3.bf16.msra.mxu0 %v32392_v52  ;;  %v8323_v52 = vld [vmem:[#allocation4 + $0x121] sm:$0xff] }
 0x73b   : > { %28383 = vmatprep.subr.bf16.mxu0 %v32393_v3 }
 0x73d   : > { %28320 = vmatmul.mubr.msk.bf16.gmra.mrb[40].mxu0 %vm366_vm4, %v34345_v55 }
 0x73e   : > { %28323 = vmatprep.mubr.msk.bf16.mxu0 %vm366_vm4, %v34351_v24 }
 0x745   : > { %28324 = vmatmul.mubr.msk.bf16.gmra.mrb[44].mxu0 %vm366_vm4, %v34353_v25 }
 0x746   : > { %28327 = vmatprep.mubr.msk.bf16.mxu0 %vm366_vm4, %v34359_v8 }
 0x74d   : > { %28328 = vmatmul.mubr.msk.bf16.gmra.mrb[48].mxu0 %vm366_vm4, %v34361_v4 }
 0x74e   : > { %28331 = vmatprep.mubr.msk.bf16.mxu0 %vm366_vm4, %v34367_v58 }
 0x755   : > { %28332 = vmatmul.mubr.msk.bf16.gmra.mrb[52].mxu0 %vm366_vm4, %v34369_v18 }
 0x756   : > { %28335 = vmatprep.mubr.msk.bf16.mxu0 %vm366_vm4, %v34375_v36 }
 0x75d   : > { %28336 = vmatmul.mubr.msk.bf16.gmra.mrb[56].mxu0 %vm366_vm4, %v34377_v17 }
 0x75e   : > { %28339 = vmatprep.mubr.msk.bf16.mxu0 %vm366_vm4, %v34383_v40 }
 0x765   : > { %28340 = vmatmul.mubr.msk.bf16.gmra.mrb[60].mxu0 %vm366_vm4, %v34521_v28 }
 0x766   : > { %28351 = vmatprep.mubr.msk.bf16.mxu0 %vm366_vm4, %v34246_v39  ;;  %v32397_v39 = vld [vmem:[%s37581_s3 + $0x220] sm:$0xff]  }
 0x76d   : > { %28352 = vmatmul.mubr.msk.bf16.vlgmr.msra.gmra.mrb[32].mxu0 %vm366_vm4, %v34256_v23  ;;  %v8011_v23 = vld [vmem:[#allocation4 + $0x198] sm:$0xff] }
 0x76e   : > { %28384 = vmatpush3.bf16.msra.mxu0 %v32393_v3  ;;  %28355 = vmatprep.mubr.msk.bf16.mxu0 %vm366_vm4, %v34261_v61  ;;  %v8012_v61 = vld [vmem:[#allocation4 + $0x1a0] sm:$0xff]  ;;  %v8345_v3 = vpack.c.bf16 %v8324_v32, %v8323_v52  ;;  %v32406_v32 = vld [vmem:[%s37581_s3 + $0x248] sm:$0xff]  }
 0x76f   : > { %28385 = vmatprep.subr.bf16.mxu0 %v32394_v50 }
 0x772   : > { %28386 = vmatpush3.bf16.msra.mxu0 %v32394_v50  ;;  %v8325_v50 = vld [vmem:[#allocation4 + $0x139] sm:$0xff] }
 0x773   : > { %28387 = vmatprep.subr.bf16.mxu0 %v32395_v57 }
 0x775   : > { %28356 = vmatmul.mubr.msk.bf16.gmra.mrb[36].mxu0 %vm366_vm4, %v34270_v43  ;;  %v8028_v43 = vpack.c.bf16 %v8012_v61, %v8011_v23  ;;  %v8330_v23 = vld [vmem:[#allocation4 + $0x171] sm:$0xff]  ;;  %v8329_v61 = vld [vmem:[#allocation4 + $0x169] sm:$0xff] }
 0x776   : > { %28359 = vmatprep.mubr.msk.bf16.mxu0 %vm366_vm4, %v34272_v12  ;;  %28388 = vmatpush3.bf16.msra.mxu0 %v32395_v57  ;;  %v8304_v12 = vld [vmem:[#allocation4 + $0x39] sm:$0xff]  ;;  %v8346_v57 = vpack.c.bf16 %v8326_v16, %v8325_v50 }
 0x777   : > { %28389 = vmatprep.subr.bf16.mxu0 %v32396_v60 }
 0x77a   : > { %28390 = vmatpush3.bf16.msra.mxu0 %v32396_v60  ;;  %v8327_v60 = vld [vmem:[#allocation4 + $0x151] sm:$0xff] }
 0x77b   : > { %28423 = vmatprep.subr.bf16.mxu0 %v32397_v39 }
 0x77d   : > { %28360 = vmatmul.mubr.msk.bf16.gmra.mrb[40].mxu0 %vm366_vm4, %v34278_v15  ;;  %v8303_v15 = vld [vmem:[#allocation4 + $0x31] sm:$0xff] }
 0x77e   : > { %28363 = vmatprep.mubr.msk.bf16.mxu0 %vm366_vm4, %v34280_v35  ;;  %v8335_v35 = vpack.c.bf16 %v8304_v12, %v8303_v15  ;;  %v8333_v12 = vld [vmem:[#allocation4 + $0x199] sm:$0xff]  ;;  %v8334_v15 = vld [vmem:[#allocation4 + $0x1a1] sm:$0xff] }
 0x785   : > { %28364 = vmatmul.mubr.msk.bf16.gmra.mrb[44].mxu0 %vm366_vm4, %v34286_v27  ;;  %v32401_v27 = vld [vmem:[%s37581_s3 + $0x260] sm:$0xff]  }
 0x786   : > { %28367 = vmatprep.mubr.msk.bf16.mxu0 %vm366_vm4, %v34288_v7  ;;  %v32402_v7 = vld [vmem:[%s37581_s3 + $0x268] sm:$0xff]   ;;  %28463 = vmatprep.subr.bf16.mxu1 %v32401_v27 }
 0x787   : > { %28464 = vmatpush3.bf16.msra.mxu1 %v32401_v27  ;;  %v8983_v27 = vld [vmem:[#allocation3 + $0x19] sm:$0xff] }
 0x788   : > { %28465 = vmatprep.subr.bf16.mxu1 %v32402_v7 }
 0x78b   : > { %28466 = vmatpush3.bf16.msra.mxu1 %v32402_v7 }
 0x78d   : > { %28368 = vmatmul.mubr.msk.bf16.gmra.mrb[48].mxu0 %vm366_vm4, %v34294_v34  ;;  %v8306_v34 = vld [vmem:[#allocation4 + $0x51] sm:$0xff] }
 0x78e   : > { %28371 = vmatprep.mubr.msk.bf16.mxu0 %vm366_vm4, %v34296_v51  ;;  %v8308_v51 = vld [vmem:[#allocation4 + $0x69] sm:$0xff] }
 0x78f   : > { %v8337_v42 = vpack.c.bf16 %v8308_v51, %v8307_v14  ;;  %v8984_v14 = vld [vmem:[#allocation3 + $0x21] sm:$0xff] }
 0x795   : > { %28372 = vmatmul.mubr.msk.bf16.gmra.mrb[52].mxu0 %vm366_vm4, %v34302_v54  ;;  %v32403_v54 = vld [vmem:[%s37581_s3 + $0x270] sm:$0xff]  }
 0x796   : > { %28375 = vmatprep.mubr.msk.bf16.mxu0 %vm366_vm4, %v34304_v44  ;;  %v8305_v44 = vld [vmem:[#allocation4 + $0x49] sm:$0xff]  ;;  %28467 = vmatprep.subr.bf16.mxu1 %v32403_v54 }
 0x797   : > { %28468 = vmatpush3.bf16.msra.mxu1 %v32403_v54  ;;  %v8986_v54 = vld [vmem:[#allocation3 + $0x39] sm:$0xff] }
 0x79d   : > { %28376 = vmatmul.mubr.msk.bf16.gmra.mrb[56].mxu0 %vm366_vm4, %v34310_v10  ;;  %v8336_v10 = vpack.c.bf16 %v8306_v34, %v8305_v44 }
 0x79e   : > { %28379 = vmatprep.mubr.msk.bf16.mxu0 %vm366_vm4, %v34429_v22  ;;  %v8320_v22 = vld [vmem:[#allocation4 + $0xf9] sm:$0xff] }
 0x79f   : > { %v8343_v5 = vpack.c.bf16 %v8320_v22, %v8319_v31 }
 0x7a5   : > { %28380 = vmatmul.mubr.msk.bf16.gmra.mrb[60].mxu0 %vm366_vm4, %v8028_v43  ;;  %v8348_v43 = vpack.c.bf16 %v8330_v23, %v8329_v61  ;;  %v8994_v61 = vld [vmem:[#allocation3 + $0x99] sm:$0xff] }
 0x7a6   : > { %28391 = vmatprep.mubr.msk.bf16.mxu0 %vm366_vm4, %v8335_v35  ;;  %v8350_v35 = vpack.c.bf16 %v8334_v15, %v8333_v12  ;;  %v32407_v12 = vld [vmem:[%s37581_s3 + $0x250] sm:$0xff]  }
 0x7ad   : > { %28392 = vmatmul.mubr.msk.bf16.vlgmr.msra.gmra.mrb[32].mxu0 %vm366_vm4, %v8336_v10 }
 0x7ae   : > { %28424 = vmatpush3.bf16.msra.mxu0 %v32397_v39  ;;  %28395 = vmatprep.mubr.msk.bf16.mxu0 %vm366_vm4, %v8337_v42  ;;  %v8347_v39 = vpack.c.bf16 %v8328_v63, %v8327_v60 }
 0x7af   : > { %28425 = vmatprep.subr.bf16.mxu0 %v32398_v20 }
 0x7b2   : > { %28426 = vmatpush3.bf16.msra.mxu0 %v32398_v20 }
 0x7b3   : > { %28427 = vmatprep.subr.bf16.mxu0 %v32399_v33 }
 0x7b5   : > { %28396 = vmatmul.mubr.msk.bf16.gmra.mrb[36].mxu0 %vm366_vm4, %v8338_v59 }
 0x7b6   : > { %28399 = vmatprep.mubr.msk.bf16.mxu0 %vm366_vm4, %v8339_v49  ;;  %28428 = vmatpush3.bf16.msra.mxu0 %v32399_v33 }
 0x7b7   : > { %28429 = vmatprep.subr.bf16.mxu0 %v32400_v45 }
 0x7ba   : > { %28430 = vmatpush3.bf16.msra.mxu0 %v32400_v45  ;;  %v8987_v45 = vld [vmem:[#allocation3 + $0x49] sm:$0xff] }
 0x7bd   : > { %28400 = vmatmul.mubr.msk.bf16.gmra.mrb[40].mxu0 %vm366_vm4, %v8340_v6 }
 0x7be   : > { %28403 = vmatprep.mubr.msk.bf16.mxu0 %vm366_vm4, %v8341_v11  ;;  %v8988_v11 = vld [vmem:[#allocation3 + $0x51] sm:$0xff] }
 0x7c5   : > { %28404 = vmatmul.mubr.msk.bf16.gmra.mrb[44].mxu0 %vm366_vm4, %v8342_v47 }
 0x7c6   : > { %28407 = vmatprep.mubr.msk.bf16.mxu0 %vm366_vm4, %v8343_v5 }
 0x7cd   : > { %28408 = vmatmul.mubr.msk.bf16.gmra.mrb[48].mxu0 %vm366_vm4, %v8344_v9 }
 0x7ce   : > { %28411 = vmatprep.mubr.msk.bf16.mxu0 %vm366_vm4, %v8345_v3  ;;  %v8993_v3 = vld [vmem:[#allocation3 + $0x91] sm:$0xff] }
 0x7d5   : > { %28412 = vmatmul.mubr.msk.bf16.gmra.mrb[52].mxu0 %vm366_vm4, %v8346_v57  ;;  %v8991_v57 = vld [vmem:[#allocation3 + $0x79] sm:$0xff] }
 0x7d6   : > { %28415 = vmatprep.mubr.msk.bf16.mxu0 %vm366_vm4, %v8347_v39 }
 0x7dd   : > { %28416 = vmatmul.mubr.msk.bf16.gmra.mrb[56].mxu0 %vm366_vm4, %v8348_v43 }
 0x7de   : > { %28419 = vmatprep.mubr.msk.bf16.mxu0 %vm366_vm4, %v34475_v56 }
 0x7e5   : > { %28420 = vmatmul.mubr.msk.bf16.gmra.mrb[60].mxu0 %vm366_vm4, %v8350_v35  ;;  %v8992_v35 = vld [vmem:[#allocation3 + $0x81] sm:$0xff] }
 0x7e6   : > { %28431 = vmatprep.mubr.msk.bf16.mxu0 %vm366_vm4, %v34320_v26  ;;  %v8655_v26 = vld [vmem:[#allocation4 + $0x19a] sm:$0xff] }
 0x7ed   : > { %28432 = vmatmul.mubr.msk.bf16.vlgmr.msra.gmra.mrb[32].mxu0 %vm366_vm4, %v34329_v19  ;;  %v8656_v19 = vld [vmem:[#allocation4 + $0x1a2] sm:$0xff] }
 0x7ee   : > { %28435 = vmatprep.mubr.msk.bf16.mxu0 %vm366_vm4, %v34334_v30  ;;  %v8672_v30 = vpack.c.bf16 %v8656_v19, %v8655_v26 }
 0x7f5   : > { %28436 = vmatmul.mubr.msk.bf16.gmra.mrb[36].mxu0 %vm366_vm4, %v34343_v38  ;;  %v32404_v38 = vld [vmem:[%s37581_s3 + $0x278] sm:$0xff]  }
 0x7f6   : > { %28439 = vmatprep.mubr.msk.bf16.mxu0 %vm366_vm4, %v34345_v55  ;;  %28469 = vmatprep.subr.bf16.mxu1 %v32404_v38  ;;  %v9137_v55 = vld [vmem:[#allocation3 + $0x1] sm:$0xff] }
 0x7f7   : > { %28470 = vmatpush3.bf16.msra.mxu1 %v32404_v38 }
 0x7fd   : > { %28440 = vmatmul.mubr.msk.bf16.gmra.mrb[40].mxu0 %vm366_vm4, %v34351_v24  ;;  %v9138_v24 = vld [vmem:[#allocation3 + $0x9] sm:$0xff] }
 0x7fe   : > { %28443 = vmatprep.mubr.msk.bf16.mxu0 %vm366_vm4, %v34353_v25  ;;  %v9169_v25 = vpack.c.bf16 %v9138_v24, %v9137_v55 }
 0x800   : > { %28471 = vmatprep.mubr.msk.bf16.mxu1 %vm366_vm4, %v9169_v25 }
 0x805   : > { %28444 = vmatmul.mubr.msk.bf16.gmra.mrb[44].mxu0 %vm366_vm4, %v34359_v8  ;;  %v32405_v8 = vld [vmem:[%s37581_s3 + $0x240] sm:$0xff]  }
 0x806   : > { %28447 = vmatprep.mubr.msk.bf16.mxu0 %vm366_vm4, %v34361_v4  ;;  %28503 = vmatprep.subr.bf16.mxu1 %v32405_v8  ;;  %v34644_v4 = vld [vmem:[%s37582_s4 + $0x1] ss:$0 sm:$0xff] }
 0x80d   : > { %28448 = vmatmul.mubr.msk.bf16.gmra.mrb[48].mxu0 %vm366_vm4, %v34367_v58 }
 0x80e   : > { %28451 = vmatprep.mubr.msk.bf16.mxu0 %vm366_vm4, %v34369_v18 }
 0x815   : > { %28452 = vmatmul.mubr.msk.bf16.gmra.mrb[52].mxu0 %vm366_vm4, %v34375_v36 }
 0x816   : > { %28455 = vmatprep.mubr.msk.bf16.mxu0 %vm366_vm4, %v34377_v17  ;;  %v8985_v17 = vld [vmem:[#allocation3 + $0x31] sm:$0xff] }
 0x81d   : > { %28456 = vmatmul.mubr.msk.bf16.gmra.mrb[56].mxu0 %vm366_vm4, %v34383_v40 }
 0x81e   : > { %28459 = vmatprep.mubr.msk.bf16.mxu0 %vm366_vm4, %v34521_v28 }
 0x825   : > { %28460 = vmatmul.mubr.msk.bf16.gmra.mrb[60].mxu0 %vm366_vm4, %v8672_v30 }
 0x8c0   : > { %v28433_v58 = vpop.f32.mrb[32].mxu0 }
 0x8c1   : > { %v8953_v18 = vadd.f32 %v28433_v58, %v34644_v4  ;;  %v8788_v36 = vpop.f32.mrb[33].mxu0 }
 0x8c2   : > { %v8951_v40 = vadd.f32 %v34644_v4, %v8788_v36  ;;  %v28434_v56 = vpop.f32.mrb[34].mxu0 }
 0x8c3   : > { %v9017_v28 = vadd.f32 %v8985_v17, %v8953_v18  ;;  %v8954_v7 = vadd.f32 %v28434_v56, %v34644_v4  ;;  %v8791_v34 = vpop.f32.mrb[35].mxu0  ;;  %v8997_v17 = vld [vmem:[#allocation3 + $0xc1] sm:$0xff] }
 0x8c4   : > { %v9015_v51 = vadd.f32 %v8983_v27, %v8951_v40  ;;  %v8952_v44 = vadd.f32 %v34644_v4, %v8791_v34  ;;  %v8995_v27 = vld [vmem:[#allocation3 + $0xa9] sm:$0xff] }
 0x8c5   : > { %9049 = vst.msk [vmem:[#allocation3 + $0x31] sm:$0xff] %vm366_vm4, %v9017_v28  ;;  %v9018_v10 = vadd.f32 %v8986_v54, %v8954_v7  ;;  %v8998_v54 = vld [vmem:[#allocation3 + $0xc9] sm:$0xff] }
 0x8c6   : > { %9047 = vst.msk [vmem:[#allocation3 + $0x19] sm:$0xff] %vm366_vm4, %v9015_v51  ;;  %v9016_v20 = vadd.f32 %v8984_v14, %v8952_v44 }
 0x8c7   : > { %9050 = vst.msk [vmem:[#allocation3 + $0x39] sm:$0xff] %vm366_vm4, %v9018_v10  ;;  %v34702_v10 = vld [vmem:[%s37581_s3 + $0x280] sm:$0xff]  }
 0x8c8   : > { %9048 = vst.msk [vmem:[#allocation3 + $0x21] sm:$0xff] %vm366_vm4, %v9016_v20  ;;  %v28437_v42 = vpop.f32.mrb[36].mxu0  ;;  %v8996_v20 = vld [vmem:[#allocation3 + $0xb1] sm:$0xff] }
 0x8c9   : > { %v8957_v33 = vadd.f32 %v28437_v42, %v34644_v4  ;;  %v8804_v62 = vpop.f32.mrb[37].mxu0 }
 0x8ca   : > { %v8955_v48 = vadd.f32 %v34644_v4, %v8804_v62  ;;  %v28438_v59 = vpop.f32.mrb[38].mxu0 }
 0x8cb   : > { %v9021_v29 = vadd.f32 %v8989_v1, %v8957_v33  ;;  %v8958_v49 = vadd.f32 %v28438_v59, %v34644_v4  ;;  %v8807_v37 = vpop.f32.mrb[39].mxu0 }
 0x8cc   : > { %v9019_v2 = vadd.f32 %v8987_v45, %v8955_v48  ;;  %v8956_v6 = vadd.f32 %v34644_v4, %v8807_v37  ;;  %v9141_v13 = vld [vmem:[#allocation3 + $0x31] sm:$0xff] }
 0x8cd   : > { %9053 = vst.msk [vmem:[#allocation3 + $0x61] sm:$0xff] %vm366_vm4, %v9021_v29  ;;  %v9022_v46 = vadd.f32 %v8990_v41, %v8958_v49  ;;  %v9139_v21 = vld [vmem:[#allocation3 + $0x19] sm:$0xff] }
 0x8ce   : > { %9051 = vst.msk [vmem:[#allocation3 + $0x49] sm:$0xff] %vm366_vm4, %v9019_v2  ;;  %v9020_v0 = vadd.f32 %v8988_v11, %v8956_v6  ;;  %v9142_v22 = vld [vmem:[#allocation3 + $0x39] sm:$0xff]  ;;  %v9001_v2 = vld [vmem:[#allocation3 + $0xf1] sm:$0xff] }
 0x8cf   : > { %9054 = vst.msk [vmem:[#allocation3 + $0x69] sm:$0xff] %vm366_vm4, %v9022_v46  ;;  %v9140_v47 = vld [vmem:[#allocation3 + $0x21] sm:$0xff]  ;;  %v34668_v52 = vpack.c.bf16 %v9142_v22, %v9141_v13  ;;  %v8999_v11 = vld [vmem:[#allocation3 + $0xd9] sm:$0xff] }
 0x8d0   : > { %9052 = vst.msk [vmem:[#allocation3 + $0x51] sm:$0xff] %vm366_vm4, %v9020_v0  ;;  %v28441_v31 = vpop.f32.mrb[40].mxu0  ;;  %v34662_v5 = vpack.c.bf16 %v9140_v47, %v9139_v21  ;;  %v9002_v47 = vld [vmem:[#allocation3 + $0xf9] sm:$0xff] }
 0x8d1   : > { %v8961_v53 = vadd.f32 %v28441_v31, %v34644_v4  ;;  %v8820_v9 = vpop.f32.mrb[41].mxu0 }
 0x8d2   : > { %v8959_v16 = vadd.f32 %v34644_v4, %v8820_v9  ;;  %v28442_v63 = vpop.f32.mrb[42].mxu0  ;;  %28472 = vmatmul.mubr.msk.bf16.vlgmr.msra.gmra.mrb[32].mxu1 %vm366_vm4, %v34662_v5 }
 0x8d3   : > { %v9025_v50 = vadd.f32 %v8993_v3, %v8961_v53  ;;  %v8962_v60 = vadd.f32 %v28442_v63, %v34644_v4  ;;  %28504 = vmatpush3.bf16.msra.mxu1 %v32405_v8  ;;  %v8823_v39 = vpop.f32.mrb[43].mxu0  ;;  %28475 = vmatprep.mubr.msk.bf16.mxu1 %vm366_vm4, %v34668_v52  ;;  %v32408_v8 = vld [vmem:[%s37581_s3 + $0x258] sm:$0xff]  }
 0x8d4   : > { %v9023_v23 = vadd.f32 %v8991_v57, %v8959_v16  ;;  %v8960_v43 = vadd.f32 %v34644_v4, %v8823_v39  ;;  %28505 = vmatprep.subr.bf16.mxu1 %v32406_v32  ;;  %v9145_v25 = vld [vmem:[#allocation3 + $0x61] sm:$0xff] }
 0x8d5   : > { %9057 = vst.msk [vmem:[#allocation3 + $0x91] sm:$0xff] %vm366_vm4, %v9025_v50  ;;  %v9026_v15 = vadd.f32 %v8994_v61, %v8962_v60  ;;  %v9143_v30 = vld [vmem:[#allocation3 + $0x49] sm:$0xff]  ;;  %v9005_v61 = vld [vmem:[#allocation3 + $0x121] sm:$0xff] }
 0x8d6   : > { %9055 = vst.msk [vmem:[#allocation3 + $0x79] sm:$0xff] %vm366_vm4, %v9023_v23  ;;  %v9024_v26 = vadd.f32 %v8992_v35, %v8960_v43  ;;  %v9146_v19 = vld [vmem:[#allocation3 + $0x69] sm:$0xff] }
 0x8d7   : > { %9058 = vst.msk [vmem:[#allocation3 + $0x99] sm:$0xff] %vm366_vm4, %v9026_v15  ;;  %v9144_v38 = vld [vmem:[#allocation3 + $0x51] sm:$0xff]  ;;  %28506 = vmatpush3.bf16.msra.mxu1 %v32406_v32  ;;  %v34690_v36 = vpack.c.bf16 %v9146_v19, %v9145_v25  ;;  %v9000_v32 = vld [vmem:[#allocation3 + $0xe1] sm:$0xff]  ;;  %v9003_v35 = vld [vmem:[#allocation3 + $0x109] sm:$0xff] }
 0x8d8   : > { %9056 = vst.msk [vmem:[#allocation3 + $0x81] sm:$0xff] %vm366_vm4, %v9024_v26  ;;  %v28445_v55 = vpop.f32.mrb[44].mxu0  ;;  %v34684_v24 = vpack.c.bf16 %v9144_v38, %v9143_v30  ;;  %28507 = vmatprep.subr.bf16.mxu1 %v32407_v12  ;;  %v9006_v38 = vld [vmem:[#allocation3 + $0x129] sm:$0xff] }
 0x8d9   : > { %v8965_v58 = vadd.f32 %v28445_v55, %v34644_v4  ;;  %v8836_v18 = vpop.f32.mrb[45].mxu0 }
 0x8da   : > { %v8963_v40 = vadd.f32 %v34644_v4, %v8836_v18  ;;  %v28446_v56 = vpop.f32.mrb[46].mxu0  ;;  %28476 = vmatmul.mubr.msk.bf16.gmra.mrb[36].mxu1 %vm366_vm4, %v34684_v24 }
 0x8db   : > { %v9029_v28 = vadd.f32 %v8997_v17, %v8965_v58  ;;  %v8966_v7 = vadd.f32 %v28446_v56, %v34644_v4  ;;  %v8839_v34 = vpop.f32.mrb[47].mxu0  ;;  %28479 = vmatprep.mubr.msk.bf16.mxu1 %vm366_vm4, %v34690_v36  ;;  %28508 = vmatpush3.bf16.msra.mxu1 %v32407_v12 }
 0x8dc   : > { %v9027_v51 = vadd.f32 %v8995_v27, %v8963_v40  ;;  %v8964_v44 = vadd.f32 %v34644_v4, %v8839_v34  ;;  %28509 = vmatprep.subr.bf16.mxu1 %v32408_v8  ;;  %v9149_v29 = vld [vmem:[#allocation3 + $0x91] sm:$0xff] }
 0x8dd   : > { %9061 = vst.msk [vmem:[#allocation3 + $0xc1] sm:$0xff] %vm366_vm4, %v9029_v28  ;;  %v9030_v14 = vadd.f32 %v8998_v54, %v8966_v7  ;;  %v9147_v62 = vld [vmem:[#allocation3 + $0x79] sm:$0xff]  ;;  %v9009_v54 = vld [vmem:[#allocation3 + $0x151] sm:$0xff] }
 0x8de   : > { %9059 = vst.msk [vmem:[#allocation3 + $0xa9] sm:$0xff] %vm366_vm4, %v9027_v51  ;;  %v9028_v42 = vadd.f32 %v8996_v20, %v8964_v44  ;;  %v9150_v33 = vld [vmem:[#allocation3 + $0x99] sm:$0xff] }
 0x8df   : > { %9062 = vst.msk [vmem:[#allocation3 + $0xc9] sm:$0xff] %vm366_vm4, %v9030_v14  ;;  %v9148_v1 = vld [vmem:[#allocation3 + $0x81] sm:$0xff]  ;;  %28510 = vmatpush3.bf16.msra.mxu1 %v32408_v8  ;;  %v34712_v37 = vpack.c.bf16 %v9150_v33, %v9149_v29  ;;  %v9004_v8 = vld [vmem:[#allocation3 + $0x111] sm:$0xff] }
 0x8e0   : > { %9060 = vst.msk [vmem:[#allocation3 + $0xb1] sm:$0xff] %vm366_vm4, %v9028_v42  ;;  %v28449_v48 = vpop.f32.mrb[48].mxu0  ;;  %v34708_v59 = vpack.c.bf16 %v9148_v1, %v9147_v62  ;;  %28543 = vmatprep.subr.bf16.mxu1 %v34702_v10  ;;  %v9007_v42 = vld [vmem:[#allocation3 + $0x139] sm:$0xff] }
 0x8e1   : > { %v8969_v45 = vadd.f32 %v28449_v48, %v34644_v4  ;;  %v8852_v49 = vpop.f32.mrb[49].mxu0  ;;  %v9010_v48 = vld [vmem:[#allocation3 + $0x159] sm:$0xff] }
 0x8e2   : > { %v8967_v41 = vadd.f32 %v34644_v4, %v8852_v49  ;;  %v28450_v6 = vpop.f32.mrb[50].mxu0  ;;  %28480 = vmatmul.mubr.msk.bf16.gmra.mrb[40].mxu1 %vm366_vm4, %v34708_v59  ;;  %v9008_v49 = vld [vmem:[#allocation3 + $0x141] sm:$0xff] }
 0x8e3   : > { %v9033_v46 = vadd.f32 %v9001_v2, %v8969_v45  ;;  %v8970_v0 = vadd.f32 %v28450_v6, %v34644_v4  ;;  %v8855_v22 = vpop.f32.mrb[51].mxu0  ;;  %28483 = vmatprep.mubr.msk.bf16.mxu1 %vm366_vm4, %v34712_v37 }
 0x8e4   : > { %v9031_v21 = vadd.f32 %v8999_v11, %v8967_v41  ;;  %v8968_v31 = vadd.f32 %v34644_v4, %v8855_v22  ;;  %v9153_v57 = vld [vmem:[#allocation3 + $0xc1] sm:$0xff] }
 0x8e5   : > { %9065 = vst.msk [vmem:[#allocation3 + $0xf1] sm:$0xff] %vm366_vm4, %v9033_v46  ;;  %v9034_v13 = vadd.f32 %v9002_v47, %v8970_v0  ;;  %v9151_v3 = vld [vmem:[#allocation3 + $0xa9] sm:$0xff] }
 0x8e6   : > { %9063 = vst.msk [vmem:[#allocation3 + $0xd9] sm:$0xff] %vm366_vm4, %v9031_v21  ;;  %v9032_v53 = vadd.f32 %v9000_v32, %v8968_v31  ;;  %v9154_v9 = vld [vmem:[#allocation3 + $0xc9] sm:$0xff] }
 0x8e7   : > { %9066 = vst.msk [vmem:[#allocation3 + $0xf9] sm:$0xff] %vm366_vm4, %v9034_v13  ;;  %v9152_v16 = vld [vmem:[#allocation3 + $0xb1] sm:$0xff]  ;;  %v34728_v23 = vpack.c.bf16 %v9154_v9, %v9153_v57  ;;  %v9013_v13 = vld [vmem:[#allocation3 + $0x181] sm:$0xff] }
 0x8e8   : > { %9064 = vst.msk [vmem:[#allocation3 + $0xe1] sm:$0xff] %vm366_vm4, %v9032_v53  ;;  %v28453_v63 = vpop.f32.mrb[52].mxu0  ;;  %v34725_v50 = vpack.c.bf16 %v9152_v16, %v9151_v3  ;;  %v9011_v3 = vld [vmem:[#allocation3 + $0x169] sm:$0xff] }
 0x8e9   : > { %v8973_v60 = vadd.f32 %v28453_v63, %v34644_v4  ;;  %v8868_v39 = vpop.f32.mrb[53].mxu0 }
 0x8ea   : > { %v8971_v43 = vadd.f32 %v34644_v4, %v8868_v39  ;;  %v28454_v12 = vpop.f32.mrb[54].mxu0  ;;  %28484 = vmatmul.mubr.msk.bf16.gmra.mrb[44].mxu1 %vm366_vm4, %v34725_v50 }
 0x8eb   : > { %v9037_v15 = vadd.f32 %v9005_v61, %v8973_v60  ;;  %v8974_v26 = vadd.f32 %v28454_v12, %v34644_v4  ;;  %v8871_v19 = vpop.f32.mrb[55].mxu0  ;;  %28487 = vmatprep.mubr.msk.bf16.mxu1 %vm366_vm4, %v34728_v23  ;;  %v9014_v60 = vld [vmem:[#allocation3 + $0x189] sm:$0xff] }
 0x8ec   : > { %v9035_v30 = vadd.f32 %v9003_v35, %v8971_v43  ;;  %v8972_v55 = vadd.f32 %v34644_v4, %v8871_v19  ;;  %v9157_v27 = vld [vmem:[#allocation3 + $0xf1] sm:$0xff] }
 0x8ed   : > { %9069 = vst.msk [vmem:[#allocation3 + $0x121] sm:$0xff] %vm366_vm4, %v9037_v15  ;;  %v9038_v25 = vadd.f32 %v9006_v38, %v8974_v26  ;;  %v9155_v17 = vld [vmem:[#allocation3 + $0xd9] sm:$0xff]  ;;  %v9012_v43 = vld [vmem:[#allocation3 + $0x171] sm:$0xff] }
 0x8ee   : > { %9067 = vst.msk [vmem:[#allocation3 + $0x109] sm:$0xff] %vm366_vm4, %v9035_v30  ;;  %v9036_v58 = vadd.f32 %v9004_v8, %v8972_v55  ;;  %v9158_v18 = vld [vmem:[#allocation3 + $0xf9] sm:$0xff]  ;;  %v9081_v55 = vld [vmem:[#allocation3 + $0x8] sm:$0xff] }
 0x8ef   : > { %9070 = vst.msk [vmem:[#allocation3 + $0x129] sm:$0xff] %vm366_vm4, %v9038_v25  ;;  %v9156_v40 = vld [vmem:[#allocation3 + $0xe1] sm:$0xff]  ;;  %v34744_v51 = vpack.c.bf16 %v9158_v18, %v9157_v27 }
 0x8f0   : > { %9068 = vst.msk [vmem:[#allocation3 + $0x111] sm:$0xff] %vm366_vm4, %v9036_v58  ;;  %v28457_v56 = vpop.f32.mrb[56].mxu0  ;;  %v34741_v28 = vpack.c.bf16 %v9156_v40, %v9155_v17  ;;  %v9083_v17 = vld [vmem:[#allocation3 + $0x20] sm:$0xff]  ;;  %v9085_v40 = vld [vmem:[#allocation3 + $0x38] sm:$0xff] }
 0x8f1   : > { %v8977_v7 = vadd.f32 %v28457_v56, %v34644_v4  ;;  %v8884_v34 = vpop.f32.mrb[57].mxu0  ;;  %v9082_v56 = vld [vmem:[#allocation3 + $0x18] sm:$0xff] }
 0x8f2   : > { %v8975_v44 = vadd.f32 %v34644_v4, %v8884_v34  ;;  %v28458_v14 = vpop.f32.mrb[58].mxu0  ;;  %28488 = vmatmul.mubr.msk.bf16.gmra.mrb[48].mxu1 %vm366_vm4, %v34741_v28  ;;  %v34786_v27 = vpack.c.bf16 %v9083_v17, %v9082_v56  ;;  %v32410_v34 = vld [vmem:[%s37581_s3 + $0x288] sm:$0xff]  }
 0x8f3   : > { %v9041_v20 = vadd.f32 %v9009_v54, %v8977_v7  ;;  %v8978_v33 = vadd.f32 %v28458_v14, %v34644_v4  ;;  %v8887_v62 = vpop.f32.mrb[59].mxu0  ;;  %28491 = vmatprep.mubr.msk.bf16.mxu1 %vm366_vm4, %v34744_v51  ;;  %v9084_v7 = vld [vmem:[#allocation3 + $0x30] sm:$0xff] }
 0x8f4   : > { %v9039_v1 = vadd.f32 %v9007_v42, %v8975_v44  ;;  %v8976_v29 = vadd.f32 %v34644_v4, %v8887_v62  ;;  %v9161_v22 = vld [vmem:[#allocation3 + $0x121] sm:$0xff]  ;;  %v34791_v54 = vpack.c.bf16 %v9085_v40, %v9084_v7  ;;  %v9087_v14 = vld [vmem:[#allocation3 + $0x50] sm:$0xff] }
 0x8f5   : > { %9073 = vst.msk [vmem:[#allocation3 + $0x151] sm:$0xff] %vm366_vm4, %v9041_v20  ;;  %v9042_v45 = vadd.f32 %v9010_v48, %v8978_v33  ;;  %v9159_v6 = vld [vmem:[#allocation3 + $0x109] sm:$0xff]  ;;  %v32411_v44 = vld [vmem:[%s37581_s3 + $0x290] sm:$0xff]  }
 0x8f6   : > { %9071 = vst.msk [vmem:[#allocation3 + $0x139] sm:$0xff] %vm366_vm4, %v9039_v1  ;;  %v9040_v2 = vadd.f32 %v9008_v49, %v8976_v29  ;;  %v9162_v41 = vld [vmem:[#allocation3 + $0x129] sm:$0xff]  ;;  %v9088_v62 = vld [vmem:[#allocation3 + $0x60] sm:$0xff]  ;;  %v9090_v49 = vld [vmem:[#allocation3 + $0x78] sm:$0xff] }
 0x8f7   : > { %9074 = vst.msk [vmem:[#allocation3 + $0x159] sm:$0xff] %vm366_vm4, %v9042_v45  ;;  %v9160_v46 = vld [vmem:[#allocation3 + $0x111] sm:$0xff]  ;;  %v34760_v31 = vpack.c.bf16 %v9162_v41, %v9161_v22  ;;  %v9089_v20 = vld [vmem:[#allocation3 + $0x68] sm:$0xff]  ;;  %v9091_v29 = vld [vmem:[#allocation3 + $0x80] sm:$0xff] }
 0x8f8   : > { %9072 = vst.msk [vmem:[#allocation3 + $0x141] sm:$0xff] %vm366_vm4, %v9040_v2  ;;  %v28461_v11 = vpop.f32.mrb[60].mxu0  ;;  %v34757_v0 = vpack.c.bf16 %v9160_v46, %v9159_v6  ;;  %v9086_v42 = vld [vmem:[#allocation3 + $0x48] sm:$0xff]  ;;  %v34806_v1 = vpack.c.bf16 %v9089_v20, %v9088_v62  ;;  %v32413_v48 = vld [vmem:[%s37581_s3 + $0x2a0] sm:$0xff]   ;;  %v9093_v45 = vld [vmem:[#allocation3 + $0x98] sm:$0xff]  ;;  %v34815_v2 = vpack.c.bf16 %v9091_v29, %v9090_v49 }
 0x8f9   : > { %v8981_v21 = vadd.f32 %v28461_v11, %v34644_v4  ;;  %v8900_v47 = vpop.f32.mrb[61].mxu0  ;;  %v34801_v33 = vpack.c.bf16 %v9087_v14, %v9086_v42  ;;  %v9092_v41 = vld [vmem:[#allocation3 + $0x90] sm:$0xff]  ;;  %v9097_v11 = vld [vmem:[#allocation3 + $0xc8] sm:$0xff]  ;;  %v9662_v7 = vld [vmem:[#allocation3 + $0x1a] sm:$0xff] }
 0x8fa   : > { %v8979_v32 = vadd.f32 %v34644_v4, %v8900_v47  ;;  %v28462_v53 = vpop.f32.mrb[62].mxu0  ;;  %28492 = vmatmul.mubr.msk.bf16.gmra.mrb[52].mxu1 %vm366_vm4, %v34757_v0  ;;  %v34817_v6 = vpack.c.bf16 %v9093_v45, %v9092_v41  ;;  %v9095_v46 = vld [vmem:[#allocation3 + $0xb0] sm:$0xff]  ;;  %v9094_v22 = vld [vmem:[#allocation3 + $0xa8] sm:$0xff]  ;;  %v9096_v47 = vld [vmem:[#allocation3 + $0xc0] sm:$0xff] }
 0x8fb   : > { %v9045_v9 = vadd.f32 %v9013_v13, %v8981_v21  ;;  %v8982_v16 = vadd.f32 %v28462_v53, %v34644_v4  ;;  %v8903_v63 = vpop.f32.mrb[63].mxu0  ;;  %28495 = vmatprep.mubr.msk.bf16.mxu1 %vm366_vm4, %v34760_v31  ;;  %v34823_v21 = vpack.c.bf16 %v9095_v46, %v9094_v22  ;;  %v34825_v13 = vpack.c.bf16 %v9097_v11, %v9096_v47  ;;  %v9101_v53 = vld [vmem:[#allocation3 + $0xf8] sm:$0xff]  ;;  %v9666_v29 = vld [vmem:[#allocation3 + $0x4a] sm:$0xff]  ;;  %v9668_v49 = vld [vmem:[#allocation3 + $0x62] sm:$0xff] }
 0x8fc   : > { %v9043_v57 = vadd.f32 %v9011_v3, %v8979_v32  ;;  %v8980_v39 = vadd.f32 %v34644_v4, %v8903_v63  ;;  %v9165_v30 = vld [vmem:[#allocation3 + $0x151] sm:$0xff]  ;;  %v9080_v4 = vld [vmem:[#allocation3] sm:$0xff] }
 0x8fd   : > { %9077 = vst.msk [vmem:[#allocation3 + $0x181] sm:$0xff] %vm366_vm4, %v9045_v9  ;;  %v9046_v61 = vadd.f32 %v9014_v60, %v8982_v16  ;;  %v9163_v35 = vld [vmem:[#allocation3 + $0x139] sm:$0xff]  ;;  %v9112_v58 = vpack.c.bf16 %v9081_v55, %v9080_v4  ;;  %v9100_v16 = vld [vmem:[#allocation3 + $0xf0] sm:$0xff]  ;;  %v9105_v60 = vld [vmem:[#allocation3 + $0x128] sm:$0xff] }
 0x8fe   : > { %9075 = vst.msk [vmem:[#allocation3 + $0x169] sm:$0xff] %vm366_vm4, %v9043_v57  ;;  %v9044_v12 = vadd.f32 %v9012_v43, %v8980_v39  ;;  %v9166_v15 = vld [vmem:[#allocation3 + $0x159] sm:$0xff]  ;;  %v34833_v63 = vpack.c.bf16 %v9101_v53, %v9100_v16  ;;  %v9103_v57 = vld [vmem:[#allocation3 + $0x110] sm:$0xff]  ;;  %v9102_v39 = vld [vmem:[#allocation3 + $0x108] sm:$0xff] }
 0x8ff   : > { %9078 = vst.msk [vmem:[#allocation3 + $0x189] sm:$0xff] %vm366_vm4, %v9046_v61  ;;  %v9164_v26 = vld [vmem:[#allocation3 + $0x141] sm:$0xff]  ;;  %v34775_v38 = vpack.c.bf16 %v9166_v15, %v9165_v30  ;;  %v9098_v9 = vld [vmem:[#allocation3 + $0xd8] sm:$0xff]  ;;  %v34839_v61 = vpack.c.bf16 %v9103_v57, %v9102_v39  ;;  %v9108_v4 = vld [vmem:[#allocation3 + $0x150] sm:$0xff] }
 0x900   : > { %9076 = vst.msk [vmem:[#allocation3 + $0x171] sm:$0xff] %vm366_vm4, %v9044_v12  ;;  %v34773_v19 = vpack.c.bf16 %v9164_v26, %v9163_v35  ;;  %v9099_v32 = vld [vmem:[#allocation3 + $0xe0] sm:$0xff]  ;;  %v9109_v35 = vld [vmem:[#allocation3 + $0x158] sm:$0xff]  ;;  %v9669_v41 = vld [vmem:[#allocation3 + $0x6a] sm:$0xff] }
 0x901   : > { %v34831_v3 = vpack.c.bf16 %v9099_v32, %v9098_v9  ;;  %v9104_v43 = vld [vmem:[#allocation3 + $0x120] sm:$0xff]  ;;  %v9106_v26 = vld [vmem:[#allocation3 + $0x138] sm:$0xff]  ;;  %v34849_v55 = vpack.c.bf16 %v9109_v35, %v9108_v4  ;;  %v34879_v11 = vpack.c.bf16 %v9669_v41, %v9668_v49  ;;  %v32417_v22 = vld [vmem:[%s37581_s3 + $0x2c0] sm:$0xff]  }
 0x902   : > { %28496 = vmatmul.mubr.msk.bf16.gmra.mrb[56].mxu1 %vm366_vm4, %v34773_v19  ;;  %v34841_v12 = vpack.c.bf16 %v9105_v60, %v9104_v43  ;;  %v9107_v15 = vld [vmem:[#allocation3 + $0x140] sm:$0xff]  ;;  %v32414_v42 = vld [vmem:[%s37581_s3 + $0x2a8] sm:$0xff]   ;;  %v9674_v60 = vld [vmem:[#allocation3 + $0xaa] sm:$0xff] }
 0x903   : > { %28499 = vmatprep.mubr.msk.bf16.mxu1 %vm366_vm4, %v34775_v38  ;;  %v34847_v30 = vpack.c.bf16 %v9107_v15, %v9106_v26  ;;  %v9665_v14 = vld [vmem:[#allocation3 + $0x3a] sm:$0xff]  ;;  %v9667_v45 = vld [vmem:[#allocation3 + $0x52] sm:$0xff]  ;;  %v9671_v32 = vld [vmem:[#allocation3 + $0x82] sm:$0xff] }
 0x904   : > { %v34874_v46 = vpack.c.bf16 %v9667_v45, %v9666_v29  ;;  %v9670_v47 = vld [vmem:[#allocation3 + $0x7a] sm:$0xff]  ;;  %v9672_v53 = vld [vmem:[#allocation3 + $0x92] sm:$0xff]  ;;  %v9676_v43 = vld [vmem:[#allocation3 + $0xc2] sm:$0xff] }
 0x905   : > { %v9167_v25 = vld [vmem:[#allocation3 + $0x169] sm:$0xff]  ;;  %v9673_v9 = vld [vmem:[#allocation3 + $0x9a] sm:$0xff]  ;;  %v34888_v16 = vpack.c.bf16 %v9671_v32, %v9670_v47  ;;  %v9675_v39 = vld [vmem:[#allocation3 + $0xb2] sm:$0xff] }
 0x906   : > { %v9110_v17 = vld [vmem:[#allocation3 + $0x168] sm:$0xff]  ;;  %v34890_v57 = vpack.c.bf16 %v9673_v9, %v9672_v53  ;;  %v34896_v35 = vpack.c.bf16 %v9675_v39, %v9674_v60  ;;  %v9678_v4 = vld [vmem:[#allocation3 + $0xda] sm:$0xff]  ;;  %v9688_v49 = vld [vmem:[#allocation3 + $0x152] sm:$0xff] }
 0x907   : > { %v9168_v8 = vld [vmem:[#allocation3 + $0x171] sm:$0xff]  ;;  %v9686_v29 = vld [vmem:[#allocation3 + $0x13a] sm:$0xff]  ;;  %v9687_v45 = vld [vmem:[#allocation3 + $0x142] sm:$0xff] }
 0x908   : > { %v34781_v18 = vpack.c.bf16 %v9168_v8, %v9167_v25  ;;  %v9660_v25 = vld [vmem:[#allocation3 + $0x2] sm:$0xff]  ;;  %v9661_v8 = vld [vmem:[#allocation3 + $0xa] sm:$0xff]  ;;  %v9689_v41 = vld [vmem:[#allocation3 + $0x15a] sm:$0xff] }
 0x909   : > { %v9692_v40 = vpack.c.bf16 %v9661_v8, %v9660_v25  ;;  %v9677_v15 = vld [vmem:[#allocation3 + $0xca] sm:$0xff]  ;;  %v9679_v25 = vld [vmem:[#allocation3 + $0xe2] sm:$0xff]  ;;  %v9680_v8 = vld [vmem:[#allocation3 + $0xf2] sm:$0xff]  ;;  %v34922_v47 = vpack.c.bf16 %v9689_v41, %v9688_v49 }
 0x90a   : > { %28500 = vmatmul.mubr.msk.bf16.gmra.mrb[60].mxu1 %vm366_vm4, %v34781_v18  ;;  %v34898_v26 = vpack.c.bf16 %v9677_v15, %v9676_v43  ;;  %v9690_v32 = vld [vmem:[#allocation3 + $0x16a] sm:$0xff]  ;;  %v9691_v53 = vld [vmem:[#allocation3 + $0x172] sm:$0xff]  ;;  %v32419_v39 = vld [vmem:[%s37581_s3 + $0x2d0] sm:$0xff]  }
 0x90b   : > { %28511 = vmatprep.mubr.msk.bf16.mxu1 %vm366_vm4, %v9112_v58  ;;  %v9111_v58 = vld [vmem:[#allocation3 + $0x170] sm:$0xff]  ;;  %v34928_v9 = vpack.c.bf16 %v9691_v53, %v9690_v32  ;;  %v32418_v60 = vld [vmem:[%s37581_s3 + $0x2c8] sm:$0xff]   ;;  %v10013_v43 = vld [vmem:[#allocation3 + $0x188] sm:$0xff] }
 0x90c   : > { %v34855_v56 = vpack.c.bf16 %v9111_v58, %v9110_v17  ;;  %v9681_v58 = vld [vmem:[#allocation3 + $0xfa] sm:$0xff]  ;;  %v34904_v17 = vpack.c.bf16 %v9679_v25, %v9678_v4  ;;  %v11278_v49 = vld [vmem:[#allocation3 + $0x91] sm:$0xff]  ;;  %v32436_v41 = vld [vmem:[%s37581_s3 + $0x358] sm:$0xff]  }
 0x90d   : > { %v10012_v15 = vld [vmem:[#allocation3 + $0x180] sm:$0xff]  ;;  %v32422_v25 = vld [vmem:[%s37581_s3 + $0x2e8] sm:$0xff]  }
 0x90e   : > { %v34974_v4 = vpack.c.bf16 %v10013_v43, %v10012_v15  ;;  %v11281_v53 = vld [vmem:[#allocation3 + $0xb1] sm:$0xff]  ;;  %v11285_v15 = vld [vmem:[#allocation3 + $0xe1] sm:$0xff] }
 0x912   : > { %28512 = vmatmul.mubr.msk.bf16.vlgmr.msra.gmra.mrb[32].mxu1 %vm366_vm4, %v34786_v27 }
 0x913   : > { %28544 = vmatpush3.bf16.msra.mxu1 %v34702_v10  ;;  %28515 = vmatprep.mubr.msk.bf16.mxu1 %vm366_vm4, %v34791_v54  ;;  %v32412_v10 = vld [vmem:[%s37581_s3 + $0x298] sm:$0xff]  }
 0x914   : > { %28545 = vmatprep.subr.bf16.mxu1 %v32410_v34 }
 0x917   : > { %28546 = vmatpush3.bf16.msra.mxu1 %v32410_v34  ;;  %v9663_v34 = vld [vmem:[#allocation3 + $0x22] sm:$0xff] }
 0x918   : > { %28547 = vmatprep.subr.bf16.mxu1 %v32411_v44  ;;  %v34860_v20 = vpack.c.bf16 %v9663_v34, %v9662_v7  ;;  %v9682_v7 = vld [vmem:[#allocation3 + $0x10a] sm:$0xff]  ;;  %v9683_v34 = vld [vmem:[#allocation3 + $0x112] sm:$0xff] }
 0x91a   : > { %28516 = vmatmul.mubr.msk.bf16.gmra.mrb[36].mxu1 %vm366_vm4, %v34801_v33 }
 0x91b   : > { %28519 = vmatprep.mubr.msk.bf16.mxu1 %vm366_vm4, %v34806_v1  ;;  %28548 = vmatpush3.bf16.msra.mxu1 %v32411_v44  ;;  %v9664_v44 = vld [vmem:[#allocation3 + $0x32] sm:$0xff] }
 0x91c   : > { %28549 = vmatprep.subr.bf16.mxu1 %v32412_v10  ;;  %v34865_v62 = vpack.c.bf16 %v9665_v14, %v9664_v44  ;;  %v9684_v44 = vld [vmem:[#allocation3 + $0x122] sm:$0xff]  ;;  %v9685_v14 = vld [vmem:[#allocation3 + $0x12a] sm:$0xff] }
 0x91f   : > { %28550 = vmatpush3.bf16.msra.mxu1 %v32412_v10  ;;  %v32415_v10 = vld [vmem:[%s37581_s3 + $0x2b0] sm:$0xff]  }
 0x920   : > { %28583 = vmatprep.subr.bf16.mxu1 %v32413_v48 }
 0x922   : > { %28520 = vmatmul.mubr.msk.bf16.gmra.mrb[40].mxu1 %vm366_vm4, %v34815_v2 }
 0x923   : > { %28523 = vmatprep.mubr.msk.bf16.mxu1 %vm366_vm4, %v34817_v6 }
 0x92a   : > { %28524 = vmatmul.mubr.msk.bf16.gmra.mrb[44].mxu1 %vm366_vm4, %v34823_v21 }
 0x92b   : > { %28527 = vmatprep.mubr.msk.bf16.mxu1 %vm366_vm4, %v34825_v13 }
 0x932   : > { %28528 = vmatmul.mubr.msk.bf16.gmra.mrb[48].mxu1 %vm366_vm4, %v34831_v3 }
 0x933   : > { %28531 = vmatprep.mubr.msk.bf16.mxu1 %vm366_vm4, %v34833_v63 }
 0x93a   : > { %28532 = vmatmul.mubr.msk.bf16.gmra.mrb[52].mxu1 %vm366_vm4, %v34839_v61 }
 0x93b   : > { %28535 = vmatprep.mubr.msk.bf16.mxu1 %vm366_vm4, %v34841_v12 }
 0x942   : > { %28536 = vmatmul.mubr.msk.bf16.gmra.mrb[56].mxu1 %vm366_vm4, %v34847_v30 }
 0x943   : > { %28539 = vmatprep.mubr.msk.bf16.mxu1 %vm366_vm4, %v34849_v55 }
 0x94a   : > { %28540 = vmatmul.mubr.msk.bf16.gmra.mrb[60].mxu1 %vm366_vm4, %v34855_v56 }
 0x94b   : > { %28551 = vmatprep.mubr.msk.bf16.mxu1 %vm366_vm4, %v9692_v40  ;;  %v34906_v40 = vpack.c.bf16 %v9681_v58, %v9680_v8  ;;  %v32423_v8 = vld [vmem:[%s37581_s3 + $0x2f0] sm:$0xff]   ;;  %v32434_v58 = vld [vmem:[%s37581_s3 + $0x348] sm:$0xff]  }
 0x952   : > { %28552 = vmatmul.mubr.msk.bf16.vlgmr.msra.gmra.mrb[32].mxu1 %vm366_vm4, %v34860_v20 }
 0x953   : > { %28584 = vmatpush3.bf16.msra.mxu1 %v32413_v48  ;;  %28555 = vmatprep.mubr.msk.bf16.mxu1 %vm366_vm4, %v34865_v62  ;;  %v32416_v48 = vld [vmem:[%s37581_s3 + $0x2b8] sm:$0xff]  }
 0x954   : > { %28585 = vmatprep.subr.bf16.mxu1 %v32414_v42 }
 0x957   : > { %28586 = vmatpush3.bf16.msra.mxu1 %v32414_v42  ;;  %v34912_v42 = vpack.c.bf16 %v9683_v34, %v9682_v7  ;;  %v32435_v34 = vld [vmem:[%s37581_s3 + $0x350] sm:$0xff]  }
 0x958   : > { %28587 = vmatprep.subr.bf16.mxu1 %v32415_v10 }
 0x95a   : > { %28556 = vmatmul.mubr.msk.bf16.gmra.mrb[36].mxu1 %vm366_vm4, %v34874_v46 }
 0x95b   : > { %28559 = vmatprep.mubr.msk.bf16.mxu1 %vm366_vm4, %v34879_v11  ;;  %28588 = vmatpush3.bf16.msra.mxu1 %v32415_v10  ;;  %v34914_v10 = vpack.c.bf16 %v9685_v14, %v9684_v44  ;;  %v11277_v44 = vld [vmem:[#allocation3 + $0x81] sm:$0xff]  ;;  %v11279_v14 = vld [vmem:[#allocation3 + $0x99] sm:$0xff] }
 0x95c   : > { %28589 = vmatprep.subr.bf16.mxu1 %v32416_v48  ;;  %v11306_v32 = vpack.c.bf16 %v11279_v14, %v11278_v49 }
 0x95f   : > { %28590 = vmatpush3.bf16.msra.mxu1 %v32416_v48  ;;  %v34920_v48 = vpack.c.bf16 %v9687_v45, %v9686_v29  ;;  %v11276_v29 = vld [vmem:[#allocation3 + $0x79] sm:$0xff] }
 0x960   : > { %28623 = vmatprep.subr.bf16.mxu1 %v32417_v22  ;;  %v11305_v45 = vpack.c.bf16 %v11277_v44, %v11276_v29 }
 0x962   : > { %28560 = vmatmul.mubr.msk.bf16.gmra.mrb[40].mxu1 %vm366_vm4, %v34888_v16 }
 0x963   : > { %28563 = vmatprep.mubr.msk.bf16.mxu1 %vm366_vm4, %v34890_v57 }
 0x96a   : > { %28564 = vmatmul.mubr.msk.bf16.gmra.mrb[44].mxu1 %vm366_vm4, %v34896_v35 }
 0x96b   : > { %28567 = vmatprep.mubr.msk.bf16.mxu1 %vm366_vm4, %v34898_v26 }
 0x972   : > { %28568 = vmatmul.mubr.msk.bf16.gmra.mrb[48].mxu1 %vm366_vm4, %v34904_v17 }
 0x973   : > { %28571 = vmatprep.mubr.msk.bf16.mxu1 %vm366_vm4, %v34906_v40 }
 0x97a   : > { %28572 = vmatmul.mubr.msk.bf16.gmra.mrb[52].mxu1 %vm366_vm4, %v34912_v42 }
 0x97b   : > { %28575 = vmatprep.mubr.msk.bf16.mxu1 %vm366_vm4, %v34914_v10 }
 0x982   : > { %28576 = vmatmul.mubr.msk.bf16.gmra.mrb[56].mxu1 %vm366_vm4, %v34920_v48 }
 0x983   : > { %28579 = vmatprep.mubr.msk.bf16.mxu1 %vm366_vm4, %v34922_v47 }
 0x98a   : > { %28580 = vmatmul.mubr.msk.bf16.gmra.mrb[60].mxu1 %vm366_vm4, %v34928_v9 }
 0x98b   : > { %28591 = vmatprep.mubr.msk.bf16.mxu1 %vm366_vm4, %v34786_v27  ;;  %v32420_v27 = vld [vmem:[%s37581_s3 + $0x2d8] sm:$0xff]  }
 0x992   : > { %28592 = vmatmul.mubr.msk.bf16.vlgmr.msra.gmra.mrb[32].mxu1 %vm366_vm4, %v34791_v54 }
 0x993   : > { %28624 = vmatpush3.bf16.msra.mxu1 %v32417_v22  ;;  %28595 = vmatprep.mubr.msk.bf16.mxu1 %vm366_vm4, %v34801_v33  ;;  %v32421_v22 = vld [vmem:[%s37581_s3 + $0x2e0] sm:$0xff]  }
 0x994   : > { %28625 = vmatprep.subr.bf16.mxu1 %v32418_v60 }
 0x997   : > { %28626 = vmatpush3.bf16.msra.mxu1 %v32418_v60  ;;  %v11283_v60 = vld [vmem:[#allocation3 + $0xc9] sm:$0xff] }
 0x998   : > { %28627 = vmatprep.subr.bf16.mxu1 %v32419_v39 }
 0x99a   : > { %28596 = vmatmul.mubr.msk.bf16.gmra.mrb[36].mxu1 %vm366_vm4, %v34806_v1 }
 0x99b   : > { %28599 = vmatprep.mubr.msk.bf16.mxu1 %vm366_vm4, %v34815_v2  ;;  %28628 = vmatpush3.bf16.msra.mxu1 %v32419_v39  ;;  %v11280_v39 = vld [vmem:[#allocation3 + $0xa9] sm:$0xff] }
 0x99c   : > { %28629 = vmatprep.subr.bf16.mxu1 %v32420_v27 }
 0x99f   : > { %28630 = vmatpush3.bf16.msra.mxu1 %v32420_v27  ;;  %v11307_v27 = vpack.c.bf16 %v11281_v53, %v11280_v39 }
 0x9a0   : > { %28663 = vmatprep.subr.bf16.mxu1 %v32421_v22 }
 0x9a2   : > { %28600 = vmatmul.mubr.msk.bf16.gmra.mrb[40].mxu1 %vm366_vm4, %v34817_v6 }
 0x9a3   : > { %28603 = vmatprep.mubr.msk.bf16.mxu1 %vm366_vm4, %v34823_v21 }
 0x9aa   : > { %28604 = vmatmul.mubr.msk.bf16.gmra.mrb[44].mxu1 %vm366_vm4, %v34825_v13 }
 0x9ab   : > { %28607 = vmatprep.mubr.msk.bf16.mxu1 %vm366_vm4, %v34831_v3 }
 0x9b2   : > { %28608 = vmatmul.mubr.msk.bf16.gmra.mrb[48].mxu1 %vm366_vm4, %v34833_v63 }
 0x9b3   : > { %28611 = vmatprep.mubr.msk.bf16.mxu1 %vm366_vm4, %v34839_v61 }
 0x9ba   : > { %28612 = vmatmul.mubr.msk.bf16.gmra.mrb[52].mxu1 %vm366_vm4, %v34841_v12 }
 0x9bb   : > { %28615 = vmatprep.mubr.msk.bf16.mxu1 %vm366_vm4, %v34847_v30 }
 0x9c2   : > { %28616 = vmatmul.mubr.msk.bf16.gmra.mrb[56].mxu1 %vm366_vm4, %v34849_v55 }
 0x9c3   : > { %28619 = vmatprep.mubr.msk.bf16.mxu1 %vm366_vm4, %v34855_v56 }
 0x9ca   : > { %28620 = vmatmul.mubr.msk.bf16.gmra.mrb[60].mxu1 %vm366_vm4, %v34974_v4 }
 0x9cb   : > { %28631 = vmatprep.mubr.msk.bf16.mxu1 %vm366_vm4, %v34662_v5  ;;  %v32424_v5 = vld [vmem:[%s37581_s3 + $0x2f8] sm:$0xff]  }
 0x9d2   : > { %28632 = vmatmul.mubr.msk.bf16.vlgmr.msra.gmra.mrb[32].mxu1 %vm366_vm4, %v34668_v52  ;;  %v32425_v52 = vld [vmem:[%s37581_s3 + $0x300] sm:$0xff]  }
 0x9d3   : > { %28664 = vmatpush3.bf16.msra.mxu1 %v32421_v22  ;;  %28635 = vmatprep.mubr.msk.bf16.mxu1 %vm366_vm4, %v34684_v24  ;;  %v10335_v24 = vld [vmem:[#allocation3 + $0x189] sm:$0xff]  ;;  %v11282_v22 = vld [vmem:[#allocation3 + $0xc1] sm:$0xff] }
 0x9d4   : > { %28665 = vmatprep.subr.bf16.mxu1 %v32422_v25  ;;  %v11308_v43 = vpack.c.bf16 %v11283_v60, %v11282_v22 }
 0x9d7   : > { %28666 = vmatpush3.bf16.msra.mxu1 %v32422_v25  ;;  %v11284_v25 = vld [vmem:[#allocation3 + $0xd9] sm:$0xff] }
 0x9d8   : > { %28667 = vmatprep.subr.bf16.mxu1 %v32423_v8 }
 0x9da   : > { %28636 = vmatmul.mubr.msk.bf16.gmra.mrb[36].mxu1 %vm366_vm4, %v34690_v36  ;;  %v10334_v36 = vld [vmem:[#allocation3 + $0x181] sm:$0xff] }
 0x9db   : > { %28639 = vmatprep.mubr.msk.bf16.mxu1 %vm366_vm4, %v34708_v59  ;;  %28668 = vmatpush3.bf16.msra.mxu1 %v32423_v8  ;;  %v35020_v59 = vpack.c.bf16 %v10335_v24, %v10334_v36  ;;  %v11309_v8 = vpack.c.bf16 %v11285_v15, %v11284_v25  ;;  %v11289_v24 = vld [vmem:[#allocation3 + $0x111] sm:$0xff]  ;;  %v11291_v36 = vld [vmem:[#allocation3 + $0x129] sm:$0xff] }
 0x9dc   : > { %28669 = vmatprep.subr.bf16.mxu1 %v32424_v5 }
 0x9df   : > { %28670 = vmatpush3.bf16.msra.mxu1 %v32424_v5  ;;  %v11286_v5 = vld [vmem:[#allocation3 + $0xf1] sm:$0xff] }
 0x9e0   : > { %28703 = vmatprep.subr.bf16.mxu1 %v32425_v52 }
 0x9e2   : > { %28640 = vmatmul.mubr.msk.bf16.gmra.mrb[40].mxu1 %vm366_vm4, %v34712_v37  ;;  %v32426_v37 = vld [vmem:[%s37581_s3 + $0x308] sm:$0xff]  }
 0x9e3   : > { %28643 = vmatprep.mubr.msk.bf16.mxu1 %vm366_vm4, %v34725_v50  ;;  %v32427_v50 = vld [vmem:[%s37581_s3 + $0x310] sm:$0xff]  }
 0x9ea   : > { %28644 = vmatmul.mubr.msk.bf16.gmra.mrb[44].mxu1 %vm366_vm4, %v34728_v23  ;;  %v32428_v23 = vld [vmem:[%s37581_s3 + $0x318] sm:$0xff]  }
 0x9eb   : > { %28647 = vmatprep.mubr.msk.bf16.mxu1 %vm366_vm4, %v34741_v28  ;;  %v32429_v28 = vld [vmem:[%s37581_s3 + $0x320] sm:$0xff]  }
 0x9f2   : > { %28648 = vmatmul.mubr.msk.bf16.gmra.mrb[48].mxu1 %vm366_vm4, %v34744_v51  ;;  %v10656_v51 = vld [vmem:[#allocation3 + $0x182] sm:$0xff] }
 0x9f3   : > { %28651 = vmatprep.mubr.msk.bf16.mxu1 %vm366_vm4, %v34757_v0  ;;  %v10657_v0 = vld [vmem:[#allocation3 + $0x18a] sm:$0xff] }
 0x9fa   : > { %28652 = vmatmul.mubr.msk.bf16.gmra.mrb[52].mxu1 %vm366_vm4, %v34760_v31  ;;  %v35066_v31 = vpack.c.bf16 %v10657_v0, %v10656_v51  ;;  %v11293_v51 = vld [vmem:[#allocation3 + $0x141] sm:$0xff]  ;;  %v11295_v0 = vld [vmem:[#allocation3 + $0x159] sm:$0xff] }
 0x9fb   : > { %28655 = vmatprep.mubr.msk.bf16.mxu1 %vm366_vm4, %v34773_v19  ;;  %v32430_v19 = vld [vmem:[%s37581_s3 + $0x328] sm:$0xff]  }
 0xa02   : > { %28656 = vmatmul.mubr.msk.bf16.gmra.mrb[56].mxu1 %vm366_vm4, %v34775_v38  ;;  %v32431_v38 = vld [vmem:[%s37581_s3 + $0x330] sm:$0xff]  }
 0xa03   : > { %28659 = vmatprep.mubr.msk.bf16.mxu1 %vm366_vm4, %v34781_v18  ;;  %v32432_v18 = vld [vmem:[%s37581_s3 + $0x338] sm:$0xff]  }
 0xa0a   : > { %28660 = vmatmul.mubr.msk.bf16.gmra.mrb[60].mxu1 %vm366_vm4, %v35020_v59 }
 0xa0b   : > { %28671 = vmatprep.mubr.msk.bf16.mxu1 %vm366_vm4, %v34860_v20  ;;  %v11274_v20 = vld [vmem:[#allocation3 + $0x61] sm:$0xff] }
 0xa12   : > { %28672 = vmatmul.mubr.msk.bf16.vlgmr.msra.gmra.mrb[32].mxu1 %vm366_vm4, %v34865_v62 }
 0xa13   : > { %28704 = vmatpush3.bf16.msra.mxu1 %v32425_v52  ;;  %28675 = vmatprep.mubr.msk.bf16.mxu1 %vm366_vm4, %v34874_v46 }
 0xa14   : > { %28705 = vmatprep.subr.bf16.mxu1 %v32426_v37 }
 0xa17   : > { %28706 = vmatpush3.bf16.msra.mxu1 %v32426_v37  ;;  %v11288_v37 = vld [vmem:[#allocation3 + $0x109] sm:$0xff] }
 0xa18   : > { %28707 = vmatprep.subr.bf16.mxu1 %v32427_v50 }
 0xa1a   : > { %28676 = vmatmul.mubr.msk.bf16.gmra.mrb[36].mxu1 %vm366_vm4, %v34879_v11 }
 0xa1b   : > { %28679 = vmatprep.mubr.msk.bf16.mxu1 %vm366_vm4, %v34888_v16  ;;  %28708 = vmatpush3.bf16.msra.mxu1 %v32427_v50  ;;  %v11311_v50 = vpack.c.bf16 %v11289_v24, %v11288_v37 }
 0xa1c   : > { %28709 = vmatprep.subr.bf16.mxu1 %v32428_v23 }
 0xa1f   : > { %28710 = vmatpush3.bf16.msra.mxu1 %v32428_v23  ;;  %v11290_v23 = vld [vmem:[#allocation3 + $0x121] sm:$0xff] }
 0xa20   : > { %28743 = vmatprep.subr.bf16.mxu1 %v32429_v28 }
 0xa22   : > { %28680 = vmatmul.mubr.msk.bf16.gmra.mrb[40].mxu1 %vm366_vm4, %v34890_v57 }
 0xa23   : > { %28683 = vmatprep.mubr.msk.bf16.mxu1 %vm366_vm4, %v34896_v35 }
 0xa2a   : > { %28684 = vmatmul.mubr.msk.bf16.gmra.mrb[44].mxu1 %vm366_vm4, %v34898_v26 }
 0xa2b   : > { %28687 = vmatprep.mubr.msk.bf16.mxu1 %vm366_vm4, %v34904_v17 }
 0xa32   : > { %28688 = vmatmul.mubr.msk.bf16.gmra.mrb[48].mxu1 %vm366_vm4, %v34906_v40 }
 0xa33   : > { %28691 = vmatprep.mubr.msk.bf16.mxu1 %vm366_vm4, %v34912_v42 }
 0xa3a   : > { %28692 = vmatmul.mubr.msk.bf16.gmra.mrb[52].mxu1 %vm366_vm4, %v34914_v10 }
 0xa3b   : > { %28695 = vmatprep.mubr.msk.bf16.mxu1 %vm366_vm4, %v34920_v48 }
 0xa42   : > { %28696 = vmatmul.mubr.msk.bf16.gmra.mrb[56].mxu1 %vm366_vm4, %v34922_v47 }
 0xa43   : > { %28699 = vmatprep.mubr.msk.bf16.mxu1 %vm366_vm4, %v34928_v9 }
 0xa4a   : > { %28700 = vmatmul.mubr.msk.bf16.gmra.mrb[60].mxu1 %vm366_vm4, %v35066_v31 }
 0xa4b   : > { %28711 = vmatprep.mubr.msk.bf16.mxu1 %vm366_vm4, %v34791_v54  ;;  %v32433_v54 = vld [vmem:[%s37581_s3 + $0x340] sm:$0xff]  }
 0xa52   : > { %28712 = vmatmul.mubr.msk.bf16.vlgmr.msra.gmra.mrb[32].mxu1 %vm366_vm4, %v34801_v33  ;;  %v10978_v33 = vld [vmem:[#allocation3 + $0x198] sm:$0xff] }
 0xa53   : > { %28744 = vmatpush3.bf16.msra.mxu1 %v32429_v28  ;;  %28715 = vmatprep.mubr.msk.bf16.mxu1 %vm366_vm4, %v34806_v1  ;;  %v10979_v1 = vld [vmem:[#allocation3 + $0x1a0] sm:$0xff]  ;;  %v11312_v28 = vpack.c.bf16 %v11291_v36, %v11290_v23 }
 0xa54   : > { %28745 = vmatprep.subr.bf16.mxu1 %v32430_v19  ;;  %v32443_v23 = vld [vmem:[%s37581_s3 + $0x370] sm:$0xff]  }
 0xa57   : > { %28746 = vmatpush3.bf16.msra.mxu1 %v32430_v19  ;;  %v11292_v19 = vld [vmem:[#allocation3 + $0x139] sm:$0xff] }
 0xa58   : > { %28747 = vmatprep.subr.bf16.mxu1 %v32431_v38 }
 0xa5a   : > { %28716 = vmatmul.mubr.msk.bf16.gmra.mrb[36].mxu1 %vm366_vm4, %v34815_v2  ;;  %v10995_v2 = vpack.c.bf16 %v10979_v1, %v10978_v33  ;;  %v11297_v33 = vld [vmem:[#allocation3 + $0x171] sm:$0xff]  ;;  %v11296_v1 = vld [vmem:[#allocation3 + $0x169] sm:$0xff] }
 0xa5b   : > { %28719 = vmatprep.mubr.msk.bf16.mxu1 %vm366_vm4, %v34817_v6  ;;  %28748 = vmatpush3.bf16.msra.mxu1 %v32431_v38  ;;  %v11271_v6 = vld [vmem:[#allocation3 + $0x39] sm:$0xff]  ;;  %v11313_v38 = vpack.c.bf16 %v11293_v51, %v11292_v19 }
 0xa5c   : > { %28749 = vmatprep.subr.bf16.mxu1 %v32432_v18 }
 0xa5f   : > { %28750 = vmatpush3.bf16.msra.mxu1 %v32432_v18  ;;  %v11294_v18 = vld [vmem:[#allocation3 + $0x151] sm:$0xff] }
 0xa60   : > { %28783 = vmatprep.subr.bf16.mxu1 %v32433_v54 }
 0xa62   : > { %28720 = vmatmul.mubr.msk.bf16.gmra.mrb[40].mxu1 %vm366_vm4, %v34823_v21  ;;  %v11270_v21 = vld [vmem:[#allocation3 + $0x31] sm:$0xff] }
 0xa63   : > { %28723 = vmatprep.mubr.msk.bf16.mxu1 %vm366_vm4, %v34825_v13  ;;  %v11302_v13 = vpack.c.bf16 %v11271_v6, %v11270_v21  ;;  %v11300_v6 = vld [vmem:[#allocation3 + $0x199] sm:$0xff]  ;;  %v11301_v21 = vld [vmem:[#allocation3 + $0x1a1] sm:$0xff] }
 0xa6a   : > { %28724 = vmatmul.mubr.msk.bf16.gmra.mrb[44].mxu1 %vm366_vm4, %v34831_v3  ;;  %v32437_v3 = vld [vmem:[%s37581_s3 + $0x380] sm:$0xff]  }
 0xa6b   : > { %28727 = vmatprep.mubr.msk.bf16.mxu1 %vm366_vm4, %v34833_v63  ;;  %v32438_v63 = vld [vmem:[%s37581_s3 + $0x388] sm:$0xff]   ;;  %28823 = vmatprep.subr.bf16.mxu0 %v32437_v3 }
 0xa6c   : > { %28824 = vmatpush3.bf16.msra.mxu0 %v32437_v3 }
 0xa6d   : > { %28825 = vmatprep.subr.bf16.mxu0 %v32438_v63 }
 0xa70   : > { %28826 = vmatpush3.bf16.msra.mxu0 %v32438_v63 }
 0xa72   : > { %28728 = vmatmul.mubr.msk.bf16.gmra.mrb[48].mxu1 %vm366_vm4, %v34839_v61  ;;  %v11273_v61 = vld [vmem:[#allocation3 + $0x51] sm:$0xff] }
 0xa73   : > { %28731 = vmatprep.mubr.msk.bf16.mxu1 %vm366_vm4, %v34841_v12  ;;  %v11275_v12 = vld [vmem:[#allocation3 + $0x69] sm:$0xff] }
 0xa74   : > { %v11304_v7 = vpack.c.bf16 %v11275_v12, %v11274_v20 }
 0xa7a   : > { %28732 = vmatmul.mubr.msk.bf16.gmra.mrb[52].mxu1 %vm366_vm4, %v34847_v30  ;;  %v32439_v30 = vld [vmem:[%s37581_s3 + $0x390] sm:$0xff]  }
 0xa7b   : > { %28735 = vmatprep.mubr.msk.bf16.mxu1 %vm366_vm4, %v34849_v55  ;;  %v11272_v55 = vld [vmem:[#allocation3 + $0x49] sm:$0xff]  ;;  %28827 = vmatprep.subr.bf16.mxu0 %v32439_v30 }
 0xa7c   : > { %28828 = vmatpush3.bf16.msra.mxu0 %v32439_v30 }
 0xa82   : > { %28736 = vmatmul.mubr.msk.bf16.gmra.mrb[56].mxu1 %vm366_vm4, %v34855_v56  ;;  %v11303_v56 = vpack.c.bf16 %v11273_v61, %v11272_v55 }
 0xa83   : > { %28739 = vmatprep.mubr.msk.bf16.mxu1 %vm366_vm4, %v34974_v4  ;;  %v11287_v4 = vld [vmem:[#allocation3 + $0xf9] sm:$0xff] }
 0xa84   : > { %v11310_v52 = vpack.c.bf16 %v11287_v4, %v11286_v5 }
 0xa8a   : > { %28740 = vmatmul.mubr.msk.bf16.gmra.mrb[60].mxu1 %vm366_vm4, %v10995_v2  ;;  %v11315_v2 = vpack.c.bf16 %v11297_v33, %v11296_v1  ;;  %v32444_v1 = vld [vmem:[%s37581_s3 + $0x378] sm:$0xff]  }
 0xa8b   : > { %28751 = vmatprep.mubr.msk.bf16.mxu1 %vm366_vm4, %v11302_v13  ;;  %v11317_v13 = vpack.c.bf16 %v11301_v21, %v11300_v6 }
 0xa92   : > { %28752 = vmatmul.mubr.msk.bf16.vlgmr.msra.gmra.mrb[32].mxu1 %vm366_vm4, %v11303_v56 }
 0xa93   : > { %28784 = vmatpush3.bf16.msra.mxu1 %v32433_v54  ;;  %28755 = vmatprep.mubr.msk.bf16.mxu1 %vm366_vm4, %v11304_v7  ;;  %v11314_v54 = vpack.c.bf16 %v11295_v0, %v11294_v18 }
 0xa94   : > { %28785 = vmatprep.subr.bf16.mxu1 %v32434_v58 }
 0xa97   : > { %28786 = vmatpush3.bf16.msra.mxu1 %v32434_v58 }
 0xa98   : > { %28787 = vmatprep.subr.bf16.mxu1 %v32435_v34 }
 0xa9a   : > { %28756 = vmatmul.mubr.msk.bf16.gmra.mrb[36].mxu1 %vm366_vm4, %v11305_v45 }
 0xa9b   : > { %28759 = vmatprep.mubr.msk.bf16.mxu1 %vm366_vm4, %v11306_v32  ;;  %28788 = vmatpush3.bf16.msra.mxu1 %v32435_v34 }
 0xa9c   : > { %28789 = vmatprep.subr.bf16.mxu1 %v32436_v41 }
 0xa9f   : > { %28790 = vmatpush3.bf16.msra.mxu1 %v32436_v41 }
 0xaa2   : > { %28760 = vmatmul.mubr.msk.bf16.gmra.mrb[40].mxu1 %vm366_vm4, %v11307_v27 }
 0xaa3   : > { %28763 = vmatprep.mubr.msk.bf16.mxu1 %vm366_vm4, %v11308_v43  ;;  %v32442_v43 = vld [vmem:[%s37581_s3 + $0x368] sm:$0xff]  }
 0xaaa   : > { %28764 = vmatmul.mubr.msk.bf16.gmra.mrb[44].mxu1 %vm366_vm4, %v11309_v8 }
 0xaab   : > { %28767 = vmatprep.mubr.msk.bf16.mxu1 %vm366_vm4, %v11310_v52 }
 0xab2   : > { %28768 = vmatmul.mubr.msk.bf16.gmra.mrb[48].mxu1 %vm366_vm4, %v11311_v50 }
 0xab3   : > { %28771 = vmatprep.mubr.msk.bf16.mxu1 %vm366_vm4, %v11312_v28 }
 0xaba   : > { %28772 = vmatmul.mubr.msk.bf16.gmra.mrb[52].mxu1 %vm366_vm4, %v11313_v38 }
 0xabb   : > { %28775 = vmatprep.mubr.msk.bf16.mxu1 %vm366_vm4, %v11314_v54 }
 0xac2   : > { %28776 = vmatmul.mubr.msk.bf16.gmra.mrb[56].mxu1 %vm366_vm4, %v11315_v2 }
 0xac3   : > { %28779 = vmatprep.mubr.msk.bf16.mxu1 %vm366_vm4, %v35020_v59 }
 0xaca   : > { %28780 = vmatmul.mubr.msk.bf16.gmra.mrb[60].mxu1 %vm366_vm4, %v11317_v13 }
 0xacb   : > { %28791 = vmatprep.mubr.msk.bf16.mxu1 %vm366_vm4, %v34865_v62  ;;  %v11622_v62 = vld [vmem:[#allocation3 + $0x19a] sm:$0xff] }
 0xad2   : > { %28792 = vmatmul.mubr.msk.bf16.vlgmr.msra.gmra.mrb[32].mxu1 %vm366_vm4, %v34874_v46  ;;  %v11623_v46 = vld [vmem:[#allocation3 + $0x1a2] sm:$0xff] }
 0xad3   : > { %28795 = vmatprep.mubr.msk.bf16.mxu1 %vm366_vm4, %v34879_v11  ;;  %v11639_v11 = vpack.c.bf16 %v11623_v46, %v11622_v62 }
 0xada   : > { %28796 = vmatmul.mubr.msk.bf16.gmra.mrb[36].mxu1 %vm366_vm4, %v34888_v16  ;;  %v32440_v16 = vld [vmem:[%s37581_s3 + $0x398] sm:$0xff]  }
 0xadb   : > { %28799 = vmatprep.mubr.msk.bf16.mxu1 %vm366_vm4, %v34890_v57  ;;  %28829 = vmatprep.subr.bf16.mxu0 %v32440_v16  ;;  %v12072_v57 = vld [vmem:[#allocation4 + $0x1] sm:$0xff] }
 0xadc   : > { %28830 = vmatpush3.bf16.msra.mxu0 %v32440_v16 }
 0xae2   : > { %28800 = vmatmul.mubr.msk.bf16.gmra.mrb[40].mxu1 %vm366_vm4, %v34896_v35  ;;  %v12073_v35 = vld [vmem:[#allocation4 + $0x9] sm:$0xff] }
 0xae3   : > { %28803 = vmatprep.mubr.msk.bf16.mxu1 %vm366_vm4, %v34898_v26  ;;  %v12104_v26 = vpack.c.bf16 %v12073_v35, %v12072_v57 }
 0xae5   : > { %28831 = vmatprep.mubr.msk.bf16.mxu0 %vm366_vm4, %v12104_v26  ;;  %v35247_v26 = vld [vmem:[%s37581_s3 + $0x3a0] sm:$0xff]  }
 0xaea   : > { %28804 = vmatmul.mubr.msk.bf16.gmra.mrb[44].mxu1 %vm366_vm4, %v34904_v17  ;;  %v32441_v17 = vld [vmem:[%s37581_s3 + $0x360] sm:$0xff]  }
 0xaeb   : > { %28807 = vmatprep.mubr.msk.bf16.mxu1 %vm366_vm4, %v34906_v40  ;;  %28863 = vmatprep.subr.bf16.mxu0 %v32441_v17  ;;  %v35189_v40 = vld [vmem:[%s37582_s4 + $0x2] ss:$0 sm:$0xff] }
 0xaf2   : > { %28808 = vmatmul.mubr.msk.bf16.gmra.mrb[48].mxu1 %vm366_vm4, %v34912_v42 }
 0xaf3   : > { %28811 = vmatprep.mubr.msk.bf16.mxu1 %vm366_vm4, %v34914_v10 }
 0xafa   : > { %28812 = vmatmul.mubr.msk.bf16.gmra.mrb[52].mxu1 %vm366_vm4, %v34920_v48 }
 0xafb   : > { %28815 = vmatprep.mubr.msk.bf16.mxu1 %vm366_vm4, %v34922_v47 }
 0xb02   : > { %28816 = vmatmul.mubr.msk.bf16.gmra.mrb[56].mxu1 %vm366_vm4, %v34928_v9 }
 0xb03   : > { %28819 = vmatprep.mubr.msk.bf16.mxu1 %vm366_vm4, %v35066_v31 }
 0xb0a   : > { %28820 = vmatmul.mubr.msk.bf16.gmra.mrb[60].mxu1 %vm366_vm4, %v11639_v11 }
 0xba5   : > { %v28793_v42 = vpop.f32.mrb[32].mxu1 }
 0xba6   : > { %v11920_v10 = vadd.f32 %v28793_v42, %v35189_v40  ;;  %v11755_v48 = vpop.f32.mrb[33].mxu1 }
 0xba7   : > { %v11918_v47 = vadd.f32 %v35189_v40, %v11755_v48  ;;  %v28794_v9 = vpop.f32.mrb[34].mxu1 }
 0xba8   : > { %v11952_v59 = vmax.f32 %v11920_v10, 0.0  ;;  %v11921_v31 = vadd.f32 %v28794_v9, %v35189_v40  ;;  %v11758_v3 = vpop.f32.mrb[35].mxu1 }
 0xba9   : > { %v11950_v63 = vmax.f32 %v11918_v47, 0.0  ;;  %v11919_v61 = vadd.f32 %v35189_v40, %v11758_v3 }
 0xbaa   : > { %11984 = vst.msk [vmem:[#allocation4 + $0x31] sm:$0xff] %vm366_vm4, %v11952_v59  ;;  %v11953_v12 = vmax.f32 %v11921_v31, 0.0 }
 0xbab   : > { %11982 = vst.msk [vmem:[#allocation4 + $0x19] sm:$0xff] %vm366_vm4, %v11950_v63  ;;  %v11951_v30 = vmax.f32 %v11919_v61, 0.0 }
 0xbac   : > { %11985 = vst.msk [vmem:[#allocation4 + $0x39] sm:$0xff] %vm366_vm4, %v11953_v12 }
 0xbad   : > { %11983 = vst.msk [vmem:[#allocation4 + $0x21] sm:$0xff] %vm366_vm4, %v11951_v30  ;;  %v28797_v55 = vpop.f32.mrb[36].mxu1 }
 0xbae   : > { %v11924_v56 = vadd.f32 %v28797_v55, %v35189_v40  ;;  %v11771_v20 = vpop.f32.mrb[37].mxu1 }
 0xbaf   : > { %v11922_v58 = vadd.f32 %v35189_v40, %v11771_v20  ;;  %v28798_v7 = vpop.f32.mrb[38].mxu1 }
 0xbb0   : > { %v11956_v34 = vmax.f32 %v11924_v56, 0.0  ;;  %v11925_v44 = vadd.f32 %v28798_v7, %v35189_v40  ;;  %v11774_v14 = vpop.f32.mrb[39].mxu1 }
 0xbb1   : > { %v11954_v29 = vmax.f32 %v11922_v58, 0.0  ;;  %v11923_v45 = vadd.f32 %v35189_v40, %v11774_v14  ;;  %v12076_v22 = vld [vmem:[#allocation4 + $0x31] sm:$0xff] }
 0xbb2   : > { %11988 = vst.msk [vmem:[#allocation4 + $0x61] sm:$0xff] %vm366_vm4, %v11956_v34  ;;  %v11957_v49 = vmax.f32 %v11925_v44, 0.0  ;;  %v12074_v53 = vld [vmem:[#allocation4 + $0x19] sm:$0xff] }
 0xbb3   : > { %11986 = vst.msk [vmem:[#allocation4 + $0x49] sm:$0xff] %vm366_vm4, %v11954_v29  ;;  %v11955_v41 = vmax.f32 %v11923_v45, 0.0  ;;  %v12077_v32 = vld [vmem:[#allocation4 + $0x39] sm:$0xff] }
 0xbb4   : > { %11989 = vst.msk [vmem:[#allocation4 + $0x69] sm:$0xff] %vm366_vm4, %v11957_v49  ;;  %v12075_v60 = vld [vmem:[#allocation4 + $0x21] sm:$0xff]  ;;  %v35213_v25 = vpack.c.bf16 %v12077_v32, %v12076_v22 }
 0xbb5   : > { %11987 = vst.msk [vmem:[#allocation4 + $0x51] sm:$0xff] %vm366_vm4, %v11955_v41  ;;  %v28801_v39 = vpop.f32.mrb[40].mxu1  ;;  %v35207_v27 = vpack.c.bf16 %v12075_v60, %v12074_v53 }
 0xbb6   : > { %v11928_v15 = vadd.f32 %v28801_v39, %v35189_v40  ;;  %v11787_v4 = vpop.f32.mrb[41].mxu1 }
 0xbb7   : > { %v11926_v8 = vadd.f32 %v35189_v40, %v11787_v4  ;;  %v28802_v5 = vpop.f32.mrb[42].mxu1  ;;  %28832 = vmatmul.mubr.msk.bf16.vlgmr.msra.gmra.mrb[64].mxu0 %vm366_vm4, %v35207_v27 }
 0xbb8   : > { %v11960_v52 = vmax.f32 %v11928_v15, 0.0  ;;  %v11929_v24 = vadd.f32 %v28802_v5, %v35189_v40  ;;  %28864 = vmatpush3.bf16.msra.mxu0 %v32441_v17  ;;  %v11790_v36 = vpop.f32.mrb[43].mxu1  ;;  %28835 = vmatprep.mubr.msk.bf16.mxu0 %vm366_vm4, %v35213_v25 }
 0xbb9   : > { %v11958_v37 = vmax.f32 %v11926_v8, 0.0  ;;  %v11927_v50 = vadd.f32 %v35189_v40, %v11790_v36  ;;  %28865 = vmatprep.subr.bf16.mxu0 %v32442_v43  ;;  %v12080_v33 = vld [vmem:[#allocation4 + $0x61] sm:$0xff] }
 0xbba   : > { %11992 = vst.msk [vmem:[#allocation4 + $0x91] sm:$0xff] %vm366_vm4, %v11960_v52  ;;  %v11961_v28 = vmax.f32 %v11929_v24, 0.0  ;;  %v12078_v19 = vld [vmem:[#allocation4 + $0x49] sm:$0xff] }
 0xbbb   : > { %11990 = vst.msk [vmem:[#allocation4 + $0x79] sm:$0xff] %vm366_vm4, %v11958_v37  ;;  %v11959_v51 = vmax.f32 %v11927_v50, 0.0  ;;  %v12081_v0 = vld [vmem:[#allocation4 + $0x69] sm:$0xff] }
 0xbbc   : > { %11993 = vst.msk [vmem:[#allocation4 + $0x99] sm:$0xff] %vm366_vm4, %v11961_v28  ;;  %v12079_v38 = vld [vmem:[#allocation4 + $0x51] sm:$0xff]  ;;  %28866 = vmatpush3.bf16.msra.mxu0 %v32442_v43  ;;  %v35235_v21 = vpack.c.bf16 %v12081_v0, %v12080_v33 }
 0xbbd   : > { %11991 = vst.msk [vmem:[#allocation4 + $0x81] sm:$0xff] %vm366_vm4, %v11959_v51  ;;  %v28805_v18 = vpop.f32.mrb[44].mxu1  ;;  %v35229_v54 = vpack.c.bf16 %v12079_v38, %v12078_v19  ;;  %28867 = vmatprep.subr.bf16.mxu0 %v32443_v23 }
 0xbbe   : > { %v11932_v2 = vadd.f32 %v28805_v18, %v35189_v40  ;;  %v11803_v6 = vpop.f32.mrb[45].mxu1 }
 0xbbf   : > { %v11930_v13 = vadd.f32 %v35189_v40, %v11803_v6  ;;  %v28806_v62 = vpop.f32.mrb[46].mxu1  ;;  %28836 = vmatmul.mubr.msk.bf16.gmra.mrb[68].mxu0 %vm366_vm4, %v35229_v54 }
 0xbc0   : > { %v11964_v46 = vmax.f32 %v11932_v2, 0.0  ;;  %v11933_v11 = vadd.f32 %v28806_v62, %v35189_v40  ;;  %v11806_v16 = vpop.f32.mrb[47].mxu1  ;;  %28839 = vmatprep.mubr.msk.bf16.mxu0 %vm366_vm4, %v35235_v21  ;;  %28868 = vmatpush3.bf16.msra.mxu0 %v32443_v23 }
 0xbc1   : > { %v11962_v57 = vmax.f32 %v11930_v13, 0.0  ;;  %v11931_v35 = vadd.f32 %v35189_v40, %v11806_v16  ;;  %28869 = vmatprep.subr.bf16.mxu0 %v32444_v1  ;;  %v12084_v31 = vld [vmem:[#allocation4 + $0x91] sm:$0xff] }
 0xbc2   : > { %11996 = vst.msk [vmem:[#allocation4 + $0xc1] sm:$0xff] %vm366_vm4, %v11964_v46  ;;  %v11965_v17 = vmax.f32 %v11933_v11, 0.0  ;;  %v12082_v48 = vld [vmem:[#allocation4 + $0x79] sm:$0xff] }
 0xbc3   : > { %11994 = vst.msk [vmem:[#allocation4 + $0xa9] sm:$0xff] %vm366_vm4, %v11962_v57  ;;  %v11963_v42 = vmax.f32 %v11931_v35, 0.0  ;;  %v12085_v10 = vld [vmem:[#allocation4 + $0x99] sm:$0xff] }
 0xbc4   : > { %11997 = vst.msk [vmem:[#allocation4 + $0xc9] sm:$0xff] %vm366_vm4, %v11965_v17  ;;  %v12083_v47 = vld [vmem:[#allocation4 + $0x81] sm:$0xff]  ;;  %28870 = vmatpush3.bf16.msra.mxu0 %v32444_v1  ;;  %v35257_v61 = vpack.c.bf16 %v12085_v10, %v12084_v31 }
 0xbc5   : > { %11995 = vst.msk [vmem:[#allocation4 + $0xb1] sm:$0xff] %vm366_vm4, %v11963_v42  ;;  %v28809_v9 = vpop.f32.mrb[48].mxu1  ;;  %v35253_v59 = vpack.c.bf16 %v12083_v47, %v12082_v48  ;;  %28903 = vmatprep.subr.bf16.mxu0 %v35247_v26 }
 0xbc6   : > { %v11936_v3 = vadd.f32 %v28809_v9, %v35189_v40  ;;  %v11819_v63 = vpop.f32.mrb[49].mxu1 }
 0xbc7   : > { %v11934_v12 = vadd.f32 %v35189_v40, %v11819_v63  ;;  %v28810_v30 = vpop.f32.mrb[50].mxu1  ;;  %28840 = vmatmul.mubr.msk.bf16.gmra.mrb[72].mxu0 %vm366_vm4, %v35253_v59 }
 0xbc8   : > { %v11968_v55 = vmax.f32 %v11936_v3, 0.0  ;;  %v11937_v56 = vadd.f32 %v28810_v30, %v35189_v40  ;;  %v11822_v20 = vpop.f32.mrb[51].mxu1  ;;  %28843 = vmatprep.mubr.msk.bf16.mxu0 %vm366_vm4, %v35257_v61 }
 0xbc9   : > { %v11966_v58 = vmax.f32 %v11934_v12, 0.0  ;;  %v11935_v7 = vadd.f32 %v35189_v40, %v11822_v20  ;;  %v12088_v32 = vld [vmem:[#allocation4 + $0xc1] sm:$0xff] }
 0xbca   : > { %12000 = vst.msk [vmem:[#allocation4 + $0xf1] sm:$0xff] %vm366_vm4, %v11968_v55  ;;  %v11969_v34 = vmax.f32 %v11937_v56, 0.0  ;;  %v12086_v29 = vld [vmem:[#allocation4 + $0xa9] sm:$0xff] }
 0xbcb   : > { %11998 = vst.msk [vmem:[#allocation4 + $0xd9] sm:$0xff] %vm366_vm4, %v11966_v58  ;;  %v11967_v44 = vmax.f32 %v11935_v7, 0.0  ;;  %v12089_v14 = vld [vmem:[#allocation4 + $0xc9] sm:$0xff] }
 0xbcc   : > { %12001 = vst.msk [vmem:[#allocation4 + $0xf9] sm:$0xff] %vm366_vm4, %v11969_v34  ;;  %v12087_v45 = vld [vmem:[#allocation4 + $0xb1] sm:$0xff]  ;;  %v35273_v39 = vpack.c.bf16 %v12089_v14, %v12088_v32  ;;  %v12016_v32 = vld [vmem:[#allocation4 + $0x8] sm:$0xff] }
 0xbcd   : > { %11999 = vst.msk [vmem:[#allocation4 + $0xe1] sm:$0xff] %vm366_vm4, %v11967_v44  ;;  %v28813_v49 = vpop.f32.mrb[52].mxu1  ;;  %v35270_v41 = vpack.c.bf16 %v12087_v45, %v12086_v29 }
 0xbce   : > { %v11940_v53 = vadd.f32 %v28813_v49, %v35189_v40  ;;  %v11835_v60 = vpop.f32.mrb[53].mxu1 }
 0xbcf   : > { %v11938_v22 = vadd.f32 %v35189_v40, %v11835_v60  ;;  %v28814_v43 = vpop.f32.mrb[54].mxu1  ;;  %28844 = vmatmul.mubr.msk.bf16.gmra.mrb[76].mxu0 %vm366_vm4, %v35270_v41 }
 0xbd0   : > { %v11972_v15 = vmax.f32 %v11940_v53, 0.0  ;;  %v11941_v4 = vadd.f32 %v28814_v43, %v35189_v40  ;;  %v11838_v8 = vpop.f32.mrb[55].mxu1  ;;  %28847 = vmatprep.mubr.msk.bf16.mxu0 %vm366_vm4, %v35273_v39 }
 0xbd1   : > { %v11970_v5 = vmax.f32 %v11938_v22, 0.0  ;;  %v11939_v52 = vadd.f32 %v35189_v40, %v11838_v8  ;;  %v12092_v0 = vld [vmem:[#allocation4 + $0xf1] sm:$0xff] }
 0xbd2   : > { %12004 = vst.msk [vmem:[#allocation4 + $0x121] sm:$0xff] %vm366_vm4, %v11972_v15  ;;  %v11973_v24 = vmax.f32 %v11941_v4, 0.0  ;;  %v12090_v50 = vld [vmem:[#allocation4 + $0xd9] sm:$0xff] }
 0xbd3   : > { %12002 = vst.msk [vmem:[#allocation4 + $0x109] sm:$0xff] %vm366_vm4, %v11970_v5  ;;  %v11971_v36 = vmax.f32 %v11939_v52, 0.0  ;;  %v12093_v37 = vld [vmem:[#allocation4 + $0xf9] sm:$0xff]  ;;  %v12019_v52 = vld [vmem:[#allocation4 + $0x30] sm:$0xff] }
 0xbd4   : > { %12005 = vst.msk [vmem:[#allocation4 + $0x129] sm:$0xff] %vm366_vm4, %v11973_v24  ;;  %v12091_v23 = vld [vmem:[#allocation4 + $0xe1] sm:$0xff]  ;;  %v35289_v18 = vpack.c.bf16 %v12093_v37, %v12092_v0  ;;  %v12020_v4 = vld [vmem:[#allocation4 + $0x38] sm:$0xff]  ;;  %v32447_v37 = vld [vmem:[%s37581_s3 + $0x3b0] sm:$0xff]  }
 0xbd5   : > { %12003 = vst.msk [vmem:[#allocation4 + $0x111] sm:$0xff] %vm366_vm4, %v11971_v36  ;;  %v28817_v28 = vpop.f32.mrb[56].mxu1  ;;  %v35286_v51 = vpack.c.bf16 %v12091_v23, %v12090_v50  ;;  %v12018_v15 = vld [vmem:[#allocation4 + $0x20] sm:$0xff]  ;;  %v12017_v8 = vld [vmem:[#allocation4 + $0x18] sm:$0xff]  ;;  %v32446_v24 = vld [vmem:[%s37581_s3 + $0x3a8] sm:$0xff]   ;;  %v35336_v36 = vpack.c.bf16 %v12020_v4, %v12019_v52 }
 0xbd6   : > { %v11944_v19 = vadd.f32 %v28817_v28, %v35189_v40  ;;  %v11851_v38 = vpop.f32.mrb[57].mxu1  ;;  %v35331_v5 = vpack.c.bf16 %v12018_v15, %v12017_v8  ;;  %v12022_v50 = vld [vmem:[#allocation4 + $0x50] sm:$0xff]  ;;  %v12024_v23 = vld [vmem:[#allocation4 + $0x68] sm:$0xff]  ;;  %v12597_v52 = vld [vmem:[#allocation4 + $0x1a] sm:$0xff] }
 0xbd7   : > { %v11942_v33 = vadd.f32 %v35189_v40, %v11851_v38  ;;  %v28818_v1 = vpop.f32.mrb[58].mxu1  ;;  %28848 = vmatmul.mubr.msk.bf16.gmra.mrb[80].mxu0 %vm366_vm4, %v35286_v51  ;;  %v12021_v28 = vld [vmem:[#allocation4 + $0x48] sm:$0xff] }
 0xbd8   : > { %v11976_v2 = vmax.f32 %v11944_v19, 0.0  ;;  %v11945_v6 = vadd.f32 %v28818_v1, %v35189_v40  ;;  %v11854_v13 = vpop.f32.mrb[59].mxu1  ;;  %28851 = vmatprep.mubr.msk.bf16.mxu0 %vm366_vm4, %v35289_v18  ;;  %v35346_v0 = vpack.c.bf16 %v12022_v50, %v12021_v28  ;;  %v12023_v19 = vld [vmem:[#allocation4 + $0x60] sm:$0xff]  ;;  %v32450_v28 = vld [vmem:[%s37581_s3 + $0x3c8] sm:$0xff]  }
 0xbd9   : > { %v11974_v62 = vmax.f32 %v11942_v33, 0.0  ;;  %v11943_v46 = vadd.f32 %v35189_v40, %v11854_v13  ;;  %v12096_v48 = vld [vmem:[#allocation4 + $0x121] sm:$0xff]  ;;  %v35351_v38 = vpack.c.bf16 %v12024_v23, %v12023_v19 }
 0xbda   : > { %12008 = vst.msk [vmem:[#allocation4 + $0x151] sm:$0xff] %vm366_vm4, %v11976_v2  ;;  %v11977_v11 = vmax.f32 %v11945_v6, 0.0  ;;  %v12094_v35 = vld [vmem:[#allocation4 + $0x109] sm:$0xff]  ;;  %v32449_v33 = vld [vmem:[%s37581_s3 + $0x3c0] sm:$0xff]   ;;  %v12028_v2 = vld [vmem:[#allocation4 + $0x98] sm:$0xff] }
 0xbdb   : > { %12006 = vst.msk [vmem:[#allocation4 + $0x139] sm:$0xff] %vm366_vm4, %v11974_v62  ;;  %v11975_v16 = vmax.f32 %v11943_v46, 0.0  ;;  %v12097_v57 = vld [vmem:[#allocation4 + $0x129] sm:$0xff]  ;;  %v12026_v1 = vld [vmem:[#allocation4 + $0x80] sm:$0xff]  ;;  %v12025_v6 = vld [vmem:[#allocation4 + $0x78] sm:$0xff] }
 0xbdc   : > { %12009 = vst.msk [vmem:[#allocation4 + $0x159] sm:$0xff] %vm366_vm4, %v11977_v11  ;;  %v12095_v17 = vld [vmem:[#allocation4 + $0x111] sm:$0xff]  ;;  %v35305_v31 = vpack.c.bf16 %v12097_v57, %v12096_v48  ;;  %v35360_v13 = vpack.c.bf16 %v12026_v1, %v12025_v6  ;;  %v12029_v57 = vld [vmem:[#allocation4 + $0xa8] sm:$0xff]  ;;  %v12034_v48 = vld [vmem:[#allocation4 + $0xe0] sm:$0xff] }
 0xbdd   : > { %12007 = vst.msk [vmem:[#allocation4 + $0x141] sm:$0xff] %vm366_vm4, %v11975_v16  ;;  %v28821_v42 = vpop.f32.mrb[60].mxu1  ;;  %v35302_v10 = vpack.c.bf16 %v12095_v17, %v12094_v35  ;;  %v12027_v62 = vld [vmem:[#allocation4 + $0x90] sm:$0xff]  ;;  %v12032_v16 = vld [vmem:[#allocation4 + $0xc8] sm:$0xff]  ;;  %v12031_v17 = vld [vmem:[#allocation4 + $0xc0] sm:$0xff] }
 0xbde   : > { %v11948_v47 = vadd.f32 %v28821_v42, %v35189_v40  ;;  %v11867_v9 = vpop.f32.mrb[61].mxu1  ;;  %v35362_v46 = vpack.c.bf16 %v12028_v2, %v12027_v62  ;;  %v12030_v11 = vld [vmem:[#allocation4 + $0xb0] sm:$0xff]  ;;  %v35370_v42 = vpack.c.bf16 %v12032_v16, %v12031_v17  ;;  %v12600_v50 = vld [vmem:[#allocation4 + $0x3a] sm:$0xff]  ;;  %v12603_v6 = vld [vmem:[#allocation4 + $0x62] sm:$0xff] }
 0xbdf   : > { %v11946_v3 = vadd.f32 %v35189_v40, %v11867_v9  ;;  %v28822_v63 = vpop.f32.mrb[62].mxu1  ;;  %28852 = vmatmul.mubr.msk.bf16.gmra.mrb[84].mxu0 %vm366_vm4, %v35302_v10  ;;  %v35368_v35 = vpack.c.bf16 %v12030_v11, %v12029_v57  ;;  %v12033_v9 = vld [vmem:[#allocation4 + $0xd8] sm:$0xff]  ;;  %v12601_v1 = vld [vmem:[#allocation4 + $0x4a] sm:$0xff]  ;;  %v32453_v57 = vld [vmem:[%s37581_s3 + $0x3e0] sm:$0xff]  }
 0xbe0   : > { %v11980_v12 = vmax.f32 %v11948_v47, 0.0  ;;  %v11949_v30 = vadd.f32 %v28822_v63, %v35189_v40  ;;  %v11870_v55 = vpop.f32.mrb[63].mxu1  ;;  %28855 = vmatprep.mubr.msk.bf16.mxu0 %vm366_vm4, %v35305_v31  ;;  %v12036_v47 = vld [vmem:[#allocation4 + $0xf8] sm:$0xff]  ;;  %v12035_v63 = vld [vmem:[#allocation4 + $0xf0] sm:$0xff] }
 0xbe1   : > { %v11978_v56 = vmax.f32 %v11946_v3, 0.0  ;;  %v11947_v20 = vadd.f32 %v35189_v40, %v11870_v55  ;;  %v12100_v45 = vld [vmem:[#allocation4 + $0x151] sm:$0xff]  ;;  %v12015_v40 = vld [vmem:[#allocation4] sm:$0xff]  ;;  %v35376_v3 = vpack.c.bf16 %v12034_v48, %v12033_v9  ;;  %v12040_v55 = vld [vmem:[#allocation4 + $0x128] sm:$0xff] }
 0xbe2   : > { %12012 = vst.msk [vmem:[#allocation4 + $0x181] sm:$0xff] %vm366_vm4, %v11980_v12  ;;  %v11981_v58 = vmax.f32 %v11949_v30, 0.0  ;;  %v12098_v44 = vld [vmem:[#allocation4 + $0x139] sm:$0xff]  ;;  %v12047_v22 = vpack.c.bf16 %v12016_v32, %v12015_v40  ;;  %v35378_v12 = vpack.c.bf16 %v12036_v47, %v12035_v63  ;;  %v12038_v30 = vld [vmem:[#allocation4 + $0x110] sm:$0xff]  ;;  %v12606_v48 = vld [vmem:[#allocation4 + $0x82] sm:$0xff] }
 0xbe3   : > { %12010 = vst.msk [vmem:[#allocation4 + $0x169] sm:$0xff] %vm366_vm4, %v11978_v56  ;;  %v11979_v7 = vmax.f32 %v11947_v20, 0.0  ;;  %v12101_v34 = vld [vmem:[#allocation4 + $0x159] sm:$0xff]  ;;  %v12037_v56 = vld [vmem:[#allocation4 + $0x108] sm:$0xff]  ;;  %v12043_v40 = vld [vmem:[#allocation4 + $0x150] sm:$0xff] }
 0xbe4   : > { %12013 = vst.msk [vmem:[#allocation4 + $0x189] sm:$0xff] %vm366_vm4, %v11981_v58  ;;  %v12099_v14 = vld [vmem:[#allocation4 + $0x141] sm:$0xff]  ;;  %v35320_v49 = vpack.c.bf16 %v12101_v34, %v12100_v45  ;;  %v35384_v20 = vpack.c.bf16 %v12038_v30, %v12037_v56  ;;  %v12602_v2 = vld [vmem:[#allocation4 + $0x52] sm:$0xff]  ;;  %v12604_v62 = vld [vmem:[#allocation4 + $0x6a] sm:$0xff] }
 0xbe5   : > { %12011 = vst.msk [vmem:[#allocation4 + $0x171] sm:$0xff] %vm366_vm4, %v11979_v7  ;;  %v35318_v29 = vpack.c.bf16 %v12099_v14, %v12098_v44  ;;  %v12039_v58 = vld [vmem:[#allocation4 + $0x120] sm:$0xff]  ;;  %v12044_v44 = vld [vmem:[#allocation4 + $0x158] sm:$0xff]  ;;  %v35419_v11 = vpack.c.bf16 %v12602_v2, %v12601_v1  ;;  %v35424_v16 = vpack.c.bf16 %v12604_v62, %v12603_v6 }
 0xbe6   : > { %v35386_v7 = vpack.c.bf16 %v12040_v55, %v12039_v58  ;;  %v12042_v34 = vld [vmem:[#allocation4 + $0x140] sm:$0xff]  ;;  %v12041_v14 = vld [vmem:[#allocation4 + $0x138] sm:$0xff]  ;;  %v35394_v32 = vpack.c.bf16 %v12044_v44, %v12043_v40  ;;  %v12609_v55 = vld [vmem:[#allocation4 + $0xaa] sm:$0xff] }
 0xbe7   : > { %28856 = vmatmul.mubr.msk.bf16.gmra.mrb[88].mxu0 %vm366_vm4, %v35318_v29  ;;  %v35392_v45 = vpack.c.bf16 %v12042_v34, %v12041_v14  ;;  %v12605_v17 = vld [vmem:[#allocation4 + $0x7a] sm:$0xff]  ;;  %v12607_v47 = vld [vmem:[#allocation4 + $0x92] sm:$0xff]  ;;  %v12611_v58 = vld [vmem:[#allocation4 + $0xc2] sm:$0xff] }
 0xbe8   : > { %28859 = vmatprep.mubr.msk.bf16.mxu0 %vm366_vm4, %v35320_v49  ;;  %v12608_v9 = vld [vmem:[#allocation4 + $0x9a] sm:$0xff]  ;;  %v35433_v63 = vpack.c.bf16 %v12606_v48, %v12605_v17  ;;  %v12610_v56 = vld [vmem:[#allocation4 + $0xb2] sm:$0xff]  ;;  %v12612_v34 = vld [vmem:[#allocation4 + $0xca] sm:$0xff] }
 0xbe9   : > { %v35435_v30 = vpack.c.bf16 %v12608_v9, %v12607_v47  ;;  %v35441_v44 = vpack.c.bf16 %v12610_v56, %v12609_v55  ;;  %v35443_v14 = vpack.c.bf16 %v12612_v34, %v12611_v58  ;;  %v12613_v40 = vld [vmem:[#allocation4 + $0xda] sm:$0xff]  ;;  %v12622_v2 = vld [vmem:[#allocation4 + $0x142] sm:$0xff]  ;;  %v12623_v6 = vld [vmem:[#allocation4 + $0x152] sm:$0xff] }
 0xbea   : > { %v12102_v53 = vld [vmem:[#allocation4 + $0x169] sm:$0xff]  ;;  %v12621_v1 = vld [vmem:[#allocation4 + $0x13a] sm:$0xff] }
 0xbeb   : > { %v12045_v15 = vld [vmem:[#allocation4 + $0x168] sm:$0xff]  ;;  %v12624_v62 = vld [vmem:[#allocation4 + $0x15a] sm:$0xff]  ;;  %v32455_v56 = vld [vmem:[%s37581_s3 + $0x3f0] sm:$0xff]  }
 0xbec   : > { %v12103_v60 = vld [vmem:[#allocation4 + $0x171] sm:$0xff]  ;;  %v35467_v17 = vpack.c.bf16 %v12624_v62, %v12623_v6  ;;  %v32454_v55 = vld [vmem:[%s37581_s3 + $0x3e8] sm:$0xff]   ;;  %v12947_v34 = vld [vmem:[#allocation4 + $0x180] sm:$0xff] }
 0xbed   : > { %v35326_v43 = vpack.c.bf16 %v12103_v60, %v12102_v53  ;;  %v12595_v53 = vld [vmem:[#allocation4 + $0x2] sm:$0xff]  ;;  %v12596_v60 = vld [vmem:[#allocation4 + $0xa] sm:$0xff]  ;;  %v12626_v47 = vld [vmem:[#allocation4 + $0x172] sm:$0xff] }
 0xbee   : > { %v12627_v4 = vpack.c.bf16 %v12596_v60, %v12595_v53  ;;  %v12614_v53 = vld [vmem:[#allocation4 + $0xe2] sm:$0xff]  ;;  %v12615_v60 = vld [vmem:[#allocation4 + $0xf2] sm:$0xff]  ;;  %v12625_v48 = vld [vmem:[#allocation4 + $0x16a] sm:$0xff] }
 0xbef   : > { %28860 = vmatmul.mubr.msk.bf16.gmra.mrb[92].mxu0 %vm366_vm4, %v35326_v43  ;;  %v35473_v9 = vpack.c.bf16 %v12626_v47, %v12625_v48  ;;  %v12948_v58 = vld [vmem:[#allocation4 + $0x188] sm:$0xff]  ;;  %v14213_v6 = vld [vmem:[#allocation4 + $0x91] sm:$0xff] }
 0xbf0   : > { %28871 = vmatprep.mubr.msk.bf16.mxu0 %vm366_vm4, %v12047_v22  ;;  %v12046_v22 = vld [vmem:[#allocation4 + $0x170] sm:$0xff]  ;;  %v32472_v62 = vld [vmem:[%s37581_s3 + $0x478] sm:$0xff]  }
 0xbf1   : > { %v35400_v8 = vpack.c.bf16 %v12046_v22, %v12045_v15  ;;  %v12616_v22 = vld [vmem:[#allocation4 + $0xfa] sm:$0xff]  ;;  %v35449_v15 = vpack.c.bf16 %v12614_v53, %v12613_v40  ;;  %v35519_v40 = vpack.c.bf16 %v12948_v58, %v12947_v34  ;;  %v32458_v53 = vld [vmem:[%s37581_s3 + $0x408] sm:$0xff]   ;;  %v14216_v47 = vld [vmem:[#allocation4 + $0xb1] sm:$0xff] }
 0xbf2   : > { %v14220_v34 = vld [vmem:[#allocation4 + $0xe1] sm:$0xff] }
 0xbf7   : > { %28872 = vmatmul.mubr.msk.bf16.vlgmr.msra.gmra.mrb[64].mxu0 %vm366_vm4, %v35331_v5 }
 0xbf8   : > { %28904 = vmatpush3.bf16.msra.mxu0 %v35247_v26  ;;  %28875 = vmatprep.mubr.msk.bf16.mxu0 %vm366_vm4, %v35336_v36  ;;  %v32448_v26 = vld [vmem:[%s37581_s3 + $0x3b8] sm:$0xff]  }
 0xbf9   : > { %28905 = vmatprep.subr.bf16.mxu0 %v32446_v24 }
 0xbfc   : > { %28906 = vmatpush3.bf16.msra.mxu0 %v32446_v24  ;;  %v12598_v24 = vld [vmem:[#allocation4 + $0x22] sm:$0xff] }
 0xbfd   : > { %28907 = vmatprep.subr.bf16.mxu0 %v32447_v37  ;;  %v35405_v23 = vpack.c.bf16 %v12598_v24, %v12597_v52  ;;  %v12617_v52 = vld [vmem:[#allocation4 + $0x10a] sm:$0xff]  ;;  %v12618_v24 = vld [vmem:[#allocation4 + $0x112] sm:$0xff] }
 0xbff   : > { %28876 = vmatmul.mubr.msk.bf16.gmra.mrb[68].mxu0 %vm366_vm4, %v35346_v0 }
 0xc00   : > { %28879 = vmatprep.mubr.msk.bf16.mxu0 %vm366_vm4, %v35351_v38  ;;  %28908 = vmatpush3.bf16.msra.mxu0 %v32447_v37  ;;  %v12599_v37 = vld [vmem:[#allocation4 + $0x32] sm:$0xff] }
 0xc01   : > { %28909 = vmatprep.subr.bf16.mxu0 %v32448_v26  ;;  %v35410_v19 = vpack.c.bf16 %v12600_v50, %v12599_v37  ;;  %v12619_v37 = vld [vmem:[#allocation4 + $0x122] sm:$0xff]  ;;  %v12620_v50 = vld [vmem:[#allocation4 + $0x12a] sm:$0xff] }
 0xc04   : > { %28910 = vmatpush3.bf16.msra.mxu0 %v32448_v26  ;;  %v32451_v26 = vld [vmem:[%s37581_s3 + $0x3d0] sm:$0xff]  }
 0xc05   : > { %28943 = vmatprep.subr.bf16.mxu0 %v32449_v33 }
 0xc07   : > { %28880 = vmatmul.mubr.msk.bf16.gmra.mrb[72].mxu0 %vm366_vm4, %v35360_v13 }
 0xc08   : > { %28883 = vmatprep.mubr.msk.bf16.mxu0 %vm366_vm4, %v35362_v46 }
 0xc0f   : > { %28884 = vmatmul.mubr.msk.bf16.gmra.mrb[76].mxu0 %vm366_vm4, %v35368_v35 }
 0xc10   : > { %28887 = vmatprep.mubr.msk.bf16.mxu0 %vm366_vm4, %v35370_v42 }
 0xc17   : > { %28888 = vmatmul.mubr.msk.bf16.gmra.mrb[80].mxu0 %vm366_vm4, %v35376_v3 }
 0xc18   : > { %28891 = vmatprep.mubr.msk.bf16.mxu0 %vm366_vm4, %v35378_v12 }
 0xc1f   : > { %28892 = vmatmul.mubr.msk.bf16.gmra.mrb[84].mxu0 %vm366_vm4, %v35384_v20 }
 0xc20   : > { %28895 = vmatprep.mubr.msk.bf16.mxu0 %vm366_vm4, %v35386_v7 }
 0xc27   : > { %28896 = vmatmul.mubr.msk.bf16.gmra.mrb[88].mxu0 %vm366_vm4, %v35392_v45 }
 0xc28   : > { %28899 = vmatprep.mubr.msk.bf16.mxu0 %vm366_vm4, %v35394_v32 }
 0xc2f   : > { %28900 = vmatmul.mubr.msk.bf16.gmra.mrb[92].mxu0 %vm366_vm4, %v35400_v8 }
 0xc30   : > { %28911 = vmatprep.mubr.msk.bf16.mxu0 %vm366_vm4, %v12627_v4  ;;  %v35451_v4 = vpack.c.bf16 %v12616_v22, %v12615_v60  ;;  %v32459_v60 = vld [vmem:[%s37581_s3 + $0x410] sm:$0xff]   ;;  %v32470_v22 = vld [vmem:[%s37581_s3 + $0x468] sm:$0xff]  }
 0xc37   : > { %28912 = vmatmul.mubr.msk.bf16.vlgmr.msra.gmra.mrb[64].mxu0 %vm366_vm4, %v35405_v23 }
 0xc38   : > { %28944 = vmatpush3.bf16.msra.mxu0 %v32449_v33  ;;  %28915 = vmatprep.mubr.msk.bf16.mxu0 %vm366_vm4, %v35410_v19  ;;  %v32452_v33 = vld [vmem:[%s37581_s3 + $0x3d8] sm:$0xff]  }
 0xc39   : > { %28945 = vmatprep.subr.bf16.mxu0 %v32450_v28 }
 0xc3c   : > { %28946 = vmatpush3.bf16.msra.mxu0 %v32450_v28  ;;  %v35457_v28 = vpack.c.bf16 %v12618_v24, %v12617_v52  ;;  %v32471_v24 = vld [vmem:[%s37581_s3 + $0x470] sm:$0xff]  }
 0xc3d   : > { %28947 = vmatprep.subr.bf16.mxu0 %v32451_v26 }
 0xc3f   : > { %28916 = vmatmul.mubr.msk.bf16.gmra.mrb[68].mxu0 %vm366_vm4, %v35419_v11 }
 0xc40   : > { %28919 = vmatprep.mubr.msk.bf16.mxu0 %vm366_vm4, %v35424_v16  ;;  %28948 = vmatpush3.bf16.msra.mxu0 %v32451_v26  ;;  %v35459_v26 = vpack.c.bf16 %v12620_v50, %v12619_v37  ;;  %v14212_v37 = vld [vmem:[#allocation4 + $0x81] sm:$0xff]  ;;  %v14214_v50 = vld [vmem:[#allocation4 + $0x99] sm:$0xff] }
 0xc41   : > { %28949 = vmatprep.subr.bf16.mxu0 %v32452_v33  ;;  %v14241_v48 = vpack.c.bf16 %v14214_v50, %v14213_v6  ;;  %v14891_v50 = vld [vmem:[#allocation3 + $0x61] sm:$0xff] }
 0xc44   : > { %28950 = vmatpush3.bf16.msra.mxu0 %v32452_v33  ;;  %v35465_v33 = vpack.c.bf16 %v12622_v2, %v12621_v1  ;;  %v14211_v1 = vld [vmem:[#allocation4 + $0x79] sm:$0xff] }
 0xc45   : > { %28983 = vmatprep.subr.bf16.mxu0 %v32453_v57  ;;  %v14240_v2 = vpack.c.bf16 %v14212_v37, %v14211_v1 }
 0xc47   : > { %28920 = vmatmul.mubr.msk.bf16.gmra.mrb[72].mxu0 %vm366_vm4, %v35433_v63 }
 0xc48   : > { %28923 = vmatprep.mubr.msk.bf16.mxu0 %vm366_vm4, %v35435_v30 }
 0xc4f   : > { %28924 = vmatmul.mubr.msk.bf16.gmra.mrb[76].mxu0 %vm366_vm4, %v35441_v44 }
 0xc50   : > { %28927 = vmatprep.mubr.msk.bf16.mxu0 %vm366_vm4, %v35443_v14 }
 0xc57   : > { %28928 = vmatmul.mubr.msk.bf16.gmra.mrb[80].mxu0 %vm366_vm4, %v35449_v15 }
 0xc58   : > { %28931 = vmatprep.mubr.msk.bf16.mxu0 %vm366_vm4, %v35451_v4 }
 0xc5f   : > { %28932 = vmatmul.mubr.msk.bf16.gmra.mrb[84].mxu0 %vm366_vm4, %v35457_v28 }
 0xc60   : > { %28935 = vmatprep.mubr.msk.bf16.mxu0 %vm366_vm4, %v35459_v26 }
 0xc67   : > { %28936 = vmatmul.mubr.msk.bf16.gmra.mrb[88].mxu0 %vm366_vm4, %v35465_v33 }
 0xc68   : > { %28939 = vmatprep.mubr.msk.bf16.mxu0 %vm366_vm4, %v35467_v17 }
 0xc6f   : > { %28940 = vmatmul.mubr.msk.bf16.gmra.mrb[92].mxu0 %vm366_vm4, %v35473_v9 }
 0xc70   : > { %28951 = vmatprep.mubr.msk.bf16.mxu0 %vm366_vm4, %v35331_v5  ;;  %v32456_v5 = vld [vmem:[%s37581_s3 + $0x3f8] sm:$0xff]  }
 0xc77   : > { %28952 = vmatmul.mubr.msk.bf16.vlgmr.msra.gmra.mrb[64].mxu0 %vm366_vm4, %v35336_v36 }
 0xc78   : > { %28984 = vmatpush3.bf16.msra.mxu0 %v32453_v57  ;;  %28955 = vmatprep.mubr.msk.bf16.mxu0 %vm366_vm4, %v35346_v0  ;;  %v32457_v57 = vld [vmem:[%s37581_s3 + $0x400] sm:$0xff]  }
 0xc79   : > { %28985 = vmatprep.subr.bf16.mxu0 %v32454_v55 }
 0xc7c   : > { %28986 = vmatpush3.bf16.msra.mxu0 %v32454_v55  ;;  %v14218_v55 = vld [vmem:[#allocation4 + $0xc9] sm:$0xff] }
 0xc7d   : > { %28987 = vmatprep.subr.bf16.mxu0 %v32455_v56 }
 0xc7f   : > { %28956 = vmatmul.mubr.msk.bf16.gmra.mrb[68].mxu0 %vm366_vm4, %v35351_v38 }
 0xc80   : > { %28959 = vmatprep.mubr.msk.bf16.mxu0 %vm366_vm4, %v35360_v13  ;;  %28988 = vmatpush3.bf16.msra.mxu0 %v32455_v56  ;;  %v14215_v56 = vld [vmem:[#allocation4 + $0xa9] sm:$0xff] }
 0xc81   : > { %28989 = vmatprep.subr.bf16.mxu0 %v32456_v5 }
 0xc84   : > { %28990 = vmatpush3.bf16.msra.mxu0 %v32456_v5  ;;  %v14242_v5 = vpack.c.bf16 %v14216_v47, %v14215_v56  ;;  %v14892_v56 = vld [vmem:[#allocation3 + $0x69] sm:$0xff] }
 0xc85   : > { %29023 = vmatprep.subr.bf16.mxu0 %v32457_v57 }
 0xc87   : > { %28960 = vmatmul.mubr.msk.bf16.gmra.mrb[72].mxu0 %vm366_vm4, %v35362_v46 }
 0xc88   : > { %28963 = vmatprep.mubr.msk.bf16.mxu0 %vm366_vm4, %v35368_v35 }
 0xc8f   : > { %28964 = vmatmul.mubr.msk.bf16.gmra.mrb[76].mxu0 %vm366_vm4, %v35370_v42 }
 0xc90   : > { %28967 = vmatprep.mubr.msk.bf16.mxu0 %vm366_vm4, %v35376_v3 }
 0xc97   : > { %28968 = vmatmul.mubr.msk.bf16.gmra.mrb[80].mxu0 %vm366_vm4, %v35378_v12 }
 0xc98   : > { %28971 = vmatprep.mubr.msk.bf16.mxu0 %vm366_vm4, %v35384_v20 }
 0xc9f   : > { %28972 = vmatmul.mubr.msk.bf16.gmra.mrb[84].mxu0 %vm366_vm4, %v35386_v7 }
 0xca0   : > { %28975 = vmatprep.mubr.msk.bf16.mxu0 %vm366_vm4, %v35392_v45 }
 0xca7   : > { %28976 = vmatmul.mubr.msk.bf16.gmra.mrb[88].mxu0 %vm366_vm4, %v35394_v32 }
 0xca8   : > { %28979 = vmatprep.mubr.msk.bf16.mxu0 %vm366_vm4, %v35400_v8 }
 0xcaf   : > { %28980 = vmatmul.mubr.msk.bf16.gmra.mrb[92].mxu0 %vm366_vm4, %v35519_v40 }
 0xcb0   : > { %28991 = vmatprep.mubr.msk.bf16.mxu0 %vm366_vm4, %v35207_v27  ;;  %v32460_v27 = vld [vmem:[%s37581_s3 + $0x418] sm:$0xff]  }
 0xcb7   : > { %28992 = vmatmul.mubr.msk.bf16.vlgmr.msra.gmra.mrb[64].mxu0 %vm366_vm4, %v35213_v25  ;;  %v32461_v25 = vld [vmem:[%s37581_s3 + $0x420] sm:$0xff]  }
 0xcb8   : > { %29024 = vmatpush3.bf16.msra.mxu0 %v32457_v57  ;;  %28995 = vmatprep.mubr.msk.bf16.mxu0 %vm366_vm4, %v35229_v54  ;;  %v13270_v54 = vld [vmem:[#allocation4 + $0x189] sm:$0xff]  ;;  %v14217_v57 = vld [vmem:[#allocation4 + $0xc1] sm:$0xff] }
 0xcb9   : > { %29025 = vmatprep.subr.bf16.mxu0 %v32458_v53  ;;  %v14243_v58 = vpack.c.bf16 %v14218_v55, %v14217_v57 }
 0xcbc   : > { %29026 = vmatpush3.bf16.msra.mxu0 %v32458_v53  ;;  %v14219_v53 = vld [vmem:[#allocation4 + $0xd9] sm:$0xff] }
 0xcbd   : > { %29027 = vmatprep.subr.bf16.mxu0 %v32459_v60 }
 0xcbf   : > { %28996 = vmatmul.mubr.msk.bf16.gmra.mrb[68].mxu0 %vm366_vm4, %v35235_v21  ;;  %v13269_v21 = vld [vmem:[#allocation4 + $0x181] sm:$0xff] }
 0xcc0   : > { %28999 = vmatprep.mubr.msk.bf16.mxu0 %vm366_vm4, %v35253_v59  ;;  %29028 = vmatpush3.bf16.msra.mxu0 %v32459_v60  ;;  %v35565_v59 = vpack.c.bf16 %v13270_v54, %v13269_v21  ;;  %v14244_v60 = vpack.c.bf16 %v14220_v34, %v14219_v53  ;;  %v14224_v54 = vld [vmem:[#allocation4 + $0x111] sm:$0xff]  ;;  %v14226_v21 = vld [vmem:[#allocation4 + $0x129] sm:$0xff] }
 0xcc1   : > { %29029 = vmatprep.subr.bf16.mxu0 %v32460_v27 }
 0xcc4   : > { %29030 = vmatpush3.bf16.msra.mxu0 %v32460_v27  ;;  %v14221_v27 = vld [vmem:[#allocation4 + $0xf1] sm:$0xff] }
 0xcc5   : > { %29063 = vmatprep.subr.bf16.mxu0 %v32461_v25 }
 0xcc7   : > { %29000 = vmatmul.mubr.msk.bf16.gmra.mrb[72].mxu0 %vm366_vm4, %v35257_v61  ;;  %v32462_v61 = vld [vmem:[%s37581_s3 + $0x428] sm:$0xff]  }
 0xcc8   : > { %29003 = vmatprep.mubr.msk.bf16.mxu0 %vm366_vm4, %v35270_v41  ;;  %v32463_v41 = vld [vmem:[%s37581_s3 + $0x430] sm:$0xff]  }
 0xccf   : > { %29004 = vmatmul.mubr.msk.bf16.gmra.mrb[76].mxu0 %vm366_vm4, %v35273_v39  ;;  %v32464_v39 = vld [vmem:[%s37581_s3 + $0x438] sm:$0xff]  }
 0xcd0   : > { %29007 = vmatprep.mubr.msk.bf16.mxu0 %vm366_vm4, %v35286_v51  ;;  %v32465_v51 = vld [vmem:[%s37581_s3 + $0x440] sm:$0xff]  }
 0xcd7   : > { %29008 = vmatmul.mubr.msk.bf16.gmra.mrb[80].mxu0 %vm366_vm4, %v35289_v18  ;;  %v13591_v18 = vld [vmem:[#allocation4 + $0x182] sm:$0xff] }
 0xcd8   : > { %29011 = vmatprep.mubr.msk.bf16.mxu0 %vm366_vm4, %v35302_v10  ;;  %v13592_v10 = vld [vmem:[#allocation4 + $0x18a] sm:$0xff] }
 0xcdf   : > { %29012 = vmatmul.mubr.msk.bf16.gmra.mrb[84].mxu0 %vm366_vm4, %v35305_v31  ;;  %v35611_v31 = vpack.c.bf16 %v13592_v10, %v13591_v18  ;;  %v14228_v18 = vld [vmem:[#allocation4 + $0x141] sm:$0xff]  ;;  %v14230_v10 = vld [vmem:[#allocation4 + $0x159] sm:$0xff] }
 0xce0   : > { %29015 = vmatprep.mubr.msk.bf16.mxu0 %vm366_vm4, %v35318_v29  ;;  %v32466_v29 = vld [vmem:[%s37581_s3 + $0x448] sm:$0xff]  }
 0xce7   : > { %29016 = vmatmul.mubr.msk.bf16.gmra.mrb[88].mxu0 %vm366_vm4, %v35320_v49  ;;  %v32467_v49 = vld [vmem:[%s37581_s3 + $0x450] sm:$0xff]  }
 0xce8   : > { %29019 = vmatprep.mubr.msk.bf16.mxu0 %vm366_vm4, %v35326_v43  ;;  %v32468_v43 = vld [vmem:[%s37581_s3 + $0x458] sm:$0xff]  }
 0xcef   : > { %29020 = vmatmul.mubr.msk.bf16.gmra.mrb[92].mxu0 %vm366_vm4, %v35565_v59 }
 0xcf0   : > { %29031 = vmatprep.mubr.msk.bf16.mxu0 %vm366_vm4, %v35405_v23  ;;  %v14209_v23 = vld [vmem:[#allocation4 + $0x61] sm:$0xff] }
 0xcf7   : > { %29032 = vmatmul.mubr.msk.bf16.vlgmr.msra.gmra.mrb[64].mxu0 %vm366_vm4, %v35410_v19 }
 0xcf8   : > { %29064 = vmatpush3.bf16.msra.mxu0 %v32461_v25  ;;  %29035 = vmatprep.mubr.msk.bf16.mxu0 %vm366_vm4, %v35419_v11 }
 0xcf9   : > { %29065 = vmatprep.subr.bf16.mxu0 %v32462_v61 }
 0xcfc   : > { %29066 = vmatpush3.bf16.msra.mxu0 %v32462_v61  ;;  %v14223_v61 = vld [vmem:[#allocation4 + $0x109] sm:$0xff] }
 0xcfd   : > { %29067 = vmatprep.subr.bf16.mxu0 %v32463_v41 }
 0xcff   : > { %29036 = vmatmul.mubr.msk.bf16.gmra.mrb[68].mxu0 %vm366_vm4, %v35424_v16 }
 0xd00   : > { %29039 = vmatprep.mubr.msk.bf16.mxu0 %vm366_vm4, %v35433_v63  ;;  %29068 = vmatpush3.bf16.msra.mxu0 %v32463_v41  ;;  %v14246_v41 = vpack.c.bf16 %v14224_v54, %v14223_v61 }
 0xd01   : > { %29069 = vmatprep.subr.bf16.mxu0 %v32464_v39 }
 0xd04   : > { %29070 = vmatpush3.bf16.msra.mxu0 %v32464_v39  ;;  %v14225_v39 = vld [vmem:[#allocation4 + $0x121] sm:$0xff] }
 0xd05   : > { %29103 = vmatprep.subr.bf16.mxu0 %v32465_v51 }
 0xd07   : > { %29040 = vmatmul.mubr.msk.bf16.gmra.mrb[72].mxu0 %vm366_vm4, %v35435_v30 }
 0xd08   : > { %29043 = vmatprep.mubr.msk.bf16.mxu0 %vm366_vm4, %v35441_v44 }
 0xd0f   : > { %29044 = vmatmul.mubr.msk.bf16.gmra.mrb[76].mxu0 %vm366_vm4, %v35443_v14 }
 0xd10   : > { %29047 = vmatprep.mubr.msk.bf16.mxu0 %vm366_vm4, %v35449_v15 }
 0xd17   : > { %29048 = vmatmul.mubr.msk.bf16.gmra.mrb[80].mxu0 %vm366_vm4, %v35451_v4 }
 0xd18   : > { %29051 = vmatprep.mubr.msk.bf16.mxu0 %vm366_vm4, %v35457_v28 }
 0xd1f   : > { %29052 = vmatmul.mubr.msk.bf16.gmra.mrb[84].mxu0 %vm366_vm4, %v35459_v26 }
 0xd20   : > { %29055 = vmatprep.mubr.msk.bf16.mxu0 %vm366_vm4, %v35465_v33 }
 0xd27   : > { %29056 = vmatmul.mubr.msk.bf16.gmra.mrb[88].mxu0 %vm366_vm4, %v35467_v17 }
 0xd28   : > { %29059 = vmatprep.mubr.msk.bf16.mxu0 %vm366_vm4, %v35473_v9 }
 0xd2f   : > { %29060 = vmatmul.mubr.msk.bf16.gmra.mrb[92].mxu0 %vm366_vm4, %v35611_v31 }
 0xd30   : > { %29071 = vmatprep.mubr.msk.bf16.mxu0 %vm366_vm4, %v35336_v36  ;;  %v32469_v36 = vld [vmem:[%s37581_s3 + $0x460] sm:$0xff]  }
 0xd37   : > { %29072 = vmatmul.mubr.msk.bf16.vlgmr.msra.gmra.mrb[64].mxu0 %vm366_vm4, %v35346_v0  ;;  %v13913_v0 = vld [vmem:[#allocation4 + $0x198] sm:$0xff] }
 0xd38   : > { %29104 = vmatpush3.bf16.msra.mxu0 %v32465_v51  ;;  %29075 = vmatprep.mubr.msk.bf16.mxu0 %vm366_vm4, %v35351_v38  ;;  %v13914_v38 = vld [vmem:[#allocation4 + $0x1a0] sm:$0xff]  ;;  %v14247_v51 = vpack.c.bf16 %v14226_v21, %v14225_v39  ;;  %v32478_v21 = vld [vmem:[%s37581_s3 + $0x488] sm:$0xff]  }
 0xd39   : > { %29105 = vmatprep.subr.bf16.mxu0 %v32466_v29 }
 0xd3c   : > { %29106 = vmatpush3.bf16.msra.mxu0 %v32466_v29  ;;  %v14227_v29 = vld [vmem:[#allocation4 + $0x139] sm:$0xff] }
 0xd3d   : > { %29107 = vmatprep.subr.bf16.mxu0 %v32467_v49 }
 0xd3f   : > { %29076 = vmatmul.mubr.msk.bf16.gmra.mrb[68].mxu0 %vm366_vm4, %v35360_v13  ;;  %v13930_v13 = vpack.c.bf16 %v13914_v38, %v13913_v0  ;;  %v14232_v0 = vld [vmem:[#allocation4 + $0x171] sm:$0xff]  ;;  %v14231_v38 = vld [vmem:[#allocation4 + $0x169] sm:$0xff] }
 0xd40   : > { %29079 = vmatprep.mubr.msk.bf16.mxu0 %vm366_vm4, %v35362_v46  ;;  %29108 = vmatpush3.bf16.msra.mxu0 %v32467_v49  ;;  %v14206_v46 = vld [vmem:[#allocation4 + $0x39] sm:$0xff]  ;;  %v14248_v49 = vpack.c.bf16 %v14228_v18, %v14227_v29 }
 0xd41   : > { %29109 = vmatprep.subr.bf16.mxu0 %v32468_v43 }
 0xd44   : > { %29110 = vmatpush3.bf16.msra.mxu0 %v32468_v43  ;;  %v14229_v43 = vld [vmem:[#allocation4 + $0x151] sm:$0xff] }
 0xd45   : > { %29143 = vmatprep.subr.bf16.mxu0 %v32469_v36 }
 0xd47   : > { %29080 = vmatmul.mubr.msk.bf16.gmra.mrb[72].mxu0 %vm366_vm4, %v35368_v35  ;;  %v14205_v35 = vld [vmem:[#allocation4 + $0x31] sm:$0xff] }
 0xd48   : > { %29083 = vmatprep.mubr.msk.bf16.mxu0 %vm366_vm4, %v35370_v42  ;;  %v14237_v42 = vpack.c.bf16 %v14206_v46, %v14205_v35  ;;  %v14235_v46 = vld [vmem:[#allocation4 + $0x199] sm:$0xff]  ;;  %v14236_v35 = vld [vmem:[#allocation4 + $0x1a1] sm:$0xff] }
 0xd4f   : > { %29084 = vmatmul.mubr.msk.bf16.gmra.mrb[76].mxu0 %vm366_vm4, %v35376_v3  ;;  %v32473_v3 = vld [vmem:[%s37581_s3 + $0x4a0] sm:$0xff]  }
 0xd50   : > { %29087 = vmatprep.mubr.msk.bf16.mxu0 %vm366_vm4, %v35378_v12  ;;  %v32474_v12 = vld [vmem:[%s37581_s3 + $0x4a8] sm:$0xff]   ;;  %29183 = vmatprep.subr.bf16.mxu1 %v32473_v3 }
 0xd51   : > { %29184 = vmatpush3.bf16.msra.mxu1 %v32473_v3  ;;  %v14885_v3 = vld [vmem:[#allocation3 + $0x19] sm:$0xff] }
 0xd52   : > { %29185 = vmatprep.subr.bf16.mxu1 %v32474_v12 }
 0xd55   : > { %29186 = vmatpush3.bf16.msra.mxu1 %v32474_v12 }
 0xd57   : > { %29088 = vmatmul.mubr.msk.bf16.gmra.mrb[80].mxu0 %vm366_vm4, %v35384_v20  ;;  %v14208_v20 = vld [vmem:[#allocation4 + $0x51] sm:$0xff] }
 0xd58   : > { %29091 = vmatprep.mubr.msk.bf16.mxu0 %vm366_vm4, %v35386_v7  ;;  %v14210_v7 = vld [vmem:[#allocation4 + $0x69] sm:$0xff] }
 0xd59   : > { %v14239_v52 = vpack.c.bf16 %v14210_v7, %v14209_v23  ;;  %v14886_v23 = vld [vmem:[#allocation3 + $0x21] sm:$0xff] }
 0xd5f   : > { %29092 = vmatmul.mubr.msk.bf16.gmra.mrb[84].mxu0 %vm366_vm4, %v35392_v45  ;;  %v32475_v45 = vld [vmem:[%s37581_s3 + $0x4b0] sm:$0xff]  }
 0xd60   : > { %29095 = vmatprep.mubr.msk.bf16.mxu0 %vm366_vm4, %v35394_v32  ;;  %v14207_v32 = vld [vmem:[#allocation4 + $0x49] sm:$0xff]  ;;  %29187 = vmatprep.subr.bf16.mxu1 %v32475_v45 }
 0xd61   : > { %29188 = vmatpush3.bf16.msra.mxu1 %v32475_v45  ;;  %v14888_v45 = vld [vmem:[#allocation3 + $0x39] sm:$0xff] }
 0xd67   : > { %29096 = vmatmul.mubr.msk.bf16.gmra.mrb[88].mxu0 %vm366_vm4, %v35400_v8  ;;  %v14238_v8 = vpack.c.bf16 %v14208_v20, %v14207_v32 }
 0xd68   : > { %29099 = vmatprep.mubr.msk.bf16.mxu0 %vm366_vm4, %v35519_v40  ;;  %v14222_v40 = vld [vmem:[#allocation4 + $0xf9] sm:$0xff] }
 0xd69   : > { %v14245_v25 = vpack.c.bf16 %v14222_v40, %v14221_v27 }
 0xd6f   : > { %29100 = vmatmul.mubr.msk.bf16.gmra.mrb[92].mxu0 %vm366_vm4, %v13930_v13  ;;  %v14250_v13 = vpack.c.bf16 %v14232_v0, %v14231_v38  ;;  %v14896_v38 = vld [vmem:[#allocation3 + $0x99] sm:$0xff] }
 0xd70   : > { %29111 = vmatprep.mubr.msk.bf16.mxu0 %vm366_vm4, %v14237_v42  ;;  %v14252_v42 = vpack.c.bf16 %v14236_v35, %v14235_v46  ;;  %v32479_v46 = vld [vmem:[%s37581_s3 + $0x490] sm:$0xff]  }
 0xd77   : > { %29112 = vmatmul.mubr.msk.bf16.vlgmr.msra.gmra.mrb[64].mxu0 %vm366_vm4, %v14238_v8 }
 0xd78   : > { %29144 = vmatpush3.bf16.msra.mxu0 %v32469_v36  ;;  %29115 = vmatprep.mubr.msk.bf16.mxu0 %vm366_vm4, %v14239_v52  ;;  %v14249_v36 = vpack.c.bf16 %v14230_v10, %v14229_v43 }
 0xd79   : > { %29145 = vmatprep.subr.bf16.mxu0 %v32470_v22 }
 0xd7c   : > { %29146 = vmatpush3.bf16.msra.mxu0 %v32470_v22 }
 0xd7d   : > { %29147 = vmatprep.subr.bf16.mxu0 %v32471_v24 }
 0xd7f   : > { %29116 = vmatmul.mubr.msk.bf16.gmra.mrb[68].mxu0 %vm366_vm4, %v14240_v2 }
 0xd80   : > { %29119 = vmatprep.mubr.msk.bf16.mxu0 %vm366_vm4, %v14241_v48  ;;  %29148 = vmatpush3.bf16.msra.mxu0 %v32471_v24 }
 0xd81   : > { %29149 = vmatprep.subr.bf16.mxu0 %v32472_v62 }
 0xd84   : > { %29150 = vmatpush3.bf16.msra.mxu0 %v32472_v62  ;;  %v14889_v62 = vld [vmem:[#allocation3 + $0x49] sm:$0xff] }
 0xd87   : > { %29120 = vmatmul.mubr.msk.bf16.gmra.mrb[72].mxu0 %vm366_vm4, %v14242_v5 }
 0xd88   : > { %29123 = vmatprep.mubr.msk.bf16.mxu0 %vm366_vm4, %v14243_v58  ;;  %v14890_v58 = vld [vmem:[#allocation3 + $0x51] sm:$0xff] }
 0xd8f   : > { %29124 = vmatmul.mubr.msk.bf16.gmra.mrb[76].mxu0 %vm366_vm4, %v14244_v60 }
 0xd90   : > { %29127 = vmatprep.mubr.msk.bf16.mxu0 %vm366_vm4, %v14245_v25 }
 0xd97   : > { %29128 = vmatmul.mubr.msk.bf16.gmra.mrb[80].mxu0 %vm366_vm4, %v14246_v41 }
 0xd98   : > { %29131 = vmatprep.mubr.msk.bf16.mxu0 %vm366_vm4, %v14247_v51  ;;  %v14895_v51 = vld [vmem:[#allocation3 + $0x91] sm:$0xff] }
 0xd9f   : > { %29132 = vmatmul.mubr.msk.bf16.gmra.mrb[84].mxu0 %vm366_vm4, %v14248_v49  ;;  %v14893_v49 = vld [vmem:[#allocation3 + $0x79] sm:$0xff] }
 0xda0   : > { %29135 = vmatprep.mubr.msk.bf16.mxu0 %vm366_vm4, %v14249_v36 }
 0xda7   : > { %29136 = vmatmul.mubr.msk.bf16.gmra.mrb[88].mxu0 %vm366_vm4, %v14250_v13 }
 0xda8   : > { %29139 = vmatprep.mubr.msk.bf16.mxu0 %vm366_vm4, %v35565_v59 }
 0xdaf   : > { %29140 = vmatmul.mubr.msk.bf16.gmra.mrb[92].mxu0 %vm366_vm4, %v14252_v42  ;;  %v14894_v42 = vld [vmem:[#allocation3 + $0x81] sm:$0xff] }
 0xdb0   : > { %29151 = vmatprep.mubr.msk.bf16.mxu0 %vm366_vm4, %v35410_v19  ;;  %v14557_v19 = vld [vmem:[#allocation4 + $0x19a] sm:$0xff] }
 0xdb7   : > { %29152 = vmatmul.mubr.msk.bf16.vlgmr.msra.gmra.mrb[64].mxu0 %vm366_vm4, %v35419_v11  ;;  %v14558_v11 = vld [vmem:[#allocation4 + $0x1a2] sm:$0xff] }
 0xdb8   : > { %29155 = vmatprep.mubr.msk.bf16.mxu0 %vm366_vm4, %v35424_v16  ;;  %v14574_v16 = vpack.c.bf16 %v14558_v11, %v14557_v19 }
 0xdbf   : > { %29156 = vmatmul.mubr.msk.bf16.gmra.mrb[68].mxu0 %vm366_vm4, %v35433_v63  ;;  %v32476_v63 = vld [vmem:[%s37581_s3 + $0x4b8] sm:$0xff]  }
 0xdc0   : > { %29159 = vmatprep.mubr.msk.bf16.mxu0 %vm366_vm4, %v35435_v30  ;;  %29189 = vmatprep.subr.bf16.mxu1 %v32476_v63  ;;  %v15039_v30 = vld [vmem:[#allocation3 + $0x1] sm:$0xff] }
 0xdc1   : > { %29190 = vmatpush3.bf16.msra.mxu1 %v32476_v63 }
 0xdc7   : > { %29160 = vmatmul.mubr.msk.bf16.gmra.mrb[72].mxu0 %vm366_vm4, %v35441_v44  ;;  %v15040_v44 = vld [vmem:[#allocation3 + $0x9] sm:$0xff] }
 0xdc8   : > { %29163 = vmatprep.mubr.msk.bf16.mxu0 %vm366_vm4, %v35443_v14  ;;  %v15071_v14 = vpack.c.bf16 %v15040_v44, %v15039_v30 }
 0xdca   : > { %29191 = vmatprep.mubr.msk.bf16.mxu1 %vm366_vm4, %v15071_v14 }
 0xdcf   : > { %29164 = vmatmul.mubr.msk.bf16.gmra.mrb[76].mxu0 %vm366_vm4, %v35449_v15  ;;  %v32477_v15 = vld [vmem:[%s37581_s3 + $0x480] sm:$0xff]  }
 0xdd0   : > { %29167 = vmatprep.mubr.msk.bf16.mxu0 %vm366_vm4, %v35451_v4  ;;  %29223 = vmatprep.subr.bf16.mxu1 %v32477_v15  ;;  %v35734_v4 = vld [vmem:[%s37582_s4 + $0x3] ss:$0 sm:$0xff] }
 0xdd7   : > { %29168 = vmatmul.mubr.msk.bf16.gmra.mrb[80].mxu0 %vm366_vm4, %v35457_v28 }
 0xdd8   : > { %29171 = vmatprep.mubr.msk.bf16.mxu0 %vm366_vm4, %v35459_v26 }
 0xddf   : > { %29172 = vmatmul.mubr.msk.bf16.gmra.mrb[84].mxu0 %vm366_vm4, %v35465_v33 }
 0xde0   : > { %29175 = vmatprep.mubr.msk.bf16.mxu0 %vm366_vm4, %v35467_v17  ;;  %v14887_v17 = vld [vmem:[#allocation3 + $0x31] sm:$0xff] }
 0xde7   : > { %29176 = vmatmul.mubr.msk.bf16.gmra.mrb[88].mxu0 %vm366_vm4, %v35473_v9 }
 0xde8   : > { %29179 = vmatprep.mubr.msk.bf16.mxu0 %vm366_vm4, %v35611_v31 }
 0xdef   : > { %29180 = vmatmul.mubr.msk.bf16.gmra.mrb[92].mxu0 %vm366_vm4, %v14574_v16 }
 0xe8a   : > { %v29153_v28 = vpop.f32.mrb[64].mxu0 }
 0xe8b   : > { %v14855_v26 = vadd.f32 %v29153_v28, %v35734_v4  ;;  %v14690_v33 = vpop.f32.mrb[65].mxu0 }
 0xe8c   : > { %v14853_v9 = vadd.f32 %v35734_v4, %v14690_v33  ;;  %v29154_v59 = vpop.f32.mrb[66].mxu0 }
 0xe8d   : > { %v14919_v31 = vadd.f32 %v14887_v17, %v14855_v26  ;;  %v14856_v12 = vadd.f32 %v29154_v59, %v35734_v4  ;;  %v14693_v20 = vpop.f32.mrb[67].mxu0  ;;  %v14899_v17 = vld [vmem:[#allocation3 + $0xc1] sm:$0xff] }
 0xe8e   : > { %v14917_v7 = vadd.f32 %v14885_v3, %v14853_v9  ;;  %v14854_v32 = vadd.f32 %v35734_v4, %v14693_v20  ;;  %v14897_v3 = vld [vmem:[#allocation3 + $0xa9] sm:$0xff] }
 0xe8f   : > { %14951 = vst.msk [vmem:[#allocation3 + $0x31] sm:$0xff] %vm366_vm4, %v14919_v31  ;;  %v14920_v8 = vadd.f32 %v14888_v45, %v14856_v12  ;;  %v14900_v45 = vld [vmem:[#allocation3 + $0xc9] sm:$0xff] }
 0xe90   : > { %14949 = vst.msk [vmem:[#allocation3 + $0x19] sm:$0xff] %vm366_vm4, %v14917_v7  ;;  %v14918_v22 = vadd.f32 %v14886_v23, %v14854_v32 }
 0xe91   : > { %14952 = vst.msk [vmem:[#allocation3 + $0x39] sm:$0xff] %vm366_vm4, %v14920_v8  ;;  %v35792_v8 = vld [vmem:[%s37581_s3 + $0x4c0] sm:$0xff]  }
 0xe92   : > { %14950 = vst.msk [vmem:[#allocation3 + $0x21] sm:$0xff] %vm366_vm4, %v14918_v22  ;;  %v29157_v52 = vpop.f32.mrb[68].mxu0  ;;  %v14898_v22 = vld [vmem:[#allocation3 + $0xb1] sm:$0xff] }
 0xe93   : > { %v14859_v24 = vadd.f32 %v29157_v52, %v35734_v4  ;;  %v14706_v37 = vpop.f32.mrb[69].mxu0 }
 0xe94   : > { %v14857_v1 = vadd.f32 %v35734_v4, %v14706_v37  ;;  %v29158_v2 = vpop.f32.mrb[70].mxu0 }
 0xe95   : > { %v14923_v6 = vadd.f32 %v14891_v50, %v14859_v24  ;;  %v14860_v48 = vadd.f32 %v29158_v2, %v35734_v4  ;;  %v14709_v47 = vpop.f32.mrb[71].mxu0 }
 0xe96   : > { %v14921_v55 = vadd.f32 %v14889_v62, %v14857_v1  ;;  %v14858_v5 = vadd.f32 %v35734_v4, %v14709_v47  ;;  %v15043_v54 = vld [vmem:[#allocation3 + $0x31] sm:$0xff] }
 0xe97   : > { %14955 = vst.msk [vmem:[#allocation3 + $0x61] sm:$0xff] %vm366_vm4, %v14923_v6  ;;  %v14924_v57 = vadd.f32 %v14892_v56, %v14860_v48  ;;  %v15041_v53 = vld [vmem:[#allocation3 + $0x19] sm:$0xff] }
 0xe98   : > { %14953 = vst.msk [vmem:[#allocation3 + $0x49] sm:$0xff] %vm366_vm4, %v14921_v55  ;;  %v14922_v34 = vadd.f32 %v14890_v58, %v14858_v5  ;;  %v15044_v40 = vld [vmem:[#allocation3 + $0x39] sm:$0xff]  ;;  %v14903_v55 = vld [vmem:[#allocation3 + $0xf1] sm:$0xff] }
 0xe99   : > { %14956 = vst.msk [vmem:[#allocation3 + $0x69] sm:$0xff] %vm366_vm4, %v14924_v57  ;;  %v15042_v60 = vld [vmem:[#allocation3 + $0x21] sm:$0xff]  ;;  %v35758_v39 = vpack.c.bf16 %v15044_v40, %v15043_v54  ;;  %v14901_v58 = vld [vmem:[#allocation3 + $0xd9] sm:$0xff] }
 0xe9a   : > { %14954 = vst.msk [vmem:[#allocation3 + $0x51] sm:$0xff] %vm366_vm4, %v14922_v34  ;;  %v29161_v27 = vpop.f32.mrb[72].mxu0  ;;  %v35752_v25 = vpack.c.bf16 %v15042_v60, %v15041_v53  ;;  %v14904_v60 = vld [vmem:[#allocation3 + $0xf9] sm:$0xff] }
 0xe9b   : > { %v14863_v61 = vadd.f32 %v29161_v27, %v35734_v4  ;;  %v14722_v41 = vpop.f32.mrb[73].mxu0 }
 0xe9c   : > { %v14861_v18 = vadd.f32 %v35734_v4, %v14722_v41  ;;  %v29162_v10 = vpop.f32.mrb[74].mxu0  ;;  %29192 = vmatmul.mubr.msk.bf16.vlgmr.msra.gmra.mrb[64].mxu1 %vm366_vm4, %v35752_v25 }
 0xe9d   : > { %v14927_v29 = vadd.f32 %v14895_v51, %v14863_v61  ;;  %v14864_v43 = vadd.f32 %v29162_v10, %v35734_v4  ;;  %29224 = vmatpush3.bf16.msra.mxu1 %v32477_v15  ;;  %v14725_v36 = vpop.f32.mrb[75].mxu0  ;;  %29195 = vmatprep.mubr.msk.bf16.mxu1 %vm366_vm4, %v35758_v39  ;;  %v32480_v15 = vld [vmem:[%s37581_s3 + $0x498] sm:$0xff]  }
 0xe9e   : > { %v14925_v0 = vadd.f32 %v14893_v49, %v14861_v18  ;;  %v14862_v13 = vadd.f32 %v35734_v4, %v14725_v36  ;;  %29225 = vmatprep.subr.bf16.mxu1 %v32478_v21  ;;  %v15047_v14 = vld [vmem:[#allocation3 + $0x61] sm:$0xff] }
 0xe9f   : > { %14959 = vst.msk [vmem:[#allocation3 + $0x91] sm:$0xff] %vm366_vm4, %v14927_v29  ;;  %v14928_v35 = vadd.f32 %v14896_v38, %v14864_v43  ;;  %v15045_v16 = vld [vmem:[#allocation3 + $0x49] sm:$0xff]  ;;  %v14907_v38 = vld [vmem:[#allocation3 + $0x121] sm:$0xff] }
 0xea0   : > { %14957 = vst.msk [vmem:[#allocation3 + $0x79] sm:$0xff] %vm366_vm4, %v14925_v0  ;;  %v14926_v19 = vadd.f32 %v14894_v42, %v14862_v13  ;;  %v15048_v11 = vld [vmem:[#allocation3 + $0x69] sm:$0xff] }
 0xea1   : > { %14960 = vst.msk [vmem:[#allocation3 + $0x99] sm:$0xff] %vm366_vm4, %v14928_v35  ;;  %v15046_v63 = vld [vmem:[#allocation3 + $0x51] sm:$0xff]  ;;  %29226 = vmatpush3.bf16.msra.mxu1 %v32478_v21  ;;  %v35780_v33 = vpack.c.bf16 %v15048_v11, %v15047_v14  ;;  %v14902_v21 = vld [vmem:[#allocation3 + $0xe1] sm:$0xff]  ;;  %v14905_v42 = vld [vmem:[#allocation3 + $0x109] sm:$0xff] }
 0xea2   : > { %14958 = vst.msk [vmem:[#allocation3 + $0x81] sm:$0xff] %vm366_vm4, %v14926_v19  ;;  %v29165_v30 = vpop.f32.mrb[76].mxu0  ;;  %v35774_v44 = vpack.c.bf16 %v15046_v63, %v15045_v16  ;;  %29227 = vmatprep.subr.bf16.mxu1 %v32479_v46  ;;  %v14908_v63 = vld [vmem:[#allocation3 + $0x129] sm:$0xff] }
 0xea3   : > { %v14867_v28 = vadd.f32 %v29165_v30, %v35734_v4  ;;  %v14738_v26 = vpop.f32.mrb[77].mxu0 }
 0xea4   : > { %v14865_v9 = vadd.f32 %v35734_v4, %v14738_v26  ;;  %v29166_v59 = vpop.f32.mrb[78].mxu0  ;;  %29196 = vmatmul.mubr.msk.bf16.gmra.mrb[68].mxu1 %vm366_vm4, %v35774_v44 }
 0xea5   : > { %v14931_v31 = vadd.f32 %v14899_v17, %v14867_v28  ;;  %v14868_v12 = vadd.f32 %v29166_v59, %v35734_v4  ;;  %v14741_v20 = vpop.f32.mrb[79].mxu0  ;;  %29199 = vmatprep.mubr.msk.bf16.mxu1 %vm366_vm4, %v35780_v33  ;;  %29228 = vmatpush3.bf16.msra.mxu1 %v32479_v46 }
 0xea6   : > { %v14929_v7 = vadd.f32 %v14897_v3, %v14865_v9  ;;  %v14866_v32 = vadd.f32 %v35734_v4, %v14741_v20  ;;  %29229 = vmatprep.subr.bf16.mxu1 %v32480_v15  ;;  %v15051_v6 = vld [vmem:[#allocation3 + $0x91] sm:$0xff] }
 0xea7   : > { %14963 = vst.msk [vmem:[#allocation3 + $0xc1] sm:$0xff] %vm366_vm4, %v14931_v31  ;;  %v14932_v23 = vadd.f32 %v14900_v45, %v14868_v12  ;;  %v15049_v37 = vld [vmem:[#allocation3 + $0x79] sm:$0xff]  ;;  %v14911_v45 = vld [vmem:[#allocation3 + $0x151] sm:$0xff] }
 0xea8   : > { %14961 = vst.msk [vmem:[#allocation3 + $0xa9] sm:$0xff] %vm366_vm4, %v14929_v7  ;;  %v14930_v52 = vadd.f32 %v14898_v22, %v14866_v32  ;;  %v15052_v24 = vld [vmem:[#allocation3 + $0x99] sm:$0xff] }
 0xea9   : > { %14964 = vst.msk [vmem:[#allocation3 + $0xc9] sm:$0xff] %vm366_vm4, %v14932_v23  ;;  %v15050_v50 = vld [vmem:[#allocation3 + $0x81] sm:$0xff]  ;;  %29230 = vmatpush3.bf16.msra.mxu1 %v32480_v15  ;;  %v35802_v47 = vpack.c.bf16 %v15052_v24, %v15051_v6  ;;  %v14906_v15 = vld [vmem:[#allocation3 + $0x111] sm:$0xff] }
 0xeaa   : > { %14962 = vst.msk [vmem:[#allocation3 + $0xb1] sm:$0xff] %vm366_vm4, %v14930_v52  ;;  %v29169_v1 = vpop.f32.mrb[80].mxu0  ;;  %v35798_v2 = vpack.c.bf16 %v15050_v50, %v15049_v37  ;;  %29263 = vmatprep.subr.bf16.mxu1 %v35792_v8  ;;  %v14909_v52 = vld [vmem:[#allocation3 + $0x139] sm:$0xff] }
 0xeab   : > { %v14871_v62 = vadd.f32 %v29169_v1, %v35734_v4  ;;  %v14754_v48 = vpop.f32.mrb[81].mxu0  ;;  %v14912_v1 = vld [vmem:[#allocation3 + $0x159] sm:$0xff] }
 0xeac   : > { %v14869_v56 = vadd.f32 %v35734_v4, %v14754_v48  ;;  %v29170_v5 = vpop.f32.mrb[82].mxu0  ;;  %29200 = vmatmul.mubr.msk.bf16.gmra.mrb[72].mxu1 %vm366_vm4, %v35798_v2  ;;  %v14910_v48 = vld [vmem:[#allocation3 + $0x141] sm:$0xff] }
 0xead   : > { %v14935_v57 = vadd.f32 %v14903_v55, %v14871_v62  ;;  %v14872_v34 = vadd.f32 %v29170_v5, %v35734_v4  ;;  %v14757_v40 = vpop.f32.mrb[83].mxu0  ;;  %29203 = vmatprep.mubr.msk.bf16.mxu1 %vm366_vm4, %v35802_v47 }
 0xeae   : > { %v14933_v53 = vadd.f32 %v14901_v58, %v14869_v56  ;;  %v14870_v27 = vadd.f32 %v35734_v4, %v14757_v40  ;;  %v15055_v49 = vld [vmem:[#allocation3 + $0xc1] sm:$0xff] }
 0xeaf   : > { %14967 = vst.msk [vmem:[#allocation3 + $0xf1] sm:$0xff] %vm366_vm4, %v14935_v57  ;;  %v14936_v54 = vadd.f32 %v14904_v60, %v14872_v34  ;;  %v15053_v51 = vld [vmem:[#allocation3 + $0xa9] sm:$0xff] }
 0xeb0   : > { %14965 = vst.msk [vmem:[#allocation3 + $0xd9] sm:$0xff] %vm366_vm4, %v14933_v53  ;;  %v14934_v61 = vadd.f32 %v14902_v21, %v14870_v27  ;;  %v15056_v41 = vld [vmem:[#allocation3 + $0xc9] sm:$0xff] }
 0xeb1   : > { %14968 = vst.msk [vmem:[#allocation3 + $0xf9] sm:$0xff] %vm366_vm4, %v14936_v54  ;;  %v15054_v18 = vld [vmem:[#allocation3 + $0xb1] sm:$0xff]  ;;  %v35818_v0 = vpack.c.bf16 %v15056_v41, %v15055_v49  ;;  %v14915_v54 = vld [vmem:[#allocation3 + $0x181] sm:$0xff] }
 0xeb2   : > { %14966 = vst.msk [vmem:[#allocation3 + $0xe1] sm:$0xff] %vm366_vm4, %v14934_v61  ;;  %v29173_v10 = vpop.f32.mrb[84].mxu0  ;;  %v35815_v29 = vpack.c.bf16 %v15054_v18, %v15053_v51  ;;  %v14913_v51 = vld [vmem:[#allocation3 + $0x169] sm:$0xff] }
 0xeb3   : > { %v14875_v43 = vadd.f32 %v29173_v10, %v35734_v4  ;;  %v14770_v36 = vpop.f32.mrb[85].mxu0 }
 0xeb4   : > { %v14873_v13 = vadd.f32 %v35734_v4, %v14770_v36  ;;  %v29174_v46 = vpop.f32.mrb[86].mxu0  ;;  %29204 = vmatmul.mubr.msk.bf16.gmra.mrb[76].mxu1 %vm366_vm4, %v35815_v29 }
 0xeb5   : > { %v14939_v35 = vadd.f32 %v14907_v38, %v14875_v43  ;;  %v14876_v19 = vadd.f32 %v29174_v46, %v35734_v4  ;;  %v14773_v11 = vpop.f32.mrb[87].mxu0  ;;  %29207 = vmatprep.mubr.msk.bf16.mxu1 %vm366_vm4, %v35818_v0  ;;  %v14916_v43 = vld [vmem:[#allocation3 + $0x189] sm:$0xff] }
 0xeb6   : > { %v14937_v16 = vadd.f32 %v14905_v42, %v14873_v13  ;;  %v14874_v30 = vadd.f32 %v35734_v4, %v14773_v11  ;;  %v15059_v3 = vld [vmem:[#allocation3 + $0xf1] sm:$0xff] }
 0xeb7   : > { %14971 = vst.msk [vmem:[#allocation3 + $0x121] sm:$0xff] %vm366_vm4, %v14939_v35  ;;  %v14940_v14 = vadd.f32 %v14908_v63, %v14876_v19  ;;  %v15057_v17 = vld [vmem:[#allocation3 + $0xd9] sm:$0xff]  ;;  %v14914_v13 = vld [vmem:[#allocation3 + $0x171] sm:$0xff] }
 0xeb8   : > { %14969 = vst.msk [vmem:[#allocation3 + $0x109] sm:$0xff] %vm366_vm4, %v14937_v16  ;;  %v14938_v28 = vadd.f32 %v14906_v15, %v14874_v30  ;;  %v15060_v26 = vld [vmem:[#allocation3 + $0xf9] sm:$0xff]  ;;  %v14983_v30 = vld [vmem:[#allocation3 + $0x8] sm:$0xff] }
 0xeb9   : > { %14972 = vst.msk [vmem:[#allocation3 + $0x129] sm:$0xff] %vm366_vm4, %v14940_v14  ;;  %v15058_v9 = vld [vmem:[#allocation3 + $0xe1] sm:$0xff]  ;;  %v35834_v7 = vpack.c.bf16 %v15060_v26, %v15059_v3 }
 0xeba   : > { %14970 = vst.msk [vmem:[#allocation3 + $0x111] sm:$0xff] %vm366_vm4, %v14938_v28  ;;  %v29177_v59 = vpop.f32.mrb[88].mxu0  ;;  %v35831_v31 = vpack.c.bf16 %v15058_v9, %v15057_v17  ;;  %v14985_v17 = vld [vmem:[#allocation3 + $0x20] sm:$0xff]  ;;  %v14987_v9 = vld [vmem:[#allocation3 + $0x38] sm:$0xff] }
 0xebb   : > { %v14879_v12 = vadd.f32 %v29177_v59, %v35734_v4  ;;  %v14786_v20 = vpop.f32.mrb[89].mxu0  ;;  %v14984_v59 = vld [vmem:[#allocation3 + $0x18] sm:$0xff] }
 0xebc   : > { %v14877_v32 = vadd.f32 %v35734_v4, %v14786_v20  ;;  %v29178_v23 = vpop.f32.mrb[90].mxu0  ;;  %29208 = vmatmul.mubr.msk.bf16.gmra.mrb[80].mxu1 %vm366_vm4, %v35831_v31  ;;  %v35876_v3 = vpack.c.bf16 %v14985_v17, %v14984_v59  ;;  %v32482_v20 = vld [vmem:[%s37581_s3 + $0x4c8] sm:$0xff]  }
 0xebd   : > { %v14943_v22 = vadd.f32 %v14911_v45, %v14879_v12  ;;  %v14880_v24 = vadd.f32 %v29178_v23, %v35734_v4  ;;  %v14789_v37 = vpop.f32.mrb[91].mxu0  ;;  %29211 = vmatprep.mubr.msk.bf16.mxu1 %vm366_vm4, %v35834_v7  ;;  %v14986_v12 = vld [vmem:[#allocation3 + $0x30] sm:$0xff] }
 0xebe   : > { %v14941_v50 = vadd.f32 %v14909_v52, %v14877_v32  ;;  %v14878_v6 = vadd.f32 %v35734_v4, %v14789_v37  ;;  %v15063_v40 = vld [vmem:[#allocation3 + $0x121] sm:$0xff]  ;;  %v35881_v45 = vpack.c.bf16 %v14987_v9, %v14986_v12  ;;  %v14989_v23 = vld [vmem:[#allocation3 + $0x50] sm:$0xff] }
 0xebf   : > { %14975 = vst.msk [vmem:[#allocation3 + $0x151] sm:$0xff] %vm366_vm4, %v14943_v22  ;;  %v14944_v62 = vadd.f32 %v14912_v1, %v14880_v24  ;;  %v15061_v5 = vld [vmem:[#allocation3 + $0x109] sm:$0xff]  ;;  %v32483_v32 = vld [vmem:[%s37581_s3 + $0x4d0] sm:$0xff]  }
 0xec0   : > { %14973 = vst.msk [vmem:[#allocation3 + $0x139] sm:$0xff] %vm366_vm4, %v14941_v50  ;;  %v14942_v55 = vadd.f32 %v14910_v48, %v14878_v6  ;;  %v15064_v56 = vld [vmem:[#allocation3 + $0x129] sm:$0xff]  ;;  %v14990_v37 = vld [vmem:[#allocation3 + $0x60] sm:$0xff]  ;;  %v14992_v48 = vld [vmem:[#allocation3 + $0x78] sm:$0xff] }
 0xec1   : > { %14976 = vst.msk [vmem:[#allocation3 + $0x159] sm:$0xff] %vm366_vm4, %v14944_v62  ;;  %v15062_v57 = vld [vmem:[#allocation3 + $0x111] sm:$0xff]  ;;  %v35850_v27 = vpack.c.bf16 %v15064_v56, %v15063_v40  ;;  %v14991_v22 = vld [vmem:[#allocation3 + $0x68] sm:$0xff]  ;;  %v14993_v6 = vld [vmem:[#allocation3 + $0x80] sm:$0xff] }
 0xec2   : > { %14974 = vst.msk [vmem:[#allocation3 + $0x141] sm:$0xff] %vm366_vm4, %v14942_v55  ;;  %v29181_v58 = vpop.f32.mrb[92].mxu0  ;;  %v35847_v34 = vpack.c.bf16 %v15062_v57, %v15061_v5  ;;  %v14988_v52 = vld [vmem:[#allocation3 + $0x48] sm:$0xff]  ;;  %v35896_v50 = vpack.c.bf16 %v14991_v22, %v14990_v37  ;;  %v32485_v1 = vld [vmem:[%s37581_s3 + $0x4e0] sm:$0xff]   ;;  %v14995_v62 = vld [vmem:[#allocation3 + $0x98] sm:$0xff]  ;;  %v35905_v55 = vpack.c.bf16 %v14993_v6, %v14992_v48 }
 0xec3   : > { %v14883_v53 = vadd.f32 %v29181_v58, %v35734_v4  ;;  %v14802_v60 = vpop.f32.mrb[93].mxu0  ;;  %v35891_v24 = vpack.c.bf16 %v14989_v23, %v14988_v52  ;;  %v14994_v56 = vld [vmem:[#allocation3 + $0x90] sm:$0xff]  ;;  %v14999_v58 = vld [vmem:[#allocation3 + $0xc8] sm:$0xff]  ;;  %v15564_v12 = vld [vmem:[#allocation3 + $0x1a] sm:$0xff] }
 0xec4   : > { %v14881_v21 = vadd.f32 %v35734_v4, %v14802_v60  ;;  %v29182_v61 = vpop.f32.mrb[94].mxu0  ;;  %29212 = vmatmul.mubr.msk.bf16.gmra.mrb[84].mxu1 %vm366_vm4, %v35847_v34  ;;  %v35907_v5 = vpack.c.bf16 %v14995_v62, %v14994_v56  ;;  %v14997_v57 = vld [vmem:[#allocation3 + $0xb0] sm:$0xff]  ;;  %v14996_v40 = vld [vmem:[#allocation3 + $0xa8] sm:$0xff]  ;;  %v14998_v60 = vld [vmem:[#allocation3 + $0xc0] sm:$0xff] }
 0xec5   : > { %v14947_v41 = vadd.f32 %v14915_v54, %v14883_v53  ;;  %v14884_v18 = vadd.f32 %v29182_v61, %v35734_v4  ;;  %v14805_v10 = vpop.f32.mrb[95].mxu0  ;;  %29215 = vmatprep.mubr.msk.bf16.mxu1 %vm366_vm4, %v35850_v27  ;;  %v35913_v53 = vpack.c.bf16 %v14997_v57, %v14996_v40  ;;  %v35915_v54 = vpack.c.bf16 %v14999_v58, %v14998_v60  ;;  %v15003_v61 = vld [vmem:[#allocation3 + $0xf8] sm:$0xff]  ;;  %v15568_v6 = vld [vmem:[#allocation3 + $0x4a] sm:$0xff]  ;;  %v15570_v48 = vld [vmem:[#allocation3 + $0x62] sm:$0xff] }
 0xec6   : > { %v14945_v49 = vadd.f32 %v14913_v51, %v14881_v21  ;;  %v14882_v36 = vadd.f32 %v35734_v4, %v14805_v10  ;;  %v15067_v16 = vld [vmem:[#allocation3 + $0x151] sm:$0xff]  ;;  %v14982_v4 = vld [vmem:[#allocation3] sm:$0xff] }
 0xec7   : > { %14979 = vst.msk [vmem:[#allocation3 + $0x181] sm:$0xff] %vm366_vm4, %v14947_v41  ;;  %v14948_v38 = vadd.f32 %v14916_v43, %v14884_v18  ;;  %v15065_v42 = vld [vmem:[#allocation3 + $0x139] sm:$0xff]  ;;  %v15014_v28 = vpack.c.bf16 %v14983_v30, %v14982_v4  ;;  %v15002_v18 = vld [vmem:[#allocation3 + $0xf0] sm:$0xff]  ;;  %v15007_v43 = vld [vmem:[#allocation3 + $0x128] sm:$0xff] }
 0xec8   : > { %14977 = vst.msk [vmem:[#allocation3 + $0x169] sm:$0xff] %vm366_vm4, %v14945_v49  ;;  %v14946_v46 = vadd.f32 %v14914_v13, %v14882_v36  ;;  %v15068_v35 = vld [vmem:[#allocation3 + $0x159] sm:$0xff]  ;;  %v35923_v10 = vpack.c.bf16 %v15003_v61, %v15002_v18  ;;  %v15005_v49 = vld [vmem:[#allocation3 + $0x110] sm:$0xff]  ;;  %v15004_v36 = vld [vmem:[#allocation3 + $0x108] sm:$0xff] }
 0xec9   : > { %14980 = vst.msk [vmem:[#allocation3 + $0x189] sm:$0xff] %vm366_vm4, %v14948_v38  ;;  %v15066_v19 = vld [vmem:[#allocation3 + $0x141] sm:$0xff]  ;;  %v35865_v63 = vpack.c.bf16 %v15068_v35, %v15067_v16  ;;  %v15000_v41 = vld [vmem:[#allocation3 + $0xd8] sm:$0xff]  ;;  %v35929_v38 = vpack.c.bf16 %v15005_v49, %v15004_v36  ;;  %v15010_v4 = vld [vmem:[#allocation3 + $0x150] sm:$0xff] }
 0xeca   : > { %14978 = vst.msk [vmem:[#allocation3 + $0x171] sm:$0xff] %vm366_vm4, %v14946_v46  ;;  %v35863_v11 = vpack.c.bf16 %v15066_v19, %v15065_v42  ;;  %v15001_v21 = vld [vmem:[#allocation3 + $0xe0] sm:$0xff]  ;;  %v15011_v42 = vld [vmem:[#allocation3 + $0x158] sm:$0xff]  ;;  %v15571_v56 = vld [vmem:[#allocation3 + $0x6a] sm:$0xff] }
 0xecb   : > { %v35921_v51 = vpack.c.bf16 %v15001_v21, %v15000_v41  ;;  %v15006_v13 = vld [vmem:[#allocation3 + $0x120] sm:$0xff]  ;;  %v15008_v19 = vld [vmem:[#allocation3 + $0x138] sm:$0xff]  ;;  %v35939_v30 = vpack.c.bf16 %v15011_v42, %v15010_v4  ;;  %v35969_v58 = vpack.c.bf16 %v15571_v56, %v15570_v48  ;;  %v32489_v40 = vld [vmem:[%s37581_s3 + $0x500] sm:$0xff]  }
 0xecc   : > { %29216 = vmatmul.mubr.msk.bf16.gmra.mrb[88].mxu1 %vm366_vm4, %v35863_v11  ;;  %v35931_v46 = vpack.c.bf16 %v15007_v43, %v15006_v13  ;;  %v15009_v35 = vld [vmem:[#allocation3 + $0x140] sm:$0xff]  ;;  %v32486_v52 = vld [vmem:[%s37581_s3 + $0x4e8] sm:$0xff]   ;;  %v15576_v43 = vld [vmem:[#allocation3 + $0xaa] sm:$0xff] }
 0xecd   : > { %29219 = vmatprep.mubr.msk.bf16.mxu1 %vm366_vm4, %v35865_v63  ;;  %v35937_v16 = vpack.c.bf16 %v15009_v35, %v15008_v19  ;;  %v15567_v23 = vld [vmem:[#allocation3 + $0x3a] sm:$0xff]  ;;  %v15569_v62 = vld [vmem:[#allocation3 + $0x52] sm:$0xff]  ;;  %v15573_v21 = vld [vmem:[#allocation3 + $0x82] sm:$0xff] }
 0xece   : > { %v35964_v57 = vpack.c.bf16 %v15569_v62, %v15568_v6  ;;  %v15572_v60 = vld [vmem:[#allocation3 + $0x7a] sm:$0xff]  ;;  %v15574_v61 = vld [vmem:[#allocation3 + $0x92] sm:$0xff]  ;;  %v15578_v13 = vld [vmem:[#allocation3 + $0xc2] sm:$0xff] }
 0xecf   : > { %v15069_v14 = vld [vmem:[#allocation3 + $0x169] sm:$0xff]  ;;  %v15575_v41 = vld [vmem:[#allocation3 + $0x9a] sm:$0xff]  ;;  %v35978_v18 = vpack.c.bf16 %v15573_v21, %v15572_v60  ;;  %v15577_v36 = vld [vmem:[#allocation3 + $0xb2] sm:$0xff] }
 0xed0   : > { %v15012_v17 = vld [vmem:[#allocation3 + $0x168] sm:$0xff]  ;;  %v35980_v49 = vpack.c.bf16 %v15575_v41, %v15574_v61  ;;  %v35986_v42 = vpack.c.bf16 %v15577_v36, %v15576_v43  ;;  %v15580_v4 = vld [vmem:[#allocation3 + $0xda] sm:$0xff]  ;;  %v15590_v48 = vld [vmem:[#allocation3 + $0x152] sm:$0xff] }
 0xed1   : > { %v15070_v15 = vld [vmem:[#allocation3 + $0x171] sm:$0xff]  ;;  %v15588_v6 = vld [vmem:[#allocation3 + $0x13a] sm:$0xff]  ;;  %v15589_v62 = vld [vmem:[#allocation3 + $0x142] sm:$0xff] }
 0xed2   : > { %v35871_v26 = vpack.c.bf16 %v15070_v15, %v15069_v14  ;;  %v15562_v14 = vld [vmem:[#allocation3 + $0x2] sm:$0xff]  ;;  %v15563_v15 = vld [vmem:[#allocation3 + $0xa] sm:$0xff]  ;;  %v15591_v56 = vld [vmem:[#allocation3 + $0x15a] sm:$0xff] }
 0xed3   : > { %v15594_v9 = vpack.c.bf16 %v15563_v15, %v15562_v14  ;;  %v15579_v35 = vld [vmem:[#allocation3 + $0xca] sm:$0xff]  ;;  %v15581_v14 = vld [vmem:[#allocation3 + $0xe2] sm:$0xff]  ;;  %v15582_v15 = vld [vmem:[#allocation3 + $0xf2] sm:$0xff]  ;;  %v36012_v60 = vpack.c.bf16 %v15591_v56, %v15590_v48 }
 0xed4   : > { %29220 = vmatmul.mubr.msk.bf16.gmra.mrb[92].mxu1 %vm366_vm4, %v35871_v26  ;;  %v35988_v19 = vpack.c.bf16 %v15579_v35, %v15578_v13  ;;  %v15592_v21 = vld [vmem:[#allocation3 + $0x16a] sm:$0xff]  ;;  %v15593_v61 = vld [vmem:[#allocation3 + $0x172] sm:$0xff]  ;;  %v32491_v36 = vld [vmem:[%s37581_s3 + $0x510] sm:$0xff]  }
 0xed5   : > { %29231 = vmatprep.mubr.msk.bf16.mxu1 %vm366_vm4, %v15014_v28  ;;  %v15013_v28 = vld [vmem:[#allocation3 + $0x170] sm:$0xff]  ;;  %v36018_v41 = vpack.c.bf16 %v15593_v61, %v15592_v21  ;;  %v32490_v43 = vld [vmem:[%s37581_s3 + $0x508] sm:$0xff]   ;;  %v15915_v13 = vld [vmem:[#allocation3 + $0x188] sm:$0xff] }
 0xed6   : > { %v35945_v59 = vpack.c.bf16 %v15013_v28, %v15012_v17  ;;  %v15583_v28 = vld [vmem:[#allocation3 + $0xfa] sm:$0xff]  ;;  %v35994_v17 = vpack.c.bf16 %v15581_v14, %v15580_v4  ;;  %v17180_v48 = vld [vmem:[#allocation3 + $0x91] sm:$0xff]  ;;  %v32508_v56 = vld [vmem:[%s37581_s3 + $0x598] sm:$0xff]  }
 0xed7   : > { %v15914_v35 = vld [vmem:[#allocation3 + $0x180] sm:$0xff]  ;;  %v32494_v14 = vld [vmem:[%s37581_s3 + $0x528] sm:$0xff]  }
 0xed8   : > { %v36064_v4 = vpack.c.bf16 %v15915_v13, %v15914_v35  ;;  %v17183_v61 = vld [vmem:[#allocation3 + $0xb1] sm:$0xff]  ;;  %v17187_v35 = vld [vmem:[#allocation3 + $0xe1] sm:$0xff] }
 0xedc   : > { %29232 = vmatmul.mubr.msk.bf16.vlgmr.msra.gmra.mrb[64].mxu1 %vm366_vm4, %v35876_v3 }
 0xedd   : > { %29264 = vmatpush3.bf16.msra.mxu1 %v35792_v8  ;;  %29235 = vmatprep.mubr.msk.bf16.mxu1 %vm366_vm4, %v35881_v45  ;;  %v32484_v8 = vld [vmem:[%s37581_s3 + $0x4d8] sm:$0xff]  }
 0xede   : > { %29265 = vmatprep.subr.bf16.mxu1 %v32482_v20 }
 0xee1   : > { %29266 = vmatpush3.bf16.msra.mxu1 %v32482_v20  ;;  %v15565_v20 = vld [vmem:[#allocation3 + $0x22] sm:$0xff] }
 0xee2   : > { %29267 = vmatprep.subr.bf16.mxu1 %v32483_v32  ;;  %v35950_v22 = vpack.c.bf16 %v15565_v20, %v15564_v12  ;;  %v15584_v12 = vld [vmem:[#allocation3 + $0x10a] sm:$0xff]  ;;  %v15585_v20 = vld [vmem:[#allocation3 + $0x112] sm:$0xff] }
 0xee4   : > { %29236 = vmatmul.mubr.msk.bf16.gmra.mrb[68].mxu1 %vm366_vm4, %v35891_v24 }
 0xee5   : > { %29239 = vmatprep.mubr.msk.bf16.mxu1 %vm366_vm4, %v35896_v50  ;;  %29268 = vmatpush3.bf16.msra.mxu1 %v32483_v32  ;;  %v15566_v32 = vld [vmem:[#allocation3 + $0x32] sm:$0xff] }
 0xee6   : > { %29269 = vmatprep.subr.bf16.mxu1 %v32484_v8  ;;  %v35955_v37 = vpack.c.bf16 %v15567_v23, %v15566_v32  ;;  %v15586_v32 = vld [vmem:[#allocation3 + $0x122] sm:$0xff]  ;;  %v15587_v23 = vld [vmem:[#allocation3 + $0x12a] sm:$0xff] }
 0xee9   : > { %29270 = vmatpush3.bf16.msra.mxu1 %v32484_v8  ;;  %v32487_v8 = vld [vmem:[%s37581_s3 + $0x4f0] sm:$0xff]  }
 0xeea   : > { %29303 = vmatprep.subr.bf16.mxu1 %v32485_v1 }
 0xeec   : > { %29240 = vmatmul.mubr.msk.bf16.gmra.mrb[72].mxu1 %vm366_vm4, %v35905_v55 }
 0xeed   : > { %29243 = vmatprep.mubr.msk.bf16.mxu1 %vm366_vm4, %v35907_v5 }
 0xef4   : > { %29244 = vmatmul.mubr.msk.bf16.gmra.mrb[76].mxu1 %vm366_vm4, %v35913_v53 }
 0xef5   : > { %29247 = vmatprep.mubr.msk.bf16.mxu1 %vm366_vm4, %v35915_v54 }
 0xefc   : > { %29248 = vmatmul.mubr.msk.bf16.gmra.mrb[80].mxu1 %vm366_vm4, %v35921_v51 }
 0xefd   : > { %29251 = vmatprep.mubr.msk.bf16.mxu1 %vm366_vm4, %v35923_v10 }
 0xf04   : > { %29252 = vmatmul.mubr.msk.bf16.gmra.mrb[84].mxu1 %vm366_vm4, %v35929_v38 }
 0xf05   : > { %29255 = vmatprep.mubr.msk.bf16.mxu1 %vm366_vm4, %v35931_v46 }
 0xf0c   : > { %29256 = vmatmul.mubr.msk.bf16.gmra.mrb[88].mxu1 %vm366_vm4, %v35937_v16 }
 0xf0d   : > { %29259 = vmatprep.mubr.msk.bf16.mxu1 %vm366_vm4, %v35939_v30 }
 0xf14   : > { %29260 = vmatmul.mubr.msk.bf16.gmra.mrb[92].mxu1 %vm366_vm4, %v35945_v59 }
 0xf15   : > { %29271 = vmatprep.mubr.msk.bf16.mxu1 %vm366_vm4, %v15594_v9  ;;  %v35996_v9 = vpack.c.bf16 %v15583_v28, %v15582_v15  ;;  %v32495_v15 = vld [vmem:[%s37581_s3 + $0x530] sm:$0xff]   ;;  %v32506_v28 = vld [vmem:[%s37581_s3 + $0x588] sm:$0xff]  }
 0xf1c   : > { %29272 = vmatmul.mubr.msk.bf16.vlgmr.msra.gmra.mrb[64].mxu1 %vm366_vm4, %v35950_v22 }
 0xf1d   : > { %29304 = vmatpush3.bf16.msra.mxu1 %v32485_v1  ;;  %29275 = vmatprep.mubr.msk.bf16.mxu1 %vm366_vm4, %v35955_v37  ;;  %v32488_v1 = vld [vmem:[%s37581_s3 + $0x4f8] sm:$0xff]  }
 0xf1e   : > { %29305 = vmatprep.subr.bf16.mxu1 %v32486_v52 }
 0xf21   : > { %29306 = vmatpush3.bf16.msra.mxu1 %v32486_v52  ;;  %v36002_v52 = vpack.c.bf16 %v15585_v20, %v15584_v12  ;;  %v32507_v20 = vld [vmem:[%s37581_s3 + $0x590] sm:$0xff]  }
 0xf22   : > { %29307 = vmatprep.subr.bf16.mxu1 %v32487_v8 }
 0xf24   : > { %29276 = vmatmul.mubr.msk.bf16.gmra.mrb[68].mxu1 %vm366_vm4, %v35964_v57 }
 0xf25   : > { %29279 = vmatprep.mubr.msk.bf16.mxu1 %vm366_vm4, %v35969_v58  ;;  %29308 = vmatpush3.bf16.msra.mxu1 %v32487_v8  ;;  %v36004_v8 = vpack.c.bf16 %v15587_v23, %v15586_v32  ;;  %v17179_v32 = vld [vmem:[#allocation3 + $0x81] sm:$0xff]  ;;  %v17181_v23 = vld [vmem:[#allocation3 + $0x99] sm:$0xff] }
 0xf26   : > { %29309 = vmatprep.subr.bf16.mxu1 %v32488_v1  ;;  %v17208_v21 = vpack.c.bf16 %v17181_v23, %v17180_v48 }
 0xf29   : > { %29310 = vmatpush3.bf16.msra.mxu1 %v32488_v1  ;;  %v36010_v1 = vpack.c.bf16 %v15589_v62, %v15588_v6  ;;  %v17178_v6 = vld [vmem:[#allocation3 + $0x79] sm:$0xff] }
 0xf2a   : > { %29343 = vmatprep.subr.bf16.mxu1 %v32489_v40  ;;  %v17207_v62 = vpack.c.bf16 %v17179_v32, %v17178_v6 }
 0xf2c   : > { %29280 = vmatmul.mubr.msk.bf16.gmra.mrb[72].mxu1 %vm366_vm4, %v35978_v18 }
 0xf2d   : > { %29283 = vmatprep.mubr.msk.bf16.mxu1 %vm366_vm4, %v35980_v49 }
 0xf34   : > { %29284 = vmatmul.mubr.msk.bf16.gmra.mrb[76].mxu1 %vm366_vm4, %v35986_v42 }
 0xf35   : > { %29287 = vmatprep.mubr.msk.bf16.mxu1 %vm366_vm4, %v35988_v19 }
 0xf3c   : > { %29288 = vmatmul.mubr.msk.bf16.gmra.mrb[80].mxu1 %vm366_vm4, %v35994_v17 }
 0xf3d   : > { %29291 = vmatprep.mubr.msk.bf16.mxu1 %vm366_vm4, %v35996_v9 }
 0xf44   : > { %29292 = vmatmul.mubr.msk.bf16.gmra.mrb[84].mxu1 %vm366_vm4, %v36002_v52 }
 0xf45   : > { %29295 = vmatprep.mubr.msk.bf16.mxu1 %vm366_vm4, %v36004_v8 }
 0xf4c   : > { %29296 = vmatmul.mubr.msk.bf16.gmra.mrb[88].mxu1 %vm366_vm4, %v36010_v1 }
 0xf4d   : > { %29299 = vmatprep.mubr.msk.bf16.mxu1 %vm366_vm4, %v36012_v60 }
 0xf54   : > { %29300 = vmatmul.mubr.msk.bf16.gmra.mrb[92].mxu1 %vm366_vm4, %v36018_v41 }
 0xf55   : > { %29311 = vmatprep.mubr.msk.bf16.mxu1 %vm366_vm4, %v35876_v3  ;;  %v32492_v3 = vld [vmem:[%s37581_s3 + $0x518] sm:$0xff]  }
 0xf5c   : > { %29312 = vmatmul.mubr.msk.bf16.vlgmr.msra.gmra.mrb[64].mxu1 %vm366_vm4, %v35881_v45 }
 0xf5d   : > { %29344 = vmatpush3.bf16.msra.mxu1 %v32489_v40  ;;  %29315 = vmatprep.mubr.msk.bf16.mxu1 %vm366_vm4, %v35891_v24  ;;  %v32493_v40 = vld [vmem:[%s37581_s3 + $0x520] sm:$0xff]  }
 0xf5e   : > { %29345 = vmatprep.subr.bf16.mxu1 %v32490_v43 }
 0xf61   : > { %29346 = vmatpush3.bf16.msra.mxu1 %v32490_v43  ;;  %v17185_v43 = vld [vmem:[#allocation3 + $0xc9] sm:$0xff] }
 0xf62   : > { %29347 = vmatprep.subr.bf16.mxu1 %v32491_v36 }
 0xf64   : > { %29316 = vmatmul.mubr.msk.bf16.gmra.mrb[68].mxu1 %vm366_vm4, %v35896_v50 }
 0xf65   : > { %29319 = vmatprep.mubr.msk.bf16.mxu1 %vm366_vm4, %v35905_v55  ;;  %29348 = vmatpush3.bf16.msra.mxu1 %v32491_v36  ;;  %v17182_v36 = vld [vmem:[#allocation3 + $0xa9] sm:$0xff] }
 0xf66   : > { %29349 = vmatprep.subr.bf16.mxu1 %v32492_v3 }
 0xf69   : > { %29350 = vmatpush3.bf16.msra.mxu1 %v32492_v3  ;;  %v17209_v3 = vpack.c.bf16 %v17183_v61, %v17182_v36 }
 0xf6a   : > { %29383 = vmatprep.subr.bf16.mxu1 %v32493_v40 }
 0xf6c   : > { %29320 = vmatmul.mubr.msk.bf16.gmra.mrb[72].mxu1 %vm366_vm4, %v35907_v5 }
 0xf6d   : > { %29323 = vmatprep.mubr.msk.bf16.mxu1 %vm366_vm4, %v35913_v53 }
 0xf74   : > { %29324 = vmatmul.mubr.msk.bf16.gmra.mrb[76].mxu1 %vm366_vm4, %v35915_v54 }
 0xf75   : > { %29327 = vmatprep.mubr.msk.bf16.mxu1 %vm366_vm4, %v35921_v51 }
 0xf7c   : > { %29328 = vmatmul.mubr.msk.bf16.gmra.mrb[80].mxu1 %vm366_vm4, %v35923_v10 }
 0xf7d   : > { %29331 = vmatprep.mubr.msk.bf16.mxu1 %vm366_vm4, %v35929_v38 }
 0xf84   : > { %29332 = vmatmul.mubr.msk.bf16.gmra.mrb[84].mxu1 %vm366_vm4, %v35931_v46 }
 0xf85   : > { %29335 = vmatprep.mubr.msk.bf16.mxu1 %vm366_vm4, %v35937_v16 }
 0xf8c   : > { %29336 = vmatmul.mubr.msk.bf16.gmra.mrb[88].mxu1 %vm366_vm4, %v35939_v30 }
 0xf8d   : > { %29339 = vmatprep.mubr.msk.bf16.mxu1 %vm366_vm4, %v35945_v59 }
 0xf94   : > { %29340 = vmatmul.mubr.msk.bf16.gmra.mrb[92].mxu1 %vm366_vm4, %v36064_v4 }
 0xf95   : > { %29351 = vmatprep.mubr.msk.bf16.mxu1 %vm366_vm4, %v35752_v25  ;;  %v32496_v25 = vld [vmem:[%s37581_s3 + $0x538] sm:$0xff]  }
 0xf9c   : > { %29352 = vmatmul.mubr.msk.bf16.vlgmr.msra.gmra.mrb[64].mxu1 %vm366_vm4, %v35758_v39  ;;  %v32497_v39 = vld [vmem:[%s37581_s3 + $0x540] sm:$0xff]  }
 0xf9d   : > { %29384 = vmatpush3.bf16.msra.mxu1 %v32493_v40  ;;  %29355 = vmatprep.mubr.msk.bf16.mxu1 %vm366_vm4, %v35774_v44  ;;  %v16237_v44 = vld [vmem:[#allocation3 + $0x189] sm:$0xff]  ;;  %v17184_v40 = vld [vmem:[#allocation3 + $0xc1] sm:$0xff] }
 0xf9e   : > { %29385 = vmatprep.subr.bf16.mxu1 %v32494_v14  ;;  %v17210_v13 = vpack.c.bf16 %v17185_v43, %v17184_v40 }
 0xfa1   : > { %29386 = vmatpush3.bf16.msra.mxu1 %v32494_v14  ;;  %v17186_v14 = vld [vmem:[#allocation3 + $0xd9] sm:$0xff] }
 0xfa2   : > { %29387 = vmatprep.subr.bf16.mxu1 %v32495_v15 }
 0xfa4   : > { %29356 = vmatmul.mubr.msk.bf16.gmra.mrb[68].mxu1 %vm366_vm4, %v35780_v33  ;;  %v16236_v33 = vld [vmem:[#allocation3 + $0x181] sm:$0xff] }
 0xfa5   : > { %29359 = vmatprep.mubr.msk.bf16.mxu1 %vm366_vm4, %v35798_v2  ;;  %29388 = vmatpush3.bf16.msra.mxu1 %v32495_v15  ;;  %v36110_v2 = vpack.c.bf16 %v16237_v44, %v16236_v33  ;;  %v17211_v15 = vpack.c.bf16 %v17187_v35, %v17186_v14  ;;  %v17191_v44 = vld [vmem:[#allocation3 + $0x111] sm:$0xff]  ;;  %v17193_v33 = vld [vmem:[#allocation3 + $0x129] sm:$0xff] }
 0xfa6   : > { %29389 = vmatprep.subr.bf16.mxu1 %v32496_v25 }
 0xfa9   : > { %29390 = vmatpush3.bf16.msra.mxu1 %v32496_v25  ;;  %v17188_v25 = vld [vmem:[#allocation3 + $0xf1] sm:$0xff] }
 0xfaa   : > { %29423 = vmatprep.subr.bf16.mxu1 %v32497_v39 }
 0xfac   : > { %29360 = vmatmul.mubr.msk.bf16.gmra.mrb[72].mxu1 %vm366_vm4, %v35802_v47  ;;  %v32498_v47 = vld [vmem:[%s37581_s3 + $0x548] sm:$0xff]  }
 0xfad   : > { %29363 = vmatprep.mubr.msk.bf16.mxu1 %vm366_vm4, %v35815_v29  ;;  %v32499_v29 = vld [vmem:[%s37581_s3 + $0x550] sm:$0xff]  }
 0xfb4   : > { %29364 = vmatmul.mubr.msk.bf16.gmra.mrb[76].mxu1 %vm366_vm4, %v35818_v0  ;;  %v32500_v0 = vld [vmem:[%s37581_s3 + $0x558] sm:$0xff]  }
 0xfb5   : > { %29367 = vmatprep.mubr.msk.bf16.mxu1 %vm366_vm4, %v35831_v31  ;;  %v32501_v31 = vld [vmem:[%s37581_s3 + $0x560] sm:$0xff]  }
 0xfbc   : > { %29368 = vmatmul.mubr.msk.bf16.gmra.mrb[80].mxu1 %vm366_vm4, %v35834_v7  ;;  %v16558_v7 = vld [vmem:[#allocation3 + $0x182] sm:$0xff] }
 0xfbd   : > { %29371 = vmatprep.mubr.msk.bf16.mxu1 %vm366_vm4, %v35847_v34  ;;  %v16559_v34 = vld [vmem:[#allocation3 + $0x18a] sm:$0xff] }
 0xfc4   : > { %29372 = vmatmul.mubr.msk.bf16.gmra.mrb[84].mxu1 %vm366_vm4, %v35850_v27  ;;  %v36156_v27 = vpack.c.bf16 %v16559_v34, %v16558_v7  ;;  %v17195_v7 = vld [vmem:[#allocation3 + $0x141] sm:$0xff]  ;;  %v17197_v34 = vld [vmem:[#allocation3 + $0x159] sm:$0xff] }
 0xfc5   : > { %29375 = vmatprep.mubr.msk.bf16.mxu1 %vm366_vm4, %v35863_v11  ;;  %v32502_v11 = vld [vmem:[%s37581_s3 + $0x568] sm:$0xff]  }
 0xfcc   : > { %29376 = vmatmul.mubr.msk.bf16.gmra.mrb[88].mxu1 %vm366_vm4, %v35865_v63  ;;  %v32503_v63 = vld [vmem:[%s37581_s3 + $0x570] sm:$0xff]  }
 0xfcd   : > { %29379 = vmatprep.mubr.msk.bf16.mxu1 %vm366_vm4, %v35871_v26  ;;  %v32504_v26 = vld [vmem:[%s37581_s3 + $0x578] sm:$0xff]  }
 0xfd4   : > { %29380 = vmatmul.mubr.msk.bf16.gmra.mrb[92].mxu1 %vm366_vm4, %v36110_v2 }
 0xfd5   : > { %29391 = vmatprep.mubr.msk.bf16.mxu1 %vm366_vm4, %v35950_v22  ;;  %v17176_v22 = vld [vmem:[#allocation3 + $0x61] sm:$0xff] }
 0xfdc   : > { %29392 = vmatmul.mubr.msk.bf16.vlgmr.msra.gmra.mrb[64].mxu1 %vm366_vm4, %v35955_v37 }
 0xfdd   : > { %29424 = vmatpush3.bf16.msra.mxu1 %v32497_v39  ;;  %29395 = vmatprep.mubr.msk.bf16.mxu1 %vm366_vm4, %v35964_v57 }
 0xfde   : > { %29425 = vmatprep.subr.bf16.mxu1 %v32498_v47 }
 0xfe1   : > { %29426 = vmatpush3.bf16.msra.mxu1 %v32498_v47  ;;  %v17190_v47 = vld [vmem:[#allocation3 + $0x109] sm:$0xff] }
 0xfe2   : > { %29427 = vmatprep.subr.bf16.mxu1 %v32499_v29 }
 0xfe4   : > { %29396 = vmatmul.mubr.msk.bf16.gmra.mrb[68].mxu1 %vm366_vm4, %v35969_v58 }
 0xfe5   : > { %29399 = vmatprep.mubr.msk.bf16.mxu1 %vm366_vm4, %v35978_v18  ;;  %29428 = vmatpush3.bf16.msra.mxu1 %v32499_v29  ;;  %v17213_v29 = vpack.c.bf16 %v17191_v44, %v17190_v47 }
 0xfe6   : > { %29429 = vmatprep.subr.bf16.mxu1 %v32500_v0 }
 0xfe9   : > { %29430 = vmatpush3.bf16.msra.mxu1 %v32500_v0  ;;  %v17192_v0 = vld [vmem:[#allocation3 + $0x121] sm:$0xff] }
 0xfea   : > { %29463 = vmatprep.subr.bf16.mxu1 %v32501_v31 }
 0xfec   : > { %29400 = vmatmul.mubr.msk.bf16.gmra.mrb[72].mxu1 %vm366_vm4, %v35980_v49 }
 0xfed   : > { %29403 = vmatprep.mubr.msk.bf16.mxu1 %vm366_vm4, %v35986_v42 }
 0xff4   : > { %29404 = vmatmul.mubr.msk.bf16.gmra.mrb[76].mxu1 %vm366_vm4, %v35988_v19 }
 0xff5   : > { %29407 = vmatprep.mubr.msk.bf16.mxu1 %vm366_vm4, %v35994_v17 }
 0xffc   : > { %29408 = vmatmul.mubr.msk.bf16.gmra.mrb[80].mxu1 %vm366_vm4, %v35996_v9 }
 0xffd   : > { %29411 = vmatprep.mubr.msk.bf16.mxu1 %vm366_vm4, %v36002_v52 }
0x1004   : > { %29412 = vmatmul.mubr.msk.bf16.gmra.mrb[84].mxu1 %vm366_vm4, %v36004_v8 }
0x1005   : > { %29415 = vmatprep.mubr.msk.bf16.mxu1 %vm366_vm4, %v36010_v1 }
0x100c   : > { %29416 = vmatmul.mubr.msk.bf16.gmra.mrb[88].mxu1 %vm366_vm4, %v36012_v60 }
0x100d   : > { %29419 = vmatprep.mubr.msk.bf16.mxu1 %vm366_vm4, %v36018_v41 }
0x1014   : > { %29420 = vmatmul.mubr.msk.bf16.gmra.mrb[92].mxu1 %vm366_vm4, %v36156_v27 }
0x1015   : > { %29431 = vmatprep.mubr.msk.bf16.mxu1 %vm366_vm4, %v35881_v45  ;;  %v32505_v45 = vld [vmem:[%s37581_s3 + $0x580] sm:$0xff]  }
0x101c   : > { %29432 = vmatmul.mubr.msk.bf16.vlgmr.msra.gmra.mrb[64].mxu1 %vm366_vm4, %v35891_v24  ;;  %v16880_v24 = vld [vmem:[#allocation3 + $0x198] sm:$0xff] }
0x101d   : > { %29464 = vmatpush3.bf16.msra.mxu1 %v32501_v31  ;;  %29435 = vmatprep.mubr.msk.bf16.mxu1 %vm366_vm4, %v35896_v50  ;;  %v16881_v50 = vld [vmem:[#allocation3 + $0x1a0] sm:$0xff]  ;;  %v17214_v31 = vpack.c.bf16 %v17193_v33, %v17192_v0 }
0x101e   : > { %29465 = vmatprep.subr.bf16.mxu1 %v32502_v11  ;;  %v32515_v0 = vld [vmem:[%s37581_s3 + $0x5b0] sm:$0xff]  }
0x1021   : > { %29466 = vmatpush3.bf16.msra.mxu1 %v32502_v11  ;;  %v17194_v11 = vld [vmem:[#allocation3 + $0x139] sm:$0xff] }
0x1022   : > { %29467 = vmatprep.subr.bf16.mxu1 %v32503_v63 }
0x1024   : > { %29436 = vmatmul.mubr.msk.bf16.gmra.mrb[68].mxu1 %vm366_vm4, %v35905_v55  ;;  %v16897_v55 = vpack.c.bf16 %v16881_v50, %v16880_v24  ;;  %v17199_v24 = vld [vmem:[#allocation3 + $0x171] sm:$0xff]  ;;  %v17198_v50 = vld [vmem:[#allocation3 + $0x169] sm:$0xff] }
0x1025   : > { %29439 = vmatprep.mubr.msk.bf16.mxu1 %vm366_vm4, %v35907_v5  ;;  %29468 = vmatpush3.bf16.msra.mxu1 %v32503_v63  ;;  %v17173_v5 = vld [vmem:[#allocation3 + $0x39] sm:$0xff]  ;;  %v17215_v63 = vpack.c.bf16 %v17195_v7, %v17194_v11 }
0x1026   : > { %29469 = vmatprep.subr.bf16.mxu1 %v32504_v26 }
0x1029   : > { %29470 = vmatpush3.bf16.msra.mxu1 %v32504_v26  ;;  %v17196_v26 = vld [vmem:[#allocation3 + $0x151] sm:$0xff] }
0x102a   : > { %29503 = vmatprep.subr.bf16.mxu1 %v32505_v45 }
0x102c   : > { %29440 = vmatmul.mubr.msk.bf16.gmra.mrb[72].mxu1 %vm366_vm4, %v35913_v53  ;;  %v17172_v53 = vld [vmem:[#allocation3 + $0x31] sm:$0xff] }
0x102d   : > { %29443 = vmatprep.mubr.msk.bf16.mxu1 %vm366_vm4, %v35915_v54  ;;  %v17204_v54 = vpack.c.bf16 %v17173_v5, %v17172_v53  ;;  %v17202_v5 = vld [vmem:[#allocation3 + $0x199] sm:$0xff]  ;;  %v17203_v53 = vld [vmem:[#allocation3 + $0x1a1] sm:$0xff] }
0x1034   : > { %29444 = vmatmul.mubr.msk.bf16.gmra.mrb[76].mxu1 %vm366_vm4, %v35921_v51  ;;  %v32509_v51 = vld [vmem:[%s37581_s3 + $0x5c0] sm:$0xff]  }
0x1035   : > { %29447 = vmatprep.mubr.msk.bf16.mxu1 %vm366_vm4, %v35923_v10  ;;  %v32510_v10 = vld [vmem:[%s37581_s3 + $0x5c8] sm:$0xff]   ;;  %29543 = vmatprep.subr.bf16.mxu0 %v32509_v51 }
0x1036   : > { %29544 = vmatpush3.bf16.msra.mxu0 %v32509_v51 }
0x1037   : > { %29545 = vmatprep.subr.bf16.mxu0 %v32510_v10 }
0x103a   : > { %29546 = vmatpush3.bf16.msra.mxu0 %v32510_v10 }
0x103c   : > { %29448 = vmatmul.mubr.msk.bf16.gmra.mrb[80].mxu1 %vm366_vm4, %v35929_v38  ;;  %v17175_v38 = vld [vmem:[#allocation3 + $0x51] sm:$0xff] }
0x103d   : > { %29451 = vmatprep.mubr.msk.bf16.mxu1 %vm366_vm4, %v35931_v46  ;;  %v17177_v46 = vld [vmem:[#allocation3 + $0x69] sm:$0xff] }
0x103e   : > { %v17206_v12 = vpack.c.bf16 %v17177_v46, %v17176_v22 }
0x1044   : > { %29452 = vmatmul.mubr.msk.bf16.gmra.mrb[84].mxu1 %vm366_vm4, %v35937_v16  ;;  %v32511_v16 = vld [vmem:[%s37581_s3 + $0x5d0] sm:$0xff]  }
0x1045   : > { %29455 = vmatprep.mubr.msk.bf16.mxu1 %vm366_vm4, %v35939_v30  ;;  %v17174_v30 = vld [vmem:[#allocation3 + $0x49] sm:$0xff]  ;;  %29547 = vmatprep.subr.bf16.mxu0 %v32511_v16 }
0x1046   : > { %29548 = vmatpush3.bf16.msra.mxu0 %v32511_v16 }
0x104c   : > { %29456 = vmatmul.mubr.msk.bf16.gmra.mrb[88].mxu1 %vm366_vm4, %v35945_v59  ;;  %v17205_v59 = vpack.c.bf16 %v17175_v38, %v17174_v30 }
0x104d   : > { %29459 = vmatprep.mubr.msk.bf16.mxu1 %vm366_vm4, %v36064_v4  ;;  %v17189_v4 = vld [vmem:[#allocation3 + $0xf9] sm:$0xff] }
0x104e   : > { %v17212_v39 = vpack.c.bf16 %v17189_v4, %v17188_v25 }
0x1054   : > { %29460 = vmatmul.mubr.msk.bf16.gmra.mrb[92].mxu1 %vm366_vm4, %v16897_v55  ;;  %v17217_v55 = vpack.c.bf16 %v17199_v24, %v17198_v50  ;;  %v32516_v50 = vld [vmem:[%s37581_s3 + $0x5b8] sm:$0xff]  }
0x1055   : > { %29471 = vmatprep.mubr.msk.bf16.mxu1 %vm366_vm4, %v17204_v54  ;;  %v17219_v54 = vpack.c.bf16 %v17203_v53, %v17202_v5 }
0x105c   : > { %29472 = vmatmul.mubr.msk.bf16.vlgmr.msra.gmra.mrb[64].mxu1 %vm366_vm4, %v17205_v59 }
0x105d   : > { %29504 = vmatpush3.bf16.msra.mxu1 %v32505_v45  ;;  %29475 = vmatprep.mubr.msk.bf16.mxu1 %vm366_vm4, %v17206_v12  ;;  %v17216_v45 = vpack.c.bf16 %v17197_v34, %v17196_v26 }
0x105e   : > { %29505 = vmatprep.subr.bf16.mxu1 %v32506_v28 }
0x1061   : > { %29506 = vmatpush3.bf16.msra.mxu1 %v32506_v28 }
0x1062   : > { %29507 = vmatprep.subr.bf16.mxu1 %v32507_v20 }
0x1064   : > { %29476 = vmatmul.mubr.msk.bf16.gmra.mrb[68].mxu1 %vm366_vm4, %v17207_v62 }
0x1065   : > { %29479 = vmatprep.mubr.msk.bf16.mxu1 %vm366_vm4, %v17208_v21  ;;  %29508 = vmatpush3.bf16.msra.mxu1 %v32507_v20 }
0x1066   : > { %29509 = vmatprep.subr.bf16.mxu1 %v32508_v56 }
0x1069   : > { %29510 = vmatpush3.bf16.msra.mxu1 %v32508_v56 }
0x106c   : > { %29480 = vmatmul.mubr.msk.bf16.gmra.mrb[72].mxu1 %vm366_vm4, %v17209_v3 }
0x106d   : > { %29483 = vmatprep.mubr.msk.bf16.mxu1 %vm366_vm4, %v17210_v13  ;;  %v32514_v13 = vld [vmem:[%s37581_s3 + $0x5a8] sm:$0xff]  }
0x1074   : > { %29484 = vmatmul.mubr.msk.bf16.gmra.mrb[76].mxu1 %vm366_vm4, %v17211_v15 }
0x1075   : > { %29487 = vmatprep.mubr.msk.bf16.mxu1 %vm366_vm4, %v17212_v39 }
0x107c   : > { %29488 = vmatmul.mubr.msk.bf16.gmra.mrb[80].mxu1 %vm366_vm4, %v17213_v29 }
0x107d   : > { %29491 = vmatprep.mubr.msk.bf16.mxu1 %vm366_vm4, %v17214_v31 }
0x1084   : > { %29492 = vmatmul.mubr.msk.bf16.gmra.mrb[84].mxu1 %vm366_vm4, %v17215_v63 }
0x1085   : > { %29495 = vmatprep.mubr.msk.bf16.mxu1 %vm366_vm4, %v17216_v45 }
0x108c   : > { %29496 = vmatmul.mubr.msk.bf16.gmra.mrb[88].mxu1 %vm366_vm4, %v17217_v55 }
0x108d   : > { %29499 = vmatprep.mubr.msk.bf16.mxu1 %vm366_vm4, %v36110_v2 }
0x1094   : > { %29500 = vmatmul.mubr.msk.bf16.gmra.mrb[92].mxu1 %vm366_vm4, %v17219_v54 }
0x1095   : > { %29511 = vmatprep.mubr.msk.bf16.mxu1 %vm366_vm4, %v35955_v37  ;;  %v17524_v37 = vld [vmem:[#allocation3 + $0x19a] sm:$0xff] }
0x109c   : > { %29512 = vmatmul.mubr.msk.bf16.vlgmr.msra.gmra.mrb[64].mxu1 %vm366_vm4, %v35964_v57  ;;  %v17525_v57 = vld [vmem:[#allocation3 + $0x1a2] sm:$0xff] }
0x109d   : > { %29515 = vmatprep.mubr.msk.bf16.mxu1 %vm366_vm4, %v35969_v58  ;;  %v17541_v58 = vpack.c.bf16 %v17525_v57, %v17524_v37 }
0x10a4   : > { %29516 = vmatmul.mubr.msk.bf16.gmra.mrb[68].mxu1 %vm366_vm4, %v35978_v18  ;;  %v32512_v18 = vld [vmem:[%s37581_s3 + $0x5d8] sm:$0xff]  }
0x10a5   : > { %29519 = vmatprep.mubr.msk.bf16.mxu1 %vm366_vm4, %v35980_v49  ;;  %29549 = vmatprep.subr.bf16.mxu0 %v32512_v18  ;;  %v17974_v49 = vld [vmem:[#allocation4 + $0x1] sm:$0xff] }
0x10a6   : > { %29550 = vmatpush3.bf16.msra.mxu0 %v32512_v18 }
0x10ac   : > { %29520 = vmatmul.mubr.msk.bf16.gmra.mrb[72].mxu1 %vm366_vm4, %v35986_v42  ;;  %v17975_v42 = vld [vmem:[#allocation4 + $0x9] sm:$0xff] }
0x10ad   : > { %29523 = vmatprep.mubr.msk.bf16.mxu1 %vm366_vm4, %v35988_v19  ;;  %v18006_v19 = vpack.c.bf16 %v17975_v42, %v17974_v49 }
0x10af   : > { %29551 = vmatprep.mubr.msk.bf16.mxu0 %vm366_vm4, %v18006_v19  ;;  %v36337_v19 = vld [vmem:[%s37581_s3 + $0x5e0] sm:$0xff]  }
0x10b4   : > { %29524 = vmatmul.mubr.msk.bf16.gmra.mrb[76].mxu1 %vm366_vm4, %v35994_v17  ;;  %v32513_v17 = vld [vmem:[%s37581_s3 + $0x5a0] sm:$0xff]  }
0x10b5   : > { %29527 = vmatprep.mubr.msk.bf16.mxu1 %vm366_vm4, %v35996_v9  ;;  %29583 = vmatprep.subr.bf16.mxu0 %v32513_v17  ;;  %v36279_v9 = vld [vmem:[%s37582_s4 + $0x4] ss:$0 sm:$0xff] }
0x10bc   : > { %29528 = vmatmul.mubr.msk.bf16.gmra.mrb[80].mxu1 %vm366_vm4, %v36002_v52 }
0x10bd   : > { %29531 = vmatprep.mubr.msk.bf16.mxu1 %vm366_vm4, %v36004_v8 }
0x10c4   : > { %29532 = vmatmul.mubr.msk.bf16.gmra.mrb[84].mxu1 %vm366_vm4, %v36010_v1 }
0x10c5   : > { %29535 = vmatprep.mubr.msk.bf16.mxu1 %vm366_vm4, %v36012_v60 }
0x10cc   : > { %29536 = vmatmul.mubr.msk.bf16.gmra.mrb[88].mxu1 %vm366_vm4, %v36018_v41 }
0x10cd   : > { %29539 = vmatprep.mubr.msk.bf16.mxu1 %vm366_vm4, %v36156_v27 }
0x10d4   : > { %29540 = vmatmul.mubr.msk.bf16.gmra.mrb[92].mxu1 %vm366_vm4, %v17541_v58 }
0x116f   : > { %v29513_v52 = vpop.f32.mrb[64].mxu1 }
0x1170   : > { %v17822_v8 = vadd.f32 %v29513_v52, %v36279_v9  ;;  %v17657_v1 = vpop.f32.mrb[65].mxu1 }
0x1171   : > { %v17820_v60 = vadd.f32 %v36279_v9, %v17657_v1  ;;  %v29514_v41 = vpop.f32.mrb[66].mxu1 }
0x1172   : > { %v17854_v2 = vmax.f32 %v17822_v8, 0.0  ;;  %v17823_v27 = vadd.f32 %v29514_v41, %v36279_v9  ;;  %v17660_v51 = vpop.f32.mrb[67].mxu1 }
0x1173   : > { %v17852_v10 = vmax.f32 %v17820_v60, 0.0  ;;  %v17821_v38 = vadd.f32 %v36279_v9, %v17660_v51 }
0x1174   : > { %17886 = vst.msk [vmem:[#allocation4 + $0x31] sm:$0xff] %vm366_vm4, %v17854_v2  ;;  %v17855_v46 = vmax.f32 %v17823_v27, 0.0 }
0x1175   : > { %17884 = vst.msk [vmem:[#allocation4 + $0x19] sm:$0xff] %vm366_vm4, %v17852_v10  ;;  %v17853_v16 = vmax.f32 %v17821_v38, 0.0 }
0x1176   : > { %17887 = vst.msk [vmem:[#allocation4 + $0x39] sm:$0xff] %vm366_vm4, %v17855_v46 }
0x1177   : > { %17885 = vst.msk [vmem:[#allocation4 + $0x21] sm:$0xff] %vm366_vm4, %v17853_v16  ;;  %v29517_v30 = vpop.f32.mrb[68].mxu1 }
0x1178   : > { %v17826_v59 = vadd.f32 %v29517_v30, %v36279_v9  ;;  %v17673_v22 = vpop.f32.mrb[69].mxu1 }
0x1179   : > { %v17824_v28 = vadd.f32 %v36279_v9, %v17673_v22  ;;  %v29518_v12 = vpop.f32.mrb[70].mxu1 }
0x117a   : > { %v17858_v20 = vmax.f32 %v17826_v59, 0.0  ;;  %v17827_v32 = vadd.f32 %v29518_v12, %v36279_v9  ;;  %v17676_v23 = vpop.f32.mrb[71].mxu1 }
0x117b   : > { %v17856_v6 = vmax.f32 %v17824_v28, 0.0  ;;  %v17825_v62 = vadd.f32 %v36279_v9, %v17676_v23  ;;  %v17978_v40 = vld [vmem:[#allocation4 + $0x31] sm:$0xff] }
0x117c   : > { %17890 = vst.msk [vmem:[#allocation4 + $0x61] sm:$0xff] %vm366_vm4, %v17858_v20  ;;  %v17859_v48 = vmax.f32 %v17827_v32, 0.0  ;;  %v17976_v61 = vld [vmem:[#allocation4 + $0x19] sm:$0xff] }
0x117d   : > { %17888 = vst.msk [vmem:[#allocation4 + $0x49] sm:$0xff] %vm366_vm4, %v17856_v6  ;;  %v17857_v56 = vmax.f32 %v17825_v62, 0.0  ;;  %v17979_v21 = vld [vmem:[#allocation4 + $0x39] sm:$0xff] }
0x117e   : > { %17891 = vst.msk [vmem:[#allocation4 + $0x69] sm:$0xff] %vm366_vm4, %v17859_v48  ;;  %v17977_v43 = vld [vmem:[#allocation4 + $0x21] sm:$0xff]  ;;  %v36303_v14 = vpack.c.bf16 %v17979_v21, %v17978_v40 }
0x117f   : > { %17889 = vst.msk [vmem:[#allocation4 + $0x51] sm:$0xff] %vm366_vm4, %v17857_v56  ;;  %v29521_v36 = vpop.f32.mrb[72].mxu1  ;;  %v36297_v3 = vpack.c.bf16 %v17977_v43, %v17976_v61 }
0x1180   : > { %v17830_v35 = vadd.f32 %v29521_v36, %v36279_v9  ;;  %v17689_v4 = vpop.f32.mrb[73].mxu1 }
0x1181   : > { %v17828_v15 = vadd.f32 %v36279_v9, %v17689_v4  ;;  %v29522_v25 = vpop.f32.mrb[74].mxu1  ;;  %29552 = vmatmul.mubr.msk.bf16.vlgmr.msra.gmra.mrb[96].mxu0 %vm366_vm4, %v36297_v3 }
0x1182   : > { %v17862_v39 = vmax.f32 %v17830_v35, 0.0  ;;  %v17831_v44 = vadd.f32 %v29522_v25, %v36279_v9  ;;  %29584 = vmatpush3.bf16.msra.mxu0 %v32513_v17  ;;  %v17692_v33 = vpop.f32.mrb[75].mxu1  ;;  %29555 = vmatprep.mubr.msk.bf16.mxu0 %vm366_vm4, %v36303_v14 }
0x1183   : > { %v17860_v47 = vmax.f32 %v17828_v15, 0.0  ;;  %v17829_v29 = vadd.f32 %v36279_v9, %v17692_v33  ;;  %29585 = vmatprep.subr.bf16.mxu0 %v32514_v13  ;;  %v17982_v24 = vld [vmem:[#allocation4 + $0x61] sm:$0xff] }
0x1184   : > { %17894 = vst.msk [vmem:[#allocation4 + $0x91] sm:$0xff] %vm366_vm4, %v17862_v39  ;;  %v17863_v31 = vmax.f32 %v17831_v44, 0.0  ;;  %v17980_v11 = vld [vmem:[#allocation4 + $0x49] sm:$0xff] }
0x1185   : > { %17892 = vst.msk [vmem:[#allocation4 + $0x79] sm:$0xff] %vm366_vm4, %v17860_v47  ;;  %v17861_v7 = vmax.f32 %v17829_v29, 0.0  ;;  %v17983_v34 = vld [vmem:[#allocation4 + $0x69] sm:$0xff] }
0x1186   : > { %17895 = vst.msk [vmem:[#allocation4 + $0x99] sm:$0xff] %vm366_vm4, %v17863_v31  ;;  %v17981_v63 = vld [vmem:[#allocation4 + $0x51] sm:$0xff]  ;;  %29586 = vmatpush3.bf16.msra.mxu0 %v32514_v13  ;;  %v36325_v53 = vpack.c.bf16 %v17983_v34, %v17982_v24 }
0x1187   : > { %17893 = vst.msk [vmem:[#allocation4 + $0x81] sm:$0xff] %vm366_vm4, %v17861_v7  ;;  %v29525_v26 = vpop.f32.mrb[76].mxu1  ;;  %v36319_v45 = vpack.c.bf16 %v17981_v63, %v17980_v11  ;;  %29587 = vmatprep.subr.bf16.mxu0 %v32515_v0 }
0x1188   : > { %v17834_v55 = vadd.f32 %v29525_v26, %v36279_v9  ;;  %v17705_v5 = vpop.f32.mrb[77].mxu1 }
0x1189   : > { %v17832_v54 = vadd.f32 %v36279_v9, %v17705_v5  ;;  %v29526_v37 = vpop.f32.mrb[78].mxu1  ;;  %29556 = vmatmul.mubr.msk.bf16.gmra.mrb[100].mxu0 %vm366_vm4, %v36319_v45 }
0x118a   : > { %v17866_v57 = vmax.f32 %v17834_v55, 0.0  ;;  %v17835_v58 = vadd.f32 %v29526_v37, %v36279_v9  ;;  %v17708_v18 = vpop.f32.mrb[79].mxu1  ;;  %29559 = vmatprep.mubr.msk.bf16.mxu0 %vm366_vm4, %v36325_v53  ;;  %29588 = vmatpush3.bf16.msra.mxu0 %v32515_v0 }
0x118b   : > { %v17864_v49 = vmax.f32 %v17832_v54, 0.0  ;;  %v17833_v42 = vadd.f32 %v36279_v9, %v17708_v18  ;;  %29589 = vmatprep.subr.bf16.mxu0 %v32516_v50  ;;  %v17986_v27 = vld [vmem:[#allocation4 + $0x91] sm:$0xff] }
0x118c   : > { %17898 = vst.msk [vmem:[#allocation4 + $0xc1] sm:$0xff] %vm366_vm4, %v17866_v57  ;;  %v17867_v17 = vmax.f32 %v17835_v58, 0.0  ;;  %v17984_v1 = vld [vmem:[#allocation4 + $0x79] sm:$0xff] }
0x118d   : > { %17896 = vst.msk [vmem:[#allocation4 + $0xa9] sm:$0xff] %vm366_vm4, %v17864_v49  ;;  %v17865_v52 = vmax.f32 %v17833_v42, 0.0  ;;  %v17987_v8 = vld [vmem:[#allocation4 + $0x99] sm:$0xff] }
0x118e   : > { %17899 = vst.msk [vmem:[#allocation4 + $0xc9] sm:$0xff] %vm366_vm4, %v17867_v17  ;;  %v17985_v60 = vld [vmem:[#allocation4 + $0x81] sm:$0xff]  ;;  %29590 = vmatpush3.bf16.msra.mxu0 %v32516_v50  ;;  %v36347_v38 = vpack.c.bf16 %v17987_v8, %v17986_v27 }
0x118f   : > { %17897 = vst.msk [vmem:[#allocation4 + $0xb1] sm:$0xff] %vm366_vm4, %v17865_v52  ;;  %v29529_v41 = vpop.f32.mrb[80].mxu1  ;;  %v36343_v2 = vpack.c.bf16 %v17985_v60, %v17984_v1  ;;  %29623 = vmatprep.subr.bf16.mxu0 %v36337_v19 }
0x1190   : > { %v17838_v51 = vadd.f32 %v29529_v41, %v36279_v9  ;;  %v17721_v10 = vpop.f32.mrb[81].mxu1 }
0x1191   : > { %v17836_v46 = vadd.f32 %v36279_v9, %v17721_v10  ;;  %v29530_v16 = vpop.f32.mrb[82].mxu1  ;;  %29560 = vmatmul.mubr.msk.bf16.gmra.mrb[104].mxu0 %vm366_vm4, %v36343_v2 }
0x1192   : > { %v17870_v30 = vmax.f32 %v17838_v51, 0.0  ;;  %v17839_v59 = vadd.f32 %v29530_v16, %v36279_v9  ;;  %v17724_v22 = vpop.f32.mrb[83].mxu1  ;;  %29563 = vmatprep.mubr.msk.bf16.mxu0 %vm366_vm4, %v36347_v38 }
0x1193   : > { %v17868_v28 = vmax.f32 %v17836_v46, 0.0  ;;  %v17837_v12 = vadd.f32 %v36279_v9, %v17724_v22  ;;  %v17990_v21 = vld [vmem:[#allocation4 + $0xc1] sm:$0xff] }
0x1194   : > { %17902 = vst.msk [vmem:[#allocation4 + $0xf1] sm:$0xff] %vm366_vm4, %v17870_v30  ;;  %v17871_v20 = vmax.f32 %v17839_v59, 0.0  ;;  %v17988_v6 = vld [vmem:[#allocation4 + $0xa9] sm:$0xff] }
0x1195   : > { %17900 = vst.msk [vmem:[#allocation4 + $0xd9] sm:$0xff] %vm366_vm4, %v17868_v28  ;;  %v17869_v32 = vmax.f32 %v17837_v12, 0.0  ;;  %v17991_v23 = vld [vmem:[#allocation4 + $0xc9] sm:$0xff] }
0x1196   : > { %17903 = vst.msk [vmem:[#allocation4 + $0xf9] sm:$0xff] %vm366_vm4, %v17871_v20  ;;  %v17989_v62 = vld [vmem:[#allocation4 + $0xb1] sm:$0xff]  ;;  %v36363_v36 = vpack.c.bf16 %v17991_v23, %v17990_v21  ;;  %v17918_v21 = vld [vmem:[#allocation4 + $0x8] sm:$0xff] }
0x1197   : > { %17901 = vst.msk [vmem:[#allocation4 + $0xe1] sm:$0xff] %vm366_vm4, %v17869_v32  ;;  %v29533_v48 = vpop.f32.mrb[84].mxu1  ;;  %v36360_v56 = vpack.c.bf16 %v17989_v62, %v17988_v6 }
0x1198   : > { %v17842_v61 = vadd.f32 %v29533_v48, %v36279_v9  ;;  %v17737_v43 = vpop.f32.mrb[85].mxu1 }
0x1199   : > { %v17840_v40 = vadd.f32 %v36279_v9, %v17737_v43  ;;  %v29534_v13 = vpop.f32.mrb[86].mxu1  ;;  %29564 = vmatmul.mubr.msk.bf16.gmra.mrb[108].mxu0 %vm366_vm4, %v36360_v56 }
0x119a   : > { %v17874_v35 = vmax.f32 %v17842_v61, 0.0  ;;  %v17843_v4 = vadd.f32 %v29534_v13, %v36279_v9  ;;  %v17740_v15 = vpop.f32.mrb[87].mxu1  ;;  %29567 = vmatprep.mubr.msk.bf16.mxu0 %vm366_vm4, %v36363_v36 }
0x119b   : > { %v17872_v25 = vmax.f32 %v17840_v40, 0.0  ;;  %v17841_v39 = vadd.f32 %v36279_v9, %v17740_v15  ;;  %v17994_v34 = vld [vmem:[#allocation4 + $0xf1] sm:$0xff] }
0x119c   : > { %17906 = vst.msk [vmem:[#allocation4 + $0x121] sm:$0xff] %vm366_vm4, %v17874_v35  ;;  %v17875_v44 = vmax.f32 %v17843_v4, 0.0  ;;  %v17992_v29 = vld [vmem:[#allocation4 + $0xd9] sm:$0xff] }
0x119d   : > { %17904 = vst.msk [vmem:[#allocation4 + $0x109] sm:$0xff] %vm366_vm4, %v17872_v25  ;;  %v17873_v33 = vmax.f32 %v17841_v39, 0.0  ;;  %v17995_v47 = vld [vmem:[#allocation4 + $0xf9] sm:$0xff]  ;;  %v17921_v39 = vld [vmem:[#allocation4 + $0x30] sm:$0xff] }
0x119e   : > { %17907 = vst.msk [vmem:[#allocation4 + $0x129] sm:$0xff] %vm366_vm4, %v17875_v44  ;;  %v17993_v0 = vld [vmem:[#allocation4 + $0xe1] sm:$0xff]  ;;  %v36379_v26 = vpack.c.bf16 %v17995_v47, %v17994_v34  ;;  %v17922_v4 = vld [vmem:[#allocation4 + $0x38] sm:$0xff]  ;;  %v32519_v47 = vld [vmem:[%s37581_s3 + $0x5f0] sm:$0xff]  }
0x119f   : > { %17905 = vst.msk [vmem:[#allocation4 + $0x111] sm:$0xff] %vm366_vm4, %v17873_v33  ;;  %v29537_v31 = vpop.f32.mrb[88].mxu1  ;;  %v36376_v7 = vpack.c.bf16 %v17993_v0, %v17992_v29  ;;  %v17920_v35 = vld [vmem:[#allocation4 + $0x20] sm:$0xff]  ;;  %v17919_v15 = vld [vmem:[#allocation4 + $0x18] sm:$0xff]  ;;  %v32518_v44 = vld [vmem:[%s37581_s3 + $0x5e8] sm:$0xff]   ;;  %v36426_v33 = vpack.c.bf16 %v17922_v4, %v17921_v39 }
0x11a0   : > { %v17846_v11 = vadd.f32 %v29537_v31, %v36279_v9  ;;  %v17753_v63 = vpop.f32.mrb[89].mxu1  ;;  %v36421_v25 = vpack.c.bf16 %v17920_v35, %v17919_v15  ;;  %v17924_v29 = vld [vmem:[#allocation4 + $0x50] sm:$0xff]  ;;  %v17926_v0 = vld [vmem:[#allocation4 + $0x68] sm:$0xff]  ;;  %v18499_v39 = vld [vmem:[#allocation4 + $0x1a] sm:$0xff] }
0x11a1   : > { %v17844_v24 = vadd.f32 %v36279_v9, %v17753_v63  ;;  %v29538_v50 = vpop.f32.mrb[90].mxu1  ;;  %29568 = vmatmul.mubr.msk.bf16.gmra.mrb[112].mxu0 %vm366_vm4, %v36376_v7  ;;  %v17923_v31 = vld [vmem:[#allocation4 + $0x48] sm:$0xff] }
0x11a2   : > { %v17878_v55 = vmax.f32 %v17846_v11, 0.0  ;;  %v17847_v5 = vadd.f32 %v29538_v50, %v36279_v9  ;;  %v17756_v54 = vpop.f32.mrb[91].mxu1  ;;  %29571 = vmatprep.mubr.msk.bf16.mxu0 %vm366_vm4, %v36379_v26  ;;  %v36436_v34 = vpack.c.bf16 %v17924_v29, %v17923_v31  ;;  %v17925_v11 = vld [vmem:[#allocation4 + $0x60] sm:$0xff]  ;;  %v32522_v31 = vld [vmem:[%s37581_s3 + $0x608] sm:$0xff]  }
0x11a3   : > { %v17876_v37 = vmax.f32 %v17844_v24, 0.0  ;;  %v17845_v57 = vadd.f32 %v36279_v9, %v17756_v54  ;;  %v17998_v1 = vld [vmem:[#allocation4 + $0x121] sm:$0xff]  ;;  %v36441_v63 = vpack.c.bf16 %v17926_v0, %v17925_v11 }
0x11a4   : > { %17910 = vst.msk [vmem:[#allocation4 + $0x151] sm:$0xff] %vm366_vm4, %v17878_v55  ;;  %v17879_v58 = vmax.f32 %v17847_v5, 0.0  ;;  %v17996_v42 = vld [vmem:[#allocation4 + $0x109] sm:$0xff]  ;;  %v32521_v24 = vld [vmem:[%s37581_s3 + $0x600] sm:$0xff]   ;;  %v17930_v55 = vld [vmem:[#allocation4 + $0x98] sm:$0xff] }
0x11a5   : > { %17908 = vst.msk [vmem:[#allocation4 + $0x139] sm:$0xff] %vm366_vm4, %v17876_v37  ;;  %v17877_v18 = vmax.f32 %v17845_v57, 0.0  ;;  %v17999_v49 = vld [vmem:[#allocation4 + $0x129] sm:$0xff]  ;;  %v17928_v50 = vld [vmem:[#allocation4 + $0x80] sm:$0xff]  ;;  %v17927_v5 = vld [vmem:[#allocation4 + $0x78] sm:$0xff] }
0x11a6   : > { %17911 = vst.msk [vmem:[#allocation4 + $0x159] sm:$0xff] %vm366_vm4, %v17879_v58  ;;  %v17997_v17 = vld [vmem:[#allocation4 + $0x111] sm:$0xff]  ;;  %v36395_v27 = vpack.c.bf16 %v17999_v49, %v17998_v1  ;;  %v36450_v54 = vpack.c.bf16 %v17928_v50, %v17927_v5  ;;  %v17931_v49 = vld [vmem:[#allocation4 + $0xa8] sm:$0xff]  ;;  %v17936_v1 = vld [vmem:[#allocation4 + $0xe0] sm:$0xff] }
0x11a7   : > { %17909 = vst.msk [vmem:[#allocation4 + $0x141] sm:$0xff] %vm366_vm4, %v17877_v18  ;;  %v29541_v52 = vpop.f32.mrb[92].mxu1  ;;  %v36392_v8 = vpack.c.bf16 %v17997_v17, %v17996_v42  ;;  %v17929_v37 = vld [vmem:[#allocation4 + $0x90] sm:$0xff]  ;;  %v17934_v18 = vld [vmem:[#allocation4 + $0xc8] sm:$0xff]  ;;  %v17933_v17 = vld [vmem:[#allocation4 + $0xc0] sm:$0xff] }
0x11a8   : > { %v17850_v60 = vadd.f32 %v29541_v52, %v36279_v9  ;;  %v17769_v41 = vpop.f32.mrb[93].mxu1  ;;  %v36452_v57 = vpack.c.bf16 %v17930_v55, %v17929_v37  ;;  %v17932_v58 = vld [vmem:[#allocation4 + $0xb0] sm:$0xff]  ;;  %v36460_v52 = vpack.c.bf16 %v17934_v18, %v17933_v17  ;;  %v18502_v29 = vld [vmem:[#allocation4 + $0x3a] sm:$0xff]  ;;  %v18505_v5 = vld [vmem:[#allocation4 + $0x62] sm:$0xff] }
0x11a9   : > { %v17848_v51 = vadd.f32 %v36279_v9, %v17769_v41  ;;  %v29542_v10 = vpop.f32.mrb[94].mxu1  ;;  %29572 = vmatmul.mubr.msk.bf16.gmra.mrb[116].mxu0 %vm366_vm4, %v36392_v8  ;;  %v36458_v42 = vpack.c.bf16 %v17932_v58, %v17931_v49  ;;  %v17935_v41 = vld [vmem:[#allocation4 + $0xd8] sm:$0xff]  ;;  %v18503_v50 = vld [vmem:[#allocation4 + $0x4a] sm:$0xff]  ;;  %v32525_v49 = vld [vmem:[%s37581_s3 + $0x620] sm:$0xff]  }
0x11aa   : > { %v17882_v46 = vmax.f32 %v17850_v60, 0.0  ;;  %v17851_v16 = vadd.f32 %v29542_v10, %v36279_v9  ;;  %v17772_v30 = vpop.f32.mrb[95].mxu1  ;;  %29575 = vmatprep.mubr.msk.bf16.mxu0 %vm366_vm4, %v36395_v27  ;;  %v17938_v60 = vld [vmem:[#allocation4 + $0xf8] sm:$0xff]  ;;  %v17937_v10 = vld [vmem:[#allocation4 + $0xf0] sm:$0xff] }
0x11ab   : > { %v17880_v59 = vmax.f32 %v17848_v51, 0.0  ;;  %v17849_v22 = vadd.f32 %v36279_v9, %v17772_v30  ;;  %v18002_v62 = vld [vmem:[#allocation4 + $0x151] sm:$0xff]  ;;  %v17917_v9 = vld [vmem:[#allocation4] sm:$0xff]  ;;  %v36466_v51 = vpack.c.bf16 %v17936_v1, %v17935_v41  ;;  %v17942_v30 = vld [vmem:[#allocation4 + $0x128] sm:$0xff] }
0x11ac   : > { %17914 = vst.msk [vmem:[#allocation4 + $0x181] sm:$0xff] %vm366_vm4, %v17882_v46  ;;  %v17883_v28 = vmax.f32 %v17851_v16, 0.0  ;;  %v18000_v32 = vld [vmem:[#allocation4 + $0x139] sm:$0xff]  ;;  %v17949_v40 = vpack.c.bf16 %v17918_v21, %v17917_v9  ;;  %v36468_v46 = vpack.c.bf16 %v17938_v60, %v17937_v10  ;;  %v17940_v16 = vld [vmem:[#allocation4 + $0x110] sm:$0xff]  ;;  %v18508_v1 = vld [vmem:[#allocation4 + $0x82] sm:$0xff] }
0x11ad   : > { %17912 = vst.msk [vmem:[#allocation4 + $0x169] sm:$0xff] %vm366_vm4, %v17880_v59  ;;  %v17881_v12 = vmax.f32 %v17849_v22, 0.0  ;;  %v18003_v20 = vld [vmem:[#allocation4 + $0x159] sm:$0xff]  ;;  %v17939_v59 = vld [vmem:[#allocation4 + $0x108] sm:$0xff]  ;;  %v17945_v9 = vld [vmem:[#allocation4 + $0x150] sm:$0xff] }
0x11ae   : > { %17915 = vst.msk [vmem:[#allocation4 + $0x189] sm:$0xff] %vm366_vm4, %v17883_v28  ;;  %v18001_v23 = vld [vmem:[#allocation4 + $0x141] sm:$0xff]  ;;  %v36410_v48 = vpack.c.bf16 %v18003_v20, %v18002_v62  ;;  %v36474_v22 = vpack.c.bf16 %v17940_v16, %v17939_v59  ;;  %v18504_v55 = vld [vmem:[#allocation4 + $0x52] sm:$0xff]  ;;  %v18506_v37 = vld [vmem:[#allocation4 + $0x6a] sm:$0xff] }
0x11af   : > { %17913 = vst.msk [vmem:[#allocation4 + $0x171] sm:$0xff] %vm366_vm4, %v17881_v12  ;;  %v36408_v6 = vpack.c.bf16 %v18001_v23, %v18000_v32  ;;  %v17941_v28 = vld [vmem:[#allocation4 + $0x120] sm:$0xff]  ;;  %v17946_v32 = vld [vmem:[#allocation4 + $0x158] sm:$0xff]  ;;  %v36509_v58 = vpack.c.bf16 %v18504_v55, %v18503_v50  ;;  %v36514_v18 = vpack.c.bf16 %v18506_v37, %v18505_v5 }
0x11b0   : > { %v36476_v12 = vpack.c.bf16 %v17942_v30, %v17941_v28  ;;  %v17944_v20 = vld [vmem:[#allocation4 + $0x140] sm:$0xff]  ;;  %v17943_v23 = vld [vmem:[#allocation4 + $0x138] sm:$0xff]  ;;  %v36484_v21 = vpack.c.bf16 %v17946_v32, %v17945_v9  ;;  %v18511_v30 = vld [vmem:[#allocation4 + $0xaa] sm:$0xff] }
0x11b1   : > { %29576 = vmatmul.mubr.msk.bf16.gmra.mrb[120].mxu0 %vm366_vm4, %v36408_v6  ;;  %v36482_v62 = vpack.c.bf16 %v17944_v20, %v17943_v23  ;;  %v18507_v17 = vld [vmem:[#allocation4 + $0x7a] sm:$0xff]  ;;  %v18509_v60 = vld [vmem:[#allocation4 + $0x92] sm:$0xff]  ;;  %v18513_v28 = vld [vmem:[#allocation4 + $0xc2] sm:$0xff] }
0x11b2   : > { %29579 = vmatprep.mubr.msk.bf16.mxu0 %vm366_vm4, %v36410_v48  ;;  %v18510_v41 = vld [vmem:[#allocation4 + $0x9a] sm:$0xff]  ;;  %v36523_v10 = vpack.c.bf16 %v18508_v1, %v18507_v17  ;;  %v18512_v59 = vld [vmem:[#allocation4 + $0xb2] sm:$0xff]  ;;  %v18514_v20 = vld [vmem:[#allocation4 + $0xca] sm:$0xff] }
0x11b3   : > { %v36525_v16 = vpack.c.bf16 %v18510_v41, %v18509_v60  ;;  %v36531_v32 = vpack.c.bf16 %v18512_v59, %v18511_v30  ;;  %v36533_v23 = vpack.c.bf16 %v18514_v20, %v18513_v28  ;;  %v18515_v9 = vld [vmem:[#allocation4 + $0xda] sm:$0xff]  ;;  %v18524_v55 = vld [vmem:[#allocation4 + $0x142] sm:$0xff]  ;;  %v18525_v5 = vld [vmem:[#allocation4 + $0x152] sm:$0xff] }
0x11b4   : > { %v18004_v61 = vld [vmem:[#allocation4 + $0x169] sm:$0xff]  ;;  %v18523_v50 = vld [vmem:[#allocation4 + $0x13a] sm:$0xff] }
0x11b5   : > { %v17947_v35 = vld [vmem:[#allocation4 + $0x168] sm:$0xff]  ;;  %v18526_v37 = vld [vmem:[#allocation4 + $0x15a] sm:$0xff]  ;;  %v32527_v59 = vld [vmem:[%s37581_s3 + $0x630] sm:$0xff]  }
0x11b6   : > { %v18005_v43 = vld [vmem:[#allocation4 + $0x171] sm:$0xff]  ;;  %v36557_v17 = vpack.c.bf16 %v18526_v37, %v18525_v5  ;;  %v32526_v30 = vld [vmem:[%s37581_s3 + $0x628] sm:$0xff]   ;;  %v18849_v20 = vld [vmem:[#allocation4 + $0x180] sm:$0xff] }
0x11b7   : > { %v36416_v13 = vpack.c.bf16 %v18005_v43, %v18004_v61  ;;  %v18497_v61 = vld [vmem:[#allocation4 + $0x2] sm:$0xff]  ;;  %v18498_v43 = vld [vmem:[#allocation4 + $0xa] sm:$0xff]  ;;  %v18528_v60 = vld [vmem:[#allocation4 + $0x172] sm:$0xff] }
0x11b8   : > { %v18529_v4 = vpack.c.bf16 %v18498_v43, %v18497_v61  ;;  %v18516_v61 = vld [vmem:[#allocation4 + $0xe2] sm:$0xff]  ;;  %v18517_v43 = vld [vmem:[#allocation4 + $0xf2] sm:$0xff]  ;;  %v18527_v1 = vld [vmem:[#allocation4 + $0x16a] sm:$0xff] }
0x11b9   : > { %29580 = vmatmul.mubr.msk.bf16.gmra.mrb[124].mxu0 %vm366_vm4, %v36416_v13  ;;  %v36563_v41 = vpack.c.bf16 %v18528_v60, %v18527_v1  ;;  %v18850_v28 = vld [vmem:[#allocation4 + $0x188] sm:$0xff]  ;;  %v20115_v5 = vld [vmem:[#allocation4 + $0x91] sm:$0xff] }
0x11ba   : > { %29591 = vmatprep.mubr.msk.bf16.mxu0 %vm366_vm4, %v17949_v40  ;;  %v17948_v40 = vld [vmem:[#allocation4 + $0x170] sm:$0xff]  ;;  %v32544_v37 = vld [vmem:[%s37581_s3 + $0x6b8] sm:$0xff]  }
0x11bb   : > { %v36490_v15 = vpack.c.bf16 %v17948_v40, %v17947_v35  ;;  %v18518_v40 = vld [vmem:[#allocation4 + $0xfa] sm:$0xff]  ;;  %v36539_v35 = vpack.c.bf16 %v18516_v61, %v18515_v9  ;;  %v36609_v9 = vpack.c.bf16 %v18850_v28, %v18849_v20  ;;  %v32530_v61 = vld [vmem:[%s37581_s3 + $0x648] sm:$0xff]   ;;  %v20118_v60 = vld [vmem:[#allocation4 + $0xb1] sm:$0xff] }
0x11bc   : > { %v20122_v20 = vld [vmem:[#allocation4 + $0xe1] sm:$0xff] }
0x11c1   : > { %29592 = vmatmul.mubr.msk.bf16.vlgmr.msra.gmra.mrb[96].mxu0 %vm366_vm4, %v36421_v25 }
0x11c2   : > { %29624 = vmatpush3.bf16.msra.mxu0 %v36337_v19  ;;  %29595 = vmatprep.mubr.msk.bf16.mxu0 %vm366_vm4, %v36426_v33  ;;  %v32520_v19 = vld [vmem:[%s37581_s3 + $0x5f8] sm:$0xff]  }
0x11c3   : > { %29625 = vmatprep.subr.bf16.mxu0 %v32518_v44 }
0x11c6   : > { %29626 = vmatpush3.bf16.msra.mxu0 %v32518_v44  ;;  %v18500_v44 = vld [vmem:[#allocation4 + $0x22] sm:$0xff] }
0x11c7   : > { %29627 = vmatprep.subr.bf16.mxu0 %v32519_v47  ;;  %v36495_v0 = vpack.c.bf16 %v18500_v44, %v18499_v39  ;;  %v18519_v39 = vld [vmem:[#allocation4 + $0x10a] sm:$0xff]  ;;  %v18520_v44 = vld [vmem:[#allocation4 + $0x112] sm:$0xff] }
0x11c9   : > { %29596 = vmatmul.mubr.msk.bf16.gmra.mrb[100].mxu0 %vm366_vm4, %v36436_v34 }
0x11ca   : > { %29599 = vmatprep.mubr.msk.bf16.mxu0 %vm366_vm4, %v36441_v63  ;;  %29628 = vmatpush3.bf16.msra.mxu0 %v32519_v47  ;;  %v18501_v47 = vld [vmem:[#allocation4 + $0x32] sm:$0xff] }
0x11cb   : > { %29629 = vmatprep.subr.bf16.mxu0 %v32520_v19  ;;  %v36500_v11 = vpack.c.bf16 %v18502_v29, %v18501_v47  ;;  %v18521_v47 = vld [vmem:[#allocation4 + $0x122] sm:$0xff]  ;;  %v18522_v29 = vld [vmem:[#allocation4 + $0x12a] sm:$0xff] }
0x11ce   : > { %29630 = vmatpush3.bf16.msra.mxu0 %v32520_v19  ;;  %v32523_v19 = vld [vmem:[%s37581_s3 + $0x610] sm:$0xff]  }
0x11cf   : > { %29663 = vmatprep.subr.bf16.mxu0 %v32521_v24 }
0x11d1   : > { %29600 = vmatmul.mubr.msk.bf16.gmra.mrb[104].mxu0 %vm366_vm4, %v36450_v54 }
0x11d2   : > { %29603 = vmatprep.mubr.msk.bf16.mxu0 %vm366_vm4, %v36452_v57 }
0x11d9   : > { %29604 = vmatmul.mubr.msk.bf16.gmra.mrb[108].mxu0 %vm366_vm4, %v36458_v42 }
0x11da   : > { %29607 = vmatprep.mubr.msk.bf16.mxu0 %vm366_vm4, %v36460_v52 }
0x11e1   : > { %29608 = vmatmul.mubr.msk.bf16.gmra.mrb[112].mxu0 %vm366_vm4, %v36466_v51 }
0x11e2   : > { %29611 = vmatprep.mubr.msk.bf16.mxu0 %vm366_vm4, %v36468_v46 }
0x11e9   : > { %29612 = vmatmul.mubr.msk.bf16.gmra.mrb[116].mxu0 %vm366_vm4, %v36474_v22 }
0x11ea   : > { %29615 = vmatprep.mubr.msk.bf16.mxu0 %vm366_vm4, %v36476_v12 }
0x11f1   : > { %29616 = vmatmul.mubr.msk.bf16.gmra.mrb[120].mxu0 %vm366_vm4, %v36482_v62 }
0x11f2   : > { %29619 = vmatprep.mubr.msk.bf16.mxu0 %vm366_vm4, %v36484_v21 }
0x11f9   : > { %29620 = vmatmul.mubr.msk.bf16.gmra.mrb[124].mxu0 %vm366_vm4, %v36490_v15 }
0x11fa   : > { %29631 = vmatprep.mubr.msk.bf16.mxu0 %vm366_vm4, %v18529_v4  ;;  %v36541_v4 = vpack.c.bf16 %v18518_v40, %v18517_v43  ;;  %v32531_v43 = vld [vmem:[%s37581_s3 + $0x650] sm:$0xff]   ;;  %v32542_v40 = vld [vmem:[%s37581_s3 + $0x6a8] sm:$0xff]  }
0x1201   : > { %29632 = vmatmul.mubr.msk.bf16.vlgmr.msra.gmra.mrb[96].mxu0 %vm366_vm4, %v36495_v0 }
0x1202   : > { %29664 = vmatpush3.bf16.msra.mxu0 %v32521_v24  ;;  %29635 = vmatprep.mubr.msk.bf16.mxu0 %vm366_vm4, %v36500_v11  ;;  %v32524_v24 = vld [vmem:[%s37581_s3 + $0x618] sm:$0xff]  }
0x1203   : > { %29665 = vmatprep.subr.bf16.mxu0 %v32522_v31 }
0x1206   : > { %29666 = vmatpush3.bf16.msra.mxu0 %v32522_v31  ;;  %v36547_v31 = vpack.c.bf16 %v18520_v44, %v18519_v39  ;;  %v32543_v44 = vld [vmem:[%s37581_s3 + $0x6b0] sm:$0xff]  }
0x1207   : > { %29667 = vmatprep.subr.bf16.mxu0 %v32523_v19 }
0x1209   : > { %29636 = vmatmul.mubr.msk.bf16.gmra.mrb[100].mxu0 %vm366_vm4, %v36509_v58 }
0x120a   : > { %29639 = vmatprep.mubr.msk.bf16.mxu0 %vm366_vm4, %v36514_v18  ;;  %29668 = vmatpush3.bf16.msra.mxu0 %v32523_v19  ;;  %v36549_v19 = vpack.c.bf16 %v18522_v29, %v18521_v47  ;;  %v20114_v47 = vld [vmem:[#allocation4 + $0x81] sm:$0xff]  ;;  %v20116_v29 = vld [vmem:[#allocation4 + $0x99] sm:$0xff] }
0x120b   : > { %29669 = vmatprep.subr.bf16.mxu0 %v32524_v24  ;;  %v20143_v1 = vpack.c.bf16 %v20116_v29, %v20115_v5  ;;  %v20793_v29 = vld [vmem:[#allocation3 + $0x61] sm:$0xff] }
0x120e   : > { %29670 = vmatpush3.bf16.msra.mxu0 %v32524_v24  ;;  %v36555_v24 = vpack.c.bf16 %v18524_v55, %v18523_v50  ;;  %v20113_v50 = vld [vmem:[#allocation4 + $0x79] sm:$0xff] }
0x120f   : > { %29703 = vmatprep.subr.bf16.mxu0 %v32525_v49  ;;  %v20142_v55 = vpack.c.bf16 %v20114_v47, %v20113_v50 }
0x1211   : > { %29640 = vmatmul.mubr.msk.bf16.gmra.mrb[104].mxu0 %vm366_vm4, %v36523_v10 }
0x1212   : > { %29643 = vmatprep.mubr.msk.bf16.mxu0 %vm366_vm4, %v36525_v16 }
0x1219   : > { %29644 = vmatmul.mubr.msk.bf16.gmra.mrb[108].mxu0 %vm366_vm4, %v36531_v32 }
0x121a   : > { %29647 = vmatprep.mubr.msk.bf16.mxu0 %vm366_vm4, %v36533_v23 }
0x1221   : > { %29648 = vmatmul.mubr.msk.bf16.gmra.mrb[112].mxu0 %vm366_vm4, %v36539_v35 }
0x1222   : > { %29651 = vmatprep.mubr.msk.bf16.mxu0 %vm366_vm4, %v36541_v4 }
0x1229   : > { %29652 = vmatmul.mubr.msk.bf16.gmra.mrb[116].mxu0 %vm366_vm4, %v36547_v31 }
0x122a   : > { %29655 = vmatprep.mubr.msk.bf16.mxu0 %vm366_vm4, %v36549_v19 }
0x1231   : > { %29656 = vmatmul.mubr.msk.bf16.gmra.mrb[120].mxu0 %vm366_vm4, %v36555_v24 }
0x1232   : > { %29659 = vmatprep.mubr.msk.bf16.mxu0 %vm366_vm4, %v36557_v17 }
0x1239   : > { %29660 = vmatmul.mubr.msk.bf16.gmra.mrb[124].mxu0 %vm366_vm4, %v36563_v41 }
0x123a   : > { %29671 = vmatprep.mubr.msk.bf16.mxu0 %vm366_vm4, %v36421_v25  ;;  %v32528_v25 = vld [vmem:[%s37581_s3 + $0x638] sm:$0xff]  }
0x1241   : > { %29672 = vmatmul.mubr.msk.bf16.vlgmr.msra.gmra.mrb[96].mxu0 %vm366_vm4, %v36426_v33 }
0x1242   : > { %29704 = vmatpush3.bf16.msra.mxu0 %v32525_v49  ;;  %29675 = vmatprep.mubr.msk.bf16.mxu0 %vm366_vm4, %v36436_v34  ;;  %v32529_v49 = vld [vmem:[%s37581_s3 + $0x640] sm:$0xff]  }
0x1243   : > { %29705 = vmatprep.subr.bf16.mxu0 %v32526_v30 }
0x1246   : > { %29706 = vmatpush3.bf16.msra.mxu0 %v32526_v30  ;;  %v20120_v30 = vld [vmem:[#allocation4 + $0xc9] sm:$0xff] }
0x1247   : > { %29707 = vmatprep.subr.bf16.mxu0 %v32527_v59 }
0x1249   : > { %29676 = vmatmul.mubr.msk.bf16.gmra.mrb[100].mxu0 %vm366_vm4, %v36441_v63 }
0x124a   : > { %29679 = vmatprep.mubr.msk.bf16.mxu0 %vm366_vm4, %v36450_v54  ;;  %29708 = vmatpush3.bf16.msra.mxu0 %v32527_v59  ;;  %v20117_v59 = vld [vmem:[#allocation4 + $0xa9] sm:$0xff] }
0x124b   : > { %29709 = vmatprep.subr.bf16.mxu0 %v32528_v25 }
0x124e   : > { %29710 = vmatpush3.bf16.msra.mxu0 %v32528_v25  ;;  %v20144_v25 = vpack.c.bf16 %v20118_v60, %v20117_v59  ;;  %v20794_v59 = vld [vmem:[#allocation3 + $0x69] sm:$0xff] }
0x124f   : > { %29743 = vmatprep.subr.bf16.mxu0 %v32529_v49 }
0x1251   : > { %29680 = vmatmul.mubr.msk.bf16.gmra.mrb[104].mxu0 %vm366_vm4, %v36452_v57 }
0x1252   : > { %29683 = vmatprep.mubr.msk.bf16.mxu0 %vm366_vm4, %v36458_v42 }
0x1259   : > { %29684 = vmatmul.mubr.msk.bf16.gmra.mrb[108].mxu0 %vm366_vm4, %v36460_v52 }
0x125a   : > { %29687 = vmatprep.mubr.msk.bf16.mxu0 %vm366_vm4, %v36466_v51 }
0x1261   : > { %29688 = vmatmul.mubr.msk.bf16.gmra.mrb[112].mxu0 %vm366_vm4, %v36468_v46 }
0x1262   : > { %29691 = vmatprep.mubr.msk.bf16.mxu0 %vm366_vm4, %v36474_v22 }
0x1269   : > { %29692 = vmatmul.mubr.msk.bf16.gmra.mrb[116].mxu0 %vm366_vm4, %v36476_v12 }
0x126a   : > { %29695 = vmatprep.mubr.msk.bf16.mxu0 %vm366_vm4, %v36482_v62 }
0x1271   : > { %29696 = vmatmul.mubr.msk.bf16.gmra.mrb[120].mxu0 %vm366_vm4, %v36484_v21 }
0x1272   : > { %29699 = vmatprep.mubr.msk.bf16.mxu0 %vm366_vm4, %v36490_v15 }
0x1279   : > { %29700 = vmatmul.mubr.msk.bf16.gmra.mrb[124].mxu0 %vm366_vm4, %v36609_v9 }
0x127a   : > { %29711 = vmatprep.mubr.msk.bf16.mxu0 %vm366_vm4, %v36297_v3  ;;  %v32532_v3 = vld [vmem:[%s37581_s3 + $0x658] sm:$0xff]  }
0x1281   : > { %29712 = vmatmul.mubr.msk.bf16.vlgmr.msra.gmra.mrb[96].mxu0 %vm366_vm4, %v36303_v14  ;;  %v32533_v14 = vld [vmem:[%s37581_s3 + $0x660] sm:$0xff]  }
0x1282   : > { %29744 = vmatpush3.bf16.msra.mxu0 %v32529_v49  ;;  %29715 = vmatprep.mubr.msk.bf16.mxu0 %vm366_vm4, %v36319_v45  ;;  %v19172_v45 = vld [vmem:[#allocation4 + $0x189] sm:$0xff]  ;;  %v20119_v49 = vld [vmem:[#allocation4 + $0xc1] sm:$0xff] }
0x1283   : > { %29745 = vmatprep.subr.bf16.mxu0 %v32530_v61  ;;  %v20145_v28 = vpack.c.bf16 %v20120_v30, %v20119_v49 }
0x1286   : > { %29746 = vmatpush3.bf16.msra.mxu0 %v32530_v61  ;;  %v20121_v61 = vld [vmem:[#allocation4 + $0xd9] sm:$0xff] }
0x1287   : > { %29747 = vmatprep.subr.bf16.mxu0 %v32531_v43 }
0x1289   : > { %29716 = vmatmul.mubr.msk.bf16.gmra.mrb[100].mxu0 %vm366_vm4, %v36325_v53  ;;  %v19171_v53 = vld [vmem:[#allocation4 + $0x181] sm:$0xff] }
0x128a   : > { %29719 = vmatprep.mubr.msk.bf16.mxu0 %vm366_vm4, %v36343_v2  ;;  %29748 = vmatpush3.bf16.msra.mxu0 %v32531_v43  ;;  %v36655_v2 = vpack.c.bf16 %v19172_v45, %v19171_v53  ;;  %v20146_v43 = vpack.c.bf16 %v20122_v20, %v20121_v61  ;;  %v20126_v45 = vld [vmem:[#allocation4 + $0x111] sm:$0xff]  ;;  %v20128_v53 = vld [vmem:[#allocation4 + $0x129] sm:$0xff] }
0x128b   : > { %29749 = vmatprep.subr.bf16.mxu0 %v32532_v3 }
0x128e   : > { %29750 = vmatpush3.bf16.msra.mxu0 %v32532_v3  ;;  %v20123_v3 = vld [vmem:[#allocation4 + $0xf1] sm:$0xff] }
0x128f   : > { %29783 = vmatprep.subr.bf16.mxu0 %v32533_v14 }
0x1291   : > { %29720 = vmatmul.mubr.msk.bf16.gmra.mrb[104].mxu0 %vm366_vm4, %v36347_v38  ;;  %v32534_v38 = vld [vmem:[%s37581_s3 + $0x668] sm:$0xff]  }
0x1292   : > { %29723 = vmatprep.mubr.msk.bf16.mxu0 %vm366_vm4, %v36360_v56  ;;  %v32535_v56 = vld [vmem:[%s37581_s3 + $0x670] sm:$0xff]  }
0x1299   : > { %29724 = vmatmul.mubr.msk.bf16.gmra.mrb[108].mxu0 %vm366_vm4, %v36363_v36  ;;  %v32536_v36 = vld [vmem:[%s37581_s3 + $0x678] sm:$0xff]  }
0x129a   : > { %29727 = vmatprep.mubr.msk.bf16.mxu0 %vm366_vm4, %v36376_v7  ;;  %v32537_v7 = vld [vmem:[%s37581_s3 + $0x680] sm:$0xff]  }
0x12a1   : > { %29728 = vmatmul.mubr.msk.bf16.gmra.mrb[112].mxu0 %vm366_vm4, %v36379_v26  ;;  %v19493_v26 = vld [vmem:[#allocation4 + $0x182] sm:$0xff] }
0x12a2   : > { %29731 = vmatprep.mubr.msk.bf16.mxu0 %vm366_vm4, %v36392_v8  ;;  %v19494_v8 = vld [vmem:[#allocation4 + $0x18a] sm:$0xff] }
0x12a9   : > { %29732 = vmatmul.mubr.msk.bf16.gmra.mrb[116].mxu0 %vm366_vm4, %v36395_v27  ;;  %v36701_v27 = vpack.c.bf16 %v19494_v8, %v19493_v26  ;;  %v20130_v26 = vld [vmem:[#allocation4 + $0x141] sm:$0xff]  ;;  %v20132_v8 = vld [vmem:[#allocation4 + $0x159] sm:$0xff] }
0x12aa   : > { %29735 = vmatprep.mubr.msk.bf16.mxu0 %vm366_vm4, %v36408_v6  ;;  %v32538_v6 = vld [vmem:[%s37581_s3 + $0x688] sm:$0xff]  }
0x12b1   : > { %29736 = vmatmul.mubr.msk.bf16.gmra.mrb[120].mxu0 %vm366_vm4, %v36410_v48  ;;  %v32539_v48 = vld [vmem:[%s37581_s3 + $0x690] sm:$0xff]  }
0x12b2   : > { %29739 = vmatprep.mubr.msk.bf16.mxu0 %vm366_vm4, %v36416_v13  ;;  %v32540_v13 = vld [vmem:[%s37581_s3 + $0x698] sm:$0xff]  }
0x12b9   : > { %29740 = vmatmul.mubr.msk.bf16.gmra.mrb[124].mxu0 %vm366_vm4, %v36655_v2 }
0x12ba   : > { %29751 = vmatprep.mubr.msk.bf16.mxu0 %vm366_vm4, %v36495_v0  ;;  %v20111_v0 = vld [vmem:[#allocation4 + $0x61] sm:$0xff] }
0x12c1   : > { %29752 = vmatmul.mubr.msk.bf16.vlgmr.msra.gmra.mrb[96].mxu0 %vm366_vm4, %v36500_v11 }
0x12c2   : > { %29784 = vmatpush3.bf16.msra.mxu0 %v32533_v14  ;;  %29755 = vmatprep.mubr.msk.bf16.mxu0 %vm366_vm4, %v36509_v58 }
0x12c3   : > { %29785 = vmatprep.subr.bf16.mxu0 %v32534_v38 }
0x12c6   : > { %29786 = vmatpush3.bf16.msra.mxu0 %v32534_v38  ;;  %v20125_v38 = vld [vmem:[#allocation4 + $0x109] sm:$0xff] }
0x12c7   : > { %29787 = vmatprep.subr.bf16.mxu0 %v32535_v56 }
0x12c9   : > { %29756 = vmatmul.mubr.msk.bf16.gmra.mrb[100].mxu0 %vm366_vm4, %v36514_v18 }
0x12ca   : > { %29759 = vmatprep.mubr.msk.bf16.mxu0 %vm366_vm4, %v36523_v10  ;;  %29788 = vmatpush3.bf16.msra.mxu0 %v32535_v56  ;;  %v20148_v56 = vpack.c.bf16 %v20126_v45, %v20125_v38 }
0x12cb   : > { %29789 = vmatprep.subr.bf16.mxu0 %v32536_v36 }
0x12ce   : > { %29790 = vmatpush3.bf16.msra.mxu0 %v32536_v36  ;;  %v20127_v36 = vld [vmem:[#allocation4 + $0x121] sm:$0xff] }
0x12cf   : > { %29823 = vmatprep.subr.bf16.mxu0 %v32537_v7 }
0x12d1   : > { %29760 = vmatmul.mubr.msk.bf16.gmra.mrb[104].mxu0 %vm366_vm4, %v36525_v16 }
0x12d2   : > { %29763 = vmatprep.mubr.msk.bf16.mxu0 %vm366_vm4, %v36531_v32 }
0x12d9   : > { %29764 = vmatmul.mubr.msk.bf16.gmra.mrb[108].mxu0 %vm366_vm4, %v36533_v23 }
0x12da   : > { %29767 = vmatprep.mubr.msk.bf16.mxu0 %vm366_vm4, %v36539_v35 }
0x12e1   : > { %29768 = vmatmul.mubr.msk.bf16.gmra.mrb[112].mxu0 %vm366_vm4, %v36541_v4 }
0x12e2   : > { %29771 = vmatprep.mubr.msk.bf16.mxu0 %vm366_vm4, %v36547_v31 }
0x12e9   : > { %29772 = vmatmul.mubr.msk.bf16.gmra.mrb[116].mxu0 %vm366_vm4, %v36549_v19 }
0x12ea   : > { %29775 = vmatprep.mubr.msk.bf16.mxu0 %vm366_vm4, %v36555_v24 }
0x12f1   : > { %29776 = vmatmul.mubr.msk.bf16.gmra.mrb[120].mxu0 %vm366_vm4, %v36557_v17 }
0x12f2   : > { %29779 = vmatprep.mubr.msk.bf16.mxu0 %vm366_vm4, %v36563_v41 }
0x12f9   : > { %29780 = vmatmul.mubr.msk.bf16.gmra.mrb[124].mxu0 %vm366_vm4, %v36701_v27 }
0x12fa   : > { %29791 = vmatprep.mubr.msk.bf16.mxu0 %vm366_vm4, %v36426_v33  ;;  %v32541_v33 = vld [vmem:[%s37581_s3 + $0x6a0] sm:$0xff]  }
0x1301   : > { %29792 = vmatmul.mubr.msk.bf16.vlgmr.msra.gmra.mrb[96].mxu0 %vm366_vm4, %v36436_v34  ;;  %v19815_v34 = vld [vmem:[#allocation4 + $0x198] sm:$0xff] }
0x1302   : > { %29824 = vmatpush3.bf16.msra.mxu0 %v32537_v7  ;;  %29795 = vmatprep.mubr.msk.bf16.mxu0 %vm366_vm4, %v36441_v63  ;;  %v19816_v63 = vld [vmem:[#allocation4 + $0x1a0] sm:$0xff]  ;;  %v20149_v7 = vpack.c.bf16 %v20128_v53, %v20127_v36  ;;  %v32550_v53 = vld [vmem:[%s37583_s5 + $0x8] sm:$0xff]  }
0x1303   : > { %29825 = vmatprep.subr.bf16.mxu0 %v32538_v6 }
0x1306   : > { %29826 = vmatpush3.bf16.msra.mxu0 %v32538_v6  ;;  %v20129_v6 = vld [vmem:[#allocation4 + $0x139] sm:$0xff] }
0x1307   : > { %29827 = vmatprep.subr.bf16.mxu0 %v32539_v48 }
0x1309   : > { %29796 = vmatmul.mubr.msk.bf16.gmra.mrb[100].mxu0 %vm366_vm4, %v36450_v54  ;;  %v19832_v54 = vpack.c.bf16 %v19816_v63, %v19815_v34  ;;  %v20134_v34 = vld [vmem:[#allocation4 + $0x171] sm:$0xff]  ;;  %v20133_v63 = vld [vmem:[#allocation4 + $0x169] sm:$0xff] }
0x130a   : > { %29799 = vmatprep.mubr.msk.bf16.mxu0 %vm366_vm4, %v36452_v57  ;;  %29828 = vmatpush3.bf16.msra.mxu0 %v32539_v48  ;;  %v20108_v57 = vld [vmem:[#allocation4 + $0x39] sm:$0xff]  ;;  %v20150_v48 = vpack.c.bf16 %v20130_v26, %v20129_v6 }
0x130b   : > { %29829 = vmatprep.subr.bf16.mxu0 %v32540_v13 }
0x130e   : > { %29830 = vmatpush3.bf16.msra.mxu0 %v32540_v13  ;;  %v20131_v13 = vld [vmem:[#allocation4 + $0x151] sm:$0xff] }
0x130f   : > { %29863 = vmatprep.subr.bf16.mxu0 %v32541_v33 }
0x1311   : > { %29800 = vmatmul.mubr.msk.bf16.gmra.mrb[104].mxu0 %vm366_vm4, %v36458_v42  ;;  %v20107_v42 = vld [vmem:[#allocation4 + $0x31] sm:$0xff] }
0x1312   : > { %29803 = vmatprep.mubr.msk.bf16.mxu0 %vm366_vm4, %v36460_v52  ;;  %v20139_v52 = vpack.c.bf16 %v20108_v57, %v20107_v42  ;;  %v20137_v57 = vld [vmem:[#allocation4 + $0x199] sm:$0xff]  ;;  %v20138_v42 = vld [vmem:[#allocation4 + $0x1a1] sm:$0xff] }
0x1319   : > { %29804 = vmatmul.mubr.msk.bf16.gmra.mrb[108].mxu0 %vm366_vm4, %v36466_v51  ;;  %v32545_v51 = vld [vmem:[%s37583_s5 + $0x20] sm:$0xff]  }
0x131a   : > { %29807 = vmatprep.mubr.msk.bf16.mxu0 %vm366_vm4, %v36468_v46  ;;  %v32546_v46 = vld [vmem:[%s37583_s5 + $0x28] sm:$0xff]   ;;  %29903 = vmatprep.subr.bf16.mxu1 %v32545_v51 }
0x131b   : > { %29904 = vmatpush3.bf16.msra.mxu1 %v32545_v51  ;;  %v20787_v51 = vld [vmem:[#allocation3 + $0x19] sm:$0xff] }
0x131c   : > { %29905 = vmatprep.subr.bf16.mxu1 %v32546_v46 }
0x131f   : > { %29906 = vmatpush3.bf16.msra.mxu1 %v32546_v46 }
0x1321   : > { %29808 = vmatmul.mubr.msk.bf16.gmra.mrb[112].mxu0 %vm366_vm4, %v36474_v22  ;;  %v20110_v22 = vld [vmem:[#allocation4 + $0x51] sm:$0xff] }
0x1322   : > { %29811 = vmatprep.mubr.msk.bf16.mxu0 %vm366_vm4, %v36476_v12  ;;  %v20112_v12 = vld [vmem:[#allocation4 + $0x69] sm:$0xff] }
0x1323   : > { %v20141_v39 = vpack.c.bf16 %v20112_v12, %v20111_v0  ;;  %v20788_v0 = vld [vmem:[#allocation3 + $0x21] sm:$0xff] }
0x1329   : > { %29812 = vmatmul.mubr.msk.bf16.gmra.mrb[116].mxu0 %vm366_vm4, %v36482_v62  ;;  %v32547_v62 = vld [vmem:[%s37583_s5 + $0x30] sm:$0xff]  }
0x132a   : > { %29815 = vmatprep.mubr.msk.bf16.mxu0 %vm366_vm4, %v36484_v21  ;;  %v20109_v21 = vld [vmem:[#allocation4 + $0x49] sm:$0xff]  ;;  %29907 = vmatprep.subr.bf16.mxu1 %v32547_v62 }
0x132b   : > { %29908 = vmatpush3.bf16.msra.mxu1 %v32547_v62  ;;  %v20790_v62 = vld [vmem:[#allocation3 + $0x39] sm:$0xff] }
0x1331   : > { %29816 = vmatmul.mubr.msk.bf16.gmra.mrb[120].mxu0 %vm366_vm4, %v36490_v15  ;;  %v20140_v15 = vpack.c.bf16 %v20110_v22, %v20109_v21 }
0x1332   : > { %29819 = vmatprep.mubr.msk.bf16.mxu0 %vm366_vm4, %v36609_v9  ;;  %v20124_v9 = vld [vmem:[#allocation4 + $0xf9] sm:$0xff] }
0x1333   : > { %v20147_v14 = vpack.c.bf16 %v20124_v9, %v20123_v3 }
0x1339   : > { %29820 = vmatmul.mubr.msk.bf16.gmra.mrb[124].mxu0 %vm366_vm4, %v19832_v54  ;;  %v20152_v54 = vpack.c.bf16 %v20134_v34, %v20133_v63  ;;  %v20798_v63 = vld [vmem:[#allocation3 + $0x99] sm:$0xff] }
0x133a   : > { %29831 = vmatprep.mubr.msk.bf16.mxu0 %vm366_vm4, %v20139_v52  ;;  %v20154_v52 = vpack.c.bf16 %v20138_v42, %v20137_v57  ;;  %v32551_v57 = vld [vmem:[%s37583_s5 + $0x10] sm:$0xff]  }
0x1341   : > { %29832 = vmatmul.mubr.msk.bf16.vlgmr.msra.gmra.mrb[96].mxu0 %vm366_vm4, %v20140_v15 }
0x1342   : > { %29864 = vmatpush3.bf16.msra.mxu0 %v32541_v33  ;;  %29835 = vmatprep.mubr.msk.bf16.mxu0 %vm366_vm4, %v20141_v39  ;;  %v20151_v33 = vpack.c.bf16 %v20132_v8, %v20131_v13 }
0x1343   : > { %29865 = vmatprep.subr.bf16.mxu0 %v32542_v40 }
0x1346   : > { %29866 = vmatpush3.bf16.msra.mxu0 %v32542_v40 }
0x1347   : > { %29867 = vmatprep.subr.bf16.mxu0 %v32543_v44 }
0x1349   : > { %29836 = vmatmul.mubr.msk.bf16.gmra.mrb[100].mxu0 %vm366_vm4, %v20142_v55 }
0x134a   : > { %29839 = vmatprep.mubr.msk.bf16.mxu0 %vm366_vm4, %v20143_v1  ;;  %29868 = vmatpush3.bf16.msra.mxu0 %v32543_v44 }
0x134b   : > { %29869 = vmatprep.subr.bf16.mxu0 %v32544_v37 }
0x134e   : > { %29870 = vmatpush3.bf16.msra.mxu0 %v32544_v37  ;;  %v20791_v37 = vld [vmem:[#allocation3 + $0x49] sm:$0xff] }
0x1351   : > { %29840 = vmatmul.mubr.msk.bf16.gmra.mrb[104].mxu0 %vm366_vm4, %v20144_v25 }
0x1352   : > { %29843 = vmatprep.mubr.msk.bf16.mxu0 %vm366_vm4, %v20145_v28  ;;  %v20792_v28 = vld [vmem:[#allocation3 + $0x51] sm:$0xff] }
0x1359   : > { %29844 = vmatmul.mubr.msk.bf16.gmra.mrb[108].mxu0 %vm366_vm4, %v20146_v43 }
0x135a   : > { %29847 = vmatprep.mubr.msk.bf16.mxu0 %vm366_vm4, %v20147_v14 }
0x1361   : > { %29848 = vmatmul.mubr.msk.bf16.gmra.mrb[112].mxu0 %vm366_vm4, %v20148_v56 }
0x1362   : > { %29851 = vmatprep.mubr.msk.bf16.mxu0 %vm366_vm4, %v20149_v7  ;;  %v20797_v7 = vld [vmem:[#allocation3 + $0x91] sm:$0xff] }
0x1369   : > { %29852 = vmatmul.mubr.msk.bf16.gmra.mrb[116].mxu0 %vm366_vm4, %v20150_v48  ;;  %v20795_v48 = vld [vmem:[#allocation3 + $0x79] sm:$0xff] }
0x136a   : > { %29855 = vmatprep.mubr.msk.bf16.mxu0 %vm366_vm4, %v20151_v33 }
0x1371   : > { %29856 = vmatmul.mubr.msk.bf16.gmra.mrb[120].mxu0 %vm366_vm4, %v20152_v54 }
0x1372   : > { %29859 = vmatprep.mubr.msk.bf16.mxu0 %vm366_vm4, %v36655_v2 }
0x1379   : > { %29860 = vmatmul.mubr.msk.bf16.gmra.mrb[124].mxu0 %vm366_vm4, %v20154_v52  ;;  %v20796_v52 = vld [vmem:[#allocation3 + $0x81] sm:$0xff] }
0x137a   : > { %29871 = vmatprep.mubr.msk.bf16.mxu0 %vm366_vm4, %v36500_v11  ;;  %v20459_v11 = vld [vmem:[#allocation4 + $0x19a] sm:$0xff] }
0x1381   : > { %29872 = vmatmul.mubr.msk.bf16.vlgmr.msra.gmra.mrb[96].mxu0 %vm366_vm4, %v36509_v58  ;;  %v20460_v58 = vld [vmem:[#allocation4 + $0x1a2] sm:$0xff] }
0x1382   : > { %29875 = vmatprep.mubr.msk.bf16.mxu0 %vm366_vm4, %v36514_v18  ;;  %v20476_v18 = vpack.c.bf16 %v20460_v58, %v20459_v11 }
0x1389   : > { %29876 = vmatmul.mubr.msk.bf16.gmra.mrb[100].mxu0 %vm366_vm4, %v36523_v10  ;;  %v32548_v10 = vld [vmem:[%s37583_s5 + $0x38] sm:$0xff]  }
0x138a   : > { %29879 = vmatprep.mubr.msk.bf16.mxu0 %vm366_vm4, %v36525_v16  ;;  %29909 = vmatprep.subr.bf16.mxu1 %v32548_v10  ;;  %v20940_v16 = vld [vmem:[#allocation3 + $0x1] sm:$0xff] }
0x138b   : > { %29910 = vmatpush3.bf16.msra.mxu1 %v32548_v10 }
0x1391   : > { %29880 = vmatmul.mubr.msk.bf16.gmra.mrb[104].mxu0 %vm366_vm4, %v36531_v32  ;;  %v20941_v32 = vld [vmem:[#allocation3 + $0x9] sm:$0xff] }
0x1392   : > { %29883 = vmatprep.mubr.msk.bf16.mxu0 %vm366_vm4, %v36533_v23  ;;  %v20972_v23 = vpack.c.bf16 %v20941_v32, %v20940_v16 }
0x1394   : > { %29911 = vmatprep.mubr.msk.bf16.mxu1 %vm366_vm4, %v20972_v23 }
0x1399   : > { %29884 = vmatmul.mubr.msk.bf16.gmra.mrb[108].mxu0 %vm366_vm4, %v36539_v35  ;;  %v32549_v35 = vld [vmem:[%s37583_s5] sm:$0xff]  }
0x139a   : > { %29887 = vmatprep.mubr.msk.bf16.mxu0 %vm366_vm4, %v36541_v4  ;;  %29943 = vmatprep.subr.bf16.mxu1 %v32549_v35  ;;  %v36824_v4 = vld [vmem:[%s37582_s4 + $0x5] ss:$0 sm:$0xff] }
0x13a1   : > { %29888 = vmatmul.mubr.msk.bf16.gmra.mrb[112].mxu0 %vm366_vm4, %v36547_v31 }
0x13a2   : > { %29891 = vmatprep.mubr.msk.bf16.mxu0 %vm366_vm4, %v36549_v19 }
0x13a9   : > { %29892 = vmatmul.mubr.msk.bf16.gmra.mrb[116].mxu0 %vm366_vm4, %v36555_v24 }
0x13aa   : > { %29895 = vmatprep.mubr.msk.bf16.mxu0 %vm366_vm4, %v36557_v17  ;;  %v20789_v17 = vld [vmem:[#allocation3 + $0x31] sm:$0xff] }
0x13b1   : > { %29896 = vmatmul.mubr.msk.bf16.gmra.mrb[120].mxu0 %vm366_vm4, %v36563_v41 }
0x13b2   : > { %29899 = vmatprep.mubr.msk.bf16.mxu0 %vm366_vm4, %v36701_v27 }
0x13b9   : > { %29900 = vmatmul.mubr.msk.bf16.gmra.mrb[124].mxu0 %vm366_vm4, %v20476_v18 }
0x1454   : > { %v29873_v31 = vpop.f32.mrb[96].mxu0 }
0x1455   : > { %v20757_v19 = vadd.f32 %v29873_v31, %v36824_v4  ;;  %v20592_v24 = vpop.f32.mrb[97].mxu0 }
0x1456   : > { %v20755_v41 = vadd.f32 %v36824_v4, %v20592_v24  ;;  %v29874_v2 = vpop.f32.mrb[98].mxu0 }
0x1457   : > { %v20821_v27 = vadd.f32 %v20789_v17, %v20757_v19  ;;  %v20758_v46 = vadd.f32 %v29874_v2, %v36824_v4  ;;  %v20595_v22 = vpop.f32.mrb[99].mxu0  ;;  %v20801_v17 = vld [vmem:[#allocation3 + $0xc1] sm:$0xff] }
0x1458   : > { %v20819_v12 = vadd.f32 %v20787_v51, %v20755_v41  ;;  %v20756_v21 = vadd.f32 %v36824_v4, %v20595_v22  ;;  %v20799_v51 = vld [vmem:[#allocation3 + $0xa9] sm:$0xff] }
0x1459   : > { %20853 = vst.msk [vmem:[#allocation3 + $0x31] sm:$0xff] %vm366_vm4, %v20821_v27  ;;  %v20822_v15 = vadd.f32 %v20790_v62, %v20758_v46  ;;  %v20802_v62 = vld [vmem:[#allocation3 + $0xc9] sm:$0xff] }
0x145a   : > { %20851 = vst.msk [vmem:[#allocation3 + $0x19] sm:$0xff] %vm366_vm4, %v20819_v12  ;;  %v20820_v40 = vadd.f32 %v20788_v0, %v20756_v21 }
0x145b   : > { %20854 = vst.msk [vmem:[#allocation3 + $0x39] sm:$0xff] %vm366_vm4, %v20822_v15  ;;  %v36882_v15 = vld [vmem:[%s37583_s5 + $0x40] sm:$0xff]  }
0x145c   : > { %20852 = vst.msk [vmem:[#allocation3 + $0x21] sm:$0xff] %vm366_vm4, %v20820_v40  ;;  %v29877_v39 = vpop.f32.mrb[100].mxu0  ;;  %v20800_v40 = vld [vmem:[#allocation3 + $0xb1] sm:$0xff] }
0x145d   : > { %v20761_v44 = vadd.f32 %v29877_v39, %v36824_v4  ;;  %v20608_v47 = vpop.f32.mrb[101].mxu0 }
0x145e   : > { %v20759_v50 = vadd.f32 %v36824_v4, %v20608_v47  ;;  %v29878_v55 = vpop.f32.mrb[102].mxu0 }
0x145f   : > { %v20825_v5 = vadd.f32 %v20793_v29, %v20761_v44  ;;  %v20762_v1 = vadd.f32 %v29878_v55, %v36824_v4  ;;  %v20611_v60 = vpop.f32.mrb[103].mxu0 }
0x1460   : > { %v20823_v30 = vadd.f32 %v20791_v37, %v20759_v50  ;;  %v20760_v25 = vadd.f32 %v36824_v4, %v20611_v60  ;;  %v20944_v45 = vld [vmem:[#allocation3 + $0x31] sm:$0xff] }
0x1461   : > { %20857 = vst.msk [vmem:[#allocation3 + $0x61] sm:$0xff] %vm366_vm4, %v20825_v5  ;;  %v20826_v49 = vadd.f32 %v20794_v59, %v20762_v1  ;;  %v20942_v61 = vld [vmem:[#allocation3 + $0x19] sm:$0xff] }
0x1462   : > { %20855 = vst.msk [vmem:[#allocation3 + $0x49] sm:$0xff] %vm366_vm4, %v20823_v30  ;;  %v20824_v20 = vadd.f32 %v20792_v28, %v20760_v25  ;;  %v20945_v9 = vld [vmem:[#allocation3 + $0x39] sm:$0xff]  ;;  %v20805_v30 = vld [vmem:[#allocation3 + $0xf1] sm:$0xff] }
0x1463   : > { %20858 = vst.msk [vmem:[#allocation3 + $0x69] sm:$0xff] %vm366_vm4, %v20826_v49  ;;  %v20943_v43 = vld [vmem:[#allocation3 + $0x21] sm:$0xff]  ;;  %v36848_v36 = vpack.c.bf16 %v20945_v9, %v20944_v45  ;;  %v20803_v28 = vld [vmem:[#allocation3 + $0xd9] sm:$0xff] }
0x1464   : > { %20856 = vst.msk [vmem:[#allocation3 + $0x51] sm:$0xff] %vm366_vm4, %v20824_v20  ;;  %v29881_v3 = vpop.f32.mrb[104].mxu0  ;;  %v36842_v14 = vpack.c.bf16 %v20943_v43, %v20942_v61  ;;  %v20806_v43 = vld [vmem:[#allocation3 + $0xf9] sm:$0xff] }
0x1465   : > { %v20765_v38 = vadd.f32 %v29881_v3, %v36824_v4  ;;  %v20624_v56 = vpop.f32.mrb[105].mxu0 }
0x1466   : > { %v20763_v26 = vadd.f32 %v36824_v4, %v20624_v56  ;;  %v29882_v8 = vpop.f32.mrb[106].mxu0  ;;  %29912 = vmatmul.mubr.msk.bf16.vlgmr.msra.gmra.mrb[96].mxu1 %vm366_vm4, %v36842_v14 }
0x1467   : > { %v20829_v6 = vadd.f32 %v20797_v7, %v20765_v38  ;;  %v20766_v13 = vadd.f32 %v29882_v8, %v36824_v4  ;;  %29944 = vmatpush3.bf16.msra.mxu1 %v32549_v35  ;;  %v20627_v33 = vpop.f32.mrb[107].mxu0  ;;  %29915 = vmatprep.mubr.msk.bf16.mxu1 %vm366_vm4, %v36848_v36  ;;  %v32552_v35 = vld [vmem:[%s37583_s5 + $0x18] sm:$0xff]  }
0x1468   : > { %v20827_v34 = vadd.f32 %v20795_v48, %v20763_v26  ;;  %v20764_v54 = vadd.f32 %v36824_v4, %v20627_v33  ;;  %29945 = vmatprep.subr.bf16.mxu1 %v32550_v53  ;;  %v20948_v23 = vld [vmem:[#allocation3 + $0x61] sm:$0xff] }
0x1469   : > { %20861 = vst.msk [vmem:[#allocation3 + $0x91] sm:$0xff] %vm366_vm4, %v20829_v6  ;;  %v20830_v42 = vadd.f32 %v20798_v63, %v20766_v13  ;;  %v20946_v18 = vld [vmem:[#allocation3 + $0x49] sm:$0xff]  ;;  %v20809_v63 = vld [vmem:[#allocation3 + $0x121] sm:$0xff] }
0x146a   : > { %20859 = vst.msk [vmem:[#allocation3 + $0x79] sm:$0xff] %vm366_vm4, %v20827_v34  ;;  %v20828_v11 = vadd.f32 %v20796_v52, %v20764_v54  ;;  %v20949_v58 = vld [vmem:[#allocation3 + $0x69] sm:$0xff] }
0x146b   : > { %20862 = vst.msk [vmem:[#allocation3 + $0x99] sm:$0xff] %vm366_vm4, %v20830_v42  ;;  %v20947_v10 = vld [vmem:[#allocation3 + $0x51] sm:$0xff]  ;;  %29946 = vmatpush3.bf16.msra.mxu1 %v32550_v53  ;;  %v36870_v24 = vpack.c.bf16 %v20949_v58, %v20948_v23  ;;  %v20804_v53 = vld [vmem:[#allocation3 + $0xe1] sm:$0xff]  ;;  %v20807_v52 = vld [vmem:[#allocation3 + $0x109] sm:$0xff] }
0x146c   : > { %20860 = vst.msk [vmem:[#allocation3 + $0x81] sm:$0xff] %vm366_vm4, %v20828_v11  ;;  %v29885_v16 = vpop.f32.mrb[108].mxu0  ;;  %v36864_v32 = vpack.c.bf16 %v20947_v10, %v20946_v18  ;;  %29947 = vmatprep.subr.bf16.mxu1 %v32551_v57  ;;  %v20810_v10 = vld [vmem:[#allocation3 + $0x129] sm:$0xff] }
0x146d   : > { %v20769_v31 = vadd.f32 %v29885_v16, %v36824_v4  ;;  %v20640_v19 = vpop.f32.mrb[109].mxu0 }
0x146e   : > { %v20767_v41 = vadd.f32 %v36824_v4, %v20640_v19  ;;  %v29886_v2 = vpop.f32.mrb[110].mxu0  ;;  %29916 = vmatmul.mubr.msk.bf16.gmra.mrb[100].mxu1 %vm366_vm4, %v36864_v32 }
0x146f   : > { %v20833_v27 = vadd.f32 %v20801_v17, %v20769_v31  ;;  %v20770_v46 = vadd.f32 %v29886_v2, %v36824_v4  ;;  %v20643_v22 = vpop.f32.mrb[111].mxu0  ;;  %29919 = vmatprep.mubr.msk.bf16.mxu1 %vm366_vm4, %v36870_v24  ;;  %29948 = vmatpush3.bf16.msra.mxu1 %v32551_v57 }
0x1470   : > { %v20831_v12 = vadd.f32 %v20799_v51, %v20767_v41  ;;  %v20768_v21 = vadd.f32 %v36824_v4, %v20643_v22  ;;  %29949 = vmatprep.subr.bf16.mxu1 %v32552_v35  ;;  %v20952_v5 = vld [vmem:[#allocation3 + $0x91] sm:$0xff] }
0x1471   : > { %20865 = vst.msk [vmem:[#allocation3 + $0xc1] sm:$0xff] %vm366_vm4, %v20833_v27  ;;  %v20834_v0 = vadd.f32 %v20802_v62, %v20770_v46  ;;  %v20950_v47 = vld [vmem:[#allocation3 + $0x79] sm:$0xff]  ;;  %v20813_v62 = vld [vmem:[#allocation3 + $0x151] sm:$0xff] }
0x1472   : > { %20863 = vst.msk [vmem:[#allocation3 + $0xa9] sm:$0xff] %vm366_vm4, %v20831_v12  ;;  %v20832_v39 = vadd.f32 %v20800_v40, %v20768_v21  ;;  %v20953_v44 = vld [vmem:[#allocation3 + $0x99] sm:$0xff] }
0x1473   : > { %20866 = vst.msk [vmem:[#allocation3 + $0xc9] sm:$0xff] %vm366_vm4, %v20834_v0  ;;  %v20951_v29 = vld [vmem:[#allocation3 + $0x81] sm:$0xff]  ;;  %29950 = vmatpush3.bf16.msra.mxu1 %v32552_v35  ;;  %v36892_v60 = vpack.c.bf16 %v20953_v44, %v20952_v5  ;;  %v20808_v35 = vld [vmem:[#allocation3 + $0x111] sm:$0xff] }
0x1474   : > { %20864 = vst.msk [vmem:[#allocation3 + $0xb1] sm:$0xff] %vm366_vm4, %v20832_v39  ;;  %v29889_v50 = vpop.f32.mrb[112].mxu0  ;;  %v36888_v55 = vpack.c.bf16 %v20951_v29, %v20950_v47  ;;  %29983 = vmatprep.subr.bf16.mxu1 %v36882_v15  ;;  %v20811_v39 = vld [vmem:[#allocation3 + $0x139] sm:$0xff] }
0x1475   : > { %v20773_v37 = vadd.f32 %v29889_v50, %v36824_v4  ;;  %v20656_v1 = vpop.f32.mrb[113].mxu0  ;;  %v20814_v50 = vld [vmem:[#allocation3 + $0x159] sm:$0xff] }
0x1476   : > { %v20771_v59 = vadd.f32 %v36824_v4, %v20656_v1  ;;  %v29890_v25 = vpop.f32.mrb[114].mxu0  ;;  %29920 = vmatmul.mubr.msk.bf16.gmra.mrb[104].mxu1 %vm366_vm4, %v36888_v55  ;;  %v20812_v1 = vld [vmem:[#allocation3 + $0x141] sm:$0xff] }
0x1477   : > { %v20837_v49 = vadd.f32 %v20805_v30, %v20773_v37  ;;  %v20774_v20 = vadd.f32 %v29890_v25, %v36824_v4  ;;  %v20659_v9 = vpop.f32.mrb[115].mxu0  ;;  %29923 = vmatprep.mubr.msk.bf16.mxu1 %vm366_vm4, %v36892_v60 }
0x1478   : > { %v20835_v61 = vadd.f32 %v20803_v28, %v20771_v59  ;;  %v20772_v3 = vadd.f32 %v36824_v4, %v20659_v9  ;;  %v20956_v48 = vld [vmem:[#allocation3 + $0xc1] sm:$0xff] }
0x1479   : > { %20869 = vst.msk [vmem:[#allocation3 + $0xf1] sm:$0xff] %vm366_vm4, %v20837_v49  ;;  %v20838_v45 = vadd.f32 %v20806_v43, %v20774_v20  ;;  %v20954_v7 = vld [vmem:[#allocation3 + $0xa9] sm:$0xff] }
0x147a   : > { %20867 = vst.msk [vmem:[#allocation3 + $0xd9] sm:$0xff] %vm366_vm4, %v20835_v61  ;;  %v20836_v38 = vadd.f32 %v20804_v53, %v20772_v3  ;;  %v20957_v56 = vld [vmem:[#allocation3 + $0xc9] sm:$0xff] }
0x147b   : > { %20870 = vst.msk [vmem:[#allocation3 + $0xf9] sm:$0xff] %vm366_vm4, %v20838_v45  ;;  %v20955_v26 = vld [vmem:[#allocation3 + $0xb1] sm:$0xff]  ;;  %v36908_v34 = vpack.c.bf16 %v20957_v56, %v20956_v48  ;;  %v20817_v45 = vld [vmem:[#allocation3 + $0x181] sm:$0xff] }
0x147c   : > { %20868 = vst.msk [vmem:[#allocation3 + $0xe1] sm:$0xff] %vm366_vm4, %v20836_v38  ;;  %v29893_v8 = vpop.f32.mrb[116].mxu0  ;;  %v36905_v6 = vpack.c.bf16 %v20955_v26, %v20954_v7  ;;  %v20815_v7 = vld [vmem:[#allocation3 + $0x169] sm:$0xff] }
0x147d   : > { %v20777_v13 = vadd.f32 %v29893_v8, %v36824_v4  ;;  %v20672_v33 = vpop.f32.mrb[117].mxu0 }
0x147e   : > { %v20775_v54 = vadd.f32 %v36824_v4, %v20672_v33  ;;  %v29894_v57 = vpop.f32.mrb[118].mxu0  ;;  %29924 = vmatmul.mubr.msk.bf16.gmra.mrb[108].mxu1 %vm366_vm4, %v36905_v6 }
0x147f   : > { %v20841_v42 = vadd.f32 %v20809_v63, %v20777_v13  ;;  %v20778_v11 = vadd.f32 %v29894_v57, %v36824_v4  ;;  %v20675_v58 = vpop.f32.mrb[119].mxu0  ;;  %29927 = vmatprep.mubr.msk.bf16.mxu1 %vm366_vm4, %v36908_v34  ;;  %v20818_v13 = vld [vmem:[#allocation3 + $0x189] sm:$0xff] }
0x1480   : > { %v20839_v18 = vadd.f32 %v20807_v52, %v20775_v54  ;;  %v20776_v16 = vadd.f32 %v36824_v4, %v20675_v58  ;;  %v20960_v51 = vld [vmem:[#allocation3 + $0xf1] sm:$0xff] }
0x1481   : > { %20873 = vst.msk [vmem:[#allocation3 + $0x121] sm:$0xff] %vm366_vm4, %v20841_v42  ;;  %v20842_v23 = vadd.f32 %v20810_v10, %v20778_v11  ;;  %v20958_v17 = vld [vmem:[#allocation3 + $0xd9] sm:$0xff]  ;;  %v20816_v54 = vld [vmem:[#allocation3 + $0x171] sm:$0xff] }
0x1482   : > { %20871 = vst.msk [vmem:[#allocation3 + $0x109] sm:$0xff] %vm366_vm4, %v20839_v18  ;;  %v20840_v31 = vadd.f32 %v20808_v35, %v20776_v16  ;;  %v20961_v19 = vld [vmem:[#allocation3 + $0xf9] sm:$0xff]  ;;  %v20885_v16 = vld [vmem:[#allocation3 + $0x8] sm:$0xff] }
0x1483   : > { %20874 = vst.msk [vmem:[#allocation3 + $0x129] sm:$0xff] %vm366_vm4, %v20842_v23  ;;  %v20959_v41 = vld [vmem:[#allocation3 + $0xe1] sm:$0xff]  ;;  %v36924_v12 = vpack.c.bf16 %v20961_v19, %v20960_v51 }
0x1484   : > { %20872 = vst.msk [vmem:[#allocation3 + $0x111] sm:$0xff] %vm366_vm4, %v20840_v31  ;;  %v29897_v2 = vpop.f32.mrb[120].mxu0  ;;  %v36921_v27 = vpack.c.bf16 %v20959_v41, %v20958_v17  ;;  %v20887_v17 = vld [vmem:[#allocation3 + $0x20] sm:$0xff]  ;;  %v20889_v41 = vld [vmem:[#allocation3 + $0x38] sm:$0xff] }
0x1485   : > { %v20781_v46 = vadd.f32 %v29897_v2, %v36824_v4  ;;  %v20688_v22 = vpop.f32.mrb[121].mxu0  ;;  %v20886_v2 = vld [vmem:[#allocation3 + $0x18] sm:$0xff] }
0x1486   : > { %v20779_v21 = vadd.f32 %v36824_v4, %v20688_v22  ;;  %v29898_v0 = vpop.f32.mrb[122].mxu0  ;;  %29928 = vmatmul.mubr.msk.bf16.gmra.mrb[112].mxu1 %vm366_vm4, %v36921_v27  ;;  %v36966_v51 = vpack.c.bf16 %v20887_v17, %v20886_v2  ;;  %v32554_v22 = vld [vmem:[%s37583_s5 + $0x48] sm:$0xff]  }
0x1487   : > { %v20845_v40 = vadd.f32 %v20813_v62, %v20781_v46  ;;  %v20782_v44 = vadd.f32 %v29898_v0, %v36824_v4  ;;  %v20691_v47 = vpop.f32.mrb[123].mxu0  ;;  %29931 = vmatprep.mubr.msk.bf16.mxu1 %vm366_vm4, %v36924_v12  ;;  %v20888_v46 = vld [vmem:[#allocation3 + $0x30] sm:$0xff] }
0x1488   : > { %v20843_v29 = vadd.f32 %v20811_v39, %v20779_v21  ;;  %v20780_v5 = vadd.f32 %v36824_v4, %v20691_v47  ;;  %v20964_v9 = vld [vmem:[#allocation3 + $0x121] sm:$0xff]  ;;  %v36971_v62 = vpack.c.bf16 %v20889_v41, %v20888_v46  ;;  %v20891_v0 = vld [vmem:[#allocation3 + $0x50] sm:$0xff] }
0x1489   : > { %20877 = vst.msk [vmem:[#allocation3 + $0x151] sm:$0xff] %vm366_vm4, %v20845_v40  ;;  %v20846_v37 = vadd.f32 %v20814_v50, %v20782_v44  ;;  %v20962_v25 = vld [vmem:[#allocation3 + $0x109] sm:$0xff]  ;;  %v32555_v21 = vld [vmem:[%s37583_s5 + $0x50] sm:$0xff]  }
0x148a   : > { %20875 = vst.msk [vmem:[#allocation3 + $0x139] sm:$0xff] %vm366_vm4, %v20843_v29  ;;  %v20844_v30 = vadd.f32 %v20812_v1, %v20780_v5  ;;  %v20965_v59 = vld [vmem:[#allocation3 + $0x129] sm:$0xff]  ;;  %v20892_v47 = vld [vmem:[#allocation3 + $0x60] sm:$0xff]  ;;  %v20894_v1 = vld [vmem:[#allocation3 + $0x78] sm:$0xff] }
0x148b   : > { %20878 = vst.msk [vmem:[#allocation3 + $0x159] sm:$0xff] %vm366_vm4, %v20846_v37  ;;  %v20963_v49 = vld [vmem:[#allocation3 + $0x111] sm:$0xff]  ;;  %v36940_v3 = vpack.c.bf16 %v20965_v59, %v20964_v9  ;;  %v20893_v40 = vld [vmem:[#allocation3 + $0x68] sm:$0xff]  ;;  %v20895_v5 = vld [vmem:[#allocation3 + $0x80] sm:$0xff] }
0x148c   : > { %20876 = vst.msk [vmem:[#allocation3 + $0x141] sm:$0xff] %vm366_vm4, %v20844_v30  ;;  %v29901_v28 = vpop.f32.mrb[124].mxu0  ;;  %v36937_v20 = vpack.c.bf16 %v20963_v49, %v20962_v25  ;;  %v20890_v39 = vld [vmem:[#allocation3 + $0x48] sm:$0xff]  ;;  %v36986_v29 = vpack.c.bf16 %v20893_v40, %v20892_v47  ;;  %v32557_v50 = vld [vmem:[%s37583_s5 + $0x60] sm:$0xff]   ;;  %v20897_v37 = vld [vmem:[#allocation3 + $0x98] sm:$0xff]  ;;  %v36995_v30 = vpack.c.bf16 %v20895_v5, %v20894_v1 }
0x148d   : > { %v20785_v61 = vadd.f32 %v29901_v28, %v36824_v4  ;;  %v20704_v43 = vpop.f32.mrb[125].mxu0  ;;  %v36981_v44 = vpack.c.bf16 %v20891_v0, %v20890_v39  ;;  %v20896_v59 = vld [vmem:[#allocation3 + $0x90] sm:$0xff]  ;;  %v20901_v28 = vld [vmem:[#allocation3 + $0xc8] sm:$0xff]  ;;  %v21465_v46 = vld [vmem:[#allocation3 + $0x1a] sm:$0xff] }
0x148e   : > { %v20783_v53 = vadd.f32 %v36824_v4, %v20704_v43  ;;  %v29902_v38 = vpop.f32.mrb[126].mxu0  ;;  %29932 = vmatmul.mubr.msk.bf16.gmra.mrb[116].mxu1 %vm366_vm4, %v36937_v20  ;;  %v36997_v25 = vpack.c.bf16 %v20897_v37, %v20896_v59  ;;  %v20899_v49 = vld [vmem:[#allocation3 + $0xb0] sm:$0xff]  ;;  %v20898_v9 = vld [vmem:[#allocation3 + $0xa8] sm:$0xff]  ;;  %v20900_v43 = vld [vmem:[#allocation3 + $0xc0] sm:$0xff] }
0x148f   : > { %v20849_v56 = vadd.f32 %v20817_v45, %v20785_v61  ;;  %v20786_v26 = vadd.f32 %v29902_v38, %v36824_v4  ;;  %v20707_v8 = vpop.f32.mrb[127].mxu0  ;;  %29935 = vmatprep.mubr.msk.bf16.mxu1 %vm366_vm4, %v36940_v3  ;;  %v37003_v61 = vpack.c.bf16 %v20899_v49, %v20898_v9  ;;  %v37005_v45 = vpack.c.bf16 %v20901_v28, %v20900_v43  ;;  %v20905_v38 = vld [vmem:[#allocation3 + $0xf8] sm:$0xff]  ;;  %v21469_v5 = vld [vmem:[#allocation3 + $0x4a] sm:$0xff]  ;;  %v21471_v1 = vld [vmem:[#allocation3 + $0x62] sm:$0xff] }
0x1490   : > { %v20847_v48 = vadd.f32 %v20815_v7, %v20783_v53  ;;  %v20784_v33 = vadd.f32 %v36824_v4, %v20707_v8  ;;  %v20968_v18 = vld [vmem:[#allocation3 + $0x151] sm:$0xff]  ;;  %v20884_v4 = vld [vmem:[#allocation3] sm:$0xff] }
0x1491   : > { %20881 = vst.msk [vmem:[#allocation3 + $0x181] sm:$0xff] %vm366_vm4, %v20849_v56  ;;  %v20850_v63 = vadd.f32 %v20818_v13, %v20786_v26  ;;  %v20966_v52 = vld [vmem:[#allocation3 + $0x139] sm:$0xff]  ;;  %v20916_v31 = vpack.c.bf16 %v20885_v16, %v20884_v4  ;;  %v20904_v26 = vld [vmem:[#allocation3 + $0xf0] sm:$0xff]  ;;  %v20909_v13 = vld [vmem:[#allocation3 + $0x128] sm:$0xff] }
0x1492   : > { %20879 = vst.msk [vmem:[#allocation3 + $0x169] sm:$0xff] %vm366_vm4, %v20847_v48  ;;  %v20848_v57 = vadd.f32 %v20816_v54, %v20784_v33  ;;  %v20969_v42 = vld [vmem:[#allocation3 + $0x159] sm:$0xff]  ;;  %v37013_v8 = vpack.c.bf16 %v20905_v38, %v20904_v26  ;;  %v20907_v48 = vld [vmem:[#allocation3 + $0x110] sm:$0xff]  ;;  %v20906_v33 = vld [vmem:[#allocation3 + $0x108] sm:$0xff] }
0x1493   : > { %20882 = vst.msk [vmem:[#allocation3 + $0x189] sm:$0xff] %vm366_vm4, %v20850_v63  ;;  %v20967_v11 = vld [vmem:[#allocation3 + $0x141] sm:$0xff]  ;;  %v36955_v10 = vpack.c.bf16 %v20969_v42, %v20968_v18  ;;  %v20902_v56 = vld [vmem:[#allocation3 + $0xd8] sm:$0xff]  ;;  %v37019_v63 = vpack.c.bf16 %v20907_v48, %v20906_v33  ;;  %v20912_v4 = vld [vmem:[#allocation3 + $0x150] sm:$0xff] }
0x1494   : > { %20880 = vst.msk [vmem:[#allocation3 + $0x171] sm:$0xff] %vm366_vm4, %v20848_v57  ;;  %v36953_v58 = vpack.c.bf16 %v20967_v11, %v20966_v52  ;;  %v20903_v53 = vld [vmem:[#allocation3 + $0xe0] sm:$0xff]  ;;  %v20913_v52 = vld [vmem:[#allocation3 + $0x158] sm:$0xff]  ;;  %v21472_v59 = vld [vmem:[#allocation3 + $0x6a] sm:$0xff] }
0x1495   : > { %v37011_v7 = vpack.c.bf16 %v20903_v53, %v20902_v56  ;;  %v20908_v54 = vld [vmem:[#allocation3 + $0x120] sm:$0xff]  ;;  %v20910_v11 = vld [vmem:[#allocation3 + $0x138] sm:$0xff]  ;;  %v37029_v16 = vpack.c.bf16 %v20913_v52, %v20912_v4  ;;  %v37059_v28 = vpack.c.bf16 %v21472_v59, %v21471_v1  ;;  %v32561_v9 = vld [vmem:[%s37583_s5 + $0x80] sm:$0xff]  }
0x1496   : > { %29936 = vmatmul.mubr.msk.bf16.gmra.mrb[120].mxu1 %vm366_vm4, %v36953_v58  ;;  %v37021_v57 = vpack.c.bf16 %v20909_v13, %v20908_v54  ;;  %v20911_v42 = vld [vmem:[#allocation3 + $0x140] sm:$0xff]  ;;  %v32558_v39 = vld [vmem:[%s37583_s5 + $0x68] sm:$0xff]   ;;  %v21477_v13 = vld [vmem:[#allocation3 + $0xaa] sm:$0xff] }
0x1497   : > { %29939 = vmatprep.mubr.msk.bf16.mxu1 %vm366_vm4, %v36955_v10  ;;  %v37027_v18 = vpack.c.bf16 %v20911_v42, %v20910_v11  ;;  %v21468_v0 = vld [vmem:[#allocation3 + $0x3a] sm:$0xff]  ;;  %v21470_v37 = vld [vmem:[#allocation3 + $0x52] sm:$0xff]  ;;  %v21474_v53 = vld [vmem:[#allocation3 + $0x82] sm:$0xff] }
0x1498   : > { %v37054_v49 = vpack.c.bf16 %v21470_v37, %v21469_v5  ;;  %v21473_v43 = vld [vmem:[#allocation3 + $0x7a] sm:$0xff]  ;;  %v21475_v38 = vld [vmem:[#allocation3 + $0x92] sm:$0xff]  ;;  %v21479_v54 = vld [vmem:[#allocation3 + $0xc2] sm:$0xff] }
0x1499   : > { %v20970_v23 = vld [vmem:[#allocation3 + $0x169] sm:$0xff]  ;;  %v21476_v56 = vld [vmem:[#allocation3 + $0x9a] sm:$0xff]  ;;  %v37068_v26 = vpack.c.bf16 %v21474_v53, %v21473_v43  ;;  %v21478_v33 = vld [vmem:[#allocation3 + $0xb2] sm:$0xff] }
0x149a   : > { %v20914_v17 = vld [vmem:[#allocation3 + $0x168] sm:$0xff]  ;;  %v37070_v48 = vpack.c.bf16 %v21476_v56, %v21475_v38  ;;  %v37076_v52 = vpack.c.bf16 %v21478_v33, %v21477_v13  ;;  %v21481_v4 = vld [vmem:[#allocation3 + $0xda] sm:$0xff]  ;;  %v21491_v1 = vld [vmem:[#allocation3 + $0x152] sm:$0xff] }
0x149b   : > { %v20971_v35 = vld [vmem:[#allocation3 + $0x171] sm:$0xff]  ;;  %v21489_v5 = vld [vmem:[#allocation3 + $0x13a] sm:$0xff]  ;;  %v21490_v37 = vld [vmem:[#allocation3 + $0x142] sm:$0xff] }
0x149c   : > { %v36961_v19 = vpack.c.bf16 %v20971_v35, %v20970_v23  ;;  %v21463_v23 = vld [vmem:[#allocation3 + $0x2] sm:$0xff]  ;;  %v21464_v35 = vld [vmem:[#allocation3 + $0xa] sm:$0xff]  ;;  %v21492_v59 = vld [vmem:[#allocation3 + $0x15a] sm:$0xff] }
0x149d   : > { %v21495_v41 = vpack.c.bf16 %v21464_v35, %v21463_v23  ;;  %v21480_v42 = vld [vmem:[#allocation3 + $0xca] sm:$0xff]  ;;  %v21482_v23 = vld [vmem:[#allocation3 + $0xe2] sm:$0xff]  ;;  %v21483_v35 = vld [vmem:[#allocation3 + $0xf2] sm:$0xff]  ;;  %v37102_v43 = vpack.c.bf16 %v21492_v59, %v21491_v1 }
0x149e   : > { %29940 = vmatmul.mubr.msk.bf16.gmra.mrb[124].mxu1 %vm366_vm4, %v36961_v19  ;;  %v37078_v11 = vpack.c.bf16 %v21480_v42, %v21479_v54  ;;  %v21493_v53 = vld [vmem:[#allocation3 + $0x16a] sm:$0xff]  ;;  %v21494_v38 = vld [vmem:[#allocation3 + $0x172] sm:$0xff]  ;;  %v32563_v33 = vld [vmem:[%s37583_s5 + $0x90] sm:$0xff]  }
0x149f   : > { %29951 = vmatprep.mubr.msk.bf16.mxu1 %vm366_vm4, %v20916_v31  ;;  %v20915_v31 = vld [vmem:[#allocation3 + $0x170] sm:$0xff]  ;;  %v37108_v56 = vpack.c.bf16 %v21494_v38, %v21493_v53  ;;  %v32562_v13 = vld [vmem:[%s37583_s5 + $0x88] sm:$0xff]   ;;  %v21816_v54 = vld [vmem:[#allocation3 + $0x188] sm:$0xff] }
0x14a0   : > { %v37035_v2 = vpack.c.bf16 %v20915_v31, %v20914_v17  ;;  %v21484_v31 = vld [vmem:[#allocation3 + $0xfa] sm:$0xff]  ;;  %v37084_v17 = vpack.c.bf16 %v21482_v23, %v21481_v4  ;;  %v23084_v1 = vld [vmem:[#allocation3 + $0xb1] sm:$0xff]  ;;  %v23086_v59 = vld [vmem:[#allocation3 + $0xc9] sm:$0xff] }
0x14a1   : > { %v21815_v42 = vld [vmem:[#allocation3 + $0x180] sm:$0xff]  ;;  %v32566_v23 = vld [vmem:[%s37583_s5 + $0xa8] sm:$0xff]   ;;  %v23083_v53 = vld [vmem:[#allocation3 + $0xa9] sm:$0xff] }
0x14a2   : > { %v37154_v4 = vpack.c.bf16 %v21816_v54, %v21815_v42  ;;  %v23110_v38 = vpack.c.bf16 %v23084_v1, %v23083_v53  ;;  %v23087_v54 = vld [vmem:[#allocation3 + $0xd9] sm:$0xff] }
0x14a6   : > { %29952 = vmatmul.mubr.msk.bf16.vlgmr.msra.gmra.mrb[96].mxu1 %vm366_vm4, %v36966_v51 }
0x14a7   : > { %29984 = vmatpush3.bf16.msra.mxu1 %v36882_v15  ;;  %29955 = vmatprep.mubr.msk.bf16.mxu1 %vm366_vm4, %v36971_v62  ;;  %v32556_v15 = vld [vmem:[%s37583_s5 + $0x58] sm:$0xff]  }
0x14a8   : > { %29985 = vmatprep.subr.bf16.mxu1 %v32554_v22 }
0x14ab   : > { %29986 = vmatpush3.bf16.msra.mxu1 %v32554_v22  ;;  %v21466_v22 = vld [vmem:[#allocation3 + $0x22] sm:$0xff] }
0x14ac   : > { %29987 = vmatprep.subr.bf16.mxu1 %v32555_v21  ;;  %v37040_v40 = vpack.c.bf16 %v21466_v22, %v21465_v46  ;;  %v21485_v46 = vld [vmem:[#allocation3 + $0x10a] sm:$0xff]  ;;  %v21486_v22 = vld [vmem:[#allocation3 + $0x112] sm:$0xff] }
0x14ae   : > { %29956 = vmatmul.mubr.msk.bf16.gmra.mrb[100].mxu1 %vm366_vm4, %v36981_v44 }
0x14af   : > { %29959 = vmatprep.mubr.msk.bf16.mxu1 %vm366_vm4, %v36986_v29  ;;  %29988 = vmatpush3.bf16.msra.mxu1 %v32555_v21  ;;  %v21467_v21 = vld [vmem:[#allocation3 + $0x32] sm:$0xff] }
0x14b0   : > { %29989 = vmatprep.subr.bf16.mxu1 %v32556_v15  ;;  %v37045_v47 = vpack.c.bf16 %v21468_v0, %v21467_v21  ;;  %v21487_v21 = vld [vmem:[#allocation3 + $0x122] sm:$0xff]  ;;  %v21488_v0 = vld [vmem:[#allocation3 + $0x12a] sm:$0xff] }
0x14b3   : > { %29990 = vmatpush3.bf16.msra.mxu1 %v32556_v15  ;;  %v32559_v15 = vld [vmem:[%s37583_s5 + $0x70] sm:$0xff]  }
0x14b4   : > { %30023 = vmatprep.subr.bf16.mxu1 %v32557_v50 }
0x14b6   : > { %29960 = vmatmul.mubr.msk.bf16.gmra.mrb[104].mxu1 %vm366_vm4, %v36995_v30 }
0x14b7   : > { %29963 = vmatprep.mubr.msk.bf16.mxu1 %vm366_vm4, %v36997_v25 }
0x14be   : > { %29964 = vmatmul.mubr.msk.bf16.gmra.mrb[108].mxu1 %vm366_vm4, %v37003_v61 }
0x14bf   : > { %29967 = vmatprep.mubr.msk.bf16.mxu1 %vm366_vm4, %v37005_v45 }
0x14c6   : > { %29968 = vmatmul.mubr.msk.bf16.gmra.mrb[112].mxu1 %vm366_vm4, %v37011_v7 }
0x14c7   : > { %29971 = vmatprep.mubr.msk.bf16.mxu1 %vm366_vm4, %v37013_v8 }
0x14ce   : > { %29972 = vmatmul.mubr.msk.bf16.gmra.mrb[116].mxu1 %vm366_vm4, %v37019_v63 }
0x14cf   : > { %29975 = vmatprep.mubr.msk.bf16.mxu1 %vm366_vm4, %v37021_v57 }
0x14d6   : > { %29976 = vmatmul.mubr.msk.bf16.gmra.mrb[120].mxu1 %vm366_vm4, %v37027_v18 }
0x14d7   : > { %29979 = vmatprep.mubr.msk.bf16.mxu1 %vm366_vm4, %v37029_v16 }
0x14de   : > { %29980 = vmatmul.mubr.msk.bf16.gmra.mrb[124].mxu1 %vm366_vm4, %v37035_v2 }
0x14df   : > { %29991 = vmatprep.mubr.msk.bf16.mxu1 %vm366_vm4, %v21495_v41  ;;  %v37086_v41 = vpack.c.bf16 %v21484_v31, %v21483_v35  ;;  %v32567_v35 = vld [vmem:[%s37583_s5 + $0xb0] sm:$0xff]  }
0x14e0   : > { %v23080_v31 = vld [vmem:[#allocation3 + $0x81] sm:$0xff] }
0x14e6   : > { %29992 = vmatmul.mubr.msk.bf16.vlgmr.msra.gmra.mrb[96].mxu1 %vm366_vm4, %v37040_v40 }
0x14e7   : > { %30024 = vmatpush3.bf16.msra.mxu1 %v32557_v50  ;;  %29995 = vmatprep.mubr.msk.bf16.mxu1 %vm366_vm4, %v37045_v47  ;;  %v32560_v50 = vld [vmem:[%s37583_s5 + $0x78] sm:$0xff]  }
0x14e8   : > { %30025 = vmatprep.subr.bf16.mxu1 %v32558_v39 }
0x14eb   : > { %30026 = vmatpush3.bf16.msra.mxu1 %v32558_v39  ;;  %v37092_v39 = vpack.c.bf16 %v21486_v22, %v21485_v46  ;;  %v23082_v46 = vld [vmem:[#allocation3 + $0x99] sm:$0xff] }
0x14ec   : > { %30027 = vmatprep.subr.bf16.mxu1 %v32559_v15  ;;  %v23079_v22 = vld [vmem:[#allocation3 + $0x79] sm:$0xff] }
0x14ee   : > { %29996 = vmatmul.mubr.msk.bf16.gmra.mrb[100].mxu1 %vm366_vm4, %v37054_v49 }
0x14ef   : > { %29999 = vmatprep.mubr.msk.bf16.mxu1 %vm366_vm4, %v37059_v28  ;;  %30028 = vmatpush3.bf16.msra.mxu1 %v32559_v15  ;;  %v37094_v15 = vpack.c.bf16 %v21488_v0, %v21487_v21  ;;  %v23108_v21 = vpack.c.bf16 %v23080_v31, %v23079_v22  ;;  %v23081_v0 = vld [vmem:[#allocation3 + $0x91] sm:$0xff] }
0x14f0   : > { %30029 = vmatprep.subr.bf16.mxu1 %v32560_v50 }
0x14f3   : > { %30030 = vmatpush3.bf16.msra.mxu1 %v32560_v50  ;;  %v37100_v50 = vpack.c.bf16 %v21490_v37, %v21489_v5  ;;  %v32580_v5 = vld [vmem:[%s37583_s5 + $0x118] sm:$0xff]   ;;  %v23109_v37 = vpack.c.bf16 %v23082_v46, %v23081_v0 }
0x14f4   : > { %30063 = vmatprep.subr.bf16.mxu1 %v32561_v9 }
0x14f6   : > { %30000 = vmatmul.mubr.msk.bf16.gmra.mrb[104].mxu1 %vm366_vm4, %v37068_v26 }
0x14f7   : > { %30003 = vmatprep.mubr.msk.bf16.mxu1 %vm366_vm4, %v37070_v48 }
0x14fe   : > { %30004 = vmatmul.mubr.msk.bf16.gmra.mrb[108].mxu1 %vm366_vm4, %v37076_v52 }
0x14ff   : > { %30007 = vmatprep.mubr.msk.bf16.mxu1 %vm366_vm4, %v37078_v11 }
0x1506   : > { %30008 = vmatmul.mubr.msk.bf16.gmra.mrb[112].mxu1 %vm366_vm4, %v37084_v17 }
0x1507   : > { %30011 = vmatprep.mubr.msk.bf16.mxu1 %vm366_vm4, %v37086_v41 }
0x150e   : > { %30012 = vmatmul.mubr.msk.bf16.gmra.mrb[116].mxu1 %vm366_vm4, %v37092_v39 }
0x150f   : > { %30015 = vmatprep.mubr.msk.bf16.mxu1 %vm366_vm4, %v37094_v15 }
0x1516   : > { %30016 = vmatmul.mubr.msk.bf16.gmra.mrb[120].mxu1 %vm366_vm4, %v37100_v50 }
0x1517   : > { %30019 = vmatprep.mubr.msk.bf16.mxu1 %vm366_vm4, %v37102_v43 }
0x151e   : > { %30020 = vmatmul.mubr.msk.bf16.gmra.mrb[124].mxu1 %vm366_vm4, %v37108_v56 }
0x151f   : > { %30031 = vmatprep.mubr.msk.bf16.mxu1 %vm366_vm4, %v36966_v51  ;;  %v32564_v51 = vld [vmem:[%s37583_s5 + $0x98] sm:$0xff]  }
0x1526   : > { %30032 = vmatmul.mubr.msk.bf16.vlgmr.msra.gmra.mrb[96].mxu1 %vm366_vm4, %v36971_v62 }
0x1527   : > { %30064 = vmatpush3.bf16.msra.mxu1 %v32561_v9  ;;  %30035 = vmatprep.mubr.msk.bf16.mxu1 %vm366_vm4, %v36981_v44  ;;  %v32565_v9 = vld [vmem:[%s37583_s5 + $0xa0] sm:$0xff]  }
0x1528   : > { %30065 = vmatprep.subr.bf16.mxu1 %v32562_v13 }
0x152b   : > { %30066 = vmatpush3.bf16.msra.mxu1 %v32562_v13  ;;  %v23085_v13 = vld [vmem:[#allocation3 + $0xc1] sm:$0xff] }
0x152c   : > { %30067 = vmatprep.subr.bf16.mxu1 %v32563_v33 }
0x152e   : > { %30036 = vmatmul.mubr.msk.bf16.gmra.mrb[100].mxu1 %vm366_vm4, %v36986_v29 }
0x152f   : > { %30039 = vmatprep.mubr.msk.bf16.mxu1 %vm366_vm4, %v36995_v30  ;;  %30068 = vmatpush3.bf16.msra.mxu1 %v32563_v33  ;;  %v23111_v33 = vpack.c.bf16 %v23086_v59, %v23085_v13 }
0x1530   : > { %30069 = vmatprep.subr.bf16.mxu1 %v32564_v51 }
0x1533   : > { %30070 = vmatpush3.bf16.msra.mxu1 %v32564_v51  ;;  %v23088_v51 = vld [vmem:[#allocation3 + $0xe1] sm:$0xff] }
0x1534   : > { %30103 = vmatprep.subr.bf16.mxu1 %v32565_v9  ;;  %v23112_v42 = vpack.c.bf16 %v23088_v51, %v23087_v54 }
0x1536   : > { %30040 = vmatmul.mubr.msk.bf16.gmra.mrb[104].mxu1 %vm366_vm4, %v36997_v25 }
0x1537   : > { %30043 = vmatprep.mubr.msk.bf16.mxu1 %vm366_vm4, %v37003_v61 }
0x153e   : > { %30044 = vmatmul.mubr.msk.bf16.gmra.mrb[108].mxu1 %vm366_vm4, %v37005_v45 }
0x153f   : > { %30047 = vmatprep.mubr.msk.bf16.mxu1 %vm366_vm4, %v37011_v7 }
0x1546   : > { %30048 = vmatmul.mubr.msk.bf16.gmra.mrb[112].mxu1 %vm366_vm4, %v37013_v8 }
0x1547   : > { %30051 = vmatprep.mubr.msk.bf16.mxu1 %vm366_vm4, %v37019_v63 }
0x154e   : > { %30052 = vmatmul.mubr.msk.bf16.gmra.mrb[116].mxu1 %vm366_vm4, %v37021_v57 }
0x154f   : > { %30055 = vmatprep.mubr.msk.bf16.mxu1 %vm366_vm4, %v37027_v18 }
0x1556   : > { %30056 = vmatmul.mubr.msk.bf16.gmra.mrb[120].mxu1 %vm366_vm4, %v37029_v16 }
0x1557   : > { %30059 = vmatprep.mubr.msk.bf16.mxu1 %vm366_vm4, %v37035_v2 }
0x155e   : > { %30060 = vmatmul.mubr.msk.bf16.gmra.mrb[124].mxu1 %vm366_vm4, %v37154_v4 }
0x155f   : > { %30071 = vmatprep.mubr.msk.bf16.mxu1 %vm366_vm4, %v36842_v14  ;;  %v32568_v14 = vld [vmem:[%s37583_s5 + $0xb8] sm:$0xff]  }
0x1566   : > { %30072 = vmatmul.mubr.msk.bf16.vlgmr.msra.gmra.mrb[96].mxu1 %vm366_vm4, %v36848_v36  ;;  %v32569_v36 = vld [vmem:[%s37583_s5 + $0xc0] sm:$0xff]  }
0x1567   : > { %30104 = vmatpush3.bf16.msra.mxu1 %v32565_v9  ;;  %30075 = vmatprep.mubr.msk.bf16.mxu1 %vm366_vm4, %v36864_v32  ;;  %v22138_v32 = vld [vmem:[#allocation3 + $0x189] sm:$0xff]  ;;  %v23090_v9 = vld [vmem:[#allocation3 + $0xf9] sm:$0xff] }
0x1568   : > { %30105 = vmatprep.subr.bf16.mxu1 %v32566_v23 }
0x156b   : > { %30106 = vmatpush3.bf16.msra.mxu1 %v32566_v23 }
0x156c   : > { %30107 = vmatprep.subr.bf16.mxu1 %v32567_v35 }
0x156e   : > { %30076 = vmatmul.mubr.msk.bf16.gmra.mrb[100].mxu1 %vm366_vm4, %v36870_v24  ;;  %v22137_v24 = vld [vmem:[#allocation3 + $0x181] sm:$0xff] }
0x156f   : > { %30079 = vmatprep.mubr.msk.bf16.mxu1 %vm366_vm4, %v36888_v55  ;;  %30108 = vmatpush3.bf16.msra.mxu1 %v32567_v35  ;;  %v37200_v55 = vpack.c.bf16 %v22138_v32, %v22137_v24  ;;  %v23092_v35 = vld [vmem:[#allocation3 + $0x111] sm:$0xff]  ;;  %v23093_v24 = vld [vmem:[#allocation3 + $0x121] sm:$0xff] }
0x1570   : > { %30109 = vmatprep.subr.bf16.mxu1 %v32568_v14 }
0x1573   : > { %30110 = vmatpush3.bf16.msra.mxu1 %v32568_v14  ;;  %v23094_v14 = vld [vmem:[#allocation3 + $0x129] sm:$0xff] }
0x1574   : > { %30143 = vmatprep.subr.bf16.mxu1 %v32569_v36 }
0x1576   : > { %30080 = vmatmul.mubr.msk.bf16.gmra.mrb[104].mxu1 %vm366_vm4, %v36892_v60  ;;  %v32570_v60 = vld [vmem:[%s37583_s5 + $0xc8] sm:$0xff]  }
0x1577   : > { %30083 = vmatprep.mubr.msk.bf16.mxu1 %vm366_vm4, %v36905_v6  ;;  %v32571_v6 = vld [vmem:[%s37583_s5 + $0xd0] sm:$0xff]  }
0x157e   : > { %30084 = vmatmul.mubr.msk.bf16.gmra.mrb[108].mxu1 %vm366_vm4, %v36908_v34  ;;  %v32572_v34 = vld [vmem:[%s37583_s5 + $0xd8] sm:$0xff]  }
0x157f   : > { %30087 = vmatprep.mubr.msk.bf16.mxu1 %vm366_vm4, %v36921_v27  ;;  %v32573_v27 = vld [vmem:[%s37583_s5 + $0xe0] sm:$0xff]  }
0x1586   : > { %30088 = vmatmul.mubr.msk.bf16.gmra.mrb[112].mxu1 %vm366_vm4, %v36924_v12  ;;  %v22459_v12 = vld [vmem:[#allocation3 + $0x182] sm:$0xff] }
0x1587   : > { %30091 = vmatprep.mubr.msk.bf16.mxu1 %vm366_vm4, %v36937_v20  ;;  %v22460_v20 = vld [vmem:[#allocation3 + $0x18a] sm:$0xff] }
0x158e   : > { %30092 = vmatmul.mubr.msk.bf16.gmra.mrb[116].mxu1 %vm366_vm4, %v36940_v3  ;;  %v37246_v3 = vpack.c.bf16 %v22460_v20, %v22459_v12  ;;  %v23097_v20 = vld [vmem:[#allocation3 + $0x151] sm:$0xff] }
0x158f   : > { %30095 = vmatprep.mubr.msk.bf16.mxu1 %vm366_vm4, %v36953_v58  ;;  %v32574_v58 = vld [vmem:[%s37583_s5 + $0xe8] sm:$0xff]  }
0x1596   : > { %30096 = vmatmul.mubr.msk.bf16.gmra.mrb[120].mxu1 %vm366_vm4, %v36955_v10  ;;  %v32575_v10 = vld [vmem:[%s37583_s5 + $0xf0] sm:$0xff]  }
0x1597   : > { %30099 = vmatprep.mubr.msk.bf16.mxu1 %vm366_vm4, %v36961_v19  ;;  %v32576_v19 = vld [vmem:[%s37583_s5 + $0xf8] sm:$0xff]  }
0x159e   : > { %30100 = vmatmul.mubr.msk.bf16.gmra.mrb[124].mxu1 %vm366_vm4, %v37200_v55 }
0x159f   : > { %30111 = vmatprep.mubr.msk.bf16.mxu1 %vm366_vm4, %v37040_v40  ;;  %v32579_v40 = vld [vmem:[%s37583_s5 + $0x110] sm:$0xff]  }
0x15a6   : > { %30112 = vmatmul.mubr.msk.bf16.vlgmr.msra.gmra.mrb[96].mxu1 %vm366_vm4, %v37045_v47 }
0x15a7   : > { %30144 = vmatpush3.bf16.msra.mxu1 %v32569_v36  ;;  %30115 = vmatprep.mubr.msk.bf16.mxu1 %vm366_vm4, %v37054_v49  ;;  %v23091_v36 = vld [vmem:[#allocation3 + $0x109] sm:$0xff] }
0x15a8   : > { %30145 = vmatprep.subr.bf16.mxu1 %v32570_v60  ;;  %v23114_v32 = vpack.c.bf16 %v23092_v35, %v23091_v36 }
0x15ab   : > { %30146 = vmatpush3.bf16.msra.mxu1 %v32570_v60  ;;  %v23115_v60 = vpack.c.bf16 %v23094_v14, %v23093_v24 }
0x15ac   : > { %30147 = vmatprep.subr.bf16.mxu1 %v32571_v6 }
0x15ae   : > { %30116 = vmatmul.mubr.msk.bf16.gmra.mrb[100].mxu1 %vm366_vm4, %v37059_v28 }
0x15af   : > { %30119 = vmatprep.mubr.msk.bf16.mxu1 %vm366_vm4, %v37068_v26  ;;  %30148 = vmatpush3.bf16.msra.mxu1 %v32571_v6  ;;  %v23096_v6 = vld [vmem:[#allocation3 + $0x141] sm:$0xff] }
0x15b0   : > { %30149 = vmatprep.subr.bf16.mxu1 %v32572_v34 }
0x15b3   : > { %30150 = vmatpush3.bf16.msra.mxu1 %v32572_v34  ;;  %v23098_v34 = vld [vmem:[#allocation3 + $0x159] sm:$0xff] }
0x15b4   : > { %30183 = vmatprep.subr.bf16.mxu1 %v32573_v27 }
0x15b6   : > { %30120 = vmatmul.mubr.msk.bf16.gmra.mrb[104].mxu1 %vm366_vm4, %v37070_v48 }
0x15b7   : > { %30123 = vmatprep.mubr.msk.bf16.mxu1 %vm366_vm4, %v37076_v52 }
0x15be   : > { %30124 = vmatmul.mubr.msk.bf16.gmra.mrb[108].mxu1 %vm366_vm4, %v37078_v11 }
0x15bf   : > { %30127 = vmatprep.mubr.msk.bf16.mxu1 %vm366_vm4, %v37084_v17 }
0x15c6   : > { %30128 = vmatmul.mubr.msk.bf16.gmra.mrb[112].mxu1 %vm366_vm4, %v37086_v41 }
0x15c7   : > { %30131 = vmatprep.mubr.msk.bf16.mxu1 %vm366_vm4, %v37092_v39 }
0x15ce   : > { %30132 = vmatmul.mubr.msk.bf16.gmra.mrb[116].mxu1 %vm366_vm4, %v37094_v15 }
0x15cf   : > { %30135 = vmatprep.mubr.msk.bf16.mxu1 %vm366_vm4, %v37100_v50 }
0x15d6   : > { %30136 = vmatmul.mubr.msk.bf16.gmra.mrb[120].mxu1 %vm366_vm4, %v37102_v43 }
0x15d7   : > { %30139 = vmatprep.mubr.msk.bf16.mxu1 %vm366_vm4, %v37108_v56 }
0x15de   : > { %30140 = vmatmul.mubr.msk.bf16.gmra.mrb[124].mxu1 %vm366_vm4, %v37246_v3 }
0x15df   : > { %30151 = vmatprep.mubr.msk.bf16.mxu1 %vm366_vm4, %v36971_v62  ;;  %v32577_v62 = vld [vmem:[%s37583_s5 + $0x100] sm:$0xff]  }
0x15e6   : > { %30152 = vmatmul.mubr.msk.bf16.vlgmr.msra.gmra.mrb[96].mxu1 %vm366_vm4, %v36981_v44  ;;  %v22781_v44 = vld [vmem:[#allocation3 + $0x198] sm:$0xff] }
0x15e7   : > { %30184 = vmatpush3.bf16.msra.mxu1 %v32573_v27  ;;  %30155 = vmatprep.mubr.msk.bf16.mxu1 %vm366_vm4, %v36986_v29  ;;  %v22782_v29 = vld [vmem:[#allocation3 + $0x1a0] sm:$0xff] }
0x15e8   : > { %30185 = vmatprep.subr.bf16.mxu1 %v32574_v58  ;;  %v23095_v27 = vld [vmem:[#allocation3 + $0x139] sm:$0xff] }
0x15e9   : > { %v23116_v12 = vpack.c.bf16 %v23096_v6, %v23095_v27 }
0x15eb   : > { %30186 = vmatpush3.bf16.msra.mxu1 %v32574_v58  ;;  %v23117_v58 = vpack.c.bf16 %v23098_v34, %v23097_v20 }
0x15ec   : > { %30187 = vmatprep.subr.bf16.mxu1 %v32575_v10 }
0x15ee   : > { %30156 = vmatmul.mubr.msk.bf16.gmra.mrb[100].mxu1 %vm366_vm4, %v36995_v30  ;;  %v22798_v30 = vpack.c.bf16 %v22782_v29, %v22781_v44  ;;  %v23103_v44 = vld [vmem:[#allocation3 + $0x199] sm:$0xff]  ;;  %v23104_v29 = vld [vmem:[#allocation3 + $0x1a1] sm:$0xff] }
0x15ef   : > { %30159 = vmatprep.mubr.msk.bf16.mxu1 %vm366_vm4, %v36997_v25  ;;  %30188 = vmatpush3.bf16.msra.mxu1 %v32575_v10  ;;  %v23074_v25 = vld [vmem:[#allocation3 + $0x39] sm:$0xff]  ;;  %v23100_v10 = vld [vmem:[#allocation3 + $0x171] sm:$0xff] }
0x15f0   : > { %30189 = vmatprep.subr.bf16.mxu1 %v32576_v19 }
0x15f3   : > { %30190 = vmatpush3.bf16.msra.mxu1 %v32576_v19  ;;  %v23099_v19 = vld [vmem:[#allocation3 + $0x169] sm:$0xff] }
0x15f4   : > { %30223 = vmatprep.subr.bf16.mxu1 %v32577_v62 }
0x15f6   : > { %30160 = vmatmul.mubr.msk.bf16.gmra.mrb[104].mxu1 %vm366_vm4, %v37003_v61  ;;  %v23073_v61 = vld [vmem:[#allocation3 + $0x31] sm:$0xff] }
0x15f7   : > { %30163 = vmatprep.mubr.msk.bf16.mxu1 %vm366_vm4, %v37005_v45  ;;  %v23105_v45 = vpack.c.bf16 %v23074_v25, %v23073_v61 }
0x15fe   : > { %30164 = vmatmul.mubr.msk.bf16.gmra.mrb[108].mxu1 %vm366_vm4, %v37011_v7  ;;  %v23076_v7 = vld [vmem:[#allocation3 + $0x51] sm:$0xff] }
0x15ff   : > { %30167 = vmatprep.mubr.msk.bf16.mxu1 %vm366_vm4, %v37013_v8  ;;  %v23078_v8 = vld [vmem:[#allocation3 + $0x69] sm:$0xff] }
0x1606   : > { %30168 = vmatmul.mubr.msk.bf16.gmra.mrb[112].mxu1 %vm366_vm4, %v37019_v63  ;;  %v23075_v63 = vld [vmem:[#allocation3 + $0x49] sm:$0xff] }
0x1607   : > { %30171 = vmatprep.mubr.msk.bf16.mxu1 %vm366_vm4, %v37021_v57  ;;  %v23106_v57 = vpack.c.bf16 %v23076_v7, %v23075_v63 }
0x160e   : > { %30172 = vmatmul.mubr.msk.bf16.gmra.mrb[116].mxu1 %vm366_vm4, %v37027_v18  ;;  %v23077_v18 = vld [vmem:[#allocation3 + $0x61] sm:$0xff] }
0x160f   : > { %30175 = vmatprep.mubr.msk.bf16.mxu1 %vm366_vm4, %v37029_v16  ;;  %v32578_v16 = vld [vmem:[%s37583_s5 + $0x108] sm:$0xff]  }
0x1616   : > { %30176 = vmatmul.mubr.msk.bf16.gmra.mrb[120].mxu1 %vm366_vm4, %v37035_v2  ;;  %v23107_v2 = vpack.c.bf16 %v23078_v8, %v23077_v18 }
0x1617   : > { %30179 = vmatprep.mubr.msk.bf16.mxu1 %vm366_vm4, %v37154_v4  ;;  %v23089_v4 = vld [vmem:[#allocation3 + $0xf1] sm:$0xff] }
0x1618   : > { %v23113_v23 = vpack.c.bf16 %v23090_v9, %v23089_v4 }
0x161e   : > { %30180 = vmatmul.mubr.msk.bf16.gmra.mrb[124].mxu1 %vm366_vm4, %v22798_v30  ;;  %v23120_v30 = vpack.c.bf16 %v23104_v29, %v23103_v44 }
0x161f   : > { %30191 = vmatprep.mubr.msk.bf16.mxu1 %vm366_vm4, %v23105_v45 }
0x1626   : > { %30192 = vmatmul.mubr.msk.bf16.vlgmr.msra.gmra.mrb[96].mxu1 %vm366_vm4, %v23106_v57 }
0x1627   : > { %30224 = vmatpush3.bf16.msra.mxu1 %v32577_v62  ;;  %30195 = vmatprep.mubr.msk.bf16.mxu1 %vm366_vm4, %v23107_v2  ;;  %v23118_v62 = vpack.c.bf16 %v23100_v10, %v23099_v19 }
0x1628   : > { %30225 = vmatprep.subr.bf16.mxu1 %v32578_v16 }
0x162b   : > { %30226 = vmatpush3.bf16.msra.mxu1 %v32578_v16 }
0x162c   : > { %30227 = vmatprep.subr.bf16.mxu1 %v32579_v40 }
0x162e   : > { %30196 = vmatmul.mubr.msk.bf16.gmra.mrb[100].mxu1 %vm366_vm4, %v23108_v21 }
0x162f   : > { %30199 = vmatprep.mubr.msk.bf16.mxu1 %vm366_vm4, %v23109_v37  ;;  %30228 = vmatpush3.bf16.msra.mxu1 %v32579_v40 }
0x1630   : > { %30229 = vmatprep.subr.bf16.mxu1 %v32580_v5 }
0x1633   : > { %30230 = vmatpush3.bf16.msra.mxu1 %v32580_v5 }
0x1636   : > { %30200 = vmatmul.mubr.msk.bf16.gmra.mrb[104].mxu1 %vm366_vm4, %v23110_v38 }
0x1637   : > { %30203 = vmatprep.mubr.msk.bf16.mxu1 %vm366_vm4, %v23111_v33 }
0x163e   : > { %30204 = vmatmul.mubr.msk.bf16.gmra.mrb[108].mxu1 %vm366_vm4, %v23112_v42 }
0x163f   : > { %30207 = vmatprep.mubr.msk.bf16.mxu1 %vm366_vm4, %v23113_v23 }
0x1646   : > { %30208 = vmatmul.mubr.msk.bf16.gmra.mrb[112].mxu1 %vm366_vm4, %v23114_v32 }
0x1647   : > { %30211 = vmatprep.mubr.msk.bf16.mxu1 %vm366_vm4, %v23115_v60 }
0x164e   : > { %30212 = vmatmul.mubr.msk.bf16.gmra.mrb[116].mxu1 %vm366_vm4, %v23116_v12 }
0x164f   : > { %30215 = vmatprep.mubr.msk.bf16.mxu1 %vm366_vm4, %v23117_v58 }
0x1656   : > { %30216 = vmatmul.mubr.msk.bf16.gmra.mrb[120].mxu1 %vm366_vm4, %v23118_v62 }
0x1657   : > { %30219 = vmatprep.mubr.msk.bf16.mxu1 %vm366_vm4, %v37200_v55 }
0x165e   : > { %30220 = vmatmul.mubr.msk.bf16.gmra.mrb[124].mxu1 %vm366_vm4, %v23120_v30 }
0x165f   : > { %30231 = vmatprep.mubr.msk.bf16.mxu1 %vm366_vm4, %v37045_v47  ;;  %v23425_v47 = vld [vmem:[#allocation3 + $0x19a] sm:$0xff] }
0x1666   : > { %30232 = vmatmul.mubr.msk.bf16.vlgmr.msra.gmra.mrb[96].mxu1 %vm366_vm4, %v37054_v49  ;;  %v23426_v49 = vld [vmem:[#allocation3 + $0x1a2] sm:$0xff] }
0x1667   : > { %30235 = vmatprep.mubr.msk.bf16.mxu1 %vm366_vm4, %v37059_v28  ;;  %v23442_v28 = vpack.c.bf16 %v23426_v49, %v23425_v47 }
0x166e   : > { %30236 = vmatmul.mubr.msk.bf16.gmra.mrb[100].mxu1 %vm366_vm4, %v37068_v26  ;;  %v37353_v26 = vld [vmem:[%s37584_s6] ss:$0 sm:$0xff] }
0x166f   : > { %30239 = vmatprep.mubr.msk.bf16.mxu1 %vm366_vm4, %v37070_v48 }
0x1676   : > { %30240 = vmatmul.mubr.msk.bf16.gmra.mrb[104].mxu1 %vm366_vm4, %v37076_v52 }
0x1677   : > { %30243 = vmatprep.mubr.msk.bf16.mxu1 %vm366_vm4, %v37078_v11 }
0x167e   : > { %30244 = vmatmul.mubr.msk.bf16.gmra.mrb[108].mxu1 %vm366_vm4, %v37084_v17 }
0x167f   : > { %30247 = vmatprep.mubr.msk.bf16.mxu1 %vm366_vm4, %v37086_v41 }
0x1686   : > { %30248 = vmatmul.mubr.msk.bf16.gmra.mrb[112].mxu1 %vm366_vm4, %v37092_v39 }
0x1687   : > { %30251 = vmatprep.mubr.msk.bf16.mxu1 %vm366_vm4, %v37094_v15 }
0x168e   : > { %30252 = vmatmul.mubr.msk.bf16.gmra.mrb[116].mxu1 %vm366_vm4, %v37100_v50 }
0x168f   : > { %30255 = vmatprep.mubr.msk.bf16.mxu1 %vm366_vm4, %v37102_v43 }
0x1696   : > { %30256 = vmatmul.mubr.msk.bf16.gmra.mrb[120].mxu1 %vm366_vm4, %v37108_v56 }
0x1697   : > { %30259 = vmatprep.mubr.msk.bf16.mxu1 %vm366_vm4, %v37246_v3 }
0x169e   : > { %30260 = vmatmul.mubr.msk.bf16.gmra.mrb[124].mxu1 %vm366_vm4, %v23442_v28 }
0x1739   : > { %v30233_v48 = vpop.f32.mrb[96].mxu1 }
0x173a   : > { %v23725_v52 = vadd.f32 %v30233_v48, %v37353_v26  ;;  %v23558_v11 = vpop.f32.mrb[97].mxu1 }
0x173b   : > { %v23723_v17 = vadd.f32 %v37353_v26, %v23558_v11  ;;  %v30234_v41 = vpop.f32.mrb[98].mxu1 }
0x173c   : > { %v23757_v39 = vsub.f32 %v23725_v52, %v23725_v52  ;;  %23950 = vst.msk [vmem:[%s37359_s11 + $0x10] sm:$0xff] %vm23947_vm7, %v23725_v52  ;;  %v23726_v15 = vadd.f32 %v30234_v41, %v37353_v26  ;;  %v23561_v50 = vpop.f32.mrb[99].mxu1 }
0x173d   : > { %v23755_v43 = vsub.f32 %v23723_v17, %v23723_v17  ;;  %23948 = vst.msk [vmem:[%s37359_s11] sm:$0xff] %vm23947_vm7, %v23723_v17  ;;  %v23724_v56 = vadd.f32 %v37353_v26, %v23561_v50 }
0x173e   : > { %v23791_v55 = vmul.f32 1.442695, %v23757_v39  ;;  %v23758_v3 = vsub.f32 %v23726_v15, %v23726_v15  ;;  %23951 = vst.msk [vmem:[%s37359_s11 + $0x18] sm:$0xff] %vm23947_vm7, %v23726_v15 }
0x173f   : > { %v23787_v25 = vmul.f32 1.442695, %v23755_v43  ;;  %v23756_v61 = vsub.f32 %v23724_v56, %v23724_v56  ;;  %23949 = vst.msk [vmem:[%s37359_s11 + $0x8] sm:$0xff] %vm23947_vm7, %v23724_v56 }
0x1740   : > { %32581 = vpow2.f32 %v23791_v55  ;;  %v23793_v45 = vmul.f32 1.442695, %v23758_v3 }
0x1741   : > { %32583 = vpow2.f32 %v23787_v25  ;;  %v23789_v7 = vmul.f32 1.442695, %v23756_v61  ;;  %v30237_v8 = vpop.f32.mrb[100].mxu1 }
0x1742   : > { %32585 = vpow2.f32 %v23793_v45  ;;  %v23729_v63 = vadd.f32 %v30237_v8, %v37353_v26  ;;  %v23574_v57 = vpop.f32.mrb[101].mxu1 }
0x1743   : > { %32587 = vpow2.f32 %v23789_v7  ;;  %v23727_v18 = vadd.f32 %v37353_v26, %v23574_v57  ;;  %v30238_v16 = vpop.f32.mrb[102].mxu1 }
0x1744   : > { %v23761_v2 = vsub.f32 %v23729_v63, %v23729_v63  ;;  %23954 = vst.msk [vmem:[%s37359_s11 + $0x30] sm:$0xff] %vm23947_vm7, %v23729_v63  ;;  %v23730_v40 = vadd.f32 %v30238_v16, %v37353_v26  ;;  %v23577_v31 = vpop.f32.mrb[103].mxu1 }
0x1745   : > { %v23759_v46 = vsub.f32 %v23727_v18, %v23727_v18  ;;  %23952 = vst.msk [vmem:[%s37359_s11 + $0x20] sm:$0xff] %vm23947_vm7, %v23727_v18  ;;  %v23728_v22 = vadd.f32 %v37353_v26, %v23577_v31 }
0x1746   : > { %v23799_v21 = vmul.f32 1.442695, %v23761_v2  ;;  %v23762_v0 = vsub.f32 %v23730_v40, %v23730_v40  ;;  %23955 = vst.msk [vmem:[%s37359_s11 + $0x38] sm:$0xff] %vm23947_vm7, %v23730_v40 }
0x1747   : > { %v23795_v5 = vmul.f32 1.442695, %v23759_v46  ;;  %v23760_v37 = vsub.f32 %v23728_v22, %v23728_v22  ;;  %23953 = vst.msk [vmem:[%s37359_s11 + $0x28] sm:$0xff] %vm23947_vm7, %v23728_v22 }
0x1748   : > { %32589 = vpow2.f32 %v23799_v21  ;;  %v23801_v1 = vmul.f32 1.442695, %v23762_v0 }
0x1749   : > { %32591 = vpow2.f32 %v23795_v5  ;;  %v30241_v59 = vpop.f32.mrb[104].mxu1  ;;  %v23797_v51 = vmul.f32 1.442695, %v23760_v37 }
0x174a   : > { %v32582_v53 = vpop.eup %32581  ;;  %32593 = vpow2.f32 %v23801_v1  ;;  %v23733_v38 = vadd.f32 %v30241_v59, %v37353_v26  ;;  %v23590_v13 = vpop.f32.mrb[105].mxu1 }
0x174b   : > { %v32584_v33 = vpop.eup %32583  ;;  %32595 = vrcp.f32 %v32582_v53  ;;  %v23731_v9 = vadd.f32 %v37353_v26, %v23590_v13  ;;  %v30242_v54 = vpop.f32.mrb[106].mxu1 }
0x174c   : > { %v32586_v42 = vpop.eup %32585  ;;  %32597 = vrcp.f32 %v32584_v33  ;;  %v23765_v4 = vsub.f32 %v23733_v38, %v23733_v38  ;;  %23958 = vst.msk [vmem:[%s37359_s11 + $0x50] sm:$0xff] %vm23947_vm7, %v23733_v38  ;;  %v23734_v23 = vadd.f32 %v30242_v54, %v37353_v26  ;;  %v23593_v35 = vpop.f32.mrb[107].mxu1 }
0x174d   : > { %v32588_v14 = vpop.eup %32587  ;;  %32599 = vrcp.f32 %v32586_v42  ;;  %v23763_v36 = vsub.f32 %v23731_v9, %v23731_v9  ;;  %23956 = vst.msk [vmem:[%s37359_s11 + $0x40] sm:$0xff] %vm23947_vm7, %v23731_v9  ;;  %v23732_v32 = vadd.f32 %v37353_v26, %v23593_v35 }
0x174e   : > { %32601 = vrcp.f32 %v32588_v14  ;;  %v23807_v24 = vmul.f32 1.442695, %v23765_v4  ;;  %v23766_v60 = vsub.f32 %v23734_v23, %v23734_v23  ;;  %23959 = vst.msk [vmem:[%s37359_s11 + $0x58] sm:$0xff] %vm23947_vm7, %v23734_v23 }
0x174f   : > { %32603 = vpow2.f32 %v23797_v51  ;;  %v23803_v6 = vmul.f32 1.442695, %v23763_v36  ;;  %v23764_v34 = vsub.f32 %v23732_v32, %v23732_v32  ;;  %23957 = vst.msk [vmem:[%s37359_s11 + $0x48] sm:$0xff] %vm23947_vm7, %v23732_v32 }
0x1750   : > { %32605 = vpow2.f32 %v23807_v24  ;;  %v23809_v27 = vmul.f32 1.442695, %v23766_v60 }
0x1751   : > { %32607 = vpow2.f32 %v23803_v6  ;;  %v30245_v12 = vpop.f32.mrb[108].mxu1  ;;  %v23805_v58 = vmul.f32 1.442695, %v23764_v34 }
0x1752   : > { %v37397_v20 = vpop.eup %32589  ;;  %32609 = vpow2.f32 %v23809_v27  ;;  %v23737_v10 = vadd.f32 %v30245_v12, %v37353_v26  ;;  %v23606_v19 = vpop.f32.mrb[109].mxu1 }
0x1753   : > { %v37400_v62 = vpop.eup %32591  ;;  %32611 = vrcp.f32 %v37397_v20  ;;  %v23735_v44 = vadd.f32 %v37353_v26, %v23606_v19  ;;  %v30246_v29 = vpop.f32.mrb[110].mxu1 }
0x1754   : > { %v37404_v30 = vpop.eup %32593  ;;  %32613 = vrcp.f32 %v37400_v62  ;;  %v23769_v47 = vsub.f32 %v23737_v10, %v23737_v10  ;;  %23962 = vst.msk [vmem:[%s37359_s11 + $0x70] sm:$0xff] %vm23947_vm7, %v23737_v10  ;;  %v23738_v49 = vadd.f32 %v30246_v29, %v37353_v26  ;;  %v23609_v28 = vpop.f32.mrb[111].mxu1 }
0x1755   : > { %v32596_v48 = vpop.eup %32595  ;;  %32615 = vrcp.f32 %v37404_v30  ;;  %v23767_v52 = vsub.f32 %v23735_v44, %v23735_v44  ;;  %23960 = vst.msk [vmem:[%s37359_s11 + $0x60] sm:$0xff] %vm23947_vm7, %v23735_v44  ;;  %v23736_v11 = vadd.f32 %v37353_v26, %v23609_v28 }
0x1756   : > { %v32598_v17 = vpop.eup %32597  ;;  %v23888_v41 = vmul.f32 %v32596_v48, %v32582_v53  ;;  %32617 = vpow2.f32 %v23805_v58  ;;  %v23815_v39 = vmul.f32 1.442695, %v23769_v47  ;;  %v23770_v15 = vsub.f32 %v23738_v49, %v23738_v49  ;;  %23963 = vst.msk [vmem:[%s37359_s11 + $0x78] sm:$0xff] %vm23947_vm7, %v23738_v49 }
0x1757   : > { %v32600_v50 = vpop.eup %32599  ;;  %v23884_v43 = vmul.f32 %v32598_v17, %v32584_v33  ;;  %v23811_v56 = vmul.f32 1.442695, %v23767_v52  ;;  %v23768_v55 = vsub.f32 %v23736_v11, %v23736_v11  ;;  %23961 = vst.msk [vmem:[%s37359_s11 + $0x68] sm:$0xff] %vm23947_vm7, %v23736_v11 }
0x1758   : > { %v32602_v3 = vpop.eup %32601  ;;  %23982 = vst.msk [vmem:[%s37414_s15 + $0x10] sm:$0xff] %vm23947_vm7, %v23888_v41  ;;  %v23890_v25 = vmul.f32 %v32600_v50, %v32586_v42  ;;  %32619 = vpow2.f32 %v23815_v39  ;;  %v23817_v63 = vmul.f32 1.442695, %v23770_v15 }
0x1759   : > { %v37426_v61 = vpop.eup %32603  ;;  %23980 = vst.msk [vmem:[%s37414_s15] sm:$0xff] %vm23947_vm7, %v23884_v43  ;;  %v23886_v45 = vmul.f32 %v32602_v3, %v32588_v14  ;;  %32621 = vpow2.f32 %v23811_v56  ;;  %v30249_v7 = vpop.f32.mrb[112].mxu1  ;;  %v23813_v2 = vmul.f32 1.442695, %v23768_v55 }
0x175a   : > { %v37430_v8 = vpop.eup %32605  ;;  %23983 = vst.msk [vmem:[%s37414_s15 + $0x18] sm:$0xff] %vm23947_vm7, %v23890_v25  ;;  %32623 = vrcp.f32 %v37426_v61  ;;  %v23741_v57 = vadd.f32 %v30249_v7, %v37353_v26  ;;  %v23622_v18 = vpop.f32.mrb[113].mxu1 }
0x175b   : > { %v37436_v16 = vpop.eup %32607  ;;  %23981 = vst.msk [vmem:[%s37414_s15 + $0x8] sm:$0xff] %vm23947_vm7, %v23886_v45  ;;  %32625 = vrcp.f32 %v37430_v8  ;;  %v23739_v40 = vadd.f32 %v37353_v26, %v23622_v18  ;;  %v30250_v31 = vpop.f32.mrb[114].mxu1 }
0x175c   : > { %v37442_v46 = vpop.eup %32609  ;;  %32627 = vrcp.f32 %v37436_v16  ;;  %v23773_v22 = vsub.f32 %v23741_v57, %v23741_v57  ;;  %23966 = vst.msk [vmem:[%s37359_s11 + $0x90] sm:$0xff] %vm23947_vm7, %v23741_v57  ;;  %v23742_v21 = vadd.f32 %v30250_v31, %v37353_v26  ;;  %v23625_v0 = vpop.f32.mrb[115].mxu1 }
0x175d   : > { %v32612_v5 = vpop.eup %32611  ;;  %32629 = vrcp.f32 %v37442_v46  ;;  %v23771_v37 = vsub.f32 %v23739_v40, %v23739_v40  ;;  %23964 = vst.msk [vmem:[%s37359_s11 + $0x80] sm:$0xff] %vm23947_vm7, %v23739_v40  ;;  %v23740_v1 = vadd.f32 %v37353_v26, %v23625_v0 }
0x175e   : > { %v32614_v59 = vpop.eup %32613  ;;  %v23896_v53 = vmul.f32 %v32612_v5, %v37397_v20  ;;  %32631 = vpow2.f32 %v23817_v63  ;;  %v23823_v38 = vmul.f32 1.442695, %v23773_v22  ;;  %v23774_v13 = vsub.f32 %v23742_v21, %v23742_v21  ;;  %23967 = vst.msk [vmem:[%s37359_s11 + $0x98] sm:$0xff] %vm23947_vm7, %v23742_v21 }
0x175f   : > { %v32616_v33 = vpop.eup %32615  ;;  %v23892_v51 = vmul.f32 %v32614_v59, %v37400_v62  ;;  %32633 = vpow2.f32 %v23813_v2  ;;  %v23819_v9 = vmul.f32 1.442695, %v23771_v37  ;;  %v23772_v54 = vsub.f32 %v23740_v1, %v23740_v1  ;;  %23965 = vst.msk [vmem:[%s37359_s11 + $0x88] sm:$0xff] %vm23947_vm7, %v23740_v1 }
0x1760   : > { %v32618_v42 = vpop.eup %32617  ;;  %23986 = vst.msk [vmem:[%s37414_s15 + $0x30] sm:$0xff] %vm23947_vm7, %v23896_v53  ;;  %v23898_v4 = vmul.f32 %v32616_v33, %v37404_v30  ;;  %32635 = vpow2.f32 %v23823_v38  ;;  %v23825_v23 = vmul.f32 1.442695, %v23774_v13 }
0x1761   : > { %23984 = vst.msk [vmem:[%s37414_s15 + $0x20] sm:$0xff] %vm23947_vm7, %v23892_v51  ;;  %32637 = vrcp.f32 %v32618_v42  ;;  %v30253_v35 = vpop.f32.mrb[116].mxu1  ;;  %v23821_v36 = vmul.f32 1.442695, %v23772_v54 }
0x1762   : > { %v37463_v14 = vpop.eup %32619  ;;  %23987 = vst.msk [vmem:[%s37414_s15 + $0x38] sm:$0xff] %vm23947_vm7, %v23898_v4  ;;  %32639 = vpow2.f32 %v23819_v9  ;;  %v23745_v32 = vadd.f32 %v30253_v35, %v37353_v26  ;;  %v23638_v24 = vpop.f32.mrb[117].mxu1 }
0x1763   : > { %v37468_v60 = vpop.eup %32621  ;;  %32641 = vrcp.f32 %v37463_v14  ;;  %v23743_v6 = vadd.f32 %v37353_v26, %v23638_v24  ;;  %v30254_v34 = vpop.f32.mrb[118].mxu1 }
0x1764   : > { %v32624_v27 = vpop.eup %32623  ;;  %32643 = vrcp.f32 %v37468_v60  ;;  %v23777_v12 = vsub.f32 %v23745_v32, %v23745_v32  ;;  %23970 = vst.msk [vmem:[%s37359_s11 + $0xb0] sm:$0xff] %vm23947_vm7, %v23745_v32  ;;  %v23746_v20 = vadd.f32 %v30254_v34, %v37353_v26  ;;  %v23641_v58 = vpop.f32.mrb[119].mxu1 }
0x1765   : > { %v32626_v10 = vpop.eup %32625  ;;  %v23894_v19 = vmul.f32 %v32624_v27, %v37426_v61  ;;  %32645 = vpow2.f32 %v23825_v23  ;;  %v23775_v62 = vsub.f32 %v23743_v6, %v23743_v6  ;;  %23968 = vst.msk [vmem:[%s37359_s11 + $0xa0] sm:$0xff] %vm23947_vm7, %v23743_v6  ;;  %v23744_v44 = vadd.f32 %v37353_v26, %v23641_v58 }
0x1766   : > { %v32628_v29 = vpop.eup %32627  ;;  %v23904_v30 = vmul.f32 %v32626_v10, %v37430_v8  ;;  %32647 = vpow2.f32 %v23821_v36  ;;  %v23831_v47 = vmul.f32 1.442695, %v23777_v12  ;;  %v23778_v49 = vsub.f32 %v23746_v20, %v23746_v20  ;;  %23971 = vst.msk [vmem:[%s37359_s11 + $0xb8] sm:$0xff] %vm23947_vm7, %v23746_v20 }
0x1767   : > { %v32630_v28 = vpop.eup %32629  ;;  %23985 = vst.msk [vmem:[%s37414_s15 + $0x28] sm:$0xff] %vm23947_vm7, %v23894_v19  ;;  %v23900_v48 = vmul.f32 %v32628_v29, %v37436_v16  ;;  %v23776_v52 = vsub.f32 %v23744_v44, %v23744_v44  ;;  %23969 = vst.msk [vmem:[%s37359_s11 + $0xa8] sm:$0xff] %vm23947_vm7, %v23744_v44  ;;  %v23827_v41 = vmul.f32 1.442695, %v23775_v62 }
0x1768   : > { %v32632_v11 = vpop.eup %32631  ;;  %23990 = vst.msk [vmem:[%s37414_s15 + $0x50] sm:$0xff] %vm23947_vm7, %v23904_v30  ;;  %v23906_v17 = vmul.f32 %v32630_v28, %v37442_v46  ;;  %32649 = vpow2.f32 %v23831_v47  ;;  %v23833_v43 = vmul.f32 1.442695, %v23778_v49 }
0x1769   : > { %v37491_v39 = vpop.eup %32633  ;;  %23988 = vst.msk [vmem:[%s37414_s15 + $0x40] sm:$0xff] %vm23947_vm7, %v23900_v48  ;;  %32651 = vrcp.f32 %v32632_v11  ;;  %v30257_v15 = vpop.f32.mrb[120].mxu1  ;;  %v23829_v25 = vmul.f32 1.442695, %v23776_v52 }
0x176a   : > { %v37495_v50 = vpop.eup %32635  ;;  %23991 = vst.msk [vmem:[%s37414_s15 + $0x58] sm:$0xff] %vm23947_vm7, %v23906_v17  ;;  %32653 = vrcp.f32 %v37491_v39  ;;  %v23749_v56 = vadd.f32 %v30257_v15, %v37353_v26  ;;  %v23654_v55 = vpop.f32.mrb[121].mxu1 }
0x176b   : > { %v32638_v3 = vpop.eup %32637  ;;  %32655 = vrcp.f32 %v37495_v50  ;;  %v23747_v61 = vadd.f32 %v37353_v26, %v23654_v55  ;;  %v30258_v45 = vpop.f32.mrb[122].mxu1 }
0x176c   : > { %v37503_v7 = vpop.eup %32639  ;;  %v23902_v8 = vmul.f32 %v32638_v3, %v32618_v42  ;;  %32657 = vpow2.f32 %v23827_v41  ;;  %v23781_v63 = vsub.f32 %v23749_v56, %v23749_v56  ;;  %23974 = vst.msk [vmem:[%s37359_s11 + $0xd0] sm:$0xff] %vm23947_vm7, %v23749_v56  ;;  %v23750_v57 = vadd.f32 %v30258_v45, %v37353_v26  ;;  %v23657_v18 = vpop.f32.mrb[123].mxu1 }
0x176d   : > { %v32642_v16 = vpop.eup %32641  ;;  %32659 = vrcp.f32 %v37503_v7  ;;  %v23779_v2 = vsub.f32 %v23747_v61, %v23747_v61  ;;  %23972 = vst.msk [vmem:[%s37359_s11 + $0xc0] sm:$0xff] %vm23947_vm7, %v23747_v61  ;;  %v23748_v40 = vadd.f32 %v37353_v26, %v23657_v18 }
0x176e   : > { %v32644_v31 = vpop.eup %32643  ;;  %23989 = vst.msk [vmem:[%s37414_s15 + $0x48] sm:$0xff] %vm23947_vm7, %v23902_v8  ;;  %v23912_v46 = vmul.f32 %v32642_v16, %v37463_v14  ;;  %32661 = vpow2.f32 %v23833_v43  ;;  %v23839_v22 = vmul.f32 1.442695, %v23781_v63  ;;  %v23782_v21 = vsub.f32 %v23750_v57, %v23750_v57  ;;  %23975 = vst.msk [vmem:[%s37359_s11 + $0xd8] sm:$0xff] %vm23947_vm7, %v23750_v57 }
0x176f   : > { %v32646_v0 = vpop.eup %32645  ;;  %v23908_v5 = vmul.f32 %v32644_v31, %v37468_v60  ;;  %32663 = vpow2.f32 %v23829_v25  ;;  %v23780_v37 = vsub.f32 %v23748_v40, %v23748_v40  ;;  %23973 = vst.msk [vmem:[%s37359_s11 + $0xc8] sm:$0xff] %vm23947_vm7, %v23748_v40  ;;  %v23835_v59 = vmul.f32 1.442695, %v23779_v2 }
0x1770   : > { %v32648_v1 = vpop.eup %32647  ;;  %23994 = vst.msk [vmem:[%s37414_s15 + $0x70] sm:$0xff] %vm23947_vm7, %v23912_v46  ;;  %32665 = vrcp.f32 %v32646_v0  ;;  %v23841_v53 = vmul.f32 1.442695, %v23782_v21 }
0x1771   : > { %23992 = vst.msk [vmem:[%s37414_s15 + $0x60] sm:$0xff] %vm23947_vm7, %v23908_v5  ;;  %32667 = vrcp.f32 %v32648_v1  ;;  %v30261_v38 = vpop.f32.mrb[124].mxu1  ;;  %v23837_v33 = vmul.f32 1.442695, %v23780_v37 }
0x1772   : > { %v32650_v13 = vpop.eup %32649  ;;  %32669 = vpow2.f32 %v23839_v22  ;;  %v23753_v51 = vadd.f32 %v30261_v38, %v37353_v26  ;;  %v23670_v9 = vpop.f32.mrb[125].mxu1 }
0x1773   : > { %v32652_v54 = vpop.eup %32651  ;;  %32671 = vrcp.f32 %v32650_v13  ;;  %v23751_v42 = vadd.f32 %v37353_v26, %v23670_v9  ;;  %v30262_v4 = vpop.f32.mrb[126].mxu1 }
0x1774   : > { %v32654_v23 = vpop.eup %32653  ;;  %v23914_v35 = vmul.f32 %v32652_v54, %v32632_v11  ;;  %32673 = vpow2.f32 %v23835_v59  ;;  %v23785_v14 = vsub.f32 %v23753_v51, %v23753_v51  ;;  %23978 = vst.msk [vmem:[%s37359_s11 + $0xf0] sm:$0xff] %vm23947_vm7, %v23753_v51  ;;  %v23754_v36 = vadd.f32 %v30262_v4, %v37353_v26  ;;  %v23673_v32 = vpop.f32.mrb[127].mxu1 }
0x1775   : > { %v32656_v24 = vpop.eup %32655  ;;  %v23910_v60 = vmul.f32 %v32654_v23, %v37491_v39  ;;  %32675 = vpow2.f32 %v23841_v53  ;;  %v23783_v6 = vsub.f32 %v23751_v42, %v23751_v42  ;;  %23976 = vst.msk [vmem:[%s37359_s11 + $0xe0] sm:$0xff] %vm23947_vm7, %v23751_v42  ;;  %v23752_v34 = vadd.f32 %v37353_v26, %v23673_v32 }
0x1776   : > { %v32658_v27 = vpop.eup %32657  ;;  %23995 = vst.msk [vmem:[%s37414_s15 + $0x78] sm:$0xff] %vm23947_vm7, %v23914_v35  ;;  %v23920_v12 = vmul.f32 %v32656_v24, %v37495_v50  ;;  %32677 = vpow2.f32 %v23837_v33  ;;  %v23847_v20 = vmul.f32 1.442695, %v23785_v14  ;;  %v23786_v58 = vsub.f32 %v23754_v36, %v23754_v36  ;;  %23979 = vst.msk [vmem:[%s37359_s11 + $0xf8] sm:$0xff] %vm23947_vm7, %v23754_v36 }
0x1777   : > { %v32660_v10 = vpop.eup %32659  ;;  %23993 = vst.msk [vmem:[%s37414_s15 + $0x68] sm:$0xff] %vm23947_vm7, %v23910_v60  ;;  %32679 = vrcp.f32 %v32658_v27  ;;  %v23843_v19 = vmul.f32 1.442695, %v23783_v6  ;;  %v23784_v62 = vsub.f32 %v23752_v34, %v23752_v34  ;;  %23977 = vst.msk [vmem:[%s37359_s11 + $0xe8] sm:$0xff] %vm23947_vm7, %v23752_v34 }
0x1778   : > { %v32662_v26 = vpop.eup %32661  ;;  %23998 = vst.msk [vmem:[%s37414_s15 + $0x90] sm:$0xff] %vm23947_vm7, %v23920_v12  ;;  %v23916_v44 = vmul.f32 %v32660_v10, %v37503_v7  ;;  %32681 = vpow2.f32 %v23847_v20  ;;  %v23849_v29 = vmul.f32 1.442695, %v23786_v58 }
0x1779   : > { %v32664_v30 = vpop.eup %32663  ;;  %32683 = vrcp.f32 %v32662_v26  ;;  %v23845_v49 = vmul.f32 1.442695, %v23784_v62 }
0x177a   : > { %v32666_v47 = vpop.eup %32665  ;;  %23996 = vst.msk [vmem:[%s37414_s15 + $0x80] sm:$0xff] %vm23947_vm7, %v23916_v44  ;;  %32685 = vrcp.f32 %v32664_v30 }
0x177b   : > { %v32668_v28 = vpop.eup %32667  ;;  %v23922_v48 = vmul.f32 %v32666_v47, %v32646_v0  ;;  %32687 = vpow2.f32 %v23843_v19 }
0x177c   : > { %v32670_v52 = vpop.eup %32669  ;;  %v23918_v11 = vmul.f32 %v32668_v28, %v32648_v1  ;;  %32689 = vpow2.f32 %v23849_v29 }
0x177d   : > { %v32672_v17 = vpop.eup %32671  ;;  %23999 = vst.msk [vmem:[%s37414_s15 + $0x98] sm:$0xff] %vm23947_vm7, %v23922_v48  ;;  %32691 = vrcp.f32 %v32670_v52 }
0x177e   : > { %v32674_v41 = vpop.eup %32673  ;;  %23997 = vst.msk [vmem:[%s37414_s15 + $0x88] sm:$0xff] %vm23947_vm7, %v23918_v11  ;;  %v23928_v39 = vmul.f32 %v32672_v17, %v32650_v13  ;;  %32693 = vpow2.f32 %v23845_v49 }
0x177f   : > { %v32676_v15 = vpop.eup %32675  ;;  %32695 = vrcp.f32 %v32674_v41 }
0x1780   : > { %v32678_v50 = vpop.eup %32677  ;;  %24002 = vst.msk [vmem:[%s37414_s15 + $0xb0] sm:$0xff] %vm23947_vm7, %v23928_v39  ;;  %32697 = vrcp.f32 %v32676_v15 }
0x1781   : > { %v32680_v43 = vpop.eup %32679  ;;  %32699 = vrcp.f32 %v32678_v50 }
0x1782   : > { %v32682_v56 = vpop.eup %32681  ;;  %v23924_v55 = vmul.f32 %v32680_v43, %v32658_v27 }
0x1783   : > { %v32684_v3 = vpop.eup %32683  ;;  %32701 = vrcp.f32 %v32682_v56 }
0x1784   : > { %v32686_v25 = vpop.eup %32685  ;;  %24000 = vst.msk [vmem:[%s37414_s15 + $0xa0] sm:$0xff] %vm23947_vm7, %v23924_v55  ;;  %v23930_v61 = vmul.f32 %v32684_v3, %v32662_v26 }
0x1785   : > { %v32688_v45 = vpop.eup %32687  ;;  %v23926_v7 = vmul.f32 %v32686_v25, %v32664_v30 }
0x1786   : > { %v32690_v8 = vpop.eup %32689  ;;  %24003 = vst.msk [vmem:[%s37414_s15 + $0xb8] sm:$0xff] %vm23947_vm7, %v23930_v61  ;;  %32703 = vrcp.f32 %v32688_v45 }
0x1787   : > { %v32692_v63 = vpop.eup %32691  ;;  %24001 = vst.msk [vmem:[%s37414_s15 + $0xa8] sm:$0xff] %vm23947_vm7, %v23926_v7  ;;  %32705 = vrcp.f32 %v32690_v8 }
0x1788   : > { %v32694_v57 = vpop.eup %32693  ;;  %v23936_v18 = vmul.f32 %v32692_v63, %v32670_v52 }
0x1789   : > { %v32696_v16 = vpop.eup %32695  ;;  %32707 = vrcp.f32 %v32694_v57 }
0x178a   : > { %v32698_v2 = vpop.eup %32697  ;;  %24006 = vst.msk [vmem:[%s37414_s15 + $0xd0] sm:$0xff] %vm23947_vm7, %v23936_v18  ;;  %v23932_v40 = vmul.f32 %v32696_v16, %v32674_v41 }
0x178b   : > { %v32700_v31 = vpop.eup %32699  ;;  %v23938_v46 = vmul.f32 %v32698_v2, %v32676_v15 }
0x178c   : > { %24004 = vst.msk [vmem:[%s37414_s15 + $0xc0] sm:$0xff] %vm23947_vm7, %v23932_v40  ;;  %v23934_v22 = vmul.f32 %v32700_v31, %v32678_v50 }
0x178d   : > { %v32702_v21 = vpop.eup %32701  ;;  %24007 = vst.msk [vmem:[%s37414_s15 + $0xd8] sm:$0xff] %vm23947_vm7, %v23938_v46 }
0x178e   : > { %24005 = vst.msk [vmem:[%s37414_s15 + $0xc8] sm:$0xff] %vm23947_vm7, %v23934_v22  ;;  %v23944_v0 = vmul.f32 %v32702_v21, %v32682_v56 }
0x1790   : > { %v32704_v5 = vpop.eup %32703  ;;  %24010 = vst.msk [vmem:[%s37414_s15 + $0xf0] sm:$0xff] %vm23947_vm7, %v23944_v0 }
0x1791   : > { %v32706_v37 = vpop.eup %32705  ;;  %v23940_v1 = vmul.f32 %v32704_v5, %v32688_v45 }
0x1792   : > { %v23946_v59 = vmul.f32 %v32706_v37, %v32690_v8 }
0x1793   : > { %v32708_v53 = vpop.eup %32707  ;;  %24008 = vst.msk [vmem:[%s37414_s15 + $0xe0] sm:$0xff] %vm23947_vm7, %v23940_v1 }
0x1794   : > { %24011 = vst.msk [vmem:[%s37414_s15 + $0xf8] sm:$0xff] %vm23947_vm7, %v23946_v59  ;;  %v23942_v38 = vmul.f32 %v32708_v53, %v32694_v57 }
0x1796   : > { %24009 = vst.msk [vmem:[%s37414_s15 + $0xe8] sm:$0xff] %vm23947_vm7, %v23942_v38 }
0x1797 PF: > { %s19_s27 = sadd.s32 1, %s32715_s27  }
0x1798   : > { %p16_p4 = scmp.ge.s32.totalorder %s19_s27, 4  }
0x179a   :  { %18 = sbr.rel (!%p16_p4) target bundleno = 1 (0x1), region = 168 }

</bundles_post_ra>
